<compile_context>
chip_gen: v5e
topology: v5e:2x2
jax: 0.10.0
libtpu: 0.0.40
codegen_flags: <defaults>
</compile_context>

<pallas_src>
import functools

import jax
import jax.numpy as jnp
from jax.experimental import pallas as pl
from jax.experimental.pallas import tpu as pltpu


# ---------------------------------------------------------------------------
# Model dimensions (small stand-ins, consistent with the module's structure)
# ---------------------------------------------------------------------------
B = 256        # batch (tiled by TB below)
TB = 128       # rows per grid step
GPT_H = 256    # gpt_model hidden size (stand-in for 4096)
CONF_H = 192   # unimol hidden size   (stand-in for 1536)
H = 128        # hidden_size
H2 = H // 2    # 64
REG_H = 64
RANK = 4
ALPHA = 32
LORA_SCALE = float(ALPHA) / float(RANK)   # 8.0
BN_EPS = 1e-5
LN_EPS = 1e-5

_SQRT2_INV = 0.7071067811865476


def _gelu(x):
    # exact (erf) GELU, matching torch.nn.GELU()
    return 0.5 * x * (1.0 + jax.lax.erf(x * _SQRT2_INV))


def polymer_kernel(
    # activations
    gpt_ref, conf_ref,
    # gpt projection: Linear(bf16 weight) + folded BatchNorm
    wgp_ref, bgp_ref, sgp_ref, hgp_ref,
    # conf projection
    wcp_ref, bcp_ref, scp_ref, hcp_ref,
    # folded LoRA weights (scale pre-applied) + biases
    wlg_ref, blg_ref, wlc_ref, blc_ref,
    # gated fusion (single un-split (2H, H) weight)
    wgate_ref, bgate_ref,
    # residual block
    wr1_ref, br1_ref, lng_ref, lnb_ref, wr2_ref, br2_ref,
    # reg net
    wq1_ref, bq1_ref, wq2_ref, bq2_ref, wq3_ref, bq3_ref,
    # outputs
    pred_ref, enh_ref, glora_ref, clora_ref,
):
    dot = functools.partial(jnp.dot, preferred_element_type=jnp.float32)

    # bf16 matmul inputs for the wide projections (f32 accumulation on MXU).
    gx = gpt_ref[...].astype(jnp.bfloat16)
    cx = conf_ref[...].astype(jnp.bfloat16)

    # --- projections: Linear -> GELU -> BatchNorm(eval, folded scale/shift) ---
    gpt_feat = _gelu(dot(gx, wgp_ref[...]) + bgp_ref[...])
    gpt_feat = gpt_feat * sgp_ref[...] + hgp_ref[...]

    conf_feat = _gelu(dot(cx, wcp_ref[...]) + bcp_ref[...])
    conf_feat = conf_feat * scp_ref[...] + hcp_ref[...]

    # --- LoRA layers: folded dense (H, H) weight, scale pre-applied ---
    gpt_lora = dot(gpt_feat, wlg_ref[...]) + blg_ref[...]
    conf_lora = dot(conf_feat, wlc_ref[...]) + blc_ref[...]
    glora_ref[...] = gpt_lora
    clora_ref[...] = conf_lora

    gpt_feat = gpt_feat + gpt_lora
    conf_feat = conf_feat + conf_lora

    # --- gated fusion: single K=2H matmul on the concatenated features ---
    cat = jnp.concatenate([gpt_feat, conf_feat], axis=-1)
    gate = jax.nn.sigmoid(dot(cat, wgate_ref[...]) + bgate_ref[...])
    combined = conf_feat + gate * (gpt_feat - conf_feat)

    # --- residual block: Linear -> GELU -> LayerNorm -> (Dropout=id) -> Linear ---
    h = _gelu(dot(combined, wr1_ref[...]) + br1_ref[...])
    mu = jnp.mean(h, axis=-1, keepdims=True)
    var = jnp.mean((h - mu) * (h - mu), axis=-1, keepdims=True)
    h = (h - mu) * jax.lax.rsqrt(var + LN_EPS) * lng_ref[...] + lnb_ref[...]
    residual = dot(h, wr2_ref[...]) + br2_ref[...]
    enh_ref[...] = residual

    # --- reg net: Linear -> GELU -> Linear -> GELU -> Linear(->1) ---
    r = _gelu(dot(residual, wq1_ref[...]) + bq1_ref[...])
    r = _gelu(dot(r, wq2_ref[...]) + bq2_ref[...])
    pred_ref[...] = dot(r, wq3_ref[...]) + bq3_ref[...]


# ---------------------------------------------------------------------------
# Host-side parameter preparation (folding LoRA, bf16 weight cast)
# ---------------------------------------------------------------------------
def prepare_kernel_params(p):
    kp = {}
    # projections: wide weights in bf16 (inputs are cast in-kernel), rest f32
    kp["wgp"] = p["wgp"].astype(jnp.bfloat16)
    kp["wcp"] = p["wcp"].astype(jnp.bfloat16)
    for k in ("bgp", "sgp", "hgp", "bcp", "scp", "hcp"):
        kp[k] = p[k]
    # LoRA: fold rank-4 factors into dense (H, H) weights with scale applied
    kp["wlg"] = LORA_SCALE * (p["ag"] @ p["bg"])
    kp["blg"] = p["blg"]
    kp["wlc"] = LORA_SCALE * (p["ac"] @ p["bc"])
    kp["blc"] = p["blc"]
    # gated fusion: single (2H, H) weight
    kp["wgate"] = p["wgate"]
    kp["bgate"] = p["bgate"]
    for k in ("wr1", "br1", "lng", "lnb", "wr2", "br2",
              "wq1", "bq1", "wq2", "bq2", "wq3", "bq3"):
        kp[k] = p[k]
    return kp


_KERNEL_WEIGHT_ORDER = [
    "wgp", "bgp", "sgp", "hgp",
    "wcp", "bcp", "scp", "hcp",
    "wlg", "blg", "wlc", "blc",
    "wgate", "bgate",
    "wr1", "br1", "lng", "lnb", "wr2", "br2",
    "wq1", "bq1", "wq2", "bq2", "wq3", "bq3",
]


def polymer_forward(gpt_embed, conf_embed, params, *, tb=TB):
    batch = gpt_embed.shape[0]
    tb = min(tb, batch)
    assert batch % tb == 0, "batch must be a multiple of the tile size"
    grid = (batch // tb,)

    kp = prepare_kernel_params(params)
    weights = [kp[k] for k in _KERNEL_WEIGHT_ORDER]

    act_spec_gpt = pl.BlockSpec((tb, GPT_H), lambda i: (i, 0))
    act_spec_conf = pl.BlockSpec((tb, CONF_H), lambda i: (i, 0))

    def full_spec(arr):
        nd = arr.ndim
        return pl.BlockSpec(arr.shape, lambda i, nd=nd: (0,) * nd)

    in_specs = [act_spec_gpt, act_spec_conf] + [full_spec(w) for w in weights]

    out_shape = (
        jax.ShapeDtypeStruct((batch, 1), jnp.float32),   # prediction
        jax.ShapeDtypeStruct((batch, H), jnp.float32),   # enhanced (residual)
        jax.ShapeDtypeStruct((batch, H), jnp.float32),   # gpt_lora
        jax.ShapeDtypeStruct((batch, H), jnp.float32),   # conf_lora
    )
    out_specs = (
        pl.BlockSpec((tb, 1), lambda i: (i, 0)),
        pl.BlockSpec((tb, H), lambda i: (i, 0)),
        pl.BlockSpec((tb, H), lambda i: (i, 0)),
        pl.BlockSpec((tb, H), lambda i: (i, 0)),
    )

    pred, enhanced, gpt_lora, conf_lora = pl.pallas_call(
        polymer_kernel,
        out_shape=out_shape,
        grid=grid,
        in_specs=in_specs,
        out_specs=out_specs,
        compiler_params=pltpu.CompilerParams(
            dimension_semantics=("parallel",),
        ),
    )(gpt_embed, conf_embed, *weights)

    return {
        "prediction": pred,
        "enhanced": enhanced,
        "gpt_lora": gpt_lora,
        "conf_lora": conf_lora,
    }


# ---------------------------------------------------------------------------
# Deterministic parameter init + pure-JAX reference (original module algebra)
# ---------------------------------------------------------------------------
def init_params(key):
    keys = iter(jax.random.split(key, 48))

    def w(shape, fan_in):
        return (jax.random.normal(next(keys), shape, jnp.float32)
                / jnp.sqrt(jnp.float32(fan_in)))

    def row(n):
        return 0.02 * jax.random.normal(next(keys), (1, n), jnp.float32)

    def fold_bn(n):
        gamma = 1.0 + 0.1 * jax.random.normal(next(keys), (1, n), jnp.float32)
        beta = 0.1 * jax.random.normal(next(keys), (1, n), jnp.float32)
        rmean = 0.1 * jax.random.normal(next(keys), (1, n), jnp.float32)
        rvar = 0.5 + jax.random.uniform(next(keys), (1, n), jnp.float32)
        scale = gamma / jnp.sqrt(rvar + BN_EPS)
        shift = beta - rmean * scale
        return scale, shift

    p = {}
    # gpt projection Linear(GPT_H -> H) + BatchNorm (eval stats folded)
    p["wgp"] = w((GPT_H, H), GPT_H)
    p["bgp"] = row(H)
    p["sgp"], p["hgp"] = fold_bn(H)
    # conf projection Linear(CONF_H -> H) + BatchNorm folded
    p["wcp"] = w((CONF_H, H), CONF_H)
    p["bcp"] = row(H)
    p["scp"], p["hcp"] = fold_bn(H)
    # LoRA gpt / conf (rank-4 factors; folding happens on the host)
    p["ag"] = w((H, RANK), H)
    p["bg"] = w((RANK, H), RANK)
    p["blg"] = row(H)
    p["ac"] = w((H, RANK), H)
    p["bc"] = w((RANK, H), RANK)
    p["blc"] = row(H)
    # gated fusion: Linear(2H -> H), pre-transposed to (2H, H)
    p["wgate"] = w((2 * H, H), 2 * H)
    p["bgate"] = row(H)
    # residual block
    p["wr1"] = w((H, H2), H)
    p["br1"] = row(H2)
    p["lng"] = jnp.ones((1, H2), jnp.float32)
    p["lnb"] = jnp.zeros((1, H2), jnp.float32)
    p["wr2"] = w((H2, H), H2)
    p["br2"] = row(H)
    # reg net
    p["wq1"] = w((H, H2), H)
    p["bq1"] = row(H2)
    p["wq2"] = w((H2, REG_H), H2)
    p["bq2"] = row(REG_H)
    p["wq3"] = w((REG_H, 1), REG_H)
    p["bq3"] = row(1)
    return p


def reference_forward(gpt_embed, conf_embed, p):
    # Mirrors the original PyTorch algebra (chained rank-4 LoRA, cat-based
    # gate, standard blend); only the projection matmul inputs are cast to
    # bf16 to match the kernel's weight precision.
    gelu = lambda x: 0.5 * x * (1.0 + jax.lax.erf(x * _SQRT2_INV))
    f32dot = functools.partial(jnp.dot, preferred_element_type=jnp.float32)

    gpt_feat = gelu(
        f32dot(gpt_embed.astype(jnp.bfloat16), p["wgp"].astype(jnp.bfloat16))
        + p["bgp"])
    gpt_feat = gpt_feat * p["sgp"] + p["hgp"]

    conf_feat = gelu(
        f32dot(conf_embed.astype(jnp.bfloat16), p["wcp"].astype(jnp.bfloat16))
        + p["bcp"])
    conf_feat = conf_feat * p["scp"] + p["hcp"]

    gpt_lora = (gpt_feat @ p["ag"]) @ p["bg"] * LORA_SCALE + p["blg"]
    conf_lora = (conf_feat @ p["ac"]) @ p["bc"] * LORA_SCALE + p["blc"]
    gpt_feat = gpt_feat + gpt_lora
    conf_feat = conf_feat + conf_lora

    cat = jnp.concatenate([gpt_feat, conf_feat], axis=-1)
    gate = jax.nn.sigmoid(cat @ p["wgate"] + p["bgate"])
    combined = gate * gpt_feat + (1.0 - gate) * conf_feat

    h = gelu(combined @ p["wr1"] + p["br1"])
    mu = jnp.mean(h, -1, keepdims=True)
    var = jnp.mean((h - mu) ** 2, -1, keepdims=True)
    h = (h - mu) * jax.lax.rsqrt(var + LN_EPS) * p["lng"] + p["lnb"]
    residual = h @ p["wr2"] + p["br2"]

    r = gelu(residual @ p["wq1"] + p["bq1"])
    r = gelu(r @ p["wq2"] + p["bq2"])
    pred = r @ p["wq3"] + p["bq3"]
    return {"prediction": pred, "enhanced": residual,
            "gpt_lora": gpt_lora, "conf_lora": conf_lora}


if __name__ == "__main__":
    key = jax.random.PRNGKey(0)
    k_gpt, k_conf, k_params = jax.random.split(key, 3)

    gpt_embed = jax.random.normal(k_gpt, (B, GPT_H), jnp.float32)
    conf_embed = jax.random.normal(k_conf, (B, CONF_H), jnp.float32)
    params = init_params(k_params)

    out = polymer_forward(gpt_embed, conf_embed, params)
    out = jax.block_until_ready(out)

    ref = reference_forward(gpt_embed, conf_embed, params)
    for name in ("prediction", "enhanced", "gpt_lora", "conf_lora"):
        assert jnp.allclose(out[name], ref[name], atol=2e-3, rtol=2e-3), name

    assert out["prediction"].shape == (B, 1)
    assert out["enhanced"].shape == (B, H)
    assert out["gpt_lora"].shape == (B, H)
    assert out["conf_lora"].shape == (B, H)

    print("KERNEL_OK")
</pallas_src>

<mosaic_0001>
module attributes {stable_mosaic.version = 11 : i64} {
  func.func @polymer_kernel(%arg0: i32, %arg1: memref<128x256xf32, #tpu.memory_space<vmem>>, %arg2: memref<128x192xf32, #tpu.memory_space<vmem>>, %arg3: memref<256x128xbf16, #tpu.memory_space<vmem>>, %arg4: memref<1x128xf32, #tpu.memory_space<vmem>>, %arg5: memref<1x128xf32, #tpu.memory_space<vmem>>, %arg6: memref<1x128xf32, #tpu.memory_space<vmem>>, %arg7: memref<192x128xbf16, #tpu.memory_space<vmem>>, %arg8: memref<1x128xf32, #tpu.memory_space<vmem>>, %arg9: memref<1x128xf32, #tpu.memory_space<vmem>>, %arg10: memref<1x128xf32, #tpu.memory_space<vmem>>, %arg11: memref<128x128xf32, #tpu.memory_space<vmem>>, %arg12: memref<1x128xf32, #tpu.memory_space<vmem>>, %arg13: memref<128x128xf32, #tpu.memory_space<vmem>>, %arg14: memref<1x128xf32, #tpu.memory_space<vmem>>, %arg15: memref<256x128xf32, #tpu.memory_space<vmem>>, %arg16: memref<1x128xf32, #tpu.memory_space<vmem>>, %arg17: memref<128x64xf32, #tpu.memory_space<vmem>>, %arg18: memref<1x64xf32, #tpu.memory_space<vmem>>, %arg19: memref<1x64xf32, #tpu.memory_space<vmem>>, %arg20: memref<1x64xf32, #tpu.memory_space<vmem>>, %arg21: memref<64x128xf32, #tpu.memory_space<vmem>>, %arg22: memref<1x128xf32, #tpu.memory_space<vmem>>, %arg23: memref<128x64xf32, #tpu.memory_space<vmem>>, %arg24: memref<1x64xf32, #tpu.memory_space<vmem>>, %arg25: memref<64x64xf32, #tpu.memory_space<vmem>>, %arg26: memref<1x64xf32, #tpu.memory_space<vmem>>, %arg27: memref<64x1xf32, #tpu.memory_space<vmem>>, %arg28: memref<1x1xf32, #tpu.memory_space<vmem>>, %arg29: memref<128x1xf32, #tpu.memory_space<vmem>>, %arg30: memref<128x128xf32, #tpu.memory_space<vmem>>, %arg31: memref<128x128xf32, #tpu.memory_space<vmem>>, %arg32: memref<128x128xf32, #tpu.memory_space<vmem>>) attributes {dimension_semantics = [#tpu.dimension_semantics<parallel>], iteration_bounds = array<i64: 2>, scalar_prefetch = 0 : i64, scratch_operands = 0 : i64, tpu.core_type = #tpu.core_type<tc>, window_params = [{transform_indices = @transform_0, window_bounds = array<i64: 128, 256>}, {transform_indices = @transform_1, window_bounds = array<i64: 128, 192>}, {pipeline_mode = #tpu.pipeline_mode<synchronous>, transform_indices = @transform_2, window_bounds = array<i64: 256, 128>}, {pipeline_mode = #tpu.pipeline_mode<synchronous>, transform_indices = @transform_3, window_bounds = array<i64: 1, 128>}, {pipeline_mode = #tpu.pipeline_mode<synchronous>, transform_indices = @transform_4, window_bounds = array<i64: 1, 128>}, {pipeline_mode = #tpu.pipeline_mode<synchronous>, transform_indices = @transform_5, window_bounds = array<i64: 1, 128>}, {pipeline_mode = #tpu.pipeline_mode<synchronous>, transform_indices = @transform_6, window_bounds = array<i64: 192, 128>}, {pipeline_mode = #tpu.pipeline_mode<synchronous>, transform_indices = @transform_7, window_bounds = array<i64: 1, 128>}, {pipeline_mode = #tpu.pipeline_mode<synchronous>, transform_indices = @transform_8, window_bounds = array<i64: 1, 128>}, {pipeline_mode = #tpu.pipeline_mode<synchronous>, transform_indices = @transform_9, window_bounds = array<i64: 1, 128>}, {pipeline_mode = #tpu.pipeline_mode<synchronous>, transform_indices = @transform_10, window_bounds = array<i64: 128, 128>}, {pipeline_mode = #tpu.pipeline_mode<synchronous>, transform_indices = @transform_11, window_bounds = array<i64: 1, 128>}, {pipeline_mode = #tpu.pipeline_mode<synchronous>, transform_indices = @transform_12, window_bounds = array<i64: 128, 128>}, {pipeline_mode = #tpu.pipeline_mode<synchronous>, transform_indices = @transform_13, window_bounds = array<i64: 1, 128>}, {pipeline_mode = #tpu.pipeline_mode<synchronous>, transform_indices = @transform_14, window_bounds = array<i64: 256, 128>}, {pipeline_mode = #tpu.pipeline_mode<synchronous>, transform_indices = @transform_15, window_bounds = array<i64: 1, 128>}, {pipeline_mode = #tpu.pipeline_mode<synchronous>, transform_indices = @transform_16, window_bounds = array<i64: 128, 64>}, {pipeline_mode = #tpu.pipeline_mode<synchronous>, transform_indices = @transform_17, window_bounds = array<i64: 1, 64>}, {pipeline_mode = #tpu.pipeline_mode<synchronous>, transform_indices = @transform_18, window_bounds = array<i64: 1, 64>}, {pipeline_mode = #tpu.pipeline_mode<synchronous>, transform_indices = @transform_19, window_bounds = array<i64: 1, 64>}, {pipeline_mode = #tpu.pipeline_mode<synchronous>, transform_indices = @transform_20, window_bounds = array<i64: 64, 128>}, {pipeline_mode = #tpu.pipeline_mode<synchronous>, transform_indices = @transform_21, window_bounds = array<i64: 1, 128>}, {pipeline_mode = #tpu.pipeline_mode<synchronous>, transform_indices = @transform_22, window_bounds = array<i64: 128, 64>}, {pipeline_mode = #tpu.pipeline_mode<synchronous>, transform_indices = @transform_23, window_bounds = array<i64: 1, 64>}, {pipeline_mode = #tpu.pipeline_mode<synchronous>, transform_indices = @transform_24, window_bounds = array<i64: 64, 64>}, {pipeline_mode = #tpu.pipeline_mode<synchronous>, transform_indices = @transform_25, window_bounds = array<i64: 1, 64>}, {pipeline_mode = #tpu.pipeline_mode<synchronous>, transform_indices = @transform_26, window_bounds = array<i64: 64, 1>}, {pipeline_mode = #tpu.pipeline_mode<synchronous>, transform_indices = @transform_27, window_bounds = array<i64: 1, 1>}, {transform_indices = @transform_28, window_bounds = array<i64: 128, 1>}, {transform_indices = @transform_29, window_bounds = array<i64: 128, 128>}, {transform_indices = @transform_30, window_bounds = array<i64: 128, 128>}, {transform_indices = @transform_31, window_bounds = array<i64: 128, 128>}]} {
    %c0 = arith.constant 0 : index
    %c0_0 = arith.constant 0 : index
    %0 = vector.load %arg1[%c0, %c0_0] : memref<128x256xf32, #tpu.memory_space<vmem>>, vector<128x256xf32>
    %1 = arith.truncf %0 : vector<128x256xf32> to vector<128x256xbf16>
    %c0_1 = arith.constant 0 : index
    %c0_2 = arith.constant 0 : index
    %2 = vector.load %arg2[%c0_1, %c0_2] : memref<128x192xf32, #tpu.memory_space<vmem>>, vector<128x192xf32>
    %3 = arith.truncf %2 : vector<128x192xf32> to vector<128x192xbf16>
    %c0_3 = arith.constant 0 : index
    %c0_4 = arith.constant 0 : index
    %4 = vector.load %arg3[%c0_3, %c0_4] : memref<256x128xbf16, #tpu.memory_space<vmem>>, vector<256x128xbf16>
    %cst = arith.constant dense<0.000000e+00> : vector<128x128xf32>
    %5 = tpu.matmul %1, %4, %cst {dimension_numbers = #tpu.dot_dimension_numbers<[1], [0], [0], [1], [0, 0, 1, 1], [], []>} : vector<128x256xbf16>, vector<256x128xbf16>, vector<128x128xf32> -> vector<128x128xf32>
    %c0_5 = arith.constant 0 : index
    %c0_6 = arith.constant 0 : index
    %6 = vector.load %arg4[%c0_5, %c0_6] : memref<1x128xf32, #tpu.memory_space<vmem>>, vector<1x128xf32>
    %7 = vector.broadcast %6 : vector<1x128xf32> to vector<128x128xf32>
    %8 = arith.addf %5, %7 : vector<128x128xf32>
    %cst_7 = arith.constant 5.000000e-01 : f32
    %9 = vector.broadcast %cst_7 : f32 to vector<128x128xf32>
    %10 = arith.mulf %9, %8 : vector<128x128xf32>
    %cst_8 = arith.constant 0.707106769 : f32
    %11 = vector.broadcast %cst_8 : f32 to vector<128x128xf32>
    %12 = arith.mulf %8, %11 : vector<128x128xf32>
    %13 = math.erf %12 : vector<128x128xf32>
    %cst_9 = arith.constant 1.000000e+00 : f32
    %14 = vector.broadcast %cst_9 : f32 to vector<128x128xf32>
    %15 = arith.addf %14, %13 : vector<128x128xf32>
    %16 = arith.mulf %10, %15 : vector<128x128xf32>
    %c0_10 = arith.constant 0 : index
    %c0_11 = arith.constant 0 : index
    %17 = vector.load %arg5[%c0_10, %c0_11] : memref<1x128xf32, #tpu.memory_space<vmem>>, vector<1x128xf32>
    %18 = vector.broadcast %17 : vector<1x128xf32> to vector<128x128xf32>
    %19 = arith.mulf %16, %18 : vector<128x128xf32>
    %c0_12 = arith.constant 0 : index
    %c0_13 = arith.constant 0 : index
    %20 = vector.load %arg6[%c0_12, %c0_13] : memref<1x128xf32, #tpu.memory_space<vmem>>, vector<1x128xf32>
    %21 = vector.broadcast %20 : vector<1x128xf32> to vector<128x128xf32>
    %22 = arith.addf %19, %21 : vector<128x128xf32>
    %c0_14 = arith.constant 0 : index
    %c0_15 = arith.constant 0 : index
    %23 = vector.load %arg7[%c0_14, %c0_15] : memref<192x128xbf16, #tpu.memory_space<vmem>>, vector<192x128xbf16>
    %cst_16 = arith.constant dense<0.000000e+00> : vector<128x128xf32>
    %24 = tpu.matmul %3, %23, %cst_16 {dimension_numbers = #tpu.dot_dimension_numbers<[1], [0], [0], [1], [0, 0, 1, 1], [], []>} : vector<128x192xbf16>, vector<192x128xbf16>, vector<128x128xf32> -> vector<128x128xf32>
    %c0_17 = arith.constant 0 : index
    %c0_18 = arith.constant 0 : index
    %25 = vector.load %arg8[%c0_17, %c0_18] : memref<1x128xf32, #tpu.memory_space<vmem>>, vector<1x128xf32>
    %26 = vector.broadcast %25 : vector<1x128xf32> to vector<128x128xf32>
    %27 = arith.addf %24, %26 : vector<128x128xf32>
    %cst_19 = arith.constant 5.000000e-01 : f32
    %28 = vector.broadcast %cst_19 : f32 to vector<128x128xf32>
    %29 = arith.mulf %28, %27 : vector<128x128xf32>
    %cst_20 = arith.constant 0.707106769 : f32
    %30 = vector.broadcast %cst_20 : f32 to vector<128x128xf32>
    %31 = arith.mulf %27, %30 : vector<128x128xf32>
    %32 = math.erf %31 : vector<128x128xf32>
    %cst_21 = arith.constant 1.000000e+00 : f32
    %33 = vector.broadcast %cst_21 : f32 to vector<128x128xf32>
    %34 = arith.addf %33, %32 : vector<128x128xf32>
    %35 = arith.mulf %29, %34 : vector<128x128xf32>
    %c0_22 = arith.constant 0 : index
    %c0_23 = arith.constant 0 : index
    %36 = vector.load %arg9[%c0_22, %c0_23] : memref<1x128xf32, #tpu.memory_space<vmem>>, vector<1x128xf32>
    %37 = vector.broadcast %36 : vector<1x128xf32> to vector<128x128xf32>
    %38 = arith.mulf %35, %37 : vector<128x128xf32>
    %c0_24 = arith.constant 0 : index
    %c0_25 = arith.constant 0 : index
    %39 = vector.load %arg10[%c0_24, %c0_25] : memref<1x128xf32, #tpu.memory_space<vmem>>, vector<1x128xf32>
    %40 = vector.broadcast %39 : vector<1x128xf32> to vector<128x128xf32>
    %41 = arith.addf %38, %40 : vector<128x128xf32>
    %c0_26 = arith.constant 0 : index
    %c0_27 = arith.constant 0 : index
    %42 = vector.load %arg11[%c0_26, %c0_27] : memref<128x128xf32, #tpu.memory_space<vmem>>, vector<128x128xf32>
    %cst_28 = arith.constant dense<0.000000e+00> : vector<128x128xf32>
    %43 = tpu.matmul %22, %42, %cst_28 {dimension_numbers = #tpu.dot_dimension_numbers<[1], [0], [0], [1], [0, 0, 1, 1], [], []>} : vector<128x128xf32>, vector<128x128xf32>, vector<128x128xf32> -> vector<128x128xf32>
    %c0_29 = arith.constant 0 : index
    %c0_30 = arith.constant 0 : index
    %44 = vector.load %arg12[%c0_29, %c0_30] : memref<1x128xf32, #tpu.memory_space<vmem>>, vector<1x128xf32>
    %45 = vector.broadcast %44 : vector<1x128xf32> to vector<128x128xf32>
    %46 = arith.addf %43, %45 : vector<128x128xf32>
    %c0_31 = arith.constant 0 : index
    %c0_32 = arith.constant 0 : index
    %47 = vector.load %arg13[%c0_31, %c0_32] : memref<128x128xf32, #tpu.memory_space<vmem>>, vector<128x128xf32>
    %cst_33 = arith.constant dense<0.000000e+00> : vector<128x128xf32>
    %48 = tpu.matmul %41, %47, %cst_33 {dimension_numbers = #tpu.dot_dimension_numbers<[1], [0], [0], [1], [0, 0, 1, 1], [], []>} : vector<128x128xf32>, vector<128x128xf32>, vector<128x128xf32> -> vector<128x128xf32>
    %c0_34 = arith.constant 0 : index
    %c0_35 = arith.constant 0 : index
    %49 = vector.load %arg14[%c0_34, %c0_35] : memref<1x128xf32, #tpu.memory_space<vmem>>, vector<1x128xf32>
    %50 = vector.broadcast %49 : vector<1x128xf32> to vector<128x128xf32>
    %51 = arith.addf %48, %50 : vector<128x128xf32>
    %c0_36 = arith.constant 0 : index
    %c0_37 = arith.constant 0 : index
    %52 = vector.load %arg31[%c0_36, %c0_37] : memref<128x128xf32, #tpu.memory_space<vmem>>, vector<128x128xf32>
    tpu.vector_store %arg31[%c0_36, %c0_37], %46 {strides = array<i32>} : memref<128x128xf32, #tpu.memory_space<vmem>>, vector<128x128xf32>,
    %c0_38 = arith.constant 0 : index
    %c0_39 = arith.constant 0 : index
    %53 = vector.load %arg32[%c0_38, %c0_39] : memref<128x128xf32, #tpu.memory_space<vmem>>, vector<128x128xf32>
    tpu.vector_store %arg32[%c0_38, %c0_39], %51 {strides = array<i32>} : memref<128x128xf32, #tpu.memory_space<vmem>>, vector<128x128xf32>,
    %54 = arith.addf %22, %46 : vector<128x128xf32>
    %55 = arith.addf %41, %51 : vector<128x128xf32>
    %56 = tpu.concatenate %54, %55 in 1 : vector<128x128xf32>, vector<128x128xf32> -> vector<128x256xf32>
    %c0_40 = arith.constant 0 : index
    %c0_41 = arith.constant 0 : index
    %57 = vector.load %arg15[%c0_40, %c0_41] : memref<256x128xf32, #tpu.memory_space<vmem>>, vector<256x128xf32>
    %cst_42 = arith.constant dense<0.000000e+00> : vector<128x128xf32>
    %58 = tpu.matmul %56, %57, %cst_42 {dimension_numbers = #tpu.dot_dimension_numbers<[1], [0], [0], [1], [0, 0, 1, 1], [], []>} : vector<128x256xf32>, vector<256x128xf32>, vector<128x128xf32> -> vector<128x128xf32>
    %c0_43 = arith.constant 0 : index
    %c0_44 = arith.constant 0 : index
    %59 = vector.load %arg16[%c0_43, %c0_44] : memref<1x128xf32, #tpu.memory_space<vmem>>, vector<1x128xf32>
    %60 = vector.broadcast %59 : vector<1x128xf32> to vector<128x128xf32>
    %61 = arith.addf %58, %60 : vector<128x128xf32>
    %62 = arith.negf %61 : vector<128x128xf32>
    %63 = math.exp %62 : vector<128x128xf32>
    %cst_45 = arith.constant 1.000000e+00 : f32
    %64 = vector.broadcast %cst_45 : f32 to vector<128x128xf32>
    %65 = arith.addf %64, %63 : vector<128x128xf32>
    %66 = arith.divf %64, %65 : vector<128x128xf32>
    %67 = arith.subf %54, %55 : vector<128x128xf32>
    %68 = arith.mulf %66, %67 : vector<128x128xf32>
    %69 = arith.addf %55, %68 : vector<128x128xf32>
    %c0_46 = arith.constant 0 : index
    %c0_47 = arith.constant 0 : index
    %70 = vector.load %arg17[%c0_46, %c0_47] : memref<128x64xf32, #tpu.memory_space<vmem>>, vector<128x64xf32>
    %cst_48 = arith.constant dense<0.000000e+00> : vector<128x64xf32>
    %71 = tpu.matmul %69, %70, %cst_48 {dimension_numbers = #tpu.dot_dimension_numbers<[1], [0], [0], [1], [0, 0, 1, 1], [], []>} : vector<128x128xf32>, vector<128x64xf32>, vector<128x64xf32> -> vector<128x64xf32>
    %c0_49 = arith.constant 0 : index
    %c0_50 = arith.constant 0 : index
    %72 = vector.load %arg18[%c0_49, %c0_50] : memref<1x64xf32, #tpu.memory_space<vmem>>, vector<1x64xf32>
    %73 = vector.broadcast %72 : vector<1x64xf32> to vector<128x64xf32>
    %74 = arith.addf %71, %73 : vector<128x64xf32>
    %cst_51 = arith.constant 5.000000e-01 : f32
    %75 = vector.broadcast %cst_51 : f32 to vector<128x64xf32>
    %76 = arith.mulf %75, %74 : vector<128x64xf32>
    %cst_52 = arith.constant 0.707106769 : f32
    %77 = vector.broadcast %cst_52 : f32 to vector<128x64xf32>
    %78 = arith.mulf %74, %77 : vector<128x64xf32>
    %79 = math.erf %78 : vector<128x64xf32>
    %cst_53 = arith.constant 1.000000e+00 : f32
    %80 = vector.broadcast %cst_53 : f32 to vector<128x64xf32>
    %81 = arith.addf %80, %79 : vector<128x64xf32>
    %82 = arith.mulf %76, %81 : vector<128x64xf32>
    %cst_54 = arith.constant dense<0.000000e+00> : vector<128xf32>
    %83 = vector.multi_reduction <add>, %82, %cst_54 [1] : vector<128x64xf32> to vector<128xf32>
    %84 = vector.shape_cast %83 : vector<128xf32> to vector<128x1xf32>
    %cst_55 = arith.constant 6.400000e+01 : f32
    %85 = vector.broadcast %cst_55 : f32 to vector<128x1xf32>
    %86 = arith.divf %84, %85 : vector<128x1xf32>
    %87 = vector.broadcast %86 : vector<128x1xf32> to vector<128x64xf32>
    %88 = arith.subf %82, %87 : vector<128x64xf32>
    %89 = vector.broadcast %86 : vector<128x1xf32> to vector<128x64xf32>
    %90 = arith.subf %82, %89 : vector<128x64xf32>
    %91 = arith.mulf %88, %90 : vector<128x64xf32>
    %cst_56 = arith.constant dense<0.000000e+00> : vector<128xf32>
    %92 = vector.multi_reduction <add>, %91, %cst_56 [1] : vector<128x64xf32> to vector<128xf32>
    %93 = vector.shape_cast %92 : vector<128xf32> to vector<128x1xf32>
    %cst_57 = arith.constant 6.400000e+01 : f32
    %94 = vector.broadcast %cst_57 : f32 to vector<128x1xf32>
    %95 = arith.divf %93, %94 : vector<128x1xf32>
    %96 = vector.broadcast %86 : vector<128x1xf32> to vector<128x64xf32>
    %97 = arith.subf %82, %96 : vector<128x64xf32>
    %cst_58 = arith.constant 9.99999974E-6 : f32
    %98 = vector.broadcast %cst_58 : f32 to vector<128x1xf32>
    %99 = arith.addf %95, %98 : vector<128x1xf32>
    %100 = math.rsqrt %99 : vector<128x1xf32>
    %101 = vector.broadcast %100 : vector<128x1xf32> to vector<128x64xf32>
    %102 = arith.mulf %97, %101 : vector<128x64xf32>
    %c0_59 = arith.constant 0 : index
    %c0_60 = arith.constant 0 : index
    %103 = vector.load %arg19[%c0_59, %c0_60] : memref<1x64xf32, #tpu.memory_space<vmem>>, vector<1x64xf32>
    %104 = vector.broadcast %103 : vector<1x64xf32> to vector<128x64xf32>
    %105 = arith.mulf %102, %104 : vector<128x64xf32>
    %c0_61 = arith.constant 0 : index
    %c0_62 = arith.constant 0 : index
    %106 = vector.load %arg20[%c0_61, %c0_62] : memref<1x64xf32, #tpu.memory_space<vmem>>, vector<1x64xf32>
    %107 = vector.broadcast %106 : vector<1x64xf32> to vector<128x64xf32>
    %108 = arith.addf %105, %107 : vector<128x64xf32>
    %c0_63 = arith.constant 0 : index
    %c0_64 = arith.constant 0 : index
    %109 = vector.load %arg21[%c0_63, %c0_64] : memref<64x128xf32, #tpu.memory_space<vmem>>, vector<64x128xf32>
    %cst_65 = arith.constant dense<0.000000e+00> : vector<128x128xf32>
    %110 = tpu.matmul %108, %109, %cst_65 {dimension_numbers = #tpu.dot_dimension_numbers<[1], [0], [0], [1], [0, 0, 1, 1], [], []>} : vector<128x64xf32>, vector<64x128xf32>, vector<128x128xf32> -> vector<128x128xf32>
    %c0_66 = arith.constant 0 : index
    %c0_67 = arith.constant 0 : index
    %111 = vector.load %arg22[%c0_66, %c0_67] : memref<1x128xf32, #tpu.memory_space<vmem>>, vector<1x128xf32>
    %112 = vector.broadcast %111 : vector<1x128xf32> to vector<128x128xf32>
    %113 = arith.addf %110, %112 : vector<128x128xf32>
    %c0_68 = arith.constant 0 : index
    %c0_69 = arith.constant 0 : index
    %114 = vector.load %arg30[%c0_68, %c0_69] : memref<128x128xf32, #tpu.memory_space<vmem>>, vector<128x128xf32>
    tpu.vector_store %arg30[%c0_68, %c0_69], %113 {strides = array<i32>} : memref<128x128xf32, #tpu.memory_space<vmem>>, vector<128x128xf32>,
    %c0_70 = arith.constant 0 : index
    %c0_71 = arith.constant 0 : index
    %115 = vector.load %arg23[%c0_70, %c0_71] : memref<128x64xf32, #tpu.memory_space<vmem>>, vector<128x64xf32>
    %cst_72 = arith.constant dense<0.000000e+00> : vector<128x64xf32>
    %116 = tpu.matmul %113, %115, %cst_72 {dimension_numbers = #tpu.dot_dimension_numbers<[1], [0], [0], [1], [0, 0, 1, 1], [], []>} : vector<128x128xf32>, vector<128x64xf32>, vector<128x64xf32> -> vector<128x64xf32>
    %c0_73 = arith.constant 0 : index
    %c0_74 = arith.constant 0 : index
    %117 = vector.load %arg24[%c0_73, %c0_74] : memref<1x64xf32, #tpu.memory_space<vmem>>, vector<1x64xf32>
    %118 = vector.broadcast %117 : vector<1x64xf32> to vector<128x64xf32>
    %119 = arith.addf %116, %118 : vector<128x64xf32>
    %cst_75 = arith.constant 5.000000e-01 : f32
    %120 = vector.broadcast %cst_75 : f32 to vector<128x64xf32>
    %121 = arith.mulf %120, %119 : vector<128x64xf32>
    %cst_76 = arith.constant 0.707106769 : f32
    %122 = vector.broadcast %cst_76 : f32 to vector<128x64xf32>
    %123 = arith.mulf %119, %122 : vector<128x64xf32>
    %124 = math.erf %123 : vector<128x64xf32>
    %cst_77 = arith.constant 1.000000e+00 : f32
    %125 = vector.broadcast %cst_77 : f32 to vector<128x64xf32>
    %126 = arith.addf %125, %124 : vector<128x64xf32>
    %127 = arith.mulf %121, %126 : vector<128x64xf32>
    %c0_78 = arith.constant 0 : index
    %c0_79 = arith.constant 0 : index
    %128 = vector.load %arg25[%c0_78, %c0_79] : memref<64x64xf32, #tpu.memory_space<vmem>>, vector<64x64xf32>
    %cst_80 = arith.constant dense<0.000000e+00> : vector<128x64xf32>
    %129 = tpu.matmul %127, %128, %cst_80 {dimension_numbers = #tpu.dot_dimension_numbers<[1], [0], [0], [1], [0, 0, 1, 1], [], []>} : vector<128x64xf32>, vector<64x64xf32>, vector<128x64xf32> -> vector<128x64xf32>
    %c0_81 = arith.constant 0 : index
    %c0_82 = arith.constant 0 : index
    %130 = vector.load %arg26[%c0_81, %c0_82] : memref<1x64xf32, #tpu.memory_space<vmem>>, vector<1x64xf32>
    %131 = vector.broadcast %130 : vector<1x64xf32> to vector<128x64xf32>
    %132 = arith.addf %129, %131 : vector<128x64xf32>
    %cst_83 = arith.constant 5.000000e-01 : f32
    %133 = vector.broadcast %cst_83 : f32 to vector<128x64xf32>
    %134 = arith.mulf %133, %132 : vector<128x64xf32>
    %cst_84 = arith.constant 0.707106769 : f32
    %135 = vector.broadcast %cst_84 : f32 to vector<128x64xf32>
    %136 = arith.mulf %132, %135 : vector<128x64xf32>
    %137 = math.erf %136 : vector<128x64xf32>
    %cst_85 = arith.constant 1.000000e+00 : f32
    %138 = vector.broadcast %cst_85 : f32 to vector<128x64xf32>
    %139 = arith.addf %138, %137 : vector<128x64xf32>
    %140 = arith.mulf %134, %139 : vector<128x64xf32>
    %c0_86 = arith.constant 0 : index
    %c0_87 = arith.constant 0 : index
    %141 = vector.load %arg27[%c0_86, %c0_87] : memref<64x1xf32, #tpu.memory_space<vmem>>, vector<64x1xf32>
    %cst_88 = arith.constant dense<0.000000e+00> : vector<128x1xf32>
    %142 = tpu.matmul %140, %141, %cst_88 {dimension_numbers = #tpu.dot_dimension_numbers<[1], [0], [0], [1], [0, 0, 1, 1], [], []>} : vector<128x64xf32>, vector<64x1xf32>, vector<128x1xf32> -> vector<128x1xf32>
    %c0_89 = arith.constant 0 : index
    %c0_90 = arith.constant 0 : index
    %143 = vector.load %arg28[%c0_89, %c0_90] : memref<1x1xf32, #tpu.memory_space<vmem>>, vector<1x1xf32>
    %144 = vector.broadcast %143 : vector<1x1xf32> to vector<128x1xf32>
    %145 = arith.addf %142, %144 : vector<128x1xf32>
    %c0_91 = arith.constant 0 : index
    %c0_92 = arith.constant 0 : index
    %146 = vector.load %arg29[%c0_91, %c0_92] : memref<128x1xf32, #tpu.memory_space<vmem>>, vector<128x1xf32>
    tpu.vector_store %arg29[%c0_91, %c0_92], %145 {strides = array<i32>} : memref<128x1xf32, #tpu.memory_space<vmem>>, vector<128x1xf32>,
    return
  }
  func.func @transform_0(%arg0: i32) -> (i32, i32) {
    %c0_i32 = arith.constant 0 : i32
    %c0_i32_0 = arith.constant 0 : i32
    return %arg0, %c0_i32 : i32, i32
  }
  func.func @transform_1(%arg0: i32) -> (i32, i32) {
    %c0_i32 = arith.constant 0 : i32
    %c0_i32_0 = arith.constant 0 : i32
    return %arg0, %c0_i32 : i32, i32
  }
  func.func @transform_2(%arg0: i32) -> (i32, i32) {
    %c0_i32 = arith.constant 0 : i32
    %c0_i32_0 = arith.constant 0 : i32
    %c0_i32_1 = arith.constant 0 : i32
    return %c0_i32, %c0_i32_0 : i32, i32
  }
  func.func @transform_3(%arg0: i32) -> (i32, i32) {
    %c0_i32 = arith.constant 0 : i32
    %c0_i32_0 = arith.constant 0 : i32
    %c0_i32_1 = arith.constant 0 : i32
    return %c0_i32, %c0_i32_0 : i32, i32
  }
  func.func @transform_4(%arg0: i32) -> (i32, i32) {
    %c0_i32 = arith.constant 0 : i32
    %c0_i32_0 = arith.constant 0 : i32
    %c0_i32_1 = arith.constant 0 : i32
    return %c0_i32, %c0_i32_0 : i32, i32
  }
  func.func @transform_5(%arg0: i32) -> (i32, i32) {
    %c0_i32 = arith.constant 0 : i32
    %c0_i32_0 = arith.constant 0 : i32
    %c0_i32_1 = arith.constant 0 : i32
    return %c0_i32, %c0_i32_0 : i32, i32
  }
  func.func @transform_6(%arg0: i32) -> (i32, i32) {
    %c0_i32 = arith.constant 0 : i32
    %c0_i32_0 = arith.constant 0 : i32
    %c0_i32_1 = arith.constant 0 : i32
    return %c0_i32, %c0_i32_0 : i32, i32
  }
  func.func @transform_7(%arg0: i32) -> (i32, i32) {
    %c0_i32 = arith.constant 0 : i32
    %c0_i32_0 = arith.constant 0 : i32
    %c0_i32_1 = arith.constant 0 : i32
    return %c0_i32, %c0_i32_0 : i32, i32
  }
  func.func @transform_8(%arg0: i32) -> (i32, i32) {
    %c0_i32 = arith.constant 0 : i32
    %c0_i32_0 = arith.constant 0 : i32
    %c0_i32_1 = arith.constant 0 : i32
    return %c0_i32, %c0_i32_0 : i32, i32
  }
  func.func @transform_9(%arg0: i32) -> (i32, i32) {
    %c0_i32 = arith.constant 0 : i32
    %c0_i32_0 = arith.constant 0 : i32
    %c0_i32_1 = arith.constant 0 : i32
    return %c0_i32, %c0_i32_0 : i32, i32
  }
  func.func @transform_10(%arg0: i32) -> (i32, i32) {
    %c0_i32 = arith.constant 0 : i32
    %c0_i32_0 = arith.constant 0 : i32
    %c0_i32_1 = arith.constant 0 : i32
    return %c0_i32, %c0_i32_0 : i32, i32
  }
  func.func @transform_11(%arg0: i32) -> (i32, i32) {
    %c0_i32 = arith.constant 0 : i32
    %c0_i32_0 = arith.constant 0 : i32
    %c0_i32_1 = arith.constant 0 : i32
    return %c0_i32, %c0_i32_0 : i32, i32
  }
  func.func @transform_12(%arg0: i32) -> (i32, i32) {
    %c0_i32 = arith.constant 0 : i32
    %c0_i32_0 = arith.constant 0 : i32
    %c0_i32_1 = arith.constant 0 : i32
    return %c0_i32, %c0_i32_0 : i32, i32
  }
  func.func @transform_13(%arg0: i32) -> (i32, i32) {
    %c0_i32 = arith.constant 0 : i32
    %c0_i32_0 = arith.constant 0 : i32
    %c0_i32_1 = arith.constant 0 : i32
    return %c0_i32, %c0_i32_0 : i32, i32
  }
  func.func @transform_14(%arg0: i32) -> (i32, i32) {
    %c0_i32 = arith.constant 0 : i32
    %c0_i32_0 = arith.constant 0 : i32
    %c0_i32_1 = arith.constant 0 : i32
    return %c0_i32, %c0_i32_0 : i32, i32
  }
  func.func @transform_15(%arg0: i32) -> (i32, i32) {
    %c0_i32 = arith.constant 0 : i32
    %c0_i32_0 = arith.constant 0 : i32
    %c0_i32_1 = arith.constant 0 : i32
    return %c0_i32, %c0_i32_0 : i32, i32
  }
  func.func @transform_16(%arg0: i32) -> (i32, i32) {
    %c0_i32 = arith.constant 0 : i32
    %c0_i32_0 = arith.constant 0 : i32
    %c0_i32_1 = arith.constant 0 : i32
    return %c0_i32, %c0_i32_0 : i32, i32
  }
  func.func @transform_17(%arg0: i32) -> (i32, i32) {
    %c0_i32 = arith.constant 0 : i32
    %c0_i32_0 = arith.constant 0 : i32
    %c0_i32_1 = arith.constant 0 : i32
    return %c0_i32, %c0_i32_0 : i32, i32
  }
  func.func @transform_18(%arg0: i32) -> (i32, i32) {
    %c0_i32 = arith.constant 0 : i32
    %c0_i32_0 = arith.constant 0 : i32
    %c0_i32_1 = arith.constant 0 : i32
    return %c0_i32, %c0_i32_0 : i32, i32
  }
  func.func @transform_19(%arg0: i32) -> (i32, i32) {
    %c0_i32 = arith.constant 0 : i32
    %c0_i32_0 = arith.constant 0 : i32
    %c0_i32_1 = arith.constant 0 : i32
    return %c0_i32, %c0_i32_0 : i32, i32
  }
  func.func @transform_20(%arg0: i32) -> (i32, i32) {
    %c0_i32 = arith.constant 0 : i32
    %c0_i32_0 = arith.constant 0 : i32
    %c0_i32_1 = arith.constant 0 : i32
    return %c0_i32, %c0_i32_0 : i32, i32
  }
  func.func @transform_21(%arg0: i32) -> (i32, i32) {
    %c0_i32 = arith.constant 0 : i32
    %c0_i32_0 = arith.constant 0 : i32
    %c0_i32_1 = arith.constant 0 : i32
    return %c0_i32, %c0_i32_0 : i32, i32
  }
  func.func @transform_22(%arg0: i32) -> (i32, i32) {
    %c0_i32 = arith.constant 0 : i32
    %c0_i32_0 = arith.constant 0 : i32
    %c0_i32_1 = arith.constant 0 : i32
    return %c0_i32, %c0_i32_0 : i32, i32
  }
  func.func @transform_23(%arg0: i32) -> (i32, i32) {
    %c0_i32 = arith.constant 0 : i32
    %c0_i32_0 = arith.constant 0 : i32
    %c0_i32_1 = arith.constant 0 : i32
    return %c0_i32, %c0_i32_0 : i32, i32
  }
  func.func @transform_24(%arg0: i32) -> (i32, i32) {
    %c0_i32 = arith.constant 0 : i32
    %c0_i32_0 = arith.constant 0 : i32
    %c0_i32_1 = arith.constant 0 : i32
    return %c0_i32, %c0_i32_0 : i32, i32
  }
  func.func @transform_25(%arg0: i32) -> (i32, i32) {
    %c0_i32 = arith.constant 0 : i32
    %c0_i32_0 = arith.constant 0 : i32
    %c0_i32_1 = arith.constant 0 : i32
    return %c0_i32, %c0_i32_0 : i32, i32
  }
  func.func @transform_26(%arg0: i32) -> (i32, i32) {
    %c0_i32 = arith.constant 0 : i32
    %c0_i32_0 = arith.constant 0 : i32
    %c0_i32_1 = arith.constant 0 : i32
    return %c0_i32, %c0_i32_0 : i32, i32
  }
  func.func @transform_27(%arg0: i32) -> (i32, i32) {
    %c0_i32 = arith.constant 0 : i32
    %c0_i32_0 = arith.constant 0 : i32
    %c0_i32_1 = arith.constant 0 : i32
    return %c0_i32, %c0_i32_0 : i32, i32
  }
  func.func @transform_28(%arg0: i32) -> (i32, i32) {
    %c0_i32 = arith.constant 0 : i32
    %c0_i32_0 = arith.constant 0 : i32
    return %arg0, %c0_i32 : i32, i32
  }
  func.func @transform_29(%arg0: i32) -> (i32, i32) {
    %c0_i32 = arith.constant 0 : i32
    %c0_i32_0 = arith.constant 0 : i32
    return %arg0, %c0_i32 : i32, i32
  }
  func.func @transform_30(%arg0: i32) -> (i32, i32) {
    %c0_i32 = arith.constant 0 : i32
    %c0_i32_0 = arith.constant 0 : i32
    return %arg0, %c0_i32 : i32, i32
  }
  func.func @transform_31(%arg0: i32) -> (i32, i32) {
    %c0_i32 = arith.constant 0 : i32
    %c0_i32_0 = arith.constant 0 : i32
    return %arg0, %c0_i32 : i32, i32
  }
}

</mosaic_0001>

<bundles_post_ra>
// kernel: tpu_custom_call.1
= control target key start
LH: loop header
LB: loop body
LE: loop exit
PB: predicated region body
PF: predicated region fallthrough
CT: control target
= control target key end

     0   :  { %s8361_s6 = smov 1   ;;  %s8362_s10 = smov 2   ;;  %s13095_s0 = inlined_call_operand.smem [shape: u32[32], index: -1, kind: input, shape index: {}] }
   0x1   :  { %s8412_s5 = sld [smem:[%s13095_s0]]   ;;  %s8363_s14 = smov 3  }
   0x2   :  { %s8417_s9 = sld [smem:[%s13095_s0 + %s8361_s6]]   ;;  %s8364_s18 = smov 4  }
   0x3   :  { %s8422_s13 = sld [smem:[%s13095_s0 + %s8362_s10]]   ;;  %s8365_s22 = smov 5  }
   0x4   :  { %s8427_s17 = sld [smem:[%s13095_s0 + %s8363_s14]]   ;;  %s8366_s26 = smov 6  }
   0x5   :  { %s8432_s21 = sld [smem:[%s13095_s0 + %s8364_s18]]   ;;  %s8367_s30 = smov 7  }
   0x6   :  { %s8437_s25 = sld [smem:[%s13095_s0 + %s8365_s22]]   ;;  %s8368_s4 = smov 8  }
   0x7   :  { %13144 = sst [smem:[#allocation21_spill]] %s8412_s5  ;;  %s8369_s10 = smov 9  }
   0x8   :  { %13145 = sst [smem:[#allocation22_spill]] %s8417_s9  ;;  %s8370_s15 = smov 10  }
   0x9   :  { %13146 = sst [smem:[#allocation23_spill]] %s8422_s13  ;;  %s8371_s20 = smov 11  }
   0xa   :  { %13147 = sst [smem:[#allocation24_spill]] %s8427_s17  ;;  %s8373_s1 = smov 13  }
   0xb   :  { %s8442_s29 = sld [smem:[%s13095_s0 + %s8366_s26]]   ;;  %s8372_s26 = smov 12  }
   0xc   :  { %s8447_s3 = sld [smem:[%s13095_s0 + %s8367_s30]]   ;;  %s8374_s7 = smov 14  }
   0xd   :  { %s8452_s8 = sld [smem:[%s13095_s0 + %s8368_s4]]   ;;  %s8376_s22 = smov 16  }
   0xe   :  { %s8457_s14 = sld [smem:[%s13095_s0 + %s8369_s10]]   ;;  %s8377_s28 = smov 17  }
   0xf   :  { %s8462_s19 = sld [smem:[%s13095_s0 + %s8370_s15]]   ;;  %s8375_s15 = smov 15  }
  0x10   :  { %s8467_s24 = sld [smem:[%s13095_s0 + %s8371_s20]]   ;;  %s8388_s23 = smov 28  }
  0x11   :  { %s8472_s30 = sld [smem:[%s13095_s0 + %s8372_s26]]   ;;  %s8390_s10 = smov 30  }
  0x12   :  { %13148 = sst [smem:[#allocation25_spill]] %s8447_s3  ;;  %s8391_s16 = smov 31  }
  0x13   :  { %13149 = sst [smem:[#allocation26_spill]] %s8452_s8 }
  0x14   :  { %13150 = sst [smem:[#allocation27_spill]] %s8457_s14 }
  0x15   :  { %13151 = sst [smem:[#allocation28_spill]] %s8462_s19 }
  0x16   :  { %13152 = sst [smem:[#allocation29_spill]] %s8467_s24 }
  0x17   :  { %s8477_s6 = sld [smem:[%s13095_s0 + %s8373_s1]]   ;;  %s8389_s1 = smov 29  }
  0x18   :  { %s8482_s12 = sld [smem:[%s13095_s0 + %s8374_s7]]   ;;  %s8378_s7 = smov 18  }
  0x19   :  { %s8487_s20 = sld [smem:[%s13095_s0 + %s8375_s15]]   ;;  %s8379_s15 = smov 19  }
  0x1a   :  { %s8492_s27 = sld [smem:[%s13095_s0 + %s8376_s22]]   ;;  %s8380_s22 = smov 20  }
  0x1b   :  { %s8497_s4 = sld [smem:[%s13095_s0 + %s8377_s28]]   ;;  %s8381_s28 = smov 21  }
  0x1c   :  { %s8565_s14 = sld [smem:[%s13095_s0 + %s8391_s16]]  }
  0x1d   :  { %13153 = sst [smem:[#allocation30_spill]] %s8477_s6 }
  0x1e   :  { %13154 = sst [smem:[#allocation31_spill]] %s8482_s12 }
  0x1f   :  { %13155 = sst [smem:[#allocation32_spill]] %s8487_s20 }
  0x20   :  { %13156 = sst [smem:[#allocation33_spill]] %s8492_s27 }
  0x21   :  { %13157 = sst [smem:[#allocation34_spill]] %s8497_s4 }
  0x22   :  { %s8502_s6 = sld [smem:[%s13095_s0 + %s8378_s7]]   ;;  %s8382_s7 = smov 22  }
  0x23   :  { %s8507_s20 = sld [smem:[%s13095_s0 + %s8379_s15]]   ;;  %s8383_s15 = smov 23  }
  0x24   :  { %s8512_s27 = sld [smem:[%s13095_s0 + %s8380_s22]]   ;;  %s8384_s22 = smov 24  }
  0x25   :  { %s8517_s4 = sld [smem:[%s13095_s0 + %s8381_s28]]   ;;  %s8385_s28 = smov 25  }
  0x26   :  { %s8532_s24 = sld [smem:[%s13095_s0 + %s8384_s22]]  }
  0x27   :  { %s8550_s12 = sld [smem:[%s13095_s0 + %s8388_s23]]  }
  0x28   :  { %13158 = sst [smem:[#allocation35_spill]] %s8502_s6 }
  0x29   :  { %13159 = sst [smem:[#allocation36_spill]] %s8507_s20 }
  0x2a   :  { %13160 = sst [smem:[#allocation37_spill]] %s8512_s27 }
  0x2b   :  { %13161 = sst [smem:[#allocation38_spill]] %s8517_s4 }
  0x2c   :  { %s8522_s6 = sld [smem:[%s13095_s0 + %s8382_s7]]   ;;  %s8386_s7 = smov 26  }
  0x2d   :  { %s8527_s20 = sld [smem:[%s13095_s0 + %s8383_s15]]   ;;  %s8387_s15 = smov 27  }
  0x2e   :  { %s8537_s4 = sld [smem:[%s13095_s0 + %s8385_s28]]  }
  0x2f   :  { %13166 = sst [smem:[#allocation43_spill]] %s8550_s12 }
  0x30   :  { %13169 = sst [smem:[#allocation46_spill]] %s8565_s14 }
  0x32   :  { %13162 = sst [smem:[#allocation39_spill]] %s8522_s6 }
  0x33   :  { %13163 = sst [smem:[#allocation40_spill]] %s8527_s20 }
  0x34   :  { %13164 = sst [smem:[#allocation41_spill]] %s8537_s4 }
  0x35   :  { %s8542_s6 = sld [smem:[%s13095_s0 + %s8386_s7]]  }
  0x36   :  { %s7291_s20 = sld [smem:[%s13095_s0 + %s8387_s15]]  }
  0x37   :  { %s8555_s4 = sld [smem:[%s13095_s0 + %s8389_s1]]  }
  0x3b   :  { %13165 = sst [smem:[#allocation42_spill]] %s8542_s6 }
  0x3c   :  { %s8560_s6 = sld [smem:[%s13095_s0 + %s8390_s10]]   ;;  %v69_v0 = vstv %s7291_s20 }
  0x3d   :  { %13167 = sst [smem:[#allocation44_spill]] %s8555_s4  ;;  %70 = vst [vmem:[#allocation2] sm:$0x1] %v69_v0 }
  0x42   :  { %13168 = sst [smem:[#allocation45_spill]] %s8560_s6 }
  0x43   :  { %71 = vsyncpa [#allocation4], 0 }
  0x44   :  { %72 = vsyncpa [#allocation7], 0 }
  0x45   :  { %73 = vsyncpa [#allocation10], 0 }
  0x46   :  { %74 = vsyncpa [#allocation5], 0 }
  0x47   :  { %76 = vsyncpa [#allocation5 + $0x1], 0 }
  0x48   :  { %77 = vsyncpa [#allocation14], 0 }
  0x49   :  { %79 = vsyncpa [#allocation14 + $0x1], 0  ;;  %s8567_s23 = smov 0   ;;  %s8569_s22 = smov 0  }
  0x4a   :  { %s8571_s26 = smov 0   ;;  %s8573_s1 = smov 0  }
  0x4b LB: > { %s13170_s13 = sld [smem:[#allocation23_spill]]  ;;  %s8588_s0 = sadd.s32 4294967295, %s8359_s1   ;;  %s8351_s22 = sphi %s8569_s22, %s13399_s22   ;;  %s8347_s23 = sphi %s8567_s23, %s13398_s23   ;;  %s8359_s1 = sphi %s8573_s1, %s13395_s1   ;;  %s8355_s26 = sphi %s8571_s26, %s13397_s26  }
  0x4c   : > { %s13171_s6 = sld [smem:[#allocation45_spill]]  ;;  %s13105_s20 = sadd.s32 4294967294, %s8359_s1  }
  0x4d   : > { %s13172_s8 = sld [smem:[#allocation26_spill]]  ;;  %s8592_s28 = sadd.s32 1, %s8359_s1  }
  0x4e   : > { %s13173_s3 = sld [smem:[#allocation25_spill]]  ;;  %s716_s2 = sadd.s32 1, %s8355_s26 }
  0x4f   : > { %s13174_s27 = sld [smem:[#allocation37_spill]]  ;;  %s713_s10 = ssub.s32 %s8359_s1, %s8592_s28 }
  0x50   : > { %s13175_s19 = sld [smem:[#allocation28_spill]]  ;;  %p726_p0 = scmp.ne.s32.totalorder %s8355_s26, %s8351_s22 }
  0x51   : > { %13176 = sst [smem:[#allocation47_spill]] %s8347_s23  ;;  %p714_p1 = scmp.eq.s32.totalorder %s713_s10, 0 }
  0x52   : > { %13177 = sst [smem:[#allocation48_spill]] %s8355_s26  ;;  %p727_p2 = scmp.eq.s32.totalorder %s8588_s0, 1 }
  0x53   : > { %13178 = sst [smem:[#allocation49_spill]] %s8359_s1  ;;  %p732_p3 = scmp.ne.s32.totalorder %s8351_s22, %s8347_s23 }
  0x54   : > { %13179 = sst [smem:[#allocation50_spill]] %s8592_s28  ;;  %p733_p4 = scmp.eq.s32.totalorder %s13105_s20, 1 }
  0x55   : > { %s8605_s7 = scalar_select %p714_p1, %s8355_s26, %s716_s2  }
  0x56   : > { %p8607_p5 = por %p727_p2, %p726_p0  ;;  %p8611_p6 = por %p733_p4, %p732_p3 }
  0x57   : > { %13180 = sst [smem:[#allocation51_spill]] %s8605_s7  ;;  %p7298_p7 = scmp.ge.s32.totalorder %s8359_s1, 1 }
  0x58   : > { %s13182_s16 = scalar_select %p8611_p6, 1, 0 }
  0x59   : > { %p792_p8 = scmp.lt.s32.totalorder %s8359_s1, 3  ;;  %p7702_p9 = scmp.eq.s32.totalorder %s8588_s0, 0 }
  0x5a   : > { %13183 = sst [smem:[#allocation52_spill]] %s13182_s16  ;;  %s838_s18 = sshll.u32 %s13175_s19, 4  ;;  %s839_s18 = int_to_ptr.hbm [resolvable:$true] %s838_s18 }
  0x5b   : > { %p8618_p10 = pnand %p7298_p7, %p792_p8  ;;  %s8392_s2 = smov [#allocation6]  }
  0x5c   : > { %s840_s10 = sshll.u32 %s8392_s2, 4  ;;  %s890_s7 = sshll.u32 %s13174_s27, 4  ;;  %s841_s10 = int_to_ptr.vmem [resolvable:$true] %s840_s10  ;;  %s8632_s7 = int_to_ptr.hbm [resolvable:$true] %s890_s7 }
  0x5d   : > { %p7676_p11 = pneg %p8618_p10  ;;  %s8075_s26 = sshra.s32 %s839_s18, 4  ;;  %s8076_s26 = int_to_ptr.hbm [resolvable:$true] %s8075_s26 }
  0x5e   : > { %s8077_s28 = scalar_lea.hbm %s8076_s26, 128  ;;  %s8082_s2 = scalar_lea.hbm %s13175_s19, 128 }
  0x5f   : > { %p8627_p12 = pnand %p7702_p9, %p7676_p11  ;;  %p8078_p13 = scmp.ne.s32.totalorder %s8076_s26, %s8077_s28 }
  0x60   : > { %p8083_p3 = scmp.lt.s32.totalorder %s8076_s26, %s13175_s19  ;;  %p8084_p4 = scmp.lt.s32.totalorder %s8082_s2, %s8077_s28 }
  0x61   : > { %p8636_p0 = pneg %p8627_p12 }
  0x62   : > { %p8085_p7 = por %p8084_p4, %p8083_p3 }
  0x63   : > { %p8080_p1 = pnand %p8636_p0, %p8078_p13 }
  0x65   : > { %p8081_p2 = pneg %p8080_p1 }
  0x67   : > { %p8086_p8 = pnand %p8085_p7, %p8081_p2 }
  0x69   : > { %8089 = shalt.err (!%p8086_p8)
}
  0x6a   : > { %s13117_s23 = smov 128   ;;  %s8394_s1 = smov 8  }
  0x6b   : > { %7682 = dma.hbm_to_vmem [thread:$0]  (!%p8627_p12), %s839_s18, 2048, %s841_s10, [#allocation7], %s13117_s23, %s13117_s23, %s8394_s1  }
  0x6c   : > { %s8395_s4 = smov [#allocation9]   ;;  %s815_s26 = sshll.u32 %s8442_s29, 4  ;;  %s8650_s26 = int_to_ptr.hbm [resolvable:$true] %s815_s26 }
  0x6d   : > { %s892_s14 = sshll.u32 %s8395_s4, 4  ;;  %s8105_s28 = sshra.s32 %s8632_s7, 4  ;;  %s893_s14 = int_to_ptr.vmem [resolvable:$true] %s892_s14  ;;  %s8106_s28 = int_to_ptr.hbm [resolvable:$true] %s8105_s28 }
  0x6e   : > { %s8107_s2 = scalar_lea.hbm %s8106_s28, 64  ;;  %s8112_s19 = scalar_lea.hbm %s13174_s27, 64 }
  0x6f   : > { %p8108_p11 = scmp.ne.s32.totalorder %s8106_s28, %s8107_s2  ;;  %p8113_p2 = scmp.lt.s32.totalorder %s8106_s28, %s13174_s27 }
  0x70   : > { %p8114_p3 = scmp.lt.s32.totalorder %s8112_s19, %s8107_s2 }
  0x71   : > { %p8110_p13 = pnand %p8108_p11, %p8636_p0 }
  0x72   : > { %p8115_p4 = por %p8114_p3, %p8113_p2 }
  0x73   : > { %p8111_p1 = pneg %p8110_p13 }
  0x75   : > { %p8116_p7 = pnand %p8115_p4, %p8111_p1 }
  0x77   : > { %8119 = shalt.err (!%p8116_p7)
}
  0x78   : > { %7688 = dma.hbm_to_vmem [thread:$0]  (!%p8627_p12), %s8632_s7, 1024, %s893_s14, [#allocation10], %s13117_s23, %s13117_s23, %s8394_s1  }
  0x79   : > { %s8396_s4 = smov [#allocation3]   ;;  %s855_s10 = sshll.u32 %s8472_s30, 4  ;;  %s856_s10 = int_to_ptr.hbm [resolvable:$true] %s855_s10 }
  0x7a   : > { %s817_s18 = sshll.u32 %s8396_s4, 4  ;;  %s8135_s19 = sshra.s32 %s8650_s26, 4  ;;  %s818_s18 = int_to_ptr.vmem [resolvable:$true] %s817_s18  ;;  %s8136_s19 = int_to_ptr.hbm [resolvable:$true] %s8135_s19 }
  0x7b   : > { %s8137_s28 = scalar_lea.hbm %s8136_s19, 96  ;;  %s8142_s2 = scalar_lea.hbm %s8442_s29, 96 }
  0x7c   : > { %p8138_p8 = scmp.ne.s32.totalorder %s8136_s19, %s8137_s28  ;;  %p8143_p1 = scmp.lt.s32.totalorder %s8136_s19, %s8442_s29 }
  0x7d   : > { %p8144_p2 = scmp.lt.s32.totalorder %s8142_s2, %s8137_s28 }
  0x7e   : > { %p8140_p11 = pnand %p8138_p8, %p8636_p0 }
  0x7f   : > { %p8145_p3 = por %p8144_p2, %p8143_p1 }
  0x80   : > { %p8141_p13 = pneg %p8140_p11 }
  0x82   : > { %p8146_p4 = pnand %p8145_p3, %p8141_p13 }
  0x84   : > { %8149 = shalt.err (!%p8146_p4)
}
  0x85   : > { %s8397_s27 = smov 64   ;;  %s8398_s14 = smov 4  }
  0x86   : > { %7679 = dma.hbm_to_vmem [thread:$0]  (!%p8627_p12), %s8650_s26, 1536, %s818_s18, [#allocation4], %s8397_s27, %s8397_s27, %s8398_s14  }
  0x87   : > { %s8399_s7 = smov [#allocation8]   ;;  %s913_s23 = sshll.u32 %s8532_s24, 4  ;;  %s914_s23 = int_to_ptr.hbm [resolvable:$true] %s913_s23 }
  0x88   : > { %s857_s4 = sshll.u32 %s8399_s7, 4  ;;  %s8165_s19 = sshra.s32 %s856_s10, 4  ;;  %s858_s4 = int_to_ptr.vmem [resolvable:$true] %s857_s4  ;;  %s8166_s19 = int_to_ptr.hbm [resolvable:$true] %s8165_s19 }
  0x89   : > { %s8167_s28 = scalar_lea.hbm %s8166_s19, 128  ;;  %s8172_s2 = scalar_lea.hbm %s8472_s30, 128 }
  0x8a   : > { %p8168_p7 = scmp.ne.s32.totalorder %s8166_s19, %s8167_s28  ;;  %p8173_p13 = scmp.lt.s32.totalorder %s8166_s19, %s8472_s30 }
  0x8b   : > { %p8174_p1 = scmp.lt.s32.totalorder %s8172_s2, %s8167_s28 }
  0x8c   : > { %p8170_p8 = pnand %p8168_p7, %p8636_p0 }
  0x8d   : > { %p8175_p2 = por %p8174_p1, %p8173_p13 }
  0x8e   : > { %p8171_p11 = pneg %p8170_p8 }
  0x90   : > { %p8176_p3 = pnand %p8175_p2, %p8171_p11 }
  0x92   : > { %8179 = shalt.err (!%p8176_p3)
}
  0x93   : > { %s13187_s27 = smov 128   ;;  %s8400_s26 = smov [#allocation11]  }
  0x94   : > { %7685 = dma.hbm_to_vmem [thread:$0]  (!%p8627_p12), %s856_s10, 2048, %s858_s4, [#allocation7], %s13187_s27, %s13187_s27, %s8394_s1  }
  0x95   : > { %s915_s18 = sshll.u32 %s8400_s26, 4  ;;  %s8195_s14 = sshra.s32 %s914_s23, 4  ;;  %s916_s18 = int_to_ptr.vmem [resolvable:$true] %s915_s18  ;;  %s8196_s14 = int_to_ptr.hbm [resolvable:$true] %s8195_s14 }
  0x96   : > { %s8197_s7 = scalar_lea.hbm %s8196_s14, 64  ;;  %s8202_s19 = scalar_lea.hbm %s8532_s24, 64 }
  0x97   : > { %p8198_p4 = scmp.ne.s32.totalorder %s8196_s14, %s8197_s7  ;;  %p8203_p11 = scmp.lt.s32.totalorder %s8196_s14, %s8532_s24 }
  0x98   : > { %p8204_p13 = scmp.lt.s32.totalorder %s8202_s19, %s8197_s7 }
  0x99   : > { %p8200_p7 = pnand %p8198_p4, %p8636_p0 }
  0x9a   : > { %p8205_p1 = por %p8204_p13, %p8203_p11 }
  0x9b   : > { %p8201_p8 = pneg %p8200_p7 }
  0x9d   : > { %p8206_p2 = pnand %p8205_p1, %p8201_p8 }
  0x9f   : > { %8209 = shalt.err (!%p8206_p2)
}
  0xa0   : > { %7691 = dma.hbm_to_vmem [thread:$0]  (!%p8627_p12), %s914_s23, 1024, %s916_s18, [#allocation10], %s13187_s27, %s13187_s27, %s8394_s1  }
  0xa1   : > { %960 = sbr.rel (%p8618_p10) target bundleno = 2289 (0x8f1), region = 132 }
  0xa6   : > { %8326 = dma.done.wait (%p7702_p9), [#allocation4], 1536  }
  0xa7   : > { %8328 = vsyncadd (%p7702_p9), [#allocation4], 4294965760 }
  0xa8   : > { %8330 = dma.done.wait (%p7702_p9), [#allocation7], 4096  }
  0xa9   : > { %8332 = vsyncadd (%p7702_p9), [#allocation7], 4294963200 }
  0xaa   : > { %8334 = dma.done.wait (%p7702_p9), [#allocation10], 2048  }
  0xab   : > { %8336 = vsyncadd (%p7702_p9), [#allocation10], 4294965248  ;;  %v7606_v1 = vld [vmem:[%s13170_s13 + $0x38] sm:$0xff]  ;;  %v7605_v2 = vld [vmem:[%s13170_s13 + $0x30] sm:$0xff]  ;;  %s7314_s23 = sshll.u32 %s8588_s0, 4  ;;  %s13188_s5 = sld [smem:[#allocation21_spill]] }
  0xac   : > { %1335 = vmatpush.bf16.msra.mxu0 %v7606_v1  ;;  %7630 = vmatpush.bf16.msra.mxu1 %v7606_v1  ;;  %v7604_v3 = vld [vmem:[%s13170_s13 + $0x28] sm:$0xff]  ;;  %v7626_v4 = vld [vmem:[#allocation3 + $0x58] sm:$0xff]  ;;  %p1084_p9 = scmp.lt.s32.totalorder %s7314_s23, 31  ;;  %v7625_v7 = vld [vmem:[#allocation3 + $0x50] sm:$0xff]  ;;  %s13189_s9 = sld [smem:[#allocation22_spill]]  ;;  %vm2277_vm0 = vcmask 523264  }
  0xad   : > { %7631 = vmatpush.bf16.msra.mxu2 %v7606_v1  ;;  %7646 = vmatpush.bf16.msra.mxu3 %v7626_v4  ;;  %v7603_v5 = vld [vmem:[%s13170_s13 + $0x20] sm:$0xff]  ;;  %v7602_v6 = vld [vmem:[%s13170_s13 + $0x18] sm:$0xff]  ;;  %v7601_v8 = vld [vmem:[%s13170_s13 + $0x10] sm:$0xff]  ;;  %s13190_s17 = sld [smem:[#allocation24_spill]]  ;;  %s13133_s4 = sand.u32 1, %s8351_s22  }
  0xae   : > { %s13401_s23 = smov (!%p1084_p9, %s7314_s23), 31  ;;  %v7600_v9 = vld [vmem:[%s13170_s13 + $0x8] sm:$0xff]  ;;  %v7599_v10 = vld [vmem:[%s13170_s13] sm:$0xff]  ;;  %v7614_v15 = vld [vmem:[%s13170_s13 + $0x78] sm:$0xff]  ;;  %s13265_s15 = sld [smem:[#allocation27_spill]] }
  0xaf   : > { %s7597_s1 = sshll.u32 %s13401_s23, 4  ;;  %v7613_v18 = vld [vmem:[%s13170_s13 + $0x70] sm:$0xff]  ;;  %v7622_v19 = vld [vmem:[#allocation3 + $0x38] sm:$0xff]  ;;  %v7612_v22 = vld [vmem:[%s13170_s13 + $0x68] sm:$0xff]  ;;  %s13273_s10 = sld [smem:[#allocation31_spill]] }
  0xb0   : > { %1336 = vmatpush.bf16.msra.mxu0 %v7605_v2  ;;  %7632 = vmatpush.bf16.msra.mxu1 %v7605_v2  ;;  %v7621_v20 = vld [vmem:[#allocation3 + $0x30] sm:$0xff]  ;;  %v7624_v21 = vld [vmem:[#allocation3 + $0x48] sm:$0xff]  ;;  %v7611_v24 = vld [vmem:[%s13170_s13 + $0x60] sm:$0xff]  ;;  %s13326_s28 = sld [smem:[#allocation29_spill]]  ;;  %s10820_s2 = sshll.u32 %s13133_s4, 7 }
  0xb1   : > { %7633 = vmatpush.bf16.msra.mxu2 %v7605_v2  ;;  %7647 = vmatpush.bf16.msra.mxu3 %v7625_v7  ;;  %s8719_s20 = scalar_lea.vmem %s13188_s5, %s7597_s1  ;;  %v7620_v23 = vld [vmem:[#allocation3 + $0x28] sm:$0xff]  ;;  %v7619_v29 = vld [vmem:[#allocation3 + $0x20] sm:$0xff]  ;;  %v7610_v30 = vld [vmem:[%s13170_s13 + $0x58] sm:$0xff]  ;;  %s10845_s27 = scalar_lea.vmem [#allocation13], %s10820_s2 }
  0xb2   : > { %v1107_v11 = vld [vmem:[%s8719_s20] sm:$0xff]  ;;  %v1109_v12 = vld [vmem:[%s8719_s20 + $0x10] sm:$0xff]  ;;  %v7608_v39 = vld [vmem:[%s13170_s13 + $0x48] sm:$0xff]  ;;  %s8747_s16 = scalar_lea.vmem %s13189_s9, %s7597_s1  ;;  %s13335_s26 = sld [smem:[#allocation30_spill]] }
  0xb3   : > { %v1127_v13 = vld [vmem:[%s8719_s20 + $0xa0] sm:$0xff]  ;;  %v1129_v14 = vld [vmem:[%s8719_s20 + $0xb0] sm:$0xff]  ;;  %v1139_v16 = vpack.c.bf16 %v1109_v12, %v1107_v11  ;;  %v1108_v45 = vld [vmem:[%s8719_s20 + $0x8] sm:$0xff]  ;;  %s10952_s18 = scalar_lea.vmem [#allocation15], %s10820_s2  ;;  %s13344_s14 = sld [smem:[#allocation33_spill]] }
  0xb4   : > { %1337 = vmatpush.bf16.msra.mxu0 %v7604_v3  ;;  %7634 = vmatpush.bf16.msra.mxu1 %v7604_v3  ;;  %v1149_v17 = vpack.c.bf16 %v1129_v14, %v1127_v13  ;;  %v1111_v25 = vld [vmem:[%s8719_s20 + $0x20] sm:$0xff]  ;;  %v1113_v26 = vld [vmem:[%s8719_s20 + $0x30] sm:$0xff]  ;;  %v1110_v46 = vld [vmem:[%s8719_s20 + $0x18] sm:$0xff]  ;;  %s13351_s7 = sld [smem:[#allocation32_spill]]  ;;  %s13007_s4 = sshll.u32 %s8588_s0, 7 }
  0xb5   : > { %7635 = vmatpush.bf16.msra.mxu2 %v7604_v3  ;;  %7648 = vmatpush.bf16.msra.mxu3 %v7624_v21  ;;  %v1131_v27 = vld [vmem:[%s8719_s20 + $0xc0] sm:$0xff]  ;;  %v1133_v28 = vld [vmem:[%s8719_s20 + $0xd0] sm:$0xff]  ;;  %v1141_v31 = vpack.c.bf16 %v1113_v26, %v1111_v25  ;;  %v1140_v49 = vpack.c.bf16 %v1110_v46, %v1108_v45  ;;  %v1112_v55 = vld [vmem:[%s8719_s20 + $0x28] sm:$0xff]  ;;  %s13352_s19 = sld [smem:[#allocation34_spill]] }
  0xb6   : > { %v1151_v32 = vpack.c.bf16 %v1133_v28, %v1131_v27  ;;  %v1135_v33 = vld [vmem:[%s8719_s20 + $0xe0] sm:$0xff]  ;;  %v1137_v34 = vld [vmem:[%s8719_s20 + $0xf0] sm:$0xff]  ;;  %v1114_v56 = vld [vmem:[%s8719_s20 + $0x38] sm:$0xff]  ;;  %s13365_s1 = sld [smem:[#allocation35_spill]] }
  0xb7   : > { %v7609_v35 = vld [vmem:[%s13170_s13 + $0x50] sm:$0xff]  ;;  %v1153_v36 = vpack.c.bf16 %v1137_v34, %v1135_v33  ;;  %v7618_v37 = vld [vmem:[#allocation3 + $0x18] sm:$0xff]  ;;  %v7623_v38 = vld [vmem:[#allocation3 + $0x40] sm:$0xff]  ;;  %v1142_v58 = vpack.c.bf16 %v1114_v56, %v1112_v55  ;;  %s13387_s12 = sld [smem:[#allocation43_spill]] }
  0xb8   : > { %1338 = vmatpush.bf16.msra.mxu0 %v7603_v5  ;;  %7636 = vmatpush.bf16.msra.mxu1 %v7603_v5  ;;  %v7617_v40 = vld [vmem:[#allocation3 + $0x10] sm:$0xff]  ;;  %v7607_v41 = vld [vmem:[%s13170_s13 + $0x40] sm:$0xff]  ;;  %v7616_v42 = vld [vmem:[#allocation3 + $0x8] sm:$0xff] }
  0xb9   : > { %7637 = vmatpush.bf16.msra.mxu2 %v7603_v5  ;;  %7649 = vmatpush.bf16.msra.mxu3 %v7623_v38  ;;  %v1115_v43 = vld [vmem:[%s8719_s20 + $0x40] sm:$0xff]  ;;  %v1117_v44 = vld [vmem:[%s8719_s20 + $0x50] sm:$0xff]  ;;  %v1116_v0 = vld [vmem:[%s8719_s20 + $0x48] sm:$0xff] }
  0xba   : > { %v7615_v47 = vld [vmem:[#allocation3] sm:$0xff]  ;;  %v1143_v48 = vpack.c.bf16 %v1117_v44, %v1115_v43  ;;  %v1157_v51 = vld [vmem:[%s8747_s16 + $0x10] sm:$0xff]  ;;  %v1118_v1 = vld [vmem:[%s8719_s20 + $0x58] sm:$0xff] }
  0xbb   : > { %v1155_v50 = vld [vmem:[%s8747_s16] sm:$0xff]  ;;  %v1121_v54 = vld [vmem:[%s8719_s20 + $0x70] sm:$0xff]  ;;  %v1144_v3 = vpack.c.bf16 %v1118_v1, %v1116_v0  ;;  %v1128_v25 = vld [vmem:[%s8719_s20 + $0xa8] sm:$0xff] }
  0xbc   : > { %1339 = vmatpush.bf16.msra.mxu0 %v7602_v6  ;;  %7638 = vmatpush.bf16.msra.mxu1 %v7602_v6  ;;  %v1187_v52 = vpack.c.bf16 %v1157_v51, %v1155_v50  ;;  %v1119_v53 = vld [vmem:[%s8719_s20 + $0x60] sm:$0xff]  ;;  %v1161_v60 = vld [vmem:[%s8747_s16 + $0x30] sm:$0xff]  ;;  %v1130_v26 = vld [vmem:[%s8719_s20 + $0xb8] sm:$0xff] }
  0xbd   : > { %7639 = vmatpush.bf16.msra.mxu2 %v7602_v6  ;;  %v1145_v57 = vpack.c.bf16 %v1121_v54, %v1119_v53  ;;  %v1159_v59 = vld [vmem:[%s8747_s16 + $0x20] sm:$0xff]  ;;  %v1125_v63 = vld [vmem:[%s8719_s20 + $0x90] sm:$0xff]  ;;  %v1164_v27 = vld [vmem:[%s8747_s16 + $0x48] sm:$0xff] }
  0xbe   : > { %v1189_v61 = vpack.c.bf16 %v1161_v60, %v1159_v59  ;;  %v1123_v62 = vld [vmem:[%s8719_s20 + $0x80] sm:$0xff]  ;;  %v1165_v5 = vld [vmem:[%s8747_s16 + $0x50] sm:$0xff]  ;;  %v1166_v28 = vld [vmem:[%s8747_s16 + $0x58] sm:$0xff] }
  0xbf   : > { %v1147_v2 = vpack.c.bf16 %v1125_v63, %v1123_v62  ;;  %v1167_v13 = vld [vmem:[%s8747_s16 + $0x60] sm:$0xff]  ;;  %v1169_v14 = vld [vmem:[%s8747_s16 + $0x70] sm:$0xff]  ;;  %v1176_v34 = vld [vmem:[%s8747_s16 + $0xa8] sm:$0xff] }
  0xc0   : > { %1340 = vmatpush.bf16.msra.mxu0 %v7601_v8  ;;  %7640 = vmatpush.bf16.msra.mxu1 %v7601_v8  ;;  %v1138_v50 = vld [vmem:[%s8719_s20 + $0xf8] sm:$0xff]  ;;  %v1172_v51 = vld [vmem:[%s8747_s16 + $0x88] sm:$0xff]  ;;  %v8811_v63 = vld [vmem:[%s13190_s17] ss:$0 sm:$0xff] }
  0xc1   : > { %7641 = vmatpush.bf16.msra.mxu2 %v7601_v8  ;;  %v1122_v8 = vld [vmem:[%s8719_s20 + $0x78] sm:$0xff]  ;;  %v1180_v54 = vld [vmem:[%s8747_s16 + $0xc8] sm:$0xff]  ;;  %v1183_v0 = vld [vmem:[%s8747_s16 + $0xe0] sm:$0xff] }
  0xc2   : > { %v1174_v53 = vld [vmem:[%s8747_s16 + $0x98] sm:$0xff]  ;;  %v1185_v1 = vld [vmem:[%s8747_s16 + $0xf0] sm:$0xff] }
  0xc3   : > { %v1182_v55 = vld [vmem:[%s8747_s16 + $0xd8] sm:$0xff] }
  0xc4   : > { %1341 = vmatpush.bf16.msra.mxu0 %v7600_v9  ;;  %7642 = vmatpush.bf16.msra.mxu1 %v7600_v9  ;;  %v1200_v56 = vpack.c.bf16 %v1182_v55, %v1180_v54 }
  0xc5   : > { %7643 = vmatpush.bf16.msra.mxu2 %v7600_v9  ;;  %v1156_v9 = vld [vmem:[%s8747_s16 + $0x8] sm:$0xff] }
  0xc8   : > { %1342 = vmatpush.bf16.msra.mxu0 %v7599_v10  ;;  %7644 = vmatpush.bf16.msra.mxu1 %v7599_v10 }
  0xc9   : > { %7645 = vmatpush.bf16.msra.mxu2 %v7599_v10  ;;  %v1158_v10 = vld [vmem:[%s8747_s16 + $0x18] sm:$0xff] }
  0xca   : > { %v1188_v12 = vpack.c.bf16 %v1158_v10, %v1156_v9  ;;  %v3158_v10 = vld [vmem:[#allocation6 + $0x70] sm:$0xff] }
  0xcb   : > { %1343 = vmatmul.bf16.vlgmr.msra.gmra.mxu0 %v1139_v16  ;;  %1368 = vmatmul.bf16.vlgmr.msra.gmra.mxu1 %v1149_v17  ;;  %v1124_v16 = vld [vmem:[%s8719_s20 + $0x88] sm:$0xff]  ;;  %v1126_v17 = vld [vmem:[%s8719_s20 + $0x98] sm:$0xff] }
  0xcc   : > { %2355 = vmatpush.bf16.msrb.mxu0 %v7626_v4  ;;  %1384 = vmatpush.bf16.msrb.mxu1 %v7614_v15  ;;  %v1163_v4 = vld [vmem:[%s8747_s16 + $0x40] sm:$0xff]  ;;  %v1193_v15 = vpack.c.bf16 %v1169_v14, %v1167_v13  ;;  %v3157_v13 = vld [vmem:[#allocation6 + $0x68] sm:$0xff] }
  0xcd   : > { %2302 = vmatpush.bf16.msrb.mxu2 %v7622_v19  ;;  %v1191_v6 = vpack.c.bf16 %v1165_v5, %v1163_v4  ;;  %v1162_v19 = vld [vmem:[%s8747_s16 + $0x38] sm:$0xff] }
  0xce   : > { %1378 = vmatmul.bf16.vlgmr.msra.gmra.mxu2 %v1153_v36  ;;  %v3159_v5 = vld [vmem:[#allocation6 + $0x78] sm:$0xff] }
  0xcf   : > { %3164 = vmatpush.msrb.mxu3 %v3159_v5 }
  0xd0   : > { %1385 = vmatpush.bf16.msrb.mxu1 %v7613_v18  ;;  %2356 = vmatpush.bf16.msrb.mxu0 %v7625_v7  ;;  %v1120_v7 = vld [vmem:[%s8719_s20 + $0x68] sm:$0xff] }
  0xd1   : > { %2303 = vmatpush.bf16.msrb.mxu2 %v7621_v20  ;;  %v1146_v11 = vpack.c.bf16 %v1122_v8, %v1120_v7  ;;  %v1160_v18 = vld [vmem:[%s8747_s16 + $0x28] sm:$0xff]  ;;  %v1148_v20 = vpack.c.bf16 %v1126_v17, %v1124_v16  ;;  %v1186_v7 = vld [vmem:[%s8747_s16 + $0xf8] sm:$0xff]  ;;  %3165 = vmatpush.msrb.mxu3 %v3158_v10 }
  0xd2   : > { %v3149_v10 = vld [vmem:[#allocation6 + $0x28] sm:$0xff] }
  0xd3   : > { %3166 = vmatpush.msrb.mxu3 %v3157_v13 }
  0xd4   : > { %1386 = vmatpush.bf16.msrb.mxu1 %v7612_v22  ;;  %2357 = vmatpush.bf16.msrb.mxu0 %v7624_v21  ;;  %v1190_v21 = vpack.c.bf16 %v1162_v19, %v1160_v18  ;;  %v1171_v22 = vld [vmem:[%s8747_s16 + $0x80] sm:$0xff] }
  0xd5   : > { %2304 = vmatpush.bf16.msrb.mxu2 %v7620_v23  ;;  %v1173_v23 = vld [vmem:[%s8747_s16 + $0x90] sm:$0xff] }
  0xd8   : > { %1387 = vmatpush.bf16.msrb.mxu1 %v7611_v24  ;;  %2358 = vmatpush.bf16.msrb.mxu0 %v7623_v38  ;;  %v1195_v24 = vpack.c.bf16 %v1173_v23, %v1171_v22  ;;  %v1134_v38 = vld [vmem:[%s8719_s20 + $0xd8] sm:$0xff] }
  0xd9   : > { %2305 = vmatpush.bf16.msrb.mxu2 %v7619_v29  ;;  %v1150_v29 = vpack.c.bf16 %v1130_v26, %v1128_v25 }
  0xdb   : > { %1348 = vmatmul.bf16.gmra.mxu0 %v1141_v31  ;;  %1373 = vmatmul.bf16.gmra.mxu1 %v1151_v32  ;;  %v1175_v31 = vld [vmem:[%s8747_s16 + $0xa0] sm:$0xff]  ;;  %v1177_v32 = vld [vmem:[%s8747_s16 + $0xb0] sm:$0xff] }
  0xdc   : > { %1388 = vmatpush.bf16.msrb.mxu1 %v7610_v30  ;;  %v1192_v30 = vpack.c.bf16 %v1166_v28, %v1164_v27  ;;  %v1197_v33 = vpack.c.bf16 %v1177_v32, %v1175_v31 }
  0xdd   : > { %2306 = vmatpush.bf16.msrb.mxu2 %v7618_v37  ;;  %v1132_v37 = vld [vmem:[%s8719_s20 + $0xc8] sm:$0xff] }
  0xe0   : > { %1389 = vmatpush.bf16.msrb.mxu1 %v7609_v35  ;;  %v1178_v35 = vld [vmem:[%s8747_s16 + $0xb8] sm:$0xff] }
  0xe1   : > { %2307 = vmatpush.bf16.msrb.mxu2 %v7617_v40  ;;  %v1198_v36 = vpack.c.bf16 %v1178_v35, %v1176_v34  ;;  %v1170_v40 = vld [vmem:[%s8747_s16 + $0x78] sm:$0xff] }
  0xe2   : > { %v3154_v35 = vld [vmem:[#allocation6 + $0x50] sm:$0xff] }
  0xe3   : > { %7455 = vmatmul.msk.bf16.vlgmr.msra.gmra.mxu3 %vm2277_vm0, %v1198_v36 }
  0xe4   : > { %1390 = vmatpush.bf16.msrb.mxu1 %v7608_v39  ;;  %v1168_v39 = vld [vmem:[%s8747_s16 + $0x68] sm:$0xff] }
  0xe5   : > { %2308 = vmatpush.bf16.msrb.mxu2 %v7616_v42  ;;  %v1194_v42 = vpack.c.bf16 %v1170_v40, %v1168_v39  ;;  %v3153_v39 = vld [vmem:[#allocation6 + $0x48] sm:$0xff] }
  0xe8   : > { %1391 = vmatpush.bf16.msrb.mxu1 %v7607_v41  ;;  %v1152_v41 = vpack.c.bf16 %v1134_v38, %v1132_v37 }
  0xe9   : > { %2309 = vmatpush.bf16.msrb.mxu2 %v7615_v47  ;;  %v1179_v47 = vld [vmem:[%s8747_s16 + $0xc0] sm:$0xff] }
  0xeb   : > { %1353 = vmatmul.bf16.gmra.mxu0 %v1143_v48  ;;  %1392 = vmatmul.bf16.vlgmr.msrb.gmra.mxu1 %v1140_v49  ;;  %v1181_v48 = vld [vmem:[%s8747_s16 + $0xd0] sm:$0xff]  ;;  %v1136_v49 = vld [vmem:[%s8719_s20 + $0xe8] sm:$0xff]  ;;  %s13366_s20 = sld [smem:[#allocation36_spill]] }
  0xec   : > { %2310 = vmatmul.bf16.vlgmr.msrb.gmra.mxu2 %v1187_v52  ;;  %v1199_v52 = vpack.c.bf16 %v1181_v48, %v1179_v47 }
  0xf3   : > { %7456 = vmatmul.msk.bf16.gmra.mxu3 %vm2277_vm0, %v1200_v56 }
  0xfb   : > { %1358 = vmatmul.bf16.gmra.mxu0 %v1145_v57  ;;  %1397 = vmatmul.bf16.gmra.mxu1 %v1142_v58  ;;  %v1154_v57 = vpack.c.bf16 %v1138_v50, %v1136_v49  ;;  %v1196_v58 = vpack.c.bf16 %v1174_v53, %v1172_v51 }
  0xfc   : > { %2315 = vmatmul.bf16.gmra.mxu2 %v1189_v61 }
 0x10b   : > { %1363 = vmatmul.bf16.gmra.mxu0 %v1147_v2  ;;  %1402 = vmatmul.bf16.gmra.mxu1 %v1144_v3  ;;  %v1201_v3 = vpack.c.bf16 %v1185_v1, %v1183_v0  ;;  %v3150_v0 = vld [vmem:[#allocation6 + $0x30] sm:$0xff] }
 0x10c   : > { %2320 = vmatmul.bf16.gmra.mxu2 %v1191_v6  ;;  %v1184_v6 = vld [vmem:[%s8747_s16 + $0xe8] sm:$0xff]  ;;  %s13367_s16 = sld [smem:[#allocation39_spill]] }
 0x10d   : > { %v1202_v9 = vpack.c.bf16 %v1186_v7, %v1184_v6 }
 0x10f   : > { %7457 = vmatmul.msk.bf16.gmra.mxu3 %vm2277_vm0, %v1202_v9 }
 0x11b   : > { %1407 = vmatmul.bf16.gmra.mxu1 %v1146_v11  ;;  %7450 = vmatmul.msk.bf16.vlgmr.msrb.gmra.mxu0 %vm2277_vm0, %v1188_v12 }
 0x11c   : > { %2325 = vmatmul.bf16.gmra.mxu2 %v1193_v15 }
 0x12b   : > { %1412 = vmatmul.bf16.gmra.mxu1 %v1148_v20  ;;  %7451 = vmatmul.msk.bf16.gmra.mxu0 %vm2277_vm0, %v1190_v21 }
 0x12c   : > { %2330 = vmatmul.bf16.gmra.mxu2 %v1195_v24  ;;  %v3156_v24 = vld [vmem:[#allocation6 + $0x60] sm:$0xff] }
 0x12d   : > { %3167 = vmatpush.msrb.mxu3 %v3156_v24 }
 0x13b   : > { %1417 = vmatmul.bf16.gmra.mxu1 %v1150_v29  ;;  %7452 = vmatmul.msk.bf16.gmra.mxu0 %vm2277_vm0, %v1192_v30  ;;  %v3155_v30 = vld [vmem:[#allocation6 + $0x58] sm:$0xff] }
 0x13c   : > { %2335 = vmatmul.bf16.gmra.mxu2 %v1197_v33  ;;  %3168 = vmatpush.msrb.mxu3 %v3155_v30 }
 0x13e   : > { %3169 = vmatpush.msrb.mxu3 %v3154_v35 }
 0x140   : > { %3170 = vmatpush.msrb.mxu3 %v3153_v39 }
 0x148   : > { %v1344_v43 = vpop.f32.mrf.mxu0  ;;  %v8791_v44 = vpop.f32.mrf.mxu1 }
 0x149   : > { %v1345_v2 = vadd.f32 %v8811_v63, %v1344_v43 }
 0x14b   : > { %1422 = vmatmul.bf16.gmra.mxu1 %v1152_v41  ;;  %7453 = vmatmul.msk.bf16.gmra.mxu0 %vm2277_vm0, %v1194_v42 }
 0x14c   : > { %2340 = vmatmul.bf16.gmra.mxu2 %v1199_v52  ;;  %v3151_v52 = vld [vmem:[#allocation6 + $0x38] sm:$0xff] }
 0x150   : > { %v1346_v45 = vpop.f32.mrf.mxu0  ;;  %v8794_v46 = vpop.f32.mrf.mxu1 }
 0x151   : > { %v1347_v15 = vadd.f32 %v8811_v63, %v1346_v45  ;;  %v3152_v45 = vld [vmem:[#allocation6 + $0x40] sm:$0xff] }
 0x152   : > { %3171 = vmatpush.msrb.mxu3 %v3152_v45 }
 0x154   : > { %3172 = vmatpush.msrb.mxu3 %v3151_v52 }
 0x156   : > { %3173 = vmatpush.msrb.mxu3 %v3150_v0 }
 0x158   : > { %v1349_v59 = vpop.f32.mrf.mxu0  ;;  %v8805_v60 = vpop.f32.mrf.mxu1  ;;  %3174 = vmatpush.msrb.mxu3 %v3149_v10 }
 0x159   : > { %v1350_v27 = vadd.f32 %v8811_v63, %v1349_v59 }
 0x15b   : > { %1427 = vmatmul.bf16.gmra.mxu1 %v1154_v57  ;;  %7454 = vmatmul.msk.bf16.gmra.mxu0 %vm2277_vm0, %v1196_v58 }
 0x15c   : > { %2345 = vmatmul.bf16.gmra.mxu2 %v1201_v3 }
 0x160   : > { %v8808_v61 = vpop.f32.mrf.mxu1  ;;  %v1351_v62 = vpop.f32.mrf.mxu0 }
 0x161   : > { %v1352_v49 = vadd.f32 %v8811_v63, %v1351_v62  ;;  %v8924_v10 = vadd.f32 %v8811_v63, %v8808_v61 }
 0x168   : > { %v1393_v4 = vpop.f32.mrf.mxu1  ;;  %v8824_v12 = vpop.f32.mrf.mxu0 }
 0x169   : > { %v8818_v8 = vadd.f32 %v1393_v4, %v1345_v2  ;;  %v8868_v2 = vpop.f32.mrf.mxu2 }
 0x16a   : > { %v8939_v61 = vadd.f32 %v8811_v63, %v8868_v2 }
 0x16b   : > { %v8821_v11 = vmul.f32 0.70710677, %v8818_v8 }
 0x16d   : > { %v1465_v14 = vmul.f32 %v8821_v11, %v8821_v11 }
 0x16f   : > { %v8829_v16 = vmin.f32 %v1465_v14, 16.0 }
 0x170   : > { %v1395_v17 = vpop.f32.mrf.mxu1  ;;  %v8839_v25 = vpop.f32.mrf.mxu0 }
 0x171   : > { %v1478_v18 = vmul.f32 3.8918573e-05, %v8829_v16  ;;  %v8832_v19 = vadd.f32 %v1395_v17, %v1347_v15  ;;  %v1467_v20 = vmul.f32 2.1237322e-06, %v8829_v16 }
 0x173   : > { %v1479_v21 = vadd.f32 0.001143296, %v1478_v18  ;;  %v8836_v22 = vmul.f32 0.70710677, %v8832_v19  ;;  %v1468_v28 = vadd.f32 0.00028619796, %v1467_v20 }
 0x175   : > { %v1480_v23 = vmul.f32 %v1479_v21, %v8829_v16  ;;  %v1505_v26 = vmul.f32 %v8836_v22, %v8836_v22  ;;  %v1469_v37 = vmul.f32 %v1468_v28, %v8829_v16 }
 0x177   : > { %v1481_v29 = vadd.f32 0.014752088, %v1480_v23  ;;  %v8844_v31 = vmin.f32 %v1505_v26, 16.0  ;;  %v1470_v50 = vadd.f32 0.0036580483, %v1469_v37 }
 0x178   : > { %v1398_v32 = vpop.f32.mrf.mxu1  ;;  %v8860_v55 = vpop.f32.mrf.mxu0 }
 0x179   : > { %v1482_v33 = vmul.f32 %v1481_v29, %v8829_v16  ;;  %v8847_v34 = vadd.f32 %v1398_v32, %v1350_v27  ;;  %v1518_v36 = vmul.f32 3.8918573e-05, %v8844_v31  ;;  %v1507_v40 = vmul.f32 2.1237322e-06, %v8844_v31 }
 0x17a   : > { %v1471_v5 = vmul.f32 %v1470_v50, %v8829_v16  ;;  %v1355_v32 = vadd.f32 %v8811_v63, %v8824_v12 }
 0x17b   : > { %v1483_v38 = vadd.f32 0.112945676, %v1482_v33  ;;  %v1519_v41 = vadd.f32 0.001143296, %v1518_v36  ;;  %v8853_v42 = vmul.f32 0.70710677, %v8847_v34  ;;  %v1381_v36 = vpop.f32.mrf.mxu2 }
 0x17c   : > { %v1508_v53 = vadd.f32 0.00028619796, %v1507_v40  ;;  %v1472_v17 = vadd.f32 0.05243302, %v1471_v5  ;;  %v8917_v5 = vadd.f32 %v8811_v63, %v8805_v60 }
 0x17d   : > { %v1484_v43 = vmul.f32 %v1483_v38, %v8829_v16  ;;  %v1520_v47 = vmul.f32 %v1519_v41, %v8844_v31  ;;  %v1545_v48 = vmul.f32 %v8853_v42, %v8853_v42 }
 0x17e   : > { %v1509_v6 = vmul.f32 %v1508_v53, %v8844_v31  ;;  %v1473_v33 = vmul.f32 %v1472_v17, %v8829_v16 }
 0x17f   : > { %v1485_v51 = vadd.f32 0.4994258, %v1484_v43  ;;  %v1521_v54 = vadd.f32 0.014752088, %v1520_v47  ;;  %v8862_v56 = vmin.f32 %v1545_v48, 16.0 }
 0x180   : > { %v1400_v57 = vpop.f32.mrf.mxu1  ;;  %v1510_v18 = vadd.f32 0.0036580483, %v1509_v6  ;;  %v8886_v27 = vpop.f32.mrf.mxu0  ;;  %v1474_v50 = vadd.f32 0.18741608, %v1473_v33 }
 0x181   : > { %v1486_v58 = vmul.f32 %v1485_v51, %v8829_v16  ;;  %v8865_v59 = vadd.f32 %v1400_v57, %v1352_v49  ;;  %v1522_v1 = vmul.f32 %v1521_v54, %v8844_v31  ;;  %v1558_v3 = vmul.f32 3.8918573e-05, %v8862_v56 }
 0x182   : > { %v1547_v9 = vmul.f32 2.1237322e-06, %v8862_v56  ;;  %v1511_v35 = vmul.f32 %v1510_v18, %v8844_v31  ;;  %v8909_v54 = vadd.f32 %v8811_v63, %v8791_v44  ;;  %v8913_v57 = vadd.f32 %v8811_v63, %v8794_v46  ;;  %v3148_v44 = vld [vmem:[#allocation6 + $0x20] sm:$0xff] }
 0x183   : > { %v8870_v62 = vadd.f32 1.0, %v1486_v58  ;;  %v8874_v4 = vmul.f32 0.70710677, %v8865_v59  ;;  %v1523_v7 = vadd.f32 0.112945676, %v1522_v1  ;;  %v3244_v1 = vld [vmem:[#allocation8 + $0x78] sm:$0xff]  ;;  %v1357_v46 = vadd.f32 %v8811_v63, %v8839_v25  ;;  %3175 = vmatpush.msrb.mxu3 %v3148_v44 }
 0x184   : > { %v1559_v14 = vadd.f32 0.001143296, %v1558_v3  ;;  %v1548_v23 = vadd.f32 0.00028619796, %v1547_v9  ;;  %v1512_v12 = vadd.f32 0.05243302, %v1511_v35  ;;  %3249 = vmatpush.msra.mxu0 %v3244_v1  ;;  %v1475_v17 = vmul.f32 %v1474_v50, %v8829_v16 }
 0x185   : > { %7804 = vrcp.f32 %v8870_v62  ;;  %v1524_v13 = vmul.f32 %v1523_v7, %v8844_v31  ;;  %v1585_v15 = vmul.f32 %v8874_v4, %v8874_v4  ;;  %v3243_v3 = vld [vmem:[#allocation8 + $0x70] sm:$0xff]  ;;  %v3147_v25 = vld [vmem:[#allocation6 + $0x18] sm:$0xff]  ;;  %v1360_v35 = vadd.f32 %v8811_v63, %v8860_v55 }
 0x186   : > { %v1560_v24 = vmul.f32 %v1559_v14, %v8862_v56  ;;  %v1549_v38 = vmul.f32 %v1548_v23, %v8862_v56  ;;  %3250 = vmatpush.msra.mxu0 %v3243_v3  ;;  %v2311_v23 = vpop.f32.mrf.mxu2  ;;  %3176 = vmatpush.msrb.mxu3 %v3147_v25  ;;  %vm1493_vm2 = vweird.f32 %v8870_v62 }
 0x187   : > { %v1525_v21 = vadd.f32 0.4994258, %v1524_v13  ;;  %v8884_v26 = vmin.f32 %v1585_v15, 16.0  ;;  %v1513_v13 = vmul.f32 %v1512_v12, %v8844_v31  ;;  %v8933_v15 = vmul.f32 0.5, %v8818_v8 }
 0x188   : > { %v1403_v20 = vpop.f32.mrf.mxu1  ;;  %v1561_v28 = vadd.f32 0.014752088, %v1560_v24  ;;  %v1550_v52 = vadd.f32 0.0036580483, %v1549_v38  ;;  %v8930_v60 = vpop.f32.mrf.mxu0  ;;  %v1499_v38 = vand.u32 2147483648, %v8870_v62 }
 0x189   : > { %v1598_v29 = vmul.f32 3.8918573e-05, %v8884_v26  ;;  %v1526_v37 = vmul.f32 %v1525_v21, %v8844_v31  ;;  %v1587_v41 = vmul.f32 2.1237322e-06, %v8884_v26  ;;  %v8901_v47 = vadd.f32 %v1403_v20, %v1355_v32 }
 0x18a   : > { %v1562_v39 = vmul.f32 %v1561_v28, %v8862_v56  ;;  %v1551_v18 = vmul.f32 %v1550_v52, %v8862_v56  ;;  %v8948_v28 = vadd.f32 %v8811_v63, %v1381_v36  ;;  %v8953_v32 = vmul.f32 0.5, %v8832_v19 }
 0x18b   : > { %v8889_v30 = vpop.eup %7804  ;;  %v1599_v40 = vadd.f32 0.001143296, %v1598_v29  ;;  %v8904_v51 = vadd.f32 1.0, %v1526_v37  ;;  %v1588_v58 = vadd.f32 0.00028619796, %v1587_v41  ;;  %v3146_v29 = vld [vmem:[#allocation6 + $0x10] sm:$0xff]  ;;  %v8966_v19 = vadd.f32 %v8811_v63, %v8886_v27 }
 0x18c   : > { %v1489_v43 = vmul.f32 %v8889_v30, %v8870_v62  ;;  %v1563_v45 = vadd.f32 0.112945676, %v1562_v39  ;;  %v8920_v9 = vmul.f32 0.70710677, %v8901_v47  ;;  %13191 = vst [vmem:[#allocation53_spill] sm:$0xff] %v8948_v28  ;;  %3177 = vmatpush.msrb.mxu3 %v3146_v29  ;;  %v8960_v39 = vmul.f32 0.5, %v8847_v34 }
 0x18d   : > { %v1600_v48 = vmul.f32 %v1599_v40, %v8884_v26  ;;  %7806 = vrcp.f32 %v8904_v51  ;;  %v1589_v20 = vmul.f32 %v1588_v58, %v8884_v26  ;;  %v1514_v33 = vadd.f32 0.18741608, %v1513_v13 }
 0x18e   : > { %v1564_v53 = vmul.f32 %v1563_v45, %v8862_v56  ;;  %v1490_v6 = vsub.f32 1.0, %v1489_v43  ;;  %v1625_v2 = vmul.f32 %v8920_v9, %v8920_v9  ;;  %v1552_v36 = vadd.f32 0.05243302, %v1551_v18  ;;  %v3145_v43 = vld [vmem:[#allocation6 + $0x8] sm:$0xff] }
 0x18f   : > { %v1601_v0 = vadd.f32 0.014752088, %v1600_v48  ;;  %v1476_v45 = vadd.f32 1.1283791, %v1475_v17  ;;  %v1590_v12 = vadd.f32 0.0036580483, %v1589_v20  ;;  %3178 = vmatpush.msrb.mxu3 %v3145_v43  ;;  %vm1494_vm1 = vweird.f32 %v8889_v30 }
 0x190   : > { %v1405_v49 = vpop.f32.mrf.mxu1  ;;  %v1565_v7 = vadd.f32 0.4994258, %v1564_v53  ;;  %v1491_v8 = vmul.f32 %v8889_v30, %v1490_v6  ;;  %v8962_v40 = vmin.f32 %v1625_v2, 16.0  ;;  %v1515_v52 = vmul.f32 %v1514_v33, %v8844_v31  ;;  %v8986_v6 = vld [vmem:[%s13173_s3] ss:$0 sm:$0xff]  ;;  %vm8988_vm3 = vmor %vm1493_vm2, %vm1494_vm1  ;;  %v8993_v13 = vpop.f32.mrf.mxu0 }
 0x191   : > { %v1602_v14 = vmul.f32 %v1601_v0, %v8884_v26  ;;  %v8943_v24 = vadd.f32 %v1405_v49, %v1357_v46  ;;  %v1497_v0 = vand.u32 2147483647, %v8870_v62  ;;  %v1500_v1 = vor.u32 1.1754944e-38, %v1499_v38 }
 0x192   : > { %v1566_v16 = vmul.f32 %v1565_v7, %v8862_v56  ;;  %v1492_v48 = vadd.f32 %v8889_v30, %v1491_v8  ;;  %v1627_v27 = vmul.f32 2.1237322e-06, %v8962_v40  ;;  %v1638_v53 = vmul.f32 3.8918573e-05, %v8962_v40  ;;  %v2313_v8 = vpop.f32.mrf.mxu2 }
 0x193   : > { %v1603_v21 = vadd.f32 0.112945676, %v1602_v14  ;;  %v8969_v55 = vmul.f32 0.70710677, %v8943_v24  ;;  %v8975_v50 = vpop.eup %7806  ;;  %v1553_v3 = vmul.f32 %v1552_v36, %v8862_v56  ;;  %v1591_v31 = vmul.f32 %v1590_v12, %v8884_v26  ;;  %v3242_v36 = vld [vmem:[#allocation8 + $0x68] sm:$0xff] }
 0x194   : > { %v8973_v34 = vadd.f32 1.0, %v1566_v16  ;;  %v1628_v44 = vadd.f32 0.00028619796, %v1627_v27  ;;  %v1639_v46 = vadd.f32 0.001143296, %v1638_v53  ;;  %v1496_v62 = vsel %vm8988_vm3, %v8889_v30, %v1492_v48  ;;  %3251 = vmatpush.msra.mxu0 %v3242_v36 }
 0x195   : > { %v1604_v37 = vmul.f32 %v1603_v21, %v8884_v26  ;;  %v1665_v14 = vmul.f32 %v8969_v55, %v8969_v55  ;;  %v1529_v17 = vmul.f32 %v8975_v50, %v8904_v51  ;;  %v1516_v25 = vadd.f32 1.1283791, %v1515_v52 }
 0x196   : > { %7808 = vrcp.f32 %v8973_v34  ;;  %v1640_v20 = vmul.f32 %v1639_v46, %v8962_v40  ;;  %vm1498_vm4 = vcmp.eq.f32.partialorder %v1497_v0, 8.507059e+37  ;;  %v9011_v2 = vmul.f32 0.5, %v8865_v59  ;;  %v3241_v0 = vld [vmem:[#allocation8 + $0x60] sm:$0xff] }
 0x197   : > { %v1605_v49 = vadd.f32 0.4994258, %v1604_v37  ;;  %v9005_v21 = vmin.f32 %v1665_v14, 16.0  ;;  %v1629_v30 = vmul.f32 %v1628_v44, %v8962_v40  ;;  %v2312_v29 = vadd.f32 %v8986_v6, %v2311_v23  ;;  %3252 = vmatpush.msra.mxu0 %v3241_v0  ;;  %v3240_v14 = vld [vmem:[#allocation8 + $0x58] sm:$0xff] }
 0x198   : > { %v1408_v41 = vpop.f32.mrf.mxu1  ;;  %v1477_v33 = vmul.f32 %v1476_v45, %v8821_v11  ;;  %v1554_v37 = vadd.f32 0.18741608, %v1553_v3  ;;  %v1592_v38 = vadd.f32 0.05243302, %v1591_v31  ;;  %v1641_v12 = vadd.f32 0.014752088, %v1640_v20  ;;  %v2360_v20 = vpop.f32.mrf.mxu0 }
 0x199   : > { %v8980_v58 = vadd.f32 %v1408_v41, %v1360_v35  ;;  %v1606_v18 = vmul.f32 %v1605_v49, %v8884_v26  ;;  %v1501_v35 = vsel %vm1498_vm4, %v1500_v1, %v1496_v62  ;;  %v1530_v41 = vsub.f32 1.0, %v1529_v17  ;;  %v3144_v62 = vld [vmem:[#allocation6] sm:$0xff]  ;;  %3253 = vmatpush.msra.mxu0 %v3240_v14 }
 0x19a   : > { %v9019_v48 = vadd.f32 %v8986_v6, %v2313_v8  ;;  %v9022_v59 = vmul.f32 %v1516_v25, %v8836_v22  ;;  %v9026_v23 = vadd.f32 %v8811_v63, %v8930_v60  ;;  %v1678_v11 = vmul.f32 3.8918573e-05, %v9005_v21  ;;  %3179 = vmatpush.msrb.mxu3 %v3144_v62 }
 0x19b   : > { %v9008_v16 = vmul.f32 0.70710677, %v8980_v58  ;;  %v9016_v43 = vadd.f32 1.0, %v1606_v18  ;;  %v1502_v52 = vmul.f32 %v1501_v35, %v1477_v33  ;;  %vm1533_vm5 = vweird.f32 %v8904_v51 }
 0x19c   : > { %v9031_v49 = vpop.eup %7808  ;;  %v1537_v27 = vand.u32 2147483647, %v8904_v51  ;;  %v1630_v53 = vadd.f32 0.0036580483, %v1629_v30  ;;  %v1642_v22 = vmul.f32 %v1641_v12, %v8962_v40  ;;  %v1539_v1 = vand.u32 2147483648, %v8904_v51 }
 0x19d   : > { %v1705_v45 = vmul.f32 %v9008_v16, %v9008_v16  ;;  %v1555_v60 = vmul.f32 %v1554_v37, %v8862_v56  ;;  %v1593_v3 = vmul.f32 %v1592_v38, %v8884_v26  ;;  %v1679_v7 = vadd.f32 0.001143296, %v1678_v11 }
 0x19e   : > { %v1531_v31 = vmul.f32 %v8975_v50, %v1530_v41  ;;  %7810 = vrcp.f32 %v9016_v43  ;;  %v1643_v44 = vadd.f32 0.112945676, %v1642_v22  ;;  %v1667_v46 = vmul.f32 2.1237322e-06, %v9005_v21 }
 0x19f   : > { %v1569_v17 = vmul.f32 %v9031_v49, %v8973_v34  ;;  %v9045_v18 = vmul.f32 0.5, %v8901_v47  ;;  %v1680_v56 = vmul.f32 %v1679_v7, %v9005_v21  ;;  %v9048_v25 = vmin.f32 %v1705_v45, 16.0 }
 0x1a0   : > { %v7386_v8 = vclamps-f32 %v1502_v52, 1.0  ;;  %vm9050_vm6 = vcmp.eq.f32.partialorder %v1537_v27, 8.507059e+37  ;;  %v1631_v33 = vmul.f32 %v1630_v53, %v8962_v40  ;;  %v1644_v35 = vmul.f32 %v1643_v44, %v8962_v40  ;;  %v1410_v44 = vpop.f32.mrf.mxu1 }
 0x1a1   : > { %vm1534_vm7 = vweird.f32 %v8975_v50  ;;  %v1540_v47 = vor.u32 1.1754944e-38, %v1539_v1  ;;  %v1556_v37 = vadd.f32 1.1283791, %v1555_v60  ;;  %v1681_v38 = vadd.f32 0.014752088, %v1680_v56 }
 0x1a2   : > { %v1532_v36 = vadd.f32 %v8975_v50, %v1531_v31  ;;  %v1594_v41 = vadd.f32 0.18741608, %v1593_v3  ;;  %v1668_v12 = vadd.f32 0.00028619796, %v1667_v46  ;;  %v9058_v11 = vadd.f32 %v2360_v20, %v2312_v29  ;;  %vm9075_vm8 = vmor %vm1533_vm5, %vm1534_vm7 }
 0x1a3   : > { %v1570_v45 = vsub.f32 1.0, %v1569_v17  ;;  %v9062_v52 = vadd.f32 %v8811_v63, %v8993_v13  ;;  %v1682_v27 = vmul.f32 %v1681_v38, %v9005_v21  ;;  %v1718_v53 = vmul.f32 3.8918573e-05, %v9048_v25 }
 0x1a4   : > { %v9066_v22 = vpop.eup %7810  ;;  %v2105_v0 = vadd.f32 1.0, %v7386_v8  ;;  %v1632_v1 = vadd.f32 0.05243302, %v1631_v33  ;;  %v1645_v60 = vadd.f32 0.4994258, %v1644_v35  ;;  %v9069_v7 = vmul.f32 0.5, %v8943_v24 }
 0x1a5   : > { %v9080_v63 = vmul.f32 %v1556_v37, %v8853_v42  ;;  %v1683_v13 = vadd.f32 0.112945676, %v1682_v27  ;;  %v1707_v3 = vmul.f32 2.1237322e-06, %v9048_v25  ;;  %v1719_v31 = vadd.f32 0.001143296, %v1718_v53 }
 0x1a6   : > { %v1536_v24 = vsel %vm9075_vm8, %v8975_v50, %v1532_v36  ;;  %vm1573_vm9 = vweird.f32 %v8973_v34  ;;  %v1595_v51 = vmul.f32 %v1594_v41, %v8884_v26  ;;  %v1669_v46 = vmul.f32 %v1668_v12, %v9005_v21 }
 0x1a7   : > { %v9090_v14 = vmul.f32 0.70710677, %v9058_v11  ;;  %v1571_v42 = vmul.f32 %v9031_v49, %v1570_v45  ;;  %v1609_v62 = vmul.f32 %v9066_v22, %v9016_v43  ;;  %v1684_v17 = vmul.f32 %v1683_v13, %v9005_v21 }
 0x1a8   : > { %v1720_v56 = vmul.f32 %v1719_v31, %v9048_v25  ;;  %v1577_v50 = vand.u32 2147483647, %v8973_v34  ;;  %v1579_v20 = vand.u32 2147483648, %v8973_v34  ;;  %v1646_v26 = vmul.f32 %v1645_v60, %v8962_v40 }
 0x1a9   : > { %v9101_v8 = vadd.f32 %v1410_v44, %v8966_v19  ;;  %v9104_v33 = vmul.f32 %v2105_v0, %v8933_v15  ;;  %v1541_v35 = vsel %vm9050_vm6, %v1540_v47, %v1536_v24  ;;  %v1633_v37 = vmul.f32 %v1632_v1, %v8962_v40 }
 0x1aa   : > { %v1708_v38 = vadd.f32 0.00028619796, %v1707_v3  ;;  %v1596_v36 = vadd.f32 1.1283791, %v1595_v51  ;;  %v1670_v41 = vadd.f32 0.0036580483, %v1669_v46  ;;  %v2432_v45 = vmul.f32 %v9090_v14, %v9090_v14 }
 0x1ab   : > { %v1721_v12 = vadd.f32 0.014752088, %v1720_v56  ;;  %v1572_v27 = vadd.f32 %v9031_v49, %v1571_v42  ;;  %vm1574_vm10 = vweird.f32 %v9031_v49  ;;  %v1610_v19 = vsub.f32 1.0, %v1609_v62  ;;  %v3239_v56 = vld [vmem:[#allocation8 + $0x50] sm:$0xff] }
 0x1ac   : > { %v1685_v53 = vadd.f32 0.4994258, %v1684_v17  ;;  %v9113_v15 = vadd.f32 1.0, %v1646_v26  ;;  %v9116_v47 = vmin.f32 %v2432_v45, 16.0  ;;  %v9119_v0 = vmul.f32 0.70710677, %v9101_v8  ;;  %vm9137_vm12 = vmor %vm1573_vm9, %vm1574_vm10  ;;  %3254 = vmatpush.msra.mxu0 %v3239_v56 }
 0x1ad   : > { %v1722_v30 = vmul.f32 %v1721_v12, %v9048_v25  ;;  %vm9121_vm11 = vcmp.eq.f32.partialorder %v1577_v50, 8.507059e+37  ;;  %v1580_v60 = vor.u32 1.1754944e-38, %v1579_v20  ;;  %v1634_v29 = vadd.f32 0.18741608, %v1633_v37 }
 0x1ae   : > { %v1709_v13 = vmul.f32 %v1708_v38, %v9048_v25  ;;  %v1671_v3 = vmul.f32 %v1670_v41, %v9005_v21  ;;  %v2434_v44 = vmul.f32 2.1237322e-06, %v9116_v47  ;;  %v1745_v24 = vmul.f32 %v9119_v0, %v9119_v0 }
 0x1af   : > { %v1723_v31 = vadd.f32 0.112945676, %v1722_v30  ;;  %v9131_v51 = vmul.f32 %v1541_v35, %v9022_v59  ;;  %v9142_v42 = vmul.f32 %v1596_v36, %v8874_v4  ;;  %v1686_v62 = vmul.f32 %v1685_v53, %v9005_v21  ;;  %v9158_v35 = vld [vmem:[%s8432_s21] ss:$0 sm:$0xff] }
 0x1b0   : > { %v9146_v17 = vmul.f32 0.5, %v8980_v58  ;;  %v1576_v59 = vsel %vm9137_vm12, %v9031_v49, %v1572_v27  ;;  %v1611_v50 = vmul.f32 %v9066_v22, %v1610_v19  ;;  %v1617_v34 = vand.u32 2147483647, %v9016_v43 }
 0x1b1   : > { %7812 = vrcp.f32 %v9113_v15  ;;  %v1635_v4 = vmul.f32 %v1634_v29, %v8962_v40  ;;  %v1710_v20 = vadd.f32 0.0036580483, %v1709_v13  ;;  %v1724_v26 = vmul.f32 %v1723_v31, %v9048_v25 }
 0x1b2   : > { %v2445_v58 = vmul.f32 3.8918573e-05, %v9116_v47  ;;  %vm1613_vm13 = vweird.f32 %v9016_v43  ;;  %v1672_v37 = vadd.f32 0.05243302, %v1671_v3  ;;  %v2435_v49 = vadd.f32 0.00028619796, %v2434_v44 }
 0x1b3   : > { %v9161_v38 = vmin.f32 %v1745_v24, 16.0  ;;  %v1619_v36 = vand.u32 2147483648, %v9016_v43  ;;  %v9164_v41 = vadd.f32 1.0, %v1686_v62  ;;  %v1725_v12 = vadd.f32 0.4994258, %v1724_v26  ;;  %v2362_v24 = vpop.f32.mrf.mxu0 }
 0x1b4   : > { %v2446_v45 = vadd.f32 0.001143296, %v2445_v58  ;;  %v1581_v40 = vsel %vm9121_vm11, %v1580_v60, %v1576_v59  ;;  %vm1614_vm14 = vweird.f32 %v9066_v22  ;;  %vm9169_vm15 = vcmp.eq.f32.partialorder %v1617_v34, 8.507059e+37  ;;  %v9187_v59 = vld [vmem:[%s8437_s25] ss:$0 sm:$0xff] }
 0x1b5   : > { %v1758_v19 = vmul.f32 3.8918573e-05, %v9161_v38  ;;  %v1612_v53 = vadd.f32 %v9066_v22, %v1611_v50  ;;  %v1636_v30 = vadd.f32 1.1283791, %v1635_v4  ;;  %v1711_v29 = vmul.f32 %v1710_v20, %v9048_v25  ;;  %vm9196_vm1 = vmor %vm1613_vm13, %vm1614_vm14 }
 0x1b6   : > { %v2447_v13 = vmul.f32 %v2446_v45, %v9116_v47  ;;  %v1673_v1 = vmul.f32 %v1672_v37, %v9005_v21  ;;  %v2436_v60 = vmul.f32 %v2435_v49, %v9116_v47  ;;  %v1747_v31 = vmul.f32 2.1237322e-06, %v9161_v38 }
 0x1b7   : > { %v9177_v3 = vpop.eup %7812  ;;  %v1759_v44 = vadd.f32 0.001143296, %v1758_v19  ;;  %7814 = vrcp.f32 %v9164_v41  ;;  %v1726_v46 = vmul.f32 %v1725_v12, %v9048_v25  ;;  %v2141_v56 = vmul.f32 %v9158_v35, %v9104_v33  ;;  %v1413_v19 = vpop.f32.mrf.mxu1 }
 0x1b8   : > { %v2448_v62 = vadd.f32 0.014752088, %v2447_v13  ;;  %v9190_v50 = vmul.f32 %v1581_v40, %v9080_v63  ;;  %v1620_v4 = vor.u32 1.1754944e-38, %v1619_v36  ;;  %v9201_v20 = vmul.f32 0.5, %v9058_v11 }
 0x1b9   : > { %v1760_v26 = vmul.f32 %v1759_v44, %v9161_v38  ;;  %v1616_v33 = vsel %vm9196_vm1, %v9066_v22, %v1612_v53  ;;  %v1649_v63 = vmul.f32 %v9177_v3, %v9113_v15  ;;  %v1712_v58 = vadd.f32 0.05243302, %v1711_v29  ;;  %v3238_v29 = vld [vmem:[#allocation8 + $0x48] sm:$0xff] }
 0x1ba   : > { %v9210_v43 = vadd.f32 %v2362_v24, %v9019_v48  ;;  %v9213_v37 = vmul.f32 %v1636_v30, %v8920_v9  ;;  %v2437_v49 = vadd.f32 0.0036580483, %v2436_v60  ;;  %v2449_v11 = vmul.f32 %v2448_v62, %v9116_v47  ;;  %3255 = vmatpush.msra.mxu0 %v3238_v29  ;;  %v3237_v62 = vld [vmem:[#allocation8 + $0x40] sm:$0xff] }
 0x1bb   : > { %v1748_v36 = vadd.f32 0.00028619796, %v1747_v31  ;;  %v1674_v12 = vadd.f32 0.18741608, %v1673_v1  ;;  %v9216_v45 = vadd.f32 1.0, %v1726_v46  ;;  %v9219_v22 = vadd.f32 %v9187_v59, %v2141_v56 }
 0x1bc   : > { %v1761_v40 = vadd.f32 0.014752088, %v1760_v26  ;;  %v1621_v53 = vsel %vm9169_vm15, %v1620_v4, %v1616_v33  ;;  %v1657_v48 = vand.u32 2147483647, %v9113_v15  ;;  %v1659_v9 = vand.u32 2147483648, %v9113_v15  ;;  %3256 = vmatpush.msra.mxu0 %v3237_v62 }
 0x1bd   : > { %13206 = vst [vmem:[#allocation54_spill] sm:$0xff] %v9219_v22  ;;  %v2450_v30 = vadd.f32 0.112945676, %v2449_v11  ;;  %v9225_v13 = vpop.eup %7814  ;;  %v1650_v60 = vsub.f32 1.0, %v1649_v63  ;;  %v1713_v1 = vmul.f32 %v1712_v58, %v9048_v25  ;;  %v9230_v44 = vmul.f32 0.70710677, %v9210_v43  ;;  %3180 = vmatmul.f32.vlgmr.msrb.gmra.mxu3 %v9219_v22 }
 0x1be   : > { %v1762_v31 = vmul.f32 %v1761_v40, %v9161_v38  ;;  %v2438_v27 = vmul.f32 %v2437_v49, %v9116_v47  ;;  %v1749_v46 = vmul.f32 %v1748_v36, %v9161_v38  ;;  %v9237_v56 = vadd.f32 %v1413_v19, %v9026_v23  ;;  %v2316_v19 = vpop.f32.mrf.mxu2 }
 0x1bf   : > { %v2451_v24 = vmul.f32 %v2450_v30, %v9116_v47  ;;  %v1675_v34 = vmul.f32 %v1674_v12, %v9005_v21  ;;  %7816 = vrcp.f32 %v9216_v45  ;;  %v2472_v26 = vmul.f32 %v9230_v44, %v9230_v44 }
 0x1c0   : > { %v1763_v4 = vadd.f32 0.112945676, %v1762_v31  ;;  %v9244_v33 = vmul.f32 %v1621_v53, %v9142_v42  ;;  %vm1653_vm2 = vweird.f32 %v9113_v15  ;;  %v1660_v63 = vor.u32 1.1754944e-38, %v1659_v9 }
 0x1c1   : > { %v1689_v58 = vmul.f32 %v9225_v13, %v9164_v41  ;;  %v9250_v23 = vmul.f32 0.5, %v9101_v8  ;;  %v1714_v21 = vadd.f32 0.18741608, %v1713_v1  ;;  %v2452_v49 = vadd.f32 0.4994258, %v2451_v24 }
 0x1c2   : > { %v1764_v11 = vmul.f32 %v1763_v4, %v9161_v38  ;;  %v9253_v36 = vmin.f32 %v2472_v26, 16.0  ;;  %v1651_v12 = vmul.f32 %v9177_v3, %v1650_v60  ;;  %v2439_v40 = vadd.f32 0.05243302, %v2438_v27 }
 0x1c3   : > { %v1750_v42 = vadd.f32 0.0036580483, %v1749_v46  ;;  %v9257_v53 = vmul.f32 0.70710677, %v9237_v56  ;;  %v1676_v9 = vadd.f32 1.1283791, %v1675_v34  ;;  %v2453_v30 = vmul.f32 %v2452_v49, %v9116_v47 }
 0x1c4   : > { %v1765_v29 = vadd.f32 0.4994258, %v1764_v11  ;;  %v2474_v8 = vmul.f32 2.1237322e-06, %v9253_v36  ;;  %vm1654_vm3 = vweird.f32 %v9177_v3  ;;  %vm9262_vm4 = vcmp.eq.f32.partialorder %v1657_v48, 8.507059e+37  ;;  %v2365_v11 = vpop.f32.mrf.mxu0 }
 0x1c5   : > { %v1690_v31 = vsub.f32 1.0, %v1689_v58  ;;  %v2485_v60 = vmul.f32 3.8918573e-05, %v9253_v36  ;;  %v1785_v27 = vmul.f32 %v9257_v53, %v9257_v53  ;;  %v9269_v24 = vpop.eup %7816  ;;  %v1715_v46 = vmul.f32 %v1714_v21, %v9048_v25  ;;  %vm9294_vm5 = vmor %vm1653_vm2, %vm1654_vm3 }
 0x1c6   : > { %v9272_v62 = vadd.f32 1.0, %v2453_v30  ;;  %v2475_v34 = vadd.f32 0.00028619796, %v2474_v8  ;;  %v2317_v4 = vadd.f32 %v8986_v6, %v2316_v19  ;;  %v1652_v48 = vadd.f32 %v9177_v3, %v1651_v12 }
 0x1c7   : > { %v2440_v26 = vmul.f32 %v2439_v40, %v9116_v47  ;;  %v1751_v58 = vmul.f32 %v1750_v42, %v9161_v38  ;;  %v2486_v49 = vadd.f32 0.001143296, %v2485_v60  ;;  %v9279_v22 = vmul.f32 %v1676_v9, %v8969_v55 }
 0x1c8   : > { %v1697_v28 = vand.u32 2147483647, %v9164_v41  ;;  %v1699_v25 = vand.u32 2147483648, %v9164_v41  ;;  %v1766_v21 = vmul.f32 %v1765_v29, %v9161_v38  ;;  %v1691_v30 = vmul.f32 %v9225_v13, %v1690_v31 }
 0x1c9   : > { %v1729_v12 = vmul.f32 %v9269_v24, %v9216_v45  ;;  %7818 = vrcp.f32 %v9272_v62  ;;  %v9288_v40 = vmin.f32 %v1785_v27, 16.0  ;;  %v1716_v42 = vadd.f32 1.1283791, %v1715_v46 }
 0x1ca   : > { %v2476_v19 = vmul.f32 %v2475_v34, %v9253_v36  ;;  %v2487_v9 = vmul.f32 %v2486_v49, %v9253_v36  ;;  %v9300_v29 = vadd.f32 %v2365_v11, %v2317_v4  ;;  %v1656_v8 = vsel %vm9294_vm5, %v9177_v3, %v1652_v48 }
 0x1cb   : > { %vm1693_vm6 = vweird.f32 %v9164_v41  ;;  %v2441_v31 = vadd.f32 0.18741608, %v2440_v26  ;;  %v1752_v60 = vadd.f32 0.05243302, %v1751_v58  ;;  %vm1694_vm7 = vweird.f32 %v9225_v13 }
 0x1cc   : > { %vm9307_vm8 = vcmp.eq.f32.partialorder %v1697_v28, 8.507059e+37  ;;  %v1700_v27 = vor.u32 1.1754944e-38, %v1699_v25  ;;  %v9311_v46 = vadd.f32 1.0, %v1766_v21  ;;  %v1692_v34 = vadd.f32 %v9225_v13, %v1691_v30  ;;  %vm9335_vm9 = vmor %vm1693_vm6, %vm1694_vm7 }
 0x1cd   : > { %v1730_v4 = vsub.f32 1.0, %v1729_v12  ;;  %v2488_v49 = vadd.f32 0.014752088, %v2487_v9  ;;  %v1798_v11 = vmul.f32 3.8918573e-05, %v9288_v40  ;;  %v1661_v3 = vsel %vm9262_vm4, %v1660_v63, %v1656_v8 }
 0x1ce   : > { %v9318_v48 = vmul.f32 %v1716_v42, %v9008_v16  ;;  %v2477_v26 = vadd.f32 0.0036580483, %v2476_v19  ;;  %v9321_v28 = vmul.f32 0.70710677, %v9300_v29  ;;  %v2442_v25 = vmul.f32 %v2441_v31, %v9116_v47 }
 0x1cf   : > { %v9323_v58 = vpop.eup %7818  ;;  %v1753_v21 = vmul.f32 %v1752_v60, %v9161_v38  ;;  %v9328_v30 = vmul.f32 0.5, %v9210_v43  ;;  %v2489_v12 = vmul.f32 %v2488_v49, %v9253_v36  ;;  %7820 = vrcp.f32 %v9311_v46 }
 0x1d0   : > { %v1787_v63 = vmul.f32 2.1237322e-06, %v9288_v40  ;;  %v1799_v47 = vadd.f32 0.001143296, %v1798_v11  ;;  %v2512_v1 = vmul.f32 %v9321_v28, %v9321_v28  ;;  %v9344_v43 = vmul.f32 %v1661_v3, %v9213_v37 }
 0x1d1   : > { %13213 = vst [vmem:[#allocation55_spill] sm:$0xff] %v9328_v30  ;;  %v1696_v55 = vsel %vm9335_vm9, %v9225_v13, %v1692_v34  ;;  %v1731_v41 = vmul.f32 %v9269_v24, %v1730_v4  ;;  %v2490_v42 = vadd.f32 0.112945676, %v2489_v12  ;;  %v1737_v19 = vand.u32 2147483647, %v9216_v45 }
 0x1d2   : > { %v2456_v9 = vmul.f32 %v9323_v58, %v9272_v62  ;;  %v2478_v8 = vmul.f32 %v2477_v26, %v9253_v36  ;;  %v1800_v31 = vmul.f32 %v1799_v47, %v9288_v40  ;;  %v1739_v60 = vand.u32 2147483648, %v9216_v45 }
 0x1d3   : > { %v2443_v37 = vadd.f32 1.1283791, %v2442_v25  ;;  %v2491_v49 = vmul.f32 %v2490_v42, %v9253_v36  ;;  %v9357_v11 = vmin.f32 %v2512_v1, 16.0  ;;  %v1701_v13 = vsel %vm9307_vm8, %v1700_v27, %v1696_v55 }
 0x1d4   : > { %v1754_v34 = vadd.f32 0.18741608, %v1753_v21  ;;  %v1788_v4 = vadd.f32 0.00028619796, %v1787_v63  ;;  %v1801_v3 = vadd.f32 0.014752088, %v1800_v31  ;;  %v1732_v12 = vadd.f32 %v9269_v24, %v1731_v41  ;;  %v1415_v31 = vpop.f32.mrf.mxu1 }
 0x1d5   : > { %vm1734_vm10 = vweird.f32 %v9269_v24  ;;  %v2492_v26 = vadd.f32 0.4994258, %v2491_v49  ;;  %v7387_v16 = vclamps-f32 %v9131_v51, 1.0  ;;  %v9364_v47 = vpop.eup %7820  ;;  %v2457_v25 = vsub.f32 1.0, %v2456_v9  ;;  %v3235_v51 = vld [vmem:[#allocation8 + $0x30] sm:$0xff] }
 0x1d6   : > { %v2479_v30 = vadd.f32 0.05243302, %v2478_v8  ;;  %v1802_v1 = vmul.f32 %v1801_v3, %v9288_v40  ;;  %v2525_v42 = vmul.f32 3.8918573e-05, %v9357_v11  ;;  %v9369_v15 = vmul.f32 %v1701_v13, %v9279_v22  ;;  %v3236_v3 = vld [vmem:[#allocation8 + $0x38] sm:$0xff] }
 0x1d7   : > { %vm1733_vm11 = vweird.f32 %v9216_v45  ;;  %vm9372_vm12 = vcmp.eq.f32.partialorder %v1737_v19, 8.507059e+37  ;;  %v1740_v21 = vor.u32 1.1754944e-38, %v1739_v60  ;;  %v9381_v63 = vmul.f32 %v2443_v37, %v9090_v14  ;;  %3257 = vmatpush.msra.mxu0 %v3236_v3 }
 0x1d8   : > { %vm9376_vm13 = vmor %vm1733_vm11, %vm1734_vm10  ;;  %v1755_v55 = vmul.f32 %v1754_v34, %v9161_v38  ;;  %v9385_v41 = vmul.f32 0.5, %v9237_v56  ;;  %v1789_v22 = vmul.f32 %v1788_v4, %v9288_v40  ;;  %v1769_v19 = vmul.f32 %v9364_v47, %v9311_v46 }
 0x1d9   : > { %v1736_v45 = vsel %vm9376_vm13, %v9269_v24, %v1732_v12  ;;  %v2493_v9 = vmul.f32 %v2492_v26, %v9253_v36  ;;  %v2106_v8 = vadd.f32 1.0, %v7387_v16  ;;  %v2458_v14 = vmul.f32 %v9323_v58, %v2457_v25  ;;  %3258 = vmatpush.msra.mxu0 %v3235_v51 }
 0x1da   : > { %v2480_v38 = vmul.f32 %v2479_v30, %v9253_v36  ;;  %v1803_v60 = vadd.f32 0.112945676, %v1802_v1  ;;  %v2526_v56 = vadd.f32 0.001143296, %v2525_v42  ;;  %vm2460_vm14 = vweird.f32 %v9272_v62 }
 0x1db   : > { %v2464_v37 = vand.u32 2147483647, %v9272_v62  ;;  %v2466_v49 = vand.u32 2147483648, %v9272_v62  ;;  %v2514_v24 = vmul.f32 2.1237322e-06, %v9357_v11  ;;  %v1741_v13 = vsel %vm9372_vm12, %v1740_v21, %v1736_v45  ;;  %v2318_v21 = vpop.f32.mrf.mxu2 }
 0x1dc   : > { %v1756_v34 = vadd.f32 1.1283791, %v1755_v55  ;;  %v1790_v4 = vadd.f32 0.0036580483, %v1789_v22  ;;  %v9403_v12 = vadd.f32 %v1415_v31, %v9062_v52  ;;  %vm2461_vm15 = vweird.f32 %v9323_v58 }
 0x1dd   : > { %v1770_v30 = vsub.f32 1.0, %v1769_v19  ;;  %v9406_v26 = vadd.f32 1.0, %v2493_v9  ;;  %v2527_v16 = vmul.f32 %v2526_v56, %v9357_v11  ;;  %v2459_v25 = vadd.f32 %v9323_v58, %v2458_v14  ;;  %vm9428_vm2 = vmor %vm2460_vm14, %vm2461_vm15 }
 0x1de   : > { %v2481_v1 = vadd.f32 0.18741608, %v2480_v38  ;;  %v1804_v42 = vmul.f32 %v1803_v60, %v9288_v40  ;;  %v2122_v27 = vmul.f32 %v2106_v8, %v8953_v32  ;;  %vm9412_vm1 = vcmp.eq.f32.partialorder %v2464_v37, 8.507059e+37  ;;  %v3234_v32 = vld [vmem:[#allocation8 + $0x28] sm:$0xff] }
 0x1df   : > { %v2467_v55 = vor.u32 1.1754944e-38, %v2466_v49  ;;  %v2515_v22 = vadd.f32 0.00028619796, %v2514_v24  ;;  %v2528_v45 = vadd.f32 0.014752088, %v2527_v16  ;;  %v9417_v19 = vmul.f32 %v1741_v13, %v9318_v48  ;;  %v2367_v49 = vpop.f32.mrf.mxu0  ;;  %3259 = vmatpush.msra.mxu0 %v3234_v32 }
 0x1e0   : > { %v1791_v9 = vmul.f32 %v1790_v4, %v9288_v40  ;;  %v2142_v31 = vmul.f32 %v9158_v35, %v2122_v27  ;;  %v9422_v14 = vmul.f32 0.70710677, %v9403_v12  ;;  %v1771_v8 = vmul.f32 %v9364_v47, %v1770_v30 }
 0x1e1   : > { %7822 = vrcp.f32 %v9406_v26  ;;  %v2529_v48 = vmul.f32 %v2528_v45, %v9357_v11  ;;  %v2319_v38 = vadd.f32 %v8986_v6, %v2318_v21  ;;  %v2463_v60 = vsel %vm9428_vm2, %v9323_v58, %v2459_v25 }
 0x1e2   : > { %v2482_v56 = vmul.f32 %v2481_v1, %v9253_v36  ;;  %v1805_v37 = vadd.f32 0.4994258, %v1804_v42  ;;  %v9441_v62 = vadd.f32 %v9187_v59, %v2142_v31  ;;  %v9444_v24 = vmul.f32 %v1756_v34, %v9119_v0 }
 0x1e3   : > { %v1777_v13 = vand.u32 2147483647, %v9311_v46  ;;  %v1779_v4 = vand.u32 2147483648, %v9311_v46  ;;  %v2516_v3 = vmul.f32 %v2515_v22, %v9357_v11  ;;  %vm1774_vm3 = vweird.f32 %v9364_v47 }
 0x1e4   : > { %13224 = vst [vmem:[#allocation56_spill] sm:$0xff] %v9441_v62  ;;  %v1792_v30 = vadd.f32 0.05243302, %v1791_v9  ;;  %v2530_v58 = vadd.f32 0.112945676, %v2529_v48  ;;  %3183 = vmatmul.f32.gmra.mxu3 %v9441_v62  ;;  %v1825_v36 = vmul.f32 %v9422_v14, %v9422_v14  ;;  %v2468_v16 = vsel %vm9412_vm1, %v2467_v55, %v2463_v60 }
 0x1e5   : > { %v1772_v0 = vadd.f32 %v9364_v47, %v1771_v8  ;;  %v9456_v34 = vadd.f32 %v2367_v49, %v2319_v38  ;;  %v7388_v25 = vclamps-f32 %v9190_v50, 1.0  ;;  %v2483_v1 = vadd.f32 1.1283791, %v2482_v56  ;;  %v1418_v8 = vpop.f32.mrf.mxu1 }
 0x1e6   : > { %v1806_v42 = vmul.f32 %v1805_v37, %v9288_v40  ;;  %v2531_v27 = vmul.f32 %v2530_v58, %v9357_v11  ;;  %v9461_v21 = vmin.f32 %v1825_v36, 16.0  ;;  %vm9465_vm4 = vcmp.eq.f32.partialorder %v1777_v13, 8.507059e+37 }
 0x1e7   : > { %v9463_v51 = vpop.eup %7822  ;;  %v2517_v52 = vadd.f32 0.0036580483, %v2516_v3  ;;  %v9470_v55 = vmul.f32 0.70710677, %v9456_v34  ;;  %v2107_v45 = vadd.f32 1.0, %v7388_v25  ;;  %vm1773_vm5 = vweird.f32 %v9311_v46 }
 0x1e8   : > { %v1780_v50 = vor.u32 1.1754944e-38, %v1779_v4  ;;  %v2532_v9 = vadd.f32 0.4994258, %v2531_v27  ;;  %v1827_v31 = vmul.f32 2.1237322e-06, %v9461_v21  ;;  %v2469_v48 = vmul.f32 %v2468_v16, %v9381_v63  ;;  %vm9477_vm6 = vmor %vm1773_vm5, %vm1774_vm3 }
 0x1e9   : > { %v1793_v60 = vmul.f32 %v1792_v30, %v9288_v40  ;;  %v1838_v56 = vmul.f32 3.8918573e-05, %v9461_v21  ;;  %v2552_v46 = vmul.f32 %v9470_v55, %v9470_v55  ;;  %v1776_v37 = vsel %vm9477_vm6, %v9364_v47, %v1772_v0 }
 0x1ea   : > { %v2496_v63 = vmul.f32 %v9463_v51, %v9406_v26  ;;  %v9490_v49 = vadd.f32 1.0, %v1806_v42  ;;  %v2123_v13 = vmul.f32 %v2107_v45, %v8960_v39  ;;  %v2533_v4 = vmul.f32 %v2532_v9, %v9357_v11  ;;  %v2321_v9 = vpop.f32.mrf.mxu2 }
 0x1eb   : > { %v1828_v3 = vadd.f32 0.00028619796, %v1827_v31  ;;  %v1839_v30 = vadd.f32 0.001143296, %v1838_v56  ;;  %v9495_v58 = vadd.f32 %v1418_v8, %v8909_v54  ;;  %v9498_v36 = vmul.f32 %v2483_v1, %v9230_v44 }
 0x1ec   : > { %v9501_v16 = vmul.f32 0.5, %v9300_v29  ;;  %v2518_v47 = vmul.f32 %v2517_v52, %v9357_v11  ;;  %v9504_v0 = vmin.f32 %v2552_v46, 16.0  ;;  %v7458_v25 = vclamps-f32 %v2469_v48, 1.0 }
 0x1ed   : > { %v1781_v39 = vsel %vm9465_vm4, %v1780_v50, %v1776_v37  ;;  %v1794_v42 = vadd.f32 0.18741608, %v1793_v60  ;;  %v1840_v27 = vmul.f32 %v1839_v30, %v9461_v21  ;;  %v2497_v45 = vsub.f32 1.0, %v2496_v63  ;;  %v3233_v50 = vld [vmem:[#allocation8 + $0x20] sm:$0xff] }
 0x1ee   : > { %v2504_v54 = vand.u32 2147483647, %v9406_v26  ;;  %v2565_v44 = vmul.f32 3.8918573e-05, %v9504_v0  ;;  %v2143_v1 = vmul.f32 %v9158_v35, %v2123_v13  ;;  %7824 = vrcp.f32 %v9490_v49  ;;  %3260 = vmatpush.msra.mxu0 %v3233_v50 }
 0x1ef   : > { %v9513_v29 = vadd.f32 1.0, %v2533_v4  ;;  %v1829_v52 = vmul.f32 %v1828_v3, %v9461_v21  ;;  %v9517_v22 = vmul.f32 0.70710677, %v9495_v58  ;;  %vm2500_vm7 = vweird.f32 %v9406_v26 }
 0x1f0   : > { %v2519_v31 = vadd.f32 0.05243302, %v2518_v47  ;;  %v1841_v32 = vadd.f32 0.014752088, %v1840_v27  ;;  %v2554_v8 = vmul.f32 2.1237322e-06, %v9504_v0  ;;  %v1795_v60 = vmul.f32 %v1794_v42, %v9288_v40  ;;  %v2370_v27 = vpop.f32.mrf.mxu0 }
 0x1f1   : > { %v3072_v48 = vadd.f32 1.0, %v7458_v25  ;;  %v2506_v38 = vand.u32 2147483648, %v9406_v26  ;;  %v2566_v56 = vadd.f32 0.001143296, %v2565_v44  ;;  %v2498_v46 = vmul.f32 %v9463_v51, %v2497_v45 }
 0x1f2   : > { %v1842_v37 = vmul.f32 %v1841_v32, %v9461_v21  ;;  %v9526_v63 = vadd.f32 %v9187_v59, %v2143_v1  ;;  %v2322_v13 = vadd.f32 %v8986_v6, %v2321_v9  ;;  %7826 = vrcp.f32 %v9513_v29  ;;  %v7790_v1 = vld [vmem:[%s13172_s8] ss:$0 sm:$0xff] }
 0x1f3   : > { %v1830_v4 = vadd.f32 0.0036580483, %v1829_v52  ;;  %v2567_v3 = vmul.f32 %v2566_v56, %v9504_v0  ;;  %v1865_v30 = vmul.f32 %v9517_v22, %v9517_v22  ;;  %v9534_v40 = vmul.f32 %v1781_v39, %v9444_v24 }
 0x1f4   : > { %13229 = vst [vmem:[#allocation57_spill] sm:$0xff] %v9526_v63  ;;  %v2520_v47 = vmul.f32 %v2519_v31, %v9357_v11  ;;  %v1843_v25 = vadd.f32 0.112945676, %v1842_v37  ;;  %v2555_v42 = vadd.f32 0.00028619796, %v2554_v8  ;;  %3186 = vmatmul.f32.gmra.mxu3 %v9526_v63  ;;  %v9538_v45 = vpop.eup %7824  ;;  %v3088_v44 = vmul.f32 %v3072_v48, %v9201_v20 }
 0x1f5   : > { %v2507_v52 = vor.u32 1.1754944e-38, %v2506_v38  ;;  %v2568_v9 = vadd.f32 0.014752088, %v2567_v3  ;;  %v9542_v50 = vmin.f32 %v1865_v30, 16.0  ;;  %v2499_v32 = vadd.f32 %v9463_v51, %v2498_v46 }
 0x1f6   : > { %vm2501_vm8 = vweird.f32 %v9463_v51  ;;  %vm9546_vm9 = vcmp.eq.f32.partialorder %v2504_v54, 8.507059e+37  ;;  %v1796_v39 = vadd.f32 1.1283791, %v1795_v60  ;;  %v1844_v31 = vmul.f32 %v1843_v25, %v9461_v21 }
 0x1f7   : > { %v1831_v8 = vmul.f32 %v1830_v4, %v9461_v21  ;;  %v2569_v20 = vmul.f32 %v2568_v9, %v9504_v0  ;;  %v1878_v48 = vmul.f32 3.8918573e-05, %v9542_v50  ;;  %v9554_v38 = vadd.f32 %v2370_v27, %v2322_v13  ;;  %vm9568_vm10 = vmor %vm2500_vm7, %vm2501_vm8 }
 0x1f8   : > { %v1809_v56 = vmul.f32 %v9538_v45, %v9490_v49  ;;  %v2521_v46 = vadd.f32 0.18741608, %v2520_v47  ;;  %v9559_v54 = vmul.f32 0.5, %v9403_v12  ;;  %v2556_v37 = vmul.f32 %v2555_v42, %v9504_v0  ;;  %v9562_v60 = vpop.eup %7826 }
 0x1f9   : > { %v9564_v3 = vmul.f32 %v7790_v1, %v3088_v44  ;;  %v1845_v13 = vadd.f32 0.4994258, %v1844_v31  ;;  %v2570_v30 = vadd.f32 0.112945676, %v2569_v20  ;;  %v1867_v25 = vmul.f32 2.1237322e-06, %v9542_v50 }
 0x1fa   : > { %v2503_v12 = vsel %vm9568_vm10, %v9463_v51, %v2499_v32  ;;  %v9577_v47 = vmul.f32 %v1796_v39, %v9257_v53  ;;  %v1819_v42 = vand.u32 2147483648, %v9490_v49  ;;  %v1879_v27 = vadd.f32 0.001143296, %v1878_v48  ;;  %v3232_v31 = vld [vmem:[#allocation8 + $0x18] sm:$0xff] }
 0x1fb   : > { %v1832_v44 = vadd.f32 0.05243302, %v1831_v8  ;;  %v2571_v26 = vmul.f32 %v2570_v30, %v9504_v0  ;;  %v9582_v1 = vmul.f32 0.70710677, %v9554_v38  ;;  %v7389_v9 = vclamps-f32 %v9244_v33, 1.0  ;;  %3261 = vmatpush.msra.mxu0 %v3232_v31 }
 0x1fc   : > { %v1810_v20 = vsub.f32 1.0, %v1809_v56  ;;  %v2536_v4 = vmul.f32 %v9562_v60, %v9513_v29  ;;  %v2557_v51 = vadd.f32 0.0036580483, %v2556_v37  ;;  %v1880_v53 = vmul.f32 %v1879_v27, %v9542_v50 }
 0x1fd   : > { %v2522_v32 = vmul.f32 %v2521_v46, %v9357_v11  ;;  %v1846_v39 = vmul.f32 %v1845_v13, %v9461_v21  ;;  %v2572_v8 = vadd.f32 0.4994258, %v2571_v26  ;;  %v1868_v48 = vadd.f32 0.00028619796, %v1867_v25  ;;  %v2323_v13 = vpop.f32.mrf.mxu2 }
 0x1fe   : > { %vm1813_vm11 = vweird.f32 %v9490_v49  ;;  %v1817_v30 = vand.u32 2147483647, %v9490_v49  ;;  %v9592_v33 = vor.u32 1.1754944e-38, %v1819_v42  ;;  %v9595_v56 = vmul.f32 0.5, %v9495_v58 }
 0x1ff   : > { %v2592_v37 = vmul.f32 %v9582_v1, %v9582_v1  ;;  %v2508_v27 = vsel %vm9546_vm9, %v2507_v52, %v2503_v12  ;;  %vm1814_vm12 = vweird.f32 %v9538_v45  ;;  %v1833_v11 = vmul.f32 %v1832_v44, %v9461_v21 }
 0x200   : > { %13234 = vst [vmem:[#allocation58_spill] sm:$0xff] %v9595_v56  ;;  %v2108_v46 = vadd.f32 1.0, %v7389_v9  ;;  %v1811_v25 = vmul.f32 %v9538_v45, %v1810_v20  ;;  %v2537_v26 = vsub.f32 1.0, %v2536_v4  ;;  %v2558_v42 = vmul.f32 %v2557_v51, %v9504_v0  ;;  %vm9640_vm15 = vmor %vm1813_vm11, %vm1814_vm12 }
 0x201   : > { %v1881_v31 = vadd.f32 0.014752088, %v1880_v53  ;;  %v2523_v58 = vadd.f32 1.1283791, %v2522_v32  ;;  %v9605_v63 = vadd.f32 1.0, %v1846_v39  ;;  %v2573_v62 = vmul.f32 %v2572_v8, %v9504_v0  ;;  %v1420_v32 = vpop.f32.mrf.mxu1 }
 0x202   : > { %v1869_v24 = vmul.f32 %v1868_v48, %v9542_v50  ;;  %v9610_v52 = vmul.f32 %v2508_v27, %v9498_v36  ;;  %v9613_v44 = vmin.f32 %v2592_v37, 16.0  ;;  %v2324_v9 = vadd.f32 %v8986_v6, %v2323_v13  ;;  %v2372_v36 = vpop.f32.mrf.mxu0 }
 0x203   : > { %v1882_v12 = vmul.f32 %v1881_v31, %v9542_v50  ;;  %vm9616_vm13 = vcmp.eq.f32.partialorder %v1817_v30, 8.507059e+37  ;;  %vm2540_vm14 = vweird.f32 %v9513_v29  ;;  %v2544_v4 = vand.u32 2147483647, %v9513_v29 }
 0x204   : > { %v1834_v51 = vadd.f32 0.18741608, %v1833_v11  ;;  %v2124_v53 = vmul.f32 %v2108_v46, %v9011_v2  ;;  %v1812_v39 = vadd.f32 %v9538_v45, %v1811_v25  ;;  %v2538_v8 = vmul.f32 %v9562_v60, %v2537_v26 }
 0x205   : > { %v2546_v48 = vand.u32 2147483648, %v9513_v29  ;;  %v2559_v6 = vadd.f32 0.05243302, %v2558_v42  ;;  %7828 = vrcp.f32 %v9605_v63  ;;  %v9627_v30 = vadd.f32 1.0, %v2573_v62 }
 0x206   : > { %v1870_v37 = vadd.f32 0.0036580483, %v1869_v24  ;;  %v1883_v27 = vadd.f32 0.112945676, %v1882_v12  ;;  %v2594_v13 = vmul.f32 2.1237322e-06, %v9613_v44  ;;  %v9632_v2 = vadd.f32 %v1420_v32, %v8913_v57 }
 0x207   : > { %v2605_v11 = vmul.f32 3.8918573e-05, %v9613_v44  ;;  %v9634_v46 = vadd.f32 %v2372_v36, %v2324_v9  ;;  %vm2541_vm1 = vweird.f32 %v9562_v60  ;;  %v1835_v62 = vmul.f32 %v1834_v51, %v9461_v21 }
 0x208   : > { %v1884_v26 = vmul.f32 %v1883_v27, %v9542_v50  ;;  %v2144_v42 = vmul.f32 %v9158_v35, %v2124_v53  ;;  %v1816_v57 = vsel %vm9640_vm15, %v9538_v45, %v1812_v39  ;;  %v2560_v31 = vmul.f32 %v2559_v6, %v9504_v0  ;;  %vm9659_vm2 = vmor %vm2540_vm14, %vm2541_vm1  ;;  %v3231_v27 = vld [vmem:[#allocation8 + $0x10] sm:$0xff] }
 0x209   : > { %v2595_v24 = vadd.f32 0.00028619796, %v2594_v13  ;;  %v2606_v49 = vadd.f32 0.001143296, %v2605_v11  ;;  %v2539_v12 = vadd.f32 %v9562_v60, %v2538_v8  ;;  %v1871_v9 = vmul.f32 %v1870_v37, %v9542_v50  ;;  %3262 = vmatpush.msra.mxu0 %v3231_v27 }
 0x20a   : > { %v1885_v32 = vadd.f32 0.4994258, %v1884_v26  ;;  %v9655_v36 = vadd.f32 %v9187_v59, %v2144_v42  ;;  %7830 = vrcp.f32 %v9627_v30  ;;  %v9666_v51 = vmul.f32 0.70710677, %v9632_v2  ;;  %v3230_v42 = vld [vmem:[#allocation8 + $0x8] sm:$0xff] }
 0x20b   : > { %v2607_v45 = vmul.f32 %v2606_v49, %v9613_v44  ;;  %v9669_v53 = vmul.f32 0.70710677, %v9634_v46  ;;  %v9671_v39 = vpop.eup %7828  ;;  %v2524_v8 = vmul.f32 %v2523_v58, %v9321_v28  ;;  %vm9674_vm3 = vcmp.eq.f32.partialorder %v2544_v4, 8.507059e+37  ;;  %3263 = vmatpush.msra.mxu0 %v3230_v42 }
 0x20c   : > { %13239 = vst [vmem:[#allocation59_spill] sm:$0xff] %v9655_v36  ;;  %v1836_v6 = vadd.f32 1.1283791, %v1835_v62  ;;  %v2596_v37 = vmul.f32 %v2595_v24, %v9613_v44  ;;  %3189 = vmatmul.f32.gmra.mxu3 %v9655_v36  ;;  %v1821_v13 = vsel %vm9616_vm13, %v9592_v33, %v1816_v57  ;;  %v2547_v11 = vor.u32 1.1754944e-38, %v2546_v48 }
 0x20d   : > { %v2608_v25 = vadd.f32 0.014752088, %v2607_v45  ;;  %v1905_v26 = vmul.f32 %v9666_v51, %v9666_v51  ;;  %v2543_v28 = vsel %vm9659_vm2, %v9562_v60, %v2539_v12  ;;  %v2561_v58 = vadd.f32 0.18741608, %v2560_v31 }
 0x20e   : > { %v1886_v4 = vmul.f32 %v1885_v32, %v9542_v50  ;;  %v2632_v62 = vmul.f32 %v9669_v53, %v9669_v53  ;;  %v1849_v33 = vmul.f32 %v9671_v39, %v9605_v63  ;;  %v9694_v20 = vmul.f32 0.5, %v9456_v34 }
 0x20f   : > { %v1872_v48 = vadd.f32 0.05243302, %v1871_v9  ;;  %v2609_v57 = vmul.f32 %v2608_v25, %v9613_v44  ;;  %v9698_v24 = vmul.f32 %v1821_v13, %v9577_v47  ;;  %v9701_v60 = vmul.f32 %v1836_v6, %v9422_v14 }
 0x210   : > { %13244 = vst [vmem:[#allocation60_spill] sm:$0xff] %v9694_v20  ;;  %v2597_v31 = vadd.f32 0.0036580483, %v2596_v37  ;;  %v9703_v49 = vmin.f32 %v1905_v26, 16.0  ;;  %v9705_v12 = vpop.eup %7830  ;;  %v2548_v32 = vsel %vm9674_vm3, %v2547_v11, %v2543_v28  ;;  %v1857_v34 = vand.u32 2147483647, %v9605_v63 }
 0x211   : > { %v1859_v9 = vand.u32 2147483648, %v9605_v63  ;;  %v9711_v21 = vmin.f32 %v2632_v62, 16.0  ;;  %v2562_v47 = vmul.f32 %v2561_v58, %v9504_v0  ;;  %v9714_v45 = vadd.f32 1.0, %v1886_v4 }
 0x212   : > { %v2610_v14 = vadd.f32 0.112945676, %v2609_v57  ;;  %v1907_v6 = vmul.f32 2.1237322e-06, %v9703_v49  ;;  %v1850_v37 = vsub.f32 1.0, %v1849_v33  ;;  %v1873_v27 = vmul.f32 %v1872_v48, %v9542_v50 }
 0x213   : > { %v1918_v13 = vmul.f32 3.8918573e-05, %v9703_v49  ;;  %v7390_v29 = vclamps-f32 %v9344_v43, 1.0  ;;  %v2576_v11 = vmul.f32 %v9705_v12, %v9627_v30  ;;  %v2598_v25 = vmul.f32 %v2597_v31, %v9613_v44 }
 0x214   : > { %v2611_v26 = vmul.f32 %v2610_v14, %v9613_v44  ;;  %v2634_v0 = vmul.f32 2.1237322e-06, %v9711_v21  ;;  %v9725_v28 = vmul.f32 %v2548_v32, %v2524_v8  ;;  %v1908_v58 = vadd.f32 0.00028619796, %v1907_v6 }
 0x215   : > { %v1919_v4 = vadd.f32 0.001143296, %v1918_v13  ;;  %v2645_v62 = vmul.f32 3.8918573e-05, %v9711_v21  ;;  %vm1853_vm4 = vweird.f32 %v9605_v63  ;;  %v9729_v42 = vor.u32 1.1754944e-38, %v1859_v9 }
 0x216   : > { %v2563_v43 = vadd.f32 1.1283791, %v2562_v47  ;;  %7832 = vrcp.f32 %v9714_v45  ;;  %v2612_v33 = vadd.f32 0.4994258, %v2611_v26  ;;  %v1874_v48 = vadd.f32 0.18741608, %v1873_v27 }
 0x217   : > { %v1920_v57 = vmul.f32 %v1919_v4, %v9703_v49  ;;  %v2646_v31 = vadd.f32 0.001143296, %v2645_v62  ;;  %v2109_v14 = vadd.f32 1.0, %v7390_v29  ;;  %v1851_v8 = vmul.f32 %v9671_v39, %v1850_v37 }
 0x218   : > { %v2577_v32 = vsub.f32 1.0, %v2576_v11  ;;  %v2599_v6 = vadd.f32 0.05243302, %v2598_v25  ;;  %v2613_v13 = vmul.f32 %v2612_v33, %v9613_v44  ;;  %v1909_v36 = vmul.f32 %v1908_v58, %v9703_v49 }
 0x219   : > { %v1921_v56 = vadd.f32 0.014752088, %v1920_v57  ;;  %v2635_v9 = vadd.f32 0.00028619796, %v2634_v0  ;;  %v2647_v47 = vmul.f32 %v2646_v31, %v9711_v21  ;;  %v9738_v20 = vmul.f32 %v2563_v43, %v9470_v55  ;;  %v2326_v57 = vpop.f32.mrf.mxu2 }
 0x21a   : > { %v2584_v27 = vand.u32 2147483647, %v9627_v30  ;;  %v9742_v26 = vmul.f32 0.5, %v9554_v38  ;;  %v9744_v29 = vadd.f32 1.0, %v2613_v13  ;;  %vm9746_vm5 = vcmp.eq.f32.partialorder %v1857_v34, 8.507059e+37  ;;  %v3229_v34 = vld [vmem:[#allocation8] sm:$0xff] }
 0x21b   : > { %v1875_v11 = vmul.f32 %v1874_v48, %v9542_v50  ;;  %v1922_v25 = vmul.f32 %v1921_v56, %v9703_v49  ;;  %v2648_v0 = vadd.f32 0.014752088, %v2647_v47  ;;  %v2125_v58 = vmul.f32 %v2109_v14, %v9045_v18  ;;  %3264 = vmatpush.msra.mxu0 %v3229_v34  ;;  %v2375_v34 = vpop.f32.mrf.mxu0 }
 0x21c   : > { %v9753_v55 = vpop.eup %7832  ;;  %v1852_v4 = vadd.f32 %v9671_v39, %v1851_v8  ;;  %vm1854_vm6 = vweird.f32 %v9671_v39  ;;  %vm2580_vm7 = vweird.f32 %v9627_v30  ;;  %v2586_v38 = vand.u32 2147483648, %v9627_v30 }
 0x21d   : > { %v2578_v62 = vmul.f32 %v9705_v12, %v2577_v32  ;;  %v2600_v50 = vmul.f32 %v2599_v6, %v9613_v44  ;;  %v1910_v43 = vadd.f32 0.0036580483, %v1909_v36  ;;  %v2636_v56 = vmul.f32 %v2635_v9, %v9711_v21  ;;  %vm9767_vm8 = vmor %vm1853_vm4, %vm1854_vm6  ;;  %v1423_v32 = vpop.f32.mrf.mxu1 }
 0x21e   : > { %7834 = vrcp.f32 %v9744_v29  ;;  %v1923_v18 = vadd.f32 0.112945676, %v1922_v25  ;;  %v2649_v33 = vmul.f32 %v2648_v0, %v9711_v21  ;;  %v2145_v48 = vmul.f32 %v9158_v35, %v2125_v58 }
 0x21f   : > { %vm2581_vm9 = vweird.f32 %v9705_v12  ;;  %vm9772_vm10 = vcmp.eq.f32.partialorder %v2584_v27, 8.507059e+37  ;;  %v1876_v14 = vadd.f32 1.1283791, %v1875_v11  ;;  %v1889_v8 = vmul.f32 %v9753_v55, %v9714_v45  ;;  %v9788_v11 = vld [vmem:[%s13173_s3] ss:$0 sm:$0xff] }
 0x220   : > { %v1856_v35 = vsel %vm9767_vm8, %v9671_v39, %v1852_v4  ;;  %v1924_v63 = vmul.f32 %v1923_v18, %v9703_v49  ;;  %v2650_v6 = vadd.f32 0.112945676, %v2649_v33  ;;  %v9783_v13 = vadd.f32 %v9187_v59, %v2145_v48  ;;  %vm9793_vm11 = vmor %vm2580_vm7, %vm2581_vm9 }
 0x221   : > { %v2579_v9 = vadd.f32 %v9705_v12, %v2578_v62  ;;  %v1911_v47 = vmul.f32 %v1910_v43, %v9703_v49  ;;  %v2637_v27 = vadd.f32 0.0036580483, %v2636_v56  ;;  %v2327_v25 = vadd.f32 %v9788_v11, %v2326_v57 }
 0x222   : > { %13251 = vst [vmem:[#allocation61_spill] sm:$0xff] %v9783_v13  ;;  %v2587_v39 = vor.u32 1.1754944e-38, %v2586_v38  ;;  %v2601_v58 = vadd.f32 0.18741608, %v2600_v50  ;;  %v2651_v59 = vmul.f32 %v2650_v6, %v9711_v21  ;;  %3192 = vmatmul.f32.gmra.mxu3 %v9783_v13  ;;  %v9800_v4 = vadd.f32 %v1423_v32, %v8917_v5 }
 0x223   : > { %v9803_v62 = vmul.f32 %v1876_v14, %v9517_v22  ;;  %v1890_v43 = vsub.f32 1.0, %v1889_v8  ;;  %v9806_v30 = vmul.f32 0.5, %v9632_v2  ;;  %v1925_v56 = vadd.f32 0.4994258, %v1924_v63 }
 0x224   : > { %v9808_v18 = vpop.eup %7834  ;;  %v1861_v38 = vsel %vm9746_vm5, %v9729_v42, %v1856_v35  ;;  %v1897_v50 = vand.u32 2147483647, %v9714_v45  ;;  %v2652_v33 = vadd.f32 0.4994258, %v2651_v59  ;;  %v9815_v5 = vmul.f32 0.70710677, %v9800_v4 }
 0x225   : > { %v2583_v22 = vsel %vm9793_vm11, %v9705_v12, %v2579_v9  ;;  %v1912_v48 = vadd.f32 0.05243302, %v1911_v47  ;;  %v2638_v2 = vmul.f32 %v2637_v27, %v9711_v21  ;;  %v9821_v57 = vadd.f32 %v2375_v34, %v2327_v25 }
 0x226   : > { %v2602_v31 = vmul.f32 %v2601_v58, %v9613_v44  ;;  %v2653_v37 = vmul.f32 %v2652_v33, %v9711_v21  ;;  %v1945_v42 = vmul.f32 %v9815_v5, %v9815_v5  ;;  %v7391_v14 = vclamps-f32 %v9369_v15, 1.0 }
 0x227   : > { %v1891_v8 = vmul.f32 %v9753_v55, %v1890_v43  ;;  %v2616_v32 = vmul.f32 %v9808_v18, %v9744_v29  ;;  %v1926_v12 = vmul.f32 %v1925_v56, %v9703_v49  ;;  %v9833_v35 = vmul.f32 0.70710677, %v9821_v57 }
 0x228   : > { %v9836_v63 = vmul.f32 %v1861_v38, %v9701_v60  ;;  %v2588_v44 = vsel %vm9772_vm10, %v2587_v39, %v2583_v22  ;;  %vm1893_vm12 = vweird.f32 %v9714_v45  ;;  %v1899_v15 = vand.u32 2147483648, %v9714_v45 }
 0x229   : > { %v1913_v6 = vmul.f32 %v1912_v48, %v9703_v49  ;;  %v2639_v9 = vadd.f32 0.05243302, %v2638_v2  ;;  %v9843_v47 = vadd.f32 1.0, %v2653_v37  ;;  %v9845_v27 = vmin.f32 %v1945_v42, 16.0 }
 0x22a   : > { %vm1894_vm13 = vweird.f32 %v9753_v55  ;;  %vm9848_vm14 = vcmp.eq.f32.partialorder %v1897_v50, 8.507059e+37  ;;  %v2603_v60 = vadd.f32 1.1283791, %v2602_v31  ;;  %v2672_v36 = vmul.f32 %v9833_v35, %v9833_v35 }
 0x22b   : > { %v2110_v0 = vadd.f32 1.0, %v7391_v14  ;;  %v1892_v39 = vadd.f32 %v9753_v55, %v1891_v8  ;;  %v2617_v58 = vsub.f32 1.0, %v2616_v32  ;;  %v9855_v59 = vadd.f32 1.0, %v1926_v12  ;;  %vm9871_vm15 = vmor %vm1893_vm12, %vm1894_vm13  ;;  %v2328_v8 = vpop.f32.mrf.mxu2  ;;  %v9891_v12 = vld [vmem:[%s8432_s21] ss:$0 sm:$0xff] }
 0x22c   : > { %7836 = vrcp.f32 %v9843_v47  ;;  %v9859_v34 = vmul.f32 %v2588_v44, %v9738_v20  ;;  %v1900_v43 = vor.u32 1.1754944e-38, %v1899_v15  ;;  %v1947_v56 = vmul.f32 2.1237322e-06, %v9845_v27 }
 0x22d   : > { %v1958_v38 = vmul.f32 3.8918573e-05, %v9845_v27  ;;  %v1914_v50 = vadd.f32 0.18741608, %v1913_v6  ;;  %v2640_v33 = vmul.f32 %v2639_v9, %v9711_v21  ;;  %v9864_v22 = vmin.f32 %v2672_v36, 16.0 }
 0x22e   : > { %v2126_v48 = vmul.f32 %v2110_v0, %v9069_v7  ;;  %v9876_v2 = vmul.f32 %v2603_v60, %v9582_v1  ;;  %v9879_v31 = vmul.f32 0.5, %v9634_v46  ;;  %v1948_v37 = vadd.f32 0.00028619796, %v1947_v56 }
 0x22f   : > { %v1959_v42 = vadd.f32 0.001143296, %v1958_v38  ;;  %v1896_v7 = vsel %vm9871_vm15, %v9753_v55, %v1892_v39  ;;  %v2618_v14 = vmul.f32 %v9808_v18, %v2617_v58  ;;  %v2624_v45 = vand.u32 2147483647, %v9744_v29  ;;  %v1425_v39 = vpop.f32.mrf.mxu1 }
 0x230   : > { %7838 = vrcp.f32 %v9855_v59  ;;  %v2674_v1 = vmul.f32 2.1237322e-06, %v9864_v22  ;;  %v2685_v46 = vmul.f32 3.8918573e-05, %v9864_v22  ;;  %v2146_v44 = vmul.f32 %v9891_v12, %v2126_v48 }
 0x231   : > { %v1960_v32 = vmul.f32 %v1959_v42, %v9845_v27  ;;  %vm2620_vm1 = vweird.f32 %v9744_v29  ;;  %vm2621_vm2 = vweird.f32 %v9808_v18  ;;  %v1915_v55 = vmul.f32 %v1914_v50, %v9703_v49  ;;  %v2377_v50 = vpop.f32.mrf.mxu0 }
 0x232   : > { %v9894_v15 = vpop.eup %7836  ;;  %v2641_v6 = vadd.f32 0.18741608, %v2640_v33  ;;  %v1949_v60 = vmul.f32 %v1948_v37, %v9845_v27  ;;  %v2329_v0 = vadd.f32 %v9788_v11, %v2328_v8  ;;  %v1901_v58 = vsel %vm9848_vm14, %v1900_v43, %v1896_v7  ;;  %v9913_v37 = vld [vmem:[%s8437_s25] ss:$0 sm:$0xff]  ;;  %vm9924_vm4 = vmor %vm2620_vm1, %vm2621_vm2 }
 0x233   : > { %v2656_v9 = vmul.f32 %v9894_v15, %v9843_v47  ;;  %v1961_v36 = vadd.f32 0.014752088, %v1960_v32  ;;  %vm9905_vm3 = vcmp.eq.f32.partialorder %v2624_v45, 8.507059e+37  ;;  %v2626_v38 = vand.u32 2147483648, %v9744_v29 }
 0x234   : > { %v2686_v49 = vadd.f32 0.001143296, %v2685_v46  ;;  %v2619_v33 = vadd.f32 %v9808_v18, %v2618_v14  ;;  %v2675_v20 = vadd.f32 0.00028619796, %v2674_v1  ;;  %v9916_v42 = vadd.f32 %v9913_v37, %v2146_v44 }
 0x235   : > { %v1962_v48 = vmul.f32 %v1961_v36, %v9845_v27  ;;  %v1916_v7 = vadd.f32 1.1283791, %v1915_v55  ;;  %v2642_v14 = vmul.f32 %v2641_v6, %v9711_v21  ;;  %v9931_v8 = vadd.f32 %v1425_v39, %v8924_v10 }
 0x236   : > { %13260 = vst [vmem:[#allocation62_spill] sm:$0xff] %v9916_v42  ;;  %v9918_v25 = vpop.eup %7838  ;;  %v2687_v45 = vmul.f32 %v2686_v49, %v9864_v22  ;;  %v2657_v32 = vsub.f32 1.0, %v2656_v9  ;;  %v1950_v1 = vadd.f32 0.0036580483, %v1949_v60  ;;  %3195 = vmatmul.f32.gmra.mxu3 %v9916_v42  ;;  %v9934_v44 = vadd.f32 %v2377_v50, %v2329_v0 }
 0x237   : > { %v1963_v46 = vadd.f32 0.112945676, %v1962_v48  ;;  %v9937_v29 = vmul.f32 %v1901_v58, %v9803_v62  ;;  %v2627_v36 = vor.u32 1.1754944e-38, %v2626_v38  ;;  %v9940_v55 = vmul.f32 0.5, %v9800_v4 }
 0x238   : > { %v2688_v21 = vadd.f32 0.014752088, %v2687_v45  ;;  %v2623_v10 = vsel %vm9924_vm4, %v9808_v18, %v2619_v33  ;;  %v1929_v6 = vmul.f32 %v9918_v25, %v9855_v59  ;;  %v2676_v60 = vmul.f32 %v2675_v20, %v9864_v22 }
 0x239   : > { %v1964_v9 = vmul.f32 %v1963_v46, %v9845_v27  ;;  %v9950_v0 = vmul.f32 %v1916_v7, %v9666_v51  ;;  %v2643_v62 = vadd.f32 1.1283791, %v2642_v14  ;;  %v9954_v4 = vmul.f32 0.70710677, %v9931_v8 }
 0x23a   : > { %v2689_v39 = vmul.f32 %v2688_v21, %v9864_v22  ;;  %v2658_v58 = vmul.f32 %v9894_v15, %v2657_v32  ;;  %v1951_v18 = vmul.f32 %v1950_v1, %v9845_v27  ;;  %v9959_v49 = vmul.f32 0.70710677, %v9934_v44 }
 0x23b   : > { %v1965_v38 = vadd.f32 0.4994258, %v1964_v9  ;;  %v2628_v50 = vsel %vm9905_vm3, %v2627_v36, %v2623_v10  ;;  %vm2660_vm5 = vweird.f32 %v9843_v47  ;;  %v1985_v33 = vmul.f32 %v9954_v4, %v9954_v4 }
 0x23c   : > { %v2690_v51 = vadd.f32 0.112945676, %v2689_v39  ;;  %v1930_v48 = vsub.f32 1.0, %v1929_v6  ;;  %vm2661_vm6 = vweird.f32 %v9894_v15  ;;  %v2677_v20 = vadd.f32 0.0036580483, %v2676_v60 }
 0x23d   : > { %v2712_v43 = vmul.f32 %v9959_v49, %v9959_v49  ;;  %v2666_v7 = vand.u32 2147483648, %v9843_v47  ;;  %v1966_v14 = vmul.f32 %v1965_v38, %v9845_v27  ;;  %v9972_v45 = vmin.f32 %v1985_v33, 16.0  ;;  %vm9981_vm8 = vmor %vm2660_vm5, %vm2661_vm6 }
 0x23e   : > { %v2691_v56 = vmul.f32 %v2690_v51, %v9864_v22  ;;  %v1937_v32 = vand.u32 2147483647, %v9855_v59  ;;  %v2659_v1 = vadd.f32 %v9894_v15, %v2658_v58  ;;  %v2664_v46 = vand.u32 2147483647, %v9843_v47 }
 0x23f   : > { %v1952_v36 = vadd.f32 0.05243302, %v1951_v18  ;;  %v2629_v21 = vmul.f32 %v2628_v50, %v9876_v2  ;;  %vm1933_vm7 = vweird.f32 %v9855_v59  ;;  %v1987_v9 = vmul.f32 2.1237322e-06, %v9972_v45 }
 0x240   : > { %v2692_v6 = vadd.f32 0.4994258, %v2691_v56  ;;  %v1998_v60 = vmul.f32 3.8918573e-05, %v9972_v45  ;;  %v1931_v39 = vmul.f32 %v9918_v25, %v1930_v48  ;;  %v1939_v58 = vand.u32 2147483648, %v9855_v59 }
 0x241   : > { %v2678_v18 = vmul.f32 %v2677_v20, %v9864_v22  ;;  %v9990_v2 = vmin.f32 %v2712_v43, 16.0  ;;  %v2644_v38 = vmul.f32 %v2643_v62, %v9669_v53  ;;  %v2667_v47 = vor.u32 1.1754944e-38, %v2666_v7 }
 0x242   : > { %v9993_v50 = vadd.f32 1.0, %v1966_v14  ;;  %v2693_v51 = vmul.f32 %v2692_v6, %v9864_v22  ;;  %v2663_v33 = vsel %vm9981_vm8, %v9894_v15, %v2659_v1  ;;  %vm2665_vm9 = vcmp.eq.f32.partialorder %v2664_v46, 8.507059e+37  ;;  %v10010_v46 = vld [vmem:[%s13265_s15] ss:$0 sm:$0xff] }
 0x243   : > { %v1953_v48 = vmul.f32 %v1952_v36, %v9845_v27  ;;  %v1999_v56 = vadd.f32 0.001143296, %v1998_v60  ;;  %v7462_v42 = vclamps-f32 %v2629_v21, 1.0  ;;  %vm1934_vm10 = vweird.f32 %v9918_v25 }
 0x244   : > { %v10001_v20 = vadd.f32 1.0, %v2693_v51  ;;  %v1988_v53 = vadd.f32 0.00028619796, %v1987_v9  ;;  %v1932_v62 = vadd.f32 %v9918_v25, %v1931_v39  ;;  %v2679_v43 = vadd.f32 0.05243302, %v2678_v18  ;;  %vm10025_vm12 = vmor %vm1933_vm7, %vm1934_vm10 }
 0x245   : > { %v2000_v7 = vmul.f32 %v1999_v56, %v9972_v45  ;;  %v2725_v14 = vmul.f32 3.8918573e-05, %v9990_v2  ;;  %v2668_v10 = vsel %vm2665_vm9, %v2667_v47, %v2663_v33  ;;  %7840 = vrcp.f32 %v9993_v50  ;;  %v2331_v47 = vpop.f32.mrf.mxu2 }
 0x246   : > { %v2714_v15 = vmul.f32 2.1237322e-06, %v9990_v2  ;;  %v7392_v1 = vclamps-f32 %v9417_v19, 1.0  ;;  %vm10012_vm11 = vcmp.eq.f32.partialorder %v1937_v32, 8.507059e+37  ;;  %v1940_v21 = vor.u32 1.1754944e-38, %v1939_v58 }
 0x247   : > { %v1954_v6 = vadd.f32 0.18741608, %v1953_v48  ;;  %v2001_v9 = vadd.f32 0.014752088, %v2000_v7  ;;  %v3076_v60 = vadd.f32 1.0, %v7462_v42  ;;  %v10017_v39 = vmul.f32 0.5, %v9821_v57  ;;  %v1428_v7 = vpop.f32.mrf.mxu1 }
 0x248   : > { %7842 = vrcp.f32 %v10001_v20  ;;  %v1989_v18 = vmul.f32 %v1988_v53, %v9972_v45  ;;  %v2669_v32 = vmul.f32 %v2668_v10, %v2644_v38  ;;  %v2680_v58 = vmul.f32 %v2679_v43, %v9864_v22 }
 0x249   : > { %v2002_v42 = vmul.f32 %v2001_v9, %v9972_v45  ;;  %v2726_v57 = vadd.f32 0.001143296, %v2725_v14  ;;  %v1936_v51 = vsel %vm10025_vm12, %v9918_v25, %v1932_v62  ;;  %v2715_v33 = vadd.f32 0.00028619796, %v2714_v15 }
 0x24a   : > { %v2111_v48 = vadd.f32 1.0, %v7392_v1  ;;  %v10036_v56 = vadd.f32 %v10010_v46, %v9564_v3  ;;  %v1955_v59 = vmul.f32 %v1954_v6, %v9845_v27  ;;  %v2332_v43 = vadd.f32 %v9788_v11, %v2331_v47  ;;  %v2380_v27 = vpop.f32.mrf.mxu0 }
 0x24b   : > { %v2003_v53 = vadd.f32 0.112945676, %v2002_v42  ;;  %v2727_v38 = vmul.f32 %v2726_v57, %v9990_v2  ;;  %v10041_v10 = vpop.eup %7840  ;;  %v10044_v14 = vmul.f32 %v3076_v60, %v9742_v26  ;;  %v10047_v25 = vmul.f32 0.5, %v9931_v8 }
 0x24c   : > { %13270 = vst [vmem:[#allocation63_spill] sm:$0xff] %v10036_v56  ;;  %v1990_v62 = vadd.f32 0.0036580483, %v1989_v18  ;;  %v2127_v3 = vmul.f32 %v2111_v48, %v9146_v17  ;;  %3265 = vmatmul.f32.vlgmr.msra.gmra.mxu0 %v10036_v56  ;;  %v1941_v15 = vsel %vm10012_vm11, %v1940_v21, %v1936_v51  ;;  %v7463_v1 = vclamps-f32 %v2669_v32, 1.0 }
 0x24d   : > { %13271 = vst [vmem:[#allocation64_spill] sm:$0xff] %v10047_v25  ;;  %v2681_v6 = vadd.f32 0.18741608, %v2680_v58  ;;  %v2004_v9 = vmul.f32 %v2003_v53, %v9972_v45  ;;  %v2716_v26 = vmul.f32 %v2715_v33, %v9990_v2  ;;  %v2728_v60 = vadd.f32 0.014752088, %v2727_v38 }
 0x24e   : > { %v10054_v47 = vpop.eup %7842  ;;  %v2147_v8 = vmul.f32 %v9891_v12, %v2127_v3  ;;  %v10059_v18 = vadd.f32 %v1428_v7, %v8939_v61  ;;  %v1956_v17 = vadd.f32 1.1283791, %v1955_v59  ;;  %v1969_v19 = vmul.f32 %v10041_v10, %v9993_v50 }
 0x24f   : > { %v2005_v36 = vadd.f32 0.4994258, %v2004_v9  ;;  %v10063_v21 = vadd.f32 %v2380_v27, %v2332_v43  ;;  %v10066_v32 = vmul.f32 %v1941_v15, %v9950_v0  ;;  %v1991_v58 = vmul.f32 %v1990_v62, %v9972_v45  ;;  %v3409_v15 = vld [vmem:[%s13273_s10 + $0xf8] sm:$0xff] }
 0x250   : > { %v2729_v42 = vmul.f32 %v2728_v60, %v9990_v2  ;;  %v10071_v57 = vadd.f32 %v9913_v37, %v2147_v8  ;;  %v3077_v61 = vadd.f32 1.0, %v7463_v1  ;;  %v1979_v51 = vand.u32 2147483648, %v9993_v50  ;;  %3479 = vmatpush.msra.mxu2 %v3409_v15 }
 0x251   : > { %v2682_v33 = vmul.f32 %v2681_v6, %v9864_v22  ;;  %v2696_v48 = vmul.f32 %v10054_v47, %v10001_v20  ;;  %v2006_v59 = vmul.f32 %v2005_v36, %v9972_v45  ;;  %v2717_v0 = vadd.f32 0.0036580483, %v2716_v26 }
 0x252   : > { %13272 = vst [vmem:[#allocation65_spill] sm:$0xff] %v10071_v57  ;;  %v2730_v53 = vadd.f32 0.112945676, %v2729_v42  ;;  %3198 = vmatmul.f32.gmra.mxu3 %v10071_v57  ;;  %v10080_v38 = vmul.f32 0.70710677, %v10059_v18  ;;  %v10083_v43 = vmul.f32 %v1956_v17, %v9815_v5  ;;  %v1970_v7 = vsub.f32 1.0, %v1969_v19 }
 0x253   : > { %v1977_v62 = vand.u32 2147483647, %v9993_v50  ;;  %v10087_v22 = vmul.f32 0.70710677, %v10063_v21  ;;  %v1992_v3 = vadd.f32 0.05243302, %v1991_v58  ;;  %v10095_v9 = vmul.f32 %v3077_v61, %v9879_v31 }
 0x254   : > { %v2731_v27 = vmul.f32 %v2730_v53, %v9990_v2  ;;  %v2025_v1 = vmul.f32 %v10080_v38, %v10080_v38  ;;  %v7393_v6 = vclamps-f32 %v9534_v40, 1.0  ;;  %v10097_v5 = vor.u32 1.1754944e-38, %v1979_v51 }
 0x255   : > { %v2683_v26 = vadd.f32 1.1283791, %v2682_v33  ;;  %v2697_v60 = vsub.f32 1.0, %v2696_v48  ;;  %vm1973_vm13 = vweird.f32 %v9993_v50  ;;  %vm2700_vm14 = vweird.f32 %v10001_v20 }
 0x256   : > { %v2704_v8 = vand.u32 2147483647, %v10001_v20  ;;  %v10102_v17 = vadd.f32 1.0, %v2006_v59  ;;  %v2718_v19 = vmul.f32 %v2717_v0, %v9990_v2  ;;  %v2706_v40 = vand.u32 2147483648, %v10001_v20 }
 0x257   : > { %v2732_v36 = vadd.f32 0.4994258, %v2731_v27  ;;  %v10106_v31 = vmin.f32 %v2025_v1, 16.0  ;;  %v2752_v58 = vmul.f32 %v10087_v22, %v10087_v22  ;;  %v1971_v42 = vmul.f32 %v10041_v10, %v1970_v7 }
 0x258   : > { %vm1974_vm15 = vweird.f32 %v10041_v10  ;;  %v1993_v61 = vmul.f32 %v1992_v3, %v9972_v45  ;;  %v2112_v51 = vadd.f32 1.0, %v7393_v6  ;;  %v2698_v33 = vmul.f32 %v10054_v47, %v2697_v60 }
 0x259   : > { %v2733_v48 = vmul.f32 %v2732_v36, %v9990_v2  ;;  %v2027_v59 = vmul.f32 2.1237322e-06, %v10106_v31  ;;  %v2038_v0 = vmul.f32 3.8918573e-05, %v10106_v31  ;;  %vm10117_vm1 = vcmp.eq.f32.partialorder %v1977_v62, 8.507059e+37  ;;  %vm10153_vm4 = vmor %vm1973_vm13, %vm1974_vm15 }
 0x25a   : > { %vm2701_vm2 = vweird.f32 %v10054_v47  ;;  %7844 = vrcp.f32 %v10102_v17  ;;  %v2719_v7 = vadd.f32 0.05243302, %v2718_v19  ;;  %v10123_v27 = vmin.f32 %v2752_v58, 16.0 }
 0x25b   : > { %v10125_v3 = vadd.f32 1.0, %v2733_v48  ;;  %v2028_v15 = vadd.f32 0.00028619796, %v2027_v59  ;;  %v2039_v1 = vadd.f32 0.001143296, %v2038_v0  ;;  %v2128_v6 = vmul.f32 %v2112_v51, %v9250_v23  ;;  %vm10141_vm3 = vmor %vm2700_vm14, %vm2701_vm2 }
 0x25c   : > { %v1972_v60 = vadd.f32 %v10041_v10, %v1971_v42  ;;  %v1994_v36 = vadd.f32 0.18741608, %v1993_v61  ;;  %v2754_v62 = vmul.f32 2.1237322e-06, %v10123_v27  ;;  %v2765_v57 = vmul.f32 3.8918573e-05, %v10123_v27 }
 0x25d   : > { %v2684_v13 = vmul.f32 %v2683_v26, %v9833_v35  ;;  %v2699_v56 = vadd.f32 %v10054_v47, %v2698_v33  ;;  %v10134_v19 = vmul.f32 0.5, %v9934_v44  ;;  %7846 = vrcp.f32 %v10125_v3  ;;  %v2333_v44 = vpop.f32.mrf.mxu2 }
 0x25e   : > { %v2720_v58 = vmul.f32 %v2719_v7, %v9990_v2  ;;  %v2029_v42 = vmul.f32 %v2028_v15, %v10106_v31  ;;  %v2040_v35 = vmul.f32 %v2039_v1, %v10106_v31  ;;  %v7459_v26 = vclamps-f32 %v9610_v52, 1.0  ;;  %v1430_v1 = vpop.f32.mrf.mxu1 }
 0x25f   : > { %vm10157_vm5 = vcmp.eq.f32.partialorder %v2704_v8, 8.507059e+37  ;;  %v2707_v51 = vor.u32 1.1754944e-38, %v2706_v40  ;;  %v2766_v33 = vadd.f32 0.001143296, %v2765_v57  ;;  %v2148_v48 = vmul.f32 %v9891_v12, %v2128_v6 }
 0x260   : > { %v10162_v59 = vpop.eup %7844  ;;  %v1976_v52 = vsel %vm10153_vm4, %v10041_v10, %v1972_v60  ;;  %v1995_v50 = vmul.f32 %v1994_v36, %v9972_v45  ;;  %v2041_v0 = vadd.f32 0.014752088, %v2040_v35  ;;  %v2755_v7 = vadd.f32 0.00028619796, %v2754_v62  ;;  %v2382_v45 = vpop.f32.mrf.mxu0 }
 0x261   : > { %v2703_v8 = vsel %vm10141_vm3, %v10054_v47, %v2699_v56  ;;  %v2767_v15 = vmul.f32 %v2766_v33, %v10123_v27  ;;  %v10173_v57 = vadd.f32 %v9913_v37, %v2148_v48  ;;  %v2334_v40 = vadd.f32 %v9788_v11, %v2333_v44  ;;  %v13284_v48 = vld [vmem:[#allocation55_spill] sm:$0xff] }
 0x262   : > { %v2721_v6 = vadd.f32 0.18741608, %v2720_v58  ;;  %v2030_v25 = vadd.f32 0.0036580483, %v2029_v42  ;;  %v2042_v10 = vmul.f32 %v2041_v0, %v10106_v31  ;;  %v3073_v60 = vadd.f32 1.0, %v7459_v26  ;;  %v13283_v26 = vld [vmem:[#allocation53_spill] sm:$0xff] }
 0x263   : > { %13282 = vst [vmem:[#allocation66_spill] sm:$0xff] %v10173_v57  ;;  %v10177_v36 = vpop.eup %7846  ;;  %v1981_v56 = vsel %vm10117_vm1, %v10097_v5, %v1976_v52  ;;  %v2009_v47 = vmul.f32 %v10162_v59, %v10102_v17  ;;  %v10185_v62 = vmul.f32 0.5, %v10059_v18  ;;  %v2768_v23 = vadd.f32 0.014752088, %v2767_v15  ;;  %3201 = vmatmul.f32.gmra.mxu3 %v10173_v57 }
 0x264   : > { %v2708_v58 = vsel %vm10157_vm5, %v2707_v51, %v2703_v8  ;;  %v2736_v42 = vmul.f32 %v10177_v36, %v10125_v3  ;;  %v2756_v35 = vmul.f32 %v2755_v7, %v10123_v27  ;;  %v10194_v5 = vadd.f32 %v1430_v1, %v13283_v26 }
 0x265   : > { %v1996_v53 = vadd.f32 1.1283791, %v1995_v50  ;;  %v2043_v44 = vadd.f32 0.112945676, %v2042_v10  ;;  %v2769_v18 = vmul.f32 %v2768_v23, %v10123_v27  ;;  %v10197_v61 = vadd.f32 %v2382_v45, %v2334_v40  ;;  %v10207_v40 = vld [vmem:[%s13172_s8] ss:$0 sm:$0xff] }
 0x266   : > { %v10200_v33 = vmul.f32 %v1981_v56, %v10083_v43  ;;  %v2722_v20 = vmul.f32 %v2721_v6, %v9990_v2  ;;  %v2031_v51 = vmul.f32 %v2030_v25, %v10106_v31  ;;  %v3089_v52 = vmul.f32 %v3073_v60, %v13284_v48  ;;  %v3408_v60 = vld [vmem:[%s13273_s10 + $0xf0] sm:$0xff] }
 0x267   : > { %v2709_v0 = vmul.f32 %v2708_v58, %v2684_v13  ;;  %v2010_v7 = vsub.f32 1.0, %v2009_v47  ;;  %v2044_v50 = vmul.f32 %v2043_v44, %v10106_v31  ;;  %v2770_v8 = vadd.f32 0.112945676, %v2769_v18  ;;  %v3393_v13 = vld [vmem:[%s13273_s10 + $0x78] sm:$0xff]  ;;  %3480 = vmatpush.msra.mxu2 %v3408_v60 }
 0x268   : > { %v2737_v15 = vsub.f32 1.0, %v2736_v42  ;;  %v2757_v1 = vadd.f32 0.0036580483, %v2756_v35  ;;  %v3109_v43 = vmul.f32 %v10207_v40, %v3089_v52  ;;  %v10211_v10 = vmul.f32 0.70710677, %v10194_v5  ;;  %3414 = vmatpush.msra.mxu1 %v3393_v13 }
 0x269   : > { %v10214_v2 = vmul.f32 %v1996_v53, %v9954_v4  ;;  %v2045_v25 = vadd.f32 0.4994258, %v2044_v50  ;;  %v2771_v6 = vmul.f32 %v2770_v8, %v10123_v27  ;;  %v10220_v45 = vmul.f32 0.70710677, %v10197_v61 }
 0x26a   : > { %vm2013_vm6 = vweird.f32 %v10102_v17  ;;  %v2017_v56 = vand.u32 2147483647, %v10102_v17  ;;  %v2019_v47 = vand.u32 2147483648, %v10102_v17  ;;  %v2032_v23 = vadd.f32 0.05243302, %v2031_v51 }
 0x26b   : > { %v10226_v58 = vadd.f32 %v10010_v46, %v3109_v43  ;;  %v2046_v4 = vmul.f32 %v2045_v25, %v10106_v31  ;;  %v2772_v42 = vadd.f32 0.4994258, %v2771_v6  ;;  %v2065_v35 = vmul.f32 %v10211_v10, %v10211_v10 }
 0x26c   : > { %v7394_v26 = vclamps-f32 %v9698_v24, 1.0  ;;  %v7464_v53 = vclamps-f32 %v2709_v0, 1.0  ;;  %v2011_v44 = vmul.f32 %v10162_v59, %v2010_v7  ;;  %v2723_v18 = vadd.f32 1.1283791, %v2722_v20 }
 0x26d   : > { %13285 = vst [vmem:[#allocation53_spill] sm:$0xff] %v10226_v58  ;;  %3268 = vmatmul.f32.gmra.mxu0 %v10226_v58  ;;  %v2792_v51 = vmul.f32 %v10220_v45, %v10220_v45  ;;  %v2738_v48 = vmul.f32 %v10177_v36, %v2737_v15  ;;  %vm2740_vm7 = vweird.f32 %v10125_v3  ;;  %v2758_v52 = vmul.f32 %v2757_v1, %v10123_v27 }
 0x26e   : > { %v2773_v50 = vmul.f32 %v2772_v42, %v10123_v27  ;;  %vm2741_vm8 = vweird.f32 %v10177_v36  ;;  %v2744_v24 = vand.u32 2147483647, %v10125_v3  ;;  %v2746_v0 = vand.u32 2147483648, %v10125_v3 }
 0x26f   : > { %v10243_v20 = vmin.f32 %v2065_v35, 16.0  ;;  %v2033_v7 = vmul.f32 %v2032_v23, %v10106_v31  ;;  %v10246_v8 = vadd.f32 1.0, %v2046_v4  ;;  %v10248_v43 = vmin.f32 %v2792_v51, 16.0  ;;  %vm10262_vm10 = vmor %vm2740_vm7, %vm2741_vm8 }
 0x270   : > { %v2113_v15 = vadd.f32 1.0, %v7394_v26  ;;  %v2012_v25 = vadd.f32 %v10162_v59, %v2011_v44  ;;  %vm2014_vm9 = vweird.f32 %v10162_v59  ;;  %v10252_v1 = vadd.f32 1.0, %v2773_v50 }
 0x271   : > { %v2067_v6 = vmul.f32 2.1237322e-06, %v10243_v20  ;;  %v2739_v13 = vadd.f32 %v10177_v36, %v2738_v48  ;;  %v2759_v60 = vadd.f32 0.05243302, %v2758_v52  ;;  %v2078_v42 = vmul.f32 3.8918573e-05, %v10243_v20  ;;  %vm10273_vm12 = vmor %vm2013_vm6, %vm2014_vm9 }
 0x272   : > { %v2794_v23 = vmul.f32 2.1237322e-06, %v10248_v43  ;;  %v3078_v4 = vadd.f32 1.0, %v7464_v53  ;;  %v2020_v35 = vor.u32 1.1754944e-38, %v2019_v47  ;;  %vm10266_vm11 = vcmp.eq.f32.partialorder %v2744_v24, 8.507059e+37 }
 0x273   : > { %7848 = vrcp.f32 %v10252_v1  ;;  %v2747_v47 = vor.u32 1.1754944e-38, %v2746_v0  ;;  %v2034_v53 = vadd.f32 0.18741608, %v2033_v7  ;;  %v2129_v3 = vmul.f32 %v2113_v15, %v9385_v41 }
 0x274   : > { %7850 = vrcp.f32 %v10246_v8  ;;  %v2016_v48 = vsel %vm10273_vm12, %v10162_v59, %v2012_v25  ;;  %v2068_v52 = vadd.f32 0.00028619796, %v2067_v6  ;;  %v2079_v50 = vadd.f32 0.001143296, %v2078_v42 }
 0x275   : > { %v2805_v24 = vmul.f32 3.8918573e-05, %v10248_v43  ;;  %v2743_v17 = vsel %vm10262_vm10, %v10177_v36, %v2739_v13  ;;  %v2760_v57 = vmul.f32 %v2759_v60, %v10123_v27  ;;  %v2795_v0 = vadd.f32 0.00028619796, %v2794_v23 }
 0x276   : > { %v2149_v7 = vmul.f32 %v9891_v12, %v2129_v3  ;;  %v10289_v58 = vmul.f32 %v3078_v4, %v10017_v39  ;;  %vm2018_vm13 = vcmp.eq.f32.partialorder %v2017_v56, 8.507059e+37  ;;  %v2724_v41 = vmul.f32 %v2723_v18, %v9959_v49  ;;  %v2336_v49 = vpop.f32.mrf.mxu2 }
 0x277   : > { %v2080_v59 = vmul.f32 %v2079_v50, %v10243_v20  ;;  %v2021_v15 = vsel %vm2018_vm13, %v2020_v35, %v2016_v48  ;;  %v2035_v25 = vmul.f32 %v2034_v53, %v10106_v31  ;;  %v2806_v6 = vadd.f32 0.001143296, %v2805_v24  ;;  %v2385_v48 = vpop.f32.mrf.mxu3 }
 0x278   : > { %v10295_v42 = vadd.f32 %v9913_v37, %v2149_v7  ;;  %v2748_v13 = vsel %vm10266_vm11, %v2747_v47, %v2743_v17  ;;  %v2069_v39 = vmul.f32 %v2068_v52, %v10243_v20  ;;  %v7460_v56 = vclamps-f32 %v9725_v28, 1.0 }
 0x279   : > { %v10297_v36 = vpop.eup %7848  ;;  %v2081_v60 = vadd.f32 0.014752088, %v2080_v59  ;;  %v2761_v23 = vadd.f32 0.18741608, %v2760_v57  ;;  %v2796_v4 = vmul.f32 %v2795_v0, %v10248_v43  ;;  %v2807_v35 = vmul.f32 %v2806_v6, %v10248_v43 }
 0x27a   : > { %v10303_v18 = vpop.eup %7850  ;;  %v2776_v31 = vmul.f32 %v10297_v36, %v10252_v1  ;;  %3204 = vmatmul.f32.gmra.mxu3 %v10295_v42  ;;  %v10311_v26 = vmul.f32 %v2021_v15, %v10214_v2  ;;  %v10314_v44 = vmul.f32 0.5, %v10063_v21  ;;  %v3074_v51 = vadd.f32 1.0, %v7460_v56  ;;  %v3392_v15 = vld [vmem:[%s13273_s10 + $0x70] sm:$0xff] }
 0x27b   : > { %v2082_v28 = vmul.f32 %v2081_v60, %v10243_v20  ;;  %v2749_v57 = vmul.f32 %v2748_v13, %v2724_v41  ;;  %v2036_v47 = vadd.f32 1.1283791, %v2035_v25  ;;  %v2808_v53 = vadd.f32 0.014752088, %v2807_v35  ;;  %3415 = vmatpush.msra.mxu1 %v3392_v15 }
 0x27c   : > { %v2337_v3 = vadd.f32 %v9788_v11, %v2336_v49  ;;  %v2049_v52 = vmul.f32 %v10303_v18, %v10246_v8  ;;  %v2070_v50 = vadd.f32 0.0036580483, %v2069_v39  ;;  %v3090_v2 = vmul.f32 %v3074_v51, %v9501_v16 }
 0x27d   : > { %v2083_v24 = vadd.f32 0.112945676, %v2082_v28  ;;  %v2762_v21 = vmul.f32 %v2761_v23, %v10123_v27  ;;  %v2777_v17 = vsub.f32 1.0, %v2776_v31  ;;  %v2797_v0 = vadd.f32 0.0036580483, %v2796_v4  ;;  %v3407_v23 = vld [vmem:[%s13273_s10 + $0xe8] sm:$0xff] }
 0x27e   : > { %v2809_v7 = vmul.f32 %v2808_v53, %v10248_v43  ;;  %v10324_v41 = vmul.f32 0.5, %v10194_v5  ;;  %v3110_v25 = vmul.f32 %v10207_v40, %v3090_v2  ;;  %v10329_v6 = vadd.f32 %v2385_v48, %v2337_v3  ;;  %3481 = vmatpush.msra.mxu2 %v3407_v23 }
 0x27f   : > { %v2084_v59 = vmul.f32 %v2083_v24, %v10243_v20  ;;  %v10332_v13 = vmul.f32 %v2036_v47, %v10080_v38  ;;  %v2057_v16 = vand.u32 2147483647, %v10246_v8  ;;  %v2059_v27 = vand.u32 2147483648, %v10246_v8  ;;  %v2338_v47 = vpop.f32.mrf.mxu2 }
 0x280   : > { %v2810_v39 = vadd.f32 0.112945676, %v2809_v7  ;;  %v7465_v60 = vclamps-f32 %v2749_v57, 1.0  ;;  %v2050_v56 = vsub.f32 1.0, %v2049_v52  ;;  %v2071_v5 = vmul.f32 %v2070_v50, %v10243_v20 }
 0x281   : > { %v10338_v49 = vadd.f32 %v10010_v46, %v3110_v25  ;;  %v2763_v31 = vadd.f32 1.1283791, %v2762_v21  ;;  %v2778_v4 = vmul.f32 %v10297_v36, %v2777_v17  ;;  %v2798_v38 = vmul.f32 %v2797_v0, %v10248_v43 }
 0x282   : > { %v2811_v35 = vmul.f32 %v2810_v39, %v10248_v43  ;;  %vm2780_vm14 = vweird.f32 %v10252_v1  ;;  %v2784_v28 = vand.u32 2147483647, %v10252_v1  ;;  %v2085_v51 = vadd.f32 0.4994258, %v2084_v59  ;;  %v2387_v59 = vpop.f32.mrf.mxu3 }
 0x283   : > { %3271 = vmatmul.f32.gmra.mxu0 %v10338_v49  ;;  %v10348_v57 = vmul.f32 0.70710677, %v10329_v6  ;;  %vm2781_vm15 = vweird.f32 %v10297_v36  ;;  %v2786_v53 = vand.u32 2147483648, %v10252_v1  ;;  %v7395_v48 = vclamps-f32 %v9836_v63, 1.0 }
 0x284   : > { %v2812_v3 = vadd.f32 0.4994258, %v2811_v35  ;;  %v2051_v52 = vmul.f32 %v10303_v18, %v2050_v56  ;;  %v2072_v50 = vadd.f32 0.05243302, %v2071_v5  ;;  %v7461_v2 = vclamps-f32 %v9859_v34, 1.0  ;;  %vm10364_vm2 = vmor %vm2780_vm14, %vm2781_vm15 }
 0x285   : > { %v2832_v24 = vmul.f32 %v10348_v57, %v10348_v57  ;;  %v2779_v21 = vadd.f32 %v10297_v36, %v2778_v4  ;;  %v2799_v17 = vadd.f32 0.05243302, %v2798_v38  ;;  %v2114_v7 = vadd.f32 1.0, %v7395_v48 }
 0x286   : > { %v2813_v0 = vmul.f32 %v2812_v3, %v10248_v43  ;;  %v3079_v15 = vadd.f32 1.0, %v7465_v60  ;;  %vm2053_vm1 = vweird.f32 %v10246_v8  ;;  %v2060_v25 = vor.u32 1.1754944e-38, %v2059_v27 }
 0x287   : > { %v2086_v34 = vmul.f32 %v2085_v51, %v10243_v20  ;;  %vm10369_vm3 = vcmp.eq.f32.partialorder %v2057_v16, 8.507059e+37  ;;  %v2764_v56 = vmul.f32 %v2763_v31, %v10087_v22  ;;  %vm10374_vm4 = vcmp.eq.f32.partialorder %v2784_v28, 8.507059e+37 }
 0x288   : > { %v10378_v27 = vadd.f32 1.0, %v2813_v0  ;;  %v10380_v5 = vmin.f32 %v2832_v24, 16.0  ;;  %v2787_v1 = vor.u32 1.1754944e-38, %v2786_v53  ;;  %v2073_v23 = vmul.f32 %v2072_v50, %v10243_v20 }
 0x289   : > { %v2130_v4 = vmul.f32 %v2114_v7, %v9559_v54  ;;  %v3075_v38 = vadd.f32 1.0, %v7461_v2  ;;  %v2052_v16 = vadd.f32 %v10303_v18, %v2051_v52  ;;  %vm2054_vm5 = vweird.f32 %v10303_v18  ;;  %v13298_v54 = vld [vmem:[#allocation60_spill] sm:$0xff] }
 0x28a   : > { %v2783_v22 = vsel %vm10364_vm2, %v10297_v36, %v2779_v21  ;;  %v2800_v31 = vmul.f32 %v2799_v17, %v10248_v43  ;;  %v10390_v35 = vadd.f32 1.0, %v2086_v34  ;;  %v2834_v28 = vmul.f32 2.1237322e-06, %v10380_v5  ;;  %vm10401_vm6 = vmor %vm2053_vm1, %vm2054_vm5  ;;  %v2341_v17 = vpop.f32.mrf.mxu2  ;;  %v3391_v34 = vld [vmem:[%s13273_s10 + $0x68] sm:$0xff] }
 0x28b   : > { %v2845_v51 = vmul.f32 3.8918573e-05, %v10380_v5  ;;  %v2150_v53 = vmul.f32 %v9891_v12, %v2130_v4  ;;  %7852 = vrcp.f32 %v10378_v27  ;;  %v3091_v3 = vmul.f32 %v3075_v38, %v13298_v54  ;;  %3416 = vmatpush.msra.mxu1 %v3391_v34 }
 0x28c   : > { %v2339_v48 = vadd.f32 %v9788_v11, %v2338_v47  ;;  %v7396_v52 = vclamps-f32 %v9937_v29, 1.0  ;;  %v2074_v50 = vadd.f32 0.18741608, %v2073_v23  ;;  %v2835_v24 = vadd.f32 0.00028619796, %v2834_v28 }
 0x28d   : > { %v2846_v2 = vadd.f32 0.001143296, %v2845_v51  ;;  %v10406_v21 = vadd.f32 %v9913_v37, %v2150_v53  ;;  %v2056_v0 = vsel %vm10401_vm6, %v10303_v18, %v2052_v16  ;;  %v2801_v47 = vadd.f32 0.18741608, %v2800_v31  ;;  %v13301_v53 = vld [vmem:[#allocation58_spill] sm:$0xff] }
 0x28e   : > { %v3111_v29 = vmul.f32 %v10207_v40, %v3091_v3  ;;  %v10412_v7 = vadd.f32 %v2387_v59, %v2339_v48  ;;  %v2788_v8 = vsel %vm10374_vm4, %v2787_v1, %v2783_v22  ;;  %7854 = vrcp.f32 %v10390_v35  ;;  %v2390_v1 = vpop.f32.mrf.mxu3 }
 0x28f   : > { %v2847_v63 = vmul.f32 %v2846_v2, %v10380_v5  ;;  %3207 = vmatmul.f32.gmra.mxu3 %v10406_v21  ;;  %v2115_v23 = vadd.f32 1.0, %v7396_v52  ;;  %v2836_v4 = vmul.f32 %v2835_v24, %v10380_v5  ;;  %v2342_v60 = vadd.f32 %v9788_v11, %v2341_v17  ;;  %v3406_v24 = vld [vmem:[%s13273_s10 + $0xe0] sm:$0xff] }
 0x290   : > { %v10422_v18 = vadd.f32 %v10010_v46, %v3111_v29  ;;  %v10425_v59 = vmul.f32 0.70710677, %v10412_v7  ;;  %v10429_v38 = vmul.f32 %v3079_v15, %v10134_v19  ;;  %v2061_v16 = vsel %vm10369_vm3, %v2060_v25, %v2056_v0  ;;  %3482 = vmatpush.msra.mxu2 %v3406_v24 }
 0x291   : > { %v2075_v22 = vmul.f32 %v2074_v50, %v10243_v20  ;;  %v2848_v31 = vadd.f32 0.014752088, %v2847_v63  ;;  %v10434_v28 = vpop.eup %7852  ;;  %v10437_v51 = vmul.f32 0.5, %v10197_v61  ;;  %v2131_v19 = vmul.f32 %v2115_v23, %v13301_v53 }
 0x292   : > { %3274 = vmatmul.f32.gmra.mxu0 %v10422_v18  ;;  %v2872_v11 = vmul.f32 %v10425_v59, %v10425_v59  ;;  %v3112_v15 = vmul.f32 %v10207_v40, %v10044_v14  ;;  %v10445_v25 = vmul.f32 %v2788_v8, %v2764_v56  ;;  %v2802_v20 = vmul.f32 %v2801_v47, %v10248_v43 }
 0x293   : > { %v2849_v39 = vmul.f32 %v2848_v31, %v10380_v5  ;;  %v10449_v54 = vadd.f32 %v2390_v1, %v2342_v60  ;;  %v10452_v61 = vmul.f32 %v2061_v16, %v10332_v13  ;;  %v2837_v3 = vadd.f32 0.0036580483, %v2836_v4  ;;  %v3390_v60 = vld [vmem:[%s13273_s10 + $0x60] sm:$0xff]  ;;  %v2343_v31 = vpop.f32.mrf.mxu2 }
 0x294   : > { %v10454_v48 = vmin.f32 %v2872_v11, 16.0  ;;  %v2151_v52 = vmul.f32 %v9891_v12, %v2131_v19  ;;  %v10457_v36 = vpop.eup %7854  ;;  %v2076_v50 = vadd.f32 1.1283791, %v2075_v22  ;;  %v2816_v14 = vmul.f32 %v10434_v28, %v10378_v27  ;;  %3417 = vmatpush.msra.mxu1 %v3390_v60 }
 0x295   : > { %v2850_v43 = vadd.f32 0.112945676, %v2849_v39  ;;  %v10462_v56 = vmul.f32 0.70710677, %v10449_v54  ;;  %v10468_v17 = vadd.f32 %v10010_v46, %v3112_v15  ;;  %v7397_v0 = vclamps-f32 %v10066_v32, 1.0  ;;  %v3389_v15 = vld [vmem:[%s13273_s10 + $0x58] sm:$0xff] }
 0x296   : > { %v2874_v13 = vmul.f32 2.1237322e-06, %v10454_v48  ;;  %v2885_v2 = vmul.f32 3.8918573e-05, %v10454_v48  ;;  %v7466_v47 = vclamps-f32 %v10445_v25, 1.0  ;;  %v10473_v8 = vmul.f32 0.5, %v10329_v6  ;;  %3418 = vmatpush.msra.mxu1 %v3389_v15 }
 0x297   : > { %v2803_v29 = vadd.f32 1.1283791, %v2802_v20  ;;  %v2851_v63 = vmul.f32 %v2850_v43, %v10380_v5  ;;  %v2838_v34 = vmul.f32 %v2837_v3, %v10380_v5  ;;  %v10479_v1 = vadd.f32 %v9913_v37, %v2151_v52 }
 0x298   : > { %v2875_v23 = vadd.f32 0.00028619796, %v2874_v13  ;;  %v2886_v4 = vadd.f32 0.001143296, %v2885_v2  ;;  %v2089_v32 = vmul.f32 %v10457_v36, %v10390_v35  ;;  %v2817_v16 = vsub.f32 1.0, %v2816_v14 }
 0x299   : > { %v2852_v22 = vadd.f32 0.4994258, %v2851_v63  ;;  %v2912_v6 = vmul.f32 %v10462_v56, %v10462_v56  ;;  %v10486_v11 = vmul.f32 %v2076_v50, %v10211_v10  ;;  %v2097_v53 = vand.u32 2147483647, %v10390_v35  ;;  %3210 = vmatmul.f32.gmra.mxu3 %v10479_v1  ;;  %v2392_v63 = vpop.f32.mrf.mxu3 }
 0x29a   : > { %v2887_v19 = vmul.f32 %v2886_v4, %v10454_v48  ;;  %3277 = vmatmul.f32.gmra.mxu0 %v10468_v17  ;;  %v2116_v25 = vadd.f32 1.0, %v7397_v0  ;;  %v2099_v20 = vand.u32 2147483648, %v10390_v35  ;;  %v2824_v39 = vand.u32 2147483647, %v10378_v27 }
 0x29b   : > { %v2853_v3 = vmul.f32 %v2852_v22, %v10380_v5  ;;  %v10496_v52 = vmin.f32 %v2912_v6, 16.0  ;;  %v2839_v10 = vadd.f32 0.05243302, %v2838_v34  ;;  %v2876_v50 = vmul.f32 %v2875_v23, %v10454_v48 }
 0x29c   : > { %v2888_v14 = vadd.f32 0.014752088, %v2887_v19  ;;  %v2132_v43 = vmul.f32 %v2116_v25, %v9806_v30  ;;  %v2090_v24 = vsub.f32 1.0, %v2089_v32  ;;  %v2818_v13 = vmul.f32 %v10434_v28, %v2817_v16  ;;  %v3388_v32 = vld [vmem:[%s13273_s10 + $0x50] sm:$0xff] }
 0x29d   : > { %v2826_v2 = vand.u32 2147483648, %v10378_v27  ;;  %v10502_v0 = vadd.f32 1.0, %v2853_v3  ;;  %v2914_v60 = vmul.f32 2.1237322e-06, %v10496_v52  ;;  %v2925_v34 = vmul.f32 3.8918573e-05, %v10496_v52  ;;  %3419 = vmatpush.msra.mxu1 %v3388_v32 }
 0x29e   : > { %v2889_v4 = vmul.f32 %v2888_v14, %v10454_v48  ;;  %v2152_v23 = vmul.f32 %v9891_v12, %v2132_v43  ;;  %vm2820_vm7 = vweird.f32 %v10378_v27  ;;  %vm2821_vm8 = vweird.f32 %v10434_v28  ;;  %v2346_v43 = vpop.f32.mrf.mxu2 }
 0x29f   : > { %7856 = vrcp.f32 %v10502_v0  ;;  %v3113_v30 = vmul.f32 %v10207_v40, %v10095_v9  ;;  %v3080_v16 = vadd.f32 1.0, %v7466_v47  ;;  %v2840_v22 = vmul.f32 %v2839_v10, %v10380_v5  ;;  %vm10526_vm10 = vmor %vm2820_vm7, %vm2821_vm8 }
 0x2a0   : > { %v2877_v6 = vadd.f32 0.0036580483, %v2876_v50  ;;  %v10516_v19 = vadd.f32 %v9913_v37, %v2152_v23  ;;  %vm2093_vm9 = vweird.f32 %v10390_v35  ;;  %v2804_v12 = vmul.f32 %v2803_v29, %v10220_v45  ;;  %v3405_v29 = vld [vmem:[%s13273_s10 + $0xd8] sm:$0xff] }
 0x2a1   : > { %v2819_v15 = vadd.f32 %v10434_v28, %v2818_v13  ;;  %v2890_v25 = vadd.f32 0.112945676, %v2889_v4  ;;  %v2926_v3 = vadd.f32 0.001143296, %v2925_v34  ;;  %v2091_v9 = vmul.f32 %v10457_v36, %v2090_v24  ;;  %3483 = vmatpush.msra.mxu2 %v3405_v29  ;;  %v10544_v13 = vld [vmem:[%s13173_s3] ss:$0 sm:$0xff]  ;;  %v2395_v29 = vpop.f32.mrf.mxu3 }
 0x2a2   : > { %13302 = vst [vmem:[#allocation55_spill] sm:$0xff] %v10516_v19  ;;  %vm10530_vm11 = vcmp.eq.f32.partialorder %v2824_v39, 8.507059e+37  ;;  %v2827_v45 = vor.u32 1.1754944e-38, %v2826_v2  ;;  %v2915_v10 = vadd.f32 0.00028619796, %v2914_v60  ;;  %3213 = vmatmul.f32.gmra.mxu3 %v10516_v19  ;;  %vm2094_vm12 = vweird.f32 %v10457_v36  ;;  %s7034_s3 = sshll.u32 %s10845_s27, 4  ;;  %s7035_s3 = int_to_ptr.vmem [resolvable:$true] %s7034_s3 }
 0x2a3   : > { %v2891_v50 = vmul.f32 %v2890_v25, %v10454_v48  ;;  %v2927_v27 = vmul.f32 %v2926_v3, %v10496_v52  ;;  %v10540_v14 = vadd.f32 %v10010_v46, %v3113_v30  ;;  %v2841_v39 = vadd.f32 0.18741608, %v2840_v22  ;;  %v3387_v25 = vld [vmem:[%s13273_s10 + $0x48] sm:$0xff]  ;;  %vm10584_vm13 = vmor %vm2093_vm9, %vm2094_vm12 }
 0x2a4   : > { %v2878_v24 = vmul.f32 %v2877_v6, %v10454_v48  ;;  %v2344_v2 = vadd.f32 %v10544_v13, %v2343_v31  ;;  %v7398_v4 = vclamps-f32 %v10200_v33, 1.0  ;;  %v2823_v34 = vsel %vm10526_vm10, %v10434_v28, %v2819_v15  ;;  %3420 = vmatpush.msra.mxu1 %v3387_v25 }
 0x2a5   : > { %13307 = vst [vmem:[#allocation60_spill] sm:$0xff] %v10540_v14  ;;  %v10548_v60 = vpop.eup %7856  ;;  %v2892_v23 = vadd.f32 0.4994258, %v2891_v50  ;;  %v2928_v30 = vadd.f32 0.014752088, %v2927_v27  ;;  %3280 = vmatmul.f32.gmra.mxu0 %v10540_v14  ;;  %v3114_v32 = vmul.f32 %v10207_v40, %v10289_v58  ;;  %v10557_v22 = vadd.f32 %v10457_v36, %v2091_v9 }
 0x2a6   : > { %v2916_v31 = vmul.f32 %v2915_v10, %v10496_v52  ;;  %v10560_v6 = vadd.f32 %v2392_v63, %v2344_v2  ;;  %v2347_v33 = vadd.f32 %v10544_v13, %v2346_v43  ;;  %v2856_v28 = vmul.f32 %v10548_v60, %v10502_v0  ;;  %v10690_v14 = vld [vmem:[%s13265_s15] ss:$0 sm:$0xff] }
 0x2a7   : > { %v2893_v15 = vmul.f32 %v2892_v23, %v10454_v48  ;;  %v2929_v3 = vmul.f32 %v2928_v30, %v10496_v52  ;;  %v2117_v47 = vadd.f32 1.0, %v7398_v4  ;;  %v2828_v58 = vsel %vm10530_vm11, %v2827_v45, %v2823_v34 }
 0x2a8   : > { %v2842_v9 = vmul.f32 %v2841_v39, %v10380_v5  ;;  %v2879_v63 = vadd.f32 0.05243302, %v2878_v24  ;;  %v10572_v10 = vmul.f32 0.70710677, %v10560_v6  ;;  %v10578_v2 = vadd.f32 %v10010_v46, %v3114_v32 }
 0x2a9   : > { %v10574_v50 = vadd.f32 1.0, %v2893_v15  ;;  %v2930_v27 = vadd.f32 0.112945676, %v2929_v3  ;;  %v2133_v43 = vmul.f32 %v2117_v47, %v9940_v55  ;;  %v10590_v5 = vor.u32 1.1754944e-38, %v2099_v20 }
 0x2aa   : > { %13308 = vst [vmem:[#allocation58_spill] sm:$0xff] %v10578_v2  ;;  %v2917_v45 = vadd.f32 0.0036580483, %v2916_v31  ;;  %v2952_v55 = vmul.f32 %v10572_v10, %v10572_v10  ;;  %v10594_v39 = vadd.f32 %v2395_v29, %v2347_v33  ;;  %v10597_v46 = vmul.f32 %v3080_v16, %v10314_v44  ;;  %v3404_v44 = vld [vmem:[%s13273_s10 + $0xd0] sm:$0xff]  ;;  %v10616_v31 = vld [vmem:[%s8432_s21] ss:$0 sm:$0xff] }
 0x2ab   : > { %v2857_v4 = vsub.f32 1.0, %v2856_v28  ;;  %7858 = vrcp.f32 %v10574_v50  ;;  %v10604_v20 = vmul.f32 %v2828_v58, %v2804_v12  ;;  %v10607_v34 = vmul.f32 0.5, %v10412_v7  ;;  %3484 = vmatpush.msra.mxu2 %v3404_v44  ;;  %v10629_v29 = vld [vmem:[%s8437_s25] ss:$0 sm:$0xff] }
 0x2ac   : > { %v2880_v23 = vmul.f32 %v2879_v63, %v10454_v48  ;;  %v2931_v30 = vmul.f32 %v2930_v27, %v10496_v52  ;;  %v2843_v16 = vadd.f32 1.1283791, %v2842_v9  ;;  %vm2860_vm14 = vweird.f32 %v10502_v0  ;;  %v3386_v9 = vld [vmem:[%s13273_s10 + $0x40] sm:$0xff] }
 0x2ad   : > { %v10613_v32 = vmin.f32 %v2952_v55, 16.0  ;;  %v2153_v12 = vmul.f32 %v10616_v31, %v2133_v43  ;;  %3283 = vmatmul.f32.gmra.mxu0 %v10578_v2  ;;  %v2864_v7 = vand.u32 2147483647, %v10502_v0  ;;  %v2918_v33 = vmul.f32 %v2917_v45, %v10496_v52  ;;  %3421 = vmatpush.msra.mxu1 %v3386_v9  ;;  %v2397_v2 = vpop.f32.mrf.mxu3 }
 0x2ae   : > { %v2932_v25 = vadd.f32 0.4994258, %v2931_v30  ;;  %v10623_v28 = vmul.f32 0.70710677, %v10594_v39  ;;  %v2858_v15 = vmul.f32 %v10548_v60, %v2857_v4  ;;  %v2866_v63 = vand.u32 2147483648, %v10502_v0 }
 0x2af   : > { %v2954_v3 = vmul.f32 2.1237322e-06, %v10613_v32  ;;  %v2965_v47 = vmul.f32 3.8918573e-05, %v10613_v32  ;;  %v10632_v58 = vadd.f32 %v10629_v29, %v2153_v12  ;;  %v2881_v27 = vadd.f32 0.18741608, %v2880_v23 }
 0x2b0   : > { %v2933_v43 = vmul.f32 %v2932_v25, %v10496_v52  ;;  %v2992_v45 = vmul.f32 %v10623_v28, %v10623_v28  ;;  %vm2861_vm15 = vweird.f32 %v10548_v60  ;;  %v7399_v44 = vclamps-f32 %v10311_v26, 1.0 }
 0x2b1   : > { %13311 = vst [vmem:[#allocation67_spill] sm:$0xff] %v10632_v58  ;;  %v10639_v55 = vpop.eup %7858  ;;  %v2955_v4 = vadd.f32 0.00028619796, %v2954_v3  ;;  %v2966_v30 = vadd.f32 0.001143296, %v2965_v47  ;;  %3216 = vmatmul.f32.gmra.mxu3 %v10632_v58  ;;  %vm10646_vm1 = vcmp.eq.f32.partialorder %v2097_v53, 8.507059e+37  ;;  %v2844_v25 = vmul.f32 %v2843_v16, %v10348_v57  ;;  %vm10662_vm2 = vmor %vm2860_vm14, %vm2861_vm15  ;;  %v2348_v58 = vpop.f32.mrf.mxu2 }
 0x2b2   : > { %v7467_v12 = vclamps-f32 %v10604_v20, 1.0  ;;  %v2896_v9 = vmul.f32 %v10639_v55, %v10574_v50  ;;  %v2919_v3 = vadd.f32 0.05243302, %v2918_v33  ;;  %v2859_v47 = vadd.f32 %v10548_v60, %v2858_v15 }
 0x2b3   : > { %v10655_v24 = vadd.f32 1.0, %v2933_v43  ;;  %v2967_v26 = vmul.f32 %v2966_v30, %v10613_v32  ;;  %v10658_v35 = vmin.f32 %v2992_v45, 16.0  ;;  %vm10666_vm3 = vcmp.eq.f32.partialorder %v2864_v7, 8.507059e+37  ;;  %v3385_v45 = vld [vmem:[%s13273_s10 + $0x38] sm:$0xff] }
 0x2b4   : > { %v2897_v20 = vsub.f32 1.0, %v2896_v9  ;;  %v2956_v16 = vmul.f32 %v2955_v4, %v10613_v32  ;;  %v2118_v33 = vadd.f32 1.0, %v7399_v44  ;;  %v2867_v15 = vor.u32 1.1754944e-38, %v2866_v63  ;;  %3422 = vmatpush.msra.mxu1 %v3385_v45 }
 0x2b5   : > { %v2882_v43 = vmul.f32 %v2881_v27, %v10454_v48  ;;  %7860 = vrcp.f32 %v10655_v24  ;;  %v3115_v0 = vmul.f32 %v10207_v40, %v10429_v38  ;;  %vm2900_vm4 = vweird.f32 %v10574_v50 }
 0x2b6   : > { %v2898_v30 = vmul.f32 %v10639_v55, %v2897_v20  ;;  %v2904_v7 = vand.u32 2147483647, %v10574_v50  ;;  %v2968_v9 = vadd.f32 0.014752088, %v2967_v26  ;;  %v2863_v48 = vsel %vm10662_vm2, %v10548_v60, %v2859_v47  ;;  %v13318_v20 = vld [vmem:[#allocation64_spill] sm:$0xff]  ;;  %v3384_v47 = vld [vmem:[%s13273_s10 + $0x30] sm:$0xff] }
 0x2b7   : > { %v2920_v63 = vmul.f32 %v2919_v3, %v10496_v52  ;;  %v2994_v38 = vmul.f32 2.1237322e-06, %v10658_v35  ;;  %v3005_v27 = vmul.f32 3.8918573e-05, %v10658_v35  ;;  %vm2901_vm5 = vweird.f32 %v10639_v55  ;;  %3423 = vmatpush.msra.mxu1 %v3384_v47  ;;  %v3381_v47 = vld [vmem:[%s13273_s10 + $0x18] sm:$0xff] }
 0x2b8   : > { %v2957_v4 = vadd.f32 0.0036580483, %v2956_v16  ;;  %v2969_v44 = vmul.f32 %v2968_v9, %v10613_v32  ;;  %v2134_v26 = vmul.f32 %v2118_v33, %v13318_v20  ;;  %v2906_v45 = vand.u32 2147483648, %v10574_v50  ;;  %vm10715_vm6 = vmor %vm2900_vm4, %vm2901_vm5  ;;  %v3382_v20 = vld [vmem:[%s13273_s10 + $0x20] sm:$0xff] }
 0x2b9   : > { %v3006_v19 = vadd.f32 0.001143296, %v3005_v27  ;;  %v10693_v60 = vadd.f32 %v10690_v14, %v3115_v0  ;;  %v2349_v3 = vadd.f32 %v10544_v13, %v2348_v58  ;;  %v2868_v53 = vsel %vm10666_vm3, %v2867_v15, %v2863_v48 }
 0x2ba   : > { %v2899_v16 = vadd.f32 %v10639_v55, %v2898_v30  ;;  %v2970_v33 = vadd.f32 0.112945676, %v2969_v44  ;;  %v2154_v9 = vmul.f32 %v10616_v31, %v2134_v26  ;;  %v13319_v0 = vsel %vm10584_vm13, %v10457_v36, %v10557_v22  ;;  %v3383_v36 = vld [vmem:[%s13273_s10 + $0x28] sm:$0xff] }
 0x2bb   : > { %v10701_v27 = vpop.eup %7860  ;;  %v2101_v13 = vsel %vm10646_vm1, %v10590_v5, %v13319_v0  ;;  %v2995_v57 = vadd.f32 0.00028619796, %v2994_v38  ;;  %v3007_v15 = vmul.f32 %v3006_v19, %v10658_v35  ;;  %3286 = vmatmul.f32.gmra.mxu0 %v10693_v60  ;;  %v10721_v37 = vadd.f32 %v2397_v2, %v2349_v3  ;;  %v3403_v30 = vld [vmem:[%s13273_s10 + $0xc8] sm:$0xff]  ;;  %3424 = vmatpush.msra.mxu1 %v3383_v36  ;;  %v3380_v36 = vld [vmem:[%s13273_s10 + $0x10] sm:$0xff] }
 0x2bc   : > { %v3081_v22 = vadd.f32 1.0, %v7467_v12  ;;  %v2921_v23 = vadd.f32 0.18741608, %v2920_v63  ;;  %v2936_v5 = vmul.f32 %v10701_v27, %v10655_v24  ;;  %v2958_v50 = vmul.f32 %v2957_v4, %v10613_v32  ;;  %3485 = vmatpush.msra.mxu2 %v3403_v30 }
 0x2bd   : > { %v2869_v48 = vmul.f32 %v2868_v53, %v2844_v25  ;;  %v2883_v38 = vadd.f32 1.1283791, %v2882_v43  ;;  %v2971_v44 = vmul.f32 %v2970_v33, %v10613_v32  ;;  %v3008_v19 = vadd.f32 0.014752088, %v3007_v15  ;;  %3425 = vmatpush.msra.mxu1 %v3382_v20 }
 0x2be   : > { %v2903_v2 = vsel %vm10715_vm6, %v10639_v55, %v2899_v16  ;;  %vm10733_vm7 = vcmp.eq.f32.partialorder %v2904_v7, 8.507059e+37  ;;  %v2907_v63 = vor.u32 1.1754944e-38, %v2906_v45  ;;  %v10738_v4 = vadd.f32 %v10629_v29, %v2154_v9 }
 0x2bf   : > { %v2972_v25 = vadd.f32 0.4994258, %v2971_v44  ;;  %v2996_v43 = vmul.f32 %v2995_v57, %v10658_v35  ;;  %v3009_v26 = vmul.f32 %v3008_v19, %v10658_v35  ;;  %v10743_v3 = vmul.f32 0.70710677, %v10721_v37  ;;  %3426 = vmatpush.msra.mxu1 %v3381_v47 }
 0x2c0   : > { %v2922_v55 = vmul.f32 %v2921_v23, %v10496_v52  ;;  %v2937_v7 = vsub.f32 1.0, %v2936_v5  ;;  %v2959_v53 = vadd.f32 0.05243302, %v2958_v50  ;;  %3219 = vmatmul.f32.gmra.mxu3 %v10738_v4  ;;  %v7400_v45 = vclamps-f32 %v10452_v61, 1.0  ;;  %v10758_v61 = vpop.f32.mrf.mxu3 }
 0x2c1   : > { %v7468_v16 = vclamps-f32 %v2869_v48, 1.0  ;;  %v2973_v33 = vmul.f32 %v2972_v25, %v10613_v32  ;;  %v3010_v9 = vadd.f32 0.112945676, %v3009_v26  ;;  %v3032_v0 = vmul.f32 %v10743_v3, %v10743_v3  ;;  %3427 = vmatpush.msra.mxu1 %v3380_v36 }
 0x2c2   : > { %v10753_v58 = vmul.f32 %v2101_v13, %v10486_v11  ;;  %v2884_v52 = vmul.f32 %v2883_v38, %v10425_v59  ;;  %v2908_v57 = vsel %vm10733_vm7, %v2907_v63, %v2903_v2  ;;  %v2119_v15 = vadd.f32 1.0, %v7400_v45  ;;  %v3379_v11 = vld [vmem:[%s13273_s10 + $0x8] sm:$0xff]  ;;  %v3402_v38 = vld [vmem:[%s13273_s10 + $0xc0] sm:$0xff] }
 0x2c3   : > { %v10761_v23 = vadd.f32 1.0, %v2973_v33  ;;  %v2997_v5 = vadd.f32 0.0036580483, %v2996_v43  ;;  %v3011_v50 = vmul.f32 %v3010_v9, %v10658_v35  ;;  %v10764_v30 = vmin.f32 %v3032_v0, 16.0  ;;  %3486 = vmatpush.msra.mxu2 %v3402_v38  ;;  %3428 = vmatpush.msra.mxu1 %v3379_v11  ;;  %v3378_v2 = vld [vmem:[%s13273_s10] sm:$0xff] }
 0x2c4   : > { %v3097_v13 = vmul.f32 %v3081_v22, %v10437_v51  ;;  %v2938_v59 = vmul.f32 %v10701_v27, %v2937_v7  ;;  %v2960_v48 = vmul.f32 %v2959_v53, %v10613_v32  ;;  %v2135_v44 = vmul.f32 %v2119_v15, %v10185_v62 }
 0x2c5   : > { %v3082_v19 = vadd.f32 1.0, %v7468_v16  ;;  %v2923_v20 = vadd.f32 1.1283791, %v2922_v55  ;;  %vm2940_vm8 = vweird.f32 %v10655_v24  ;;  %7862 = vrcp.f32 %v10761_v23  ;;  %3429 = vmatpush.msra.mxu1 %v3378_v2 }
 0x2c6   : > { %v2909_v12 = vmul.f32 %v2908_v57, %v2884_v52  ;;  %vm2941_vm9 = vweird.f32 %v10701_v27  ;;  %v2946_v51 = vand.u32 2147483648, %v10655_v24  ;;  %v3012_v22 = vadd.f32 0.4994258, %v3011_v50 }
 0x2c7   : > { %v2998_v63 = vmul.f32 %v2997_v5, %v10658_v35  ;;  %v3034_v25 = vmul.f32 2.1237322e-06, %v10764_v30  ;;  %v3045_v62 = vmul.f32 3.8918573e-05, %v10764_v30  ;;  %v2155_v43 = vmul.f32 %v10616_v31, %v2135_v44  ;;  %vm10786_vm10 = vmor %vm2940_vm8, %vm2941_vm9 }
 0x2c8   : > { %v2939_v26 = vadd.f32 %v10701_v27, %v2938_v59  ;;  %v2944_v47 = vand.u32 2147483647, %v10655_v24  ;;  %v2961_v55 = vadd.f32 0.18741608, %v2960_v48  ;;  %v3013_v7 = vmul.f32 %v3012_v22, %v10658_v35  ;;  %v3184_v24 = vpop.f32.mrf.mxu3 }
 0x2c9   : > { %v3035_v45 = vadd.f32 0.00028619796, %v3034_v25  ;;  %v3046_v16 = vadd.f32 0.001143296, %v3045_v62  ;;  %v10791_v33 = vadd.f32 %v10629_v29, %v2155_v43  ;;  %v3116_v9 = vmul.f32 %v10207_v40, %v10597_v46 }
 0x2ca   : > { %v7469_v0 = vclamps-f32 %v2909_v12, 1.0  ;;  %v2947_v52 = vor.u32 1.1754944e-38, %v2946_v51  ;;  %v10795_v57 = vadd.f32 1.0, %v3013_v7  ;;  %v7401_v15 = vclamps-f32 %v10753_v58, 1.0 }
 0x2cb   : > { %v10799_v36 = vpop.eup %7862  ;;  %v2999_v5 = vadd.f32 0.05243302, %v2998_v63  ;;  %v3036_v50 = vmul.f32 %v3035_v45, %v10764_v30  ;;  %v3047_v11 = vmul.f32 %v3046_v16, %v10764_v30  ;;  %3222 = vmatmul.f32.gmra.mxu3 %v10791_v33  ;;  %v10805_v46 = vadd.f32 %v10690_v14, %v3116_v9 }
 0x2cc   : > { %v2924_v59 = vmul.f32 %v2923_v20, %v10462_v56  ;;  %v2943_v58 = vsel %vm10786_vm10, %v10701_v27, %v2939_v26  ;;  %vm2945_vm11 = vcmp.eq.f32.partialorder %v2944_v47, 8.507059e+37  ;;  %v2976_v48 = vmul.f32 %v10799_v36, %v10761_v23  ;;  %v10823_v56 = vld [vmem:[%s13326_s28] ss:$0 sm:$0xff]  ;;  %s13368_s28 = sld [smem:[#allocation38_spill]] }
 0x2cd   : > { %v3098_v38 = vmul.f32 %v3082_v19, %v10473_v8  ;;  %v2962_v44 = vmul.f32 %v2961_v55, %v10613_v32  ;;  %7864 = vrcp.f32 %v10795_v57  ;;  %3289 = vmatmul.f32.gmra.mxu0 %v10805_v46  ;;  %v3117_v2 = vmul.f32 %v10207_v40, %v3097_v13 }
 0x2ce   : > { %v2977_v27 = vsub.f32 1.0, %v2976_v48  ;;  %v3037_v20 = vadd.f32 0.0036580483, %v3036_v50  ;;  %v3048_v12 = vadd.f32 0.014752088, %v3047_v11  ;;  %v2120_v51 = vadd.f32 1.0, %v7401_v15 }
 0x2cf   : > { %v3083_v22 = vadd.f32 1.0, %v7469_v0  ;;  %v2948_v63 = vsel %vm2945_vm11, %v2947_v52, %v2943_v58  ;;  %vm2980_vm12 = vweird.f32 %v10761_v23  ;;  %v3000_v8 = vmul.f32 %v2999_v5, %v10658_v35  ;;  %v3401_v5 = vld [vmem:[%s13273_s10 + $0xb8] sm:$0xff]  ;;  %v3400_v50 = vld [vmem:[%s13273_s10 + $0xb0] sm:$0xff] }
 0x2d0   : > { %v2978_v32 = vmul.f32 %v10799_v36, %v2977_v27  ;;  %v3038_v19 = vmul.f32 %v3037_v20, %v10764_v30  ;;  %v3049_v40 = vmul.f32 %v3048_v12, %v10764_v30  ;;  %v2136_v13 = vmul.f32 %v2120_v51, %v10324_v41  ;;  %v3187_v53 = vpop.f32.mrf.mxu3  ;;  %3487 = vmatpush.msra.mxu2 %v3401_v5  ;;  %v3399_v20 = vld [vmem:[%s13273_s10 + $0xa8] sm:$0xff] }
 0x2d1   : > { %vm2981_vm13 = vweird.f32 %v10799_v36  ;;  %v10833_v25 = vadd.f32 %v10690_v14, %v3117_v2  ;;  %v3182_v62 = vadd.f32 %v10823_v56, %v10758_v61  ;;  %v3185_v43 = vadd.f32 %v10823_v56, %v3184_v24  ;;  %v13327_v61 = vld [vmem:[#allocation54_spill] sm:$0xff] }
 0x2d2   : > { %v2963_v26 = vadd.f32 1.1283791, %v2962_v44  ;;  %v2986_v47 = vand.u32 2147483648, %v10761_v23  ;;  %v3050_v55 = vadd.f32 0.112945676, %v3049_v40  ;;  %v2156_v7 = vmul.f32 %v10616_v31, %v2136_v13  ;;  %vm10855_vm14 = vmor %vm2980_vm12, %vm2981_vm13  ;;  %3488 = vmatpush.msra.mxu2 %v3400_v50  ;;  %v13332_v40 = vld [vmem:[#allocation56_spill] sm:$0xff] }
 0x2d3   : > { %v10840_v41 = vpop.eup %7864  ;;  %v2979_v45 = vadd.f32 %v10799_v36, %v2978_v32  ;;  %v2984_v16 = vand.u32 2147483647, %v10761_v23  ;;  %v3001_v9 = vadd.f32 0.18741608, %v3000_v8  ;;  %3314 = vst [vmem:[%s10845_s27] sm:$0xff] %v3182_v62  ;;  %v10849_v0 = vadd.f32 %v3182_v62, %v13327_v61  ;;  %v10870_v23 = vld [vmem:[%s13172_s8] ss:$0 sm:$0xff] }
 0x2d4   : > { %v2949_v52 = vmul.f32 %v2948_v63, %v2924_v59  ;;  %v3016_v15 = vmul.f32 %v10840_v41, %v10795_v57  ;;  %v3039_v24 = vadd.f32 0.05243302, %v3038_v19  ;;  %3315 = vst [vmem:[%s10845_s27 + $0x8] sm:$0xff] %v3185_v43  ;;  %v3051_v11 = vmul.f32 %v3050_v55, %v10764_v30  ;;  %3489 = vmatpush.msra.mxu2 %v3399_v20  ;;  %v3397_v62 = vld [vmem:[%s13273_s10 + $0x98] sm:$0xff]  ;;  %v3396_v61 = vld [vmem:[%s13273_s10 + $0x90] sm:$0xff] }
 0x2d5   : > { %v10866_v59 = vadd.f32 %v10629_v29, %v2156_v7  ;;  %3292 = vmatmul.f32.gmra.mxu0 %v10833_v25  ;;  %v3118_v58 = vmul.f32 %v10870_v23, %v3098_v38  ;;  %v3099_v48 = vmul.f32 %v3083_v22, %v10607_v34  ;;  %v2964_v44 = vmul.f32 %v2963_v26, %v10572_v10 }
 0x2d6   : > { %v2987_v2 = vor.u32 1.1754944e-38, %v2986_v47  ;;  %v3017_v27 = vsub.f32 1.0, %v3016_v15  ;;  %3430 = vmatmul.f32.vlgmr.msra.gmra.mxu1 %v10849_v0  ;;  %v2983_v29 = vsel %vm10855_vm14, %v10799_v36, %v2979_v45  ;;  %vm10880_vm15 = vcmp.eq.f32.partialorder %v2984_v16, 8.507059e+37  ;;  %v3398_v36 = vld [vmem:[%s13273_s10 + $0xa0] sm:$0xff] }
 0x2d7   : > { %v3052_v38 = vadd.f32 0.4994258, %v3051_v11  ;;  %3225 = vmatmul.f32.gmra.mxu3 %v10866_v59  ;;  %v3188_v10 = vadd.f32 %v10823_v56, %v3187_v53  ;;  %v7470_v34 = vclamps-f32 %v2949_v52, 1.0  ;;  %v3002_v51 = vmul.f32 %v3001_v9, %v10658_v35  ;;  %3490 = vmatpush.msra.mxu2 %v3398_v36  ;;  %v3266_v36 = vpop.f32.mrf.mxu0 }
 0x2d8   : > { %v3018_v22 = vmul.f32 %v10840_v41, %v3017_v27  ;;  %v3040_v63 = vmul.f32 %v3039_v24, %v10764_v30  ;;  %vm3020_vm1 = vweird.f32 %v10795_v57  ;;  %vm3021_vm2 = vweird.f32 %v10840_v41  ;;  %v3190_v26 = vpop.f32.mrf.mxu3  ;;  %v3395_v24 = vld [vmem:[%s13273_s10 + $0x88] sm:$0xff] }
 0x2d9   : > { %v3053_v8 = vmul.f32 %v3052_v38, %v10764_v30  ;;  %v10894_v32 = vadd.f32 %v10690_v14, %v3118_v58  ;;  %3316 = vst [vmem:[%s10845_s27 + $0x10] sm:$0xff] %v3188_v10  ;;  %v2988_v35 = vsel %vm10880_vm15, %v2987_v2, %v2983_v29  ;;  %v3026_v19 = vand.u32 2147483648, %v10795_v57  ;;  %vm10912_vm3 = vmor %vm3020_vm1, %vm3021_vm2  ;;  %3491 = vmatpush.msra.mxu2 %v3397_v62  ;;  %v13336_v2 = vld [vmem:[#allocation57_spill] sm:$0xff] }
 0x2da   : > { %v10901_v13 = vadd.f32 %v3185_v43, %v13332_v40  ;;  %v3019_v47 = vadd.f32 %v10840_v41, %v3018_v22  ;;  %v3024_v55 = vand.u32 2147483647, %v10795_v57  ;;  %v3191_v53 = vadd.f32 %v10823_v56, %v3190_v26 }
 0x2db   : > { %v3054_v7 = vadd.f32 1.0, %v3053_v8  ;;  %v2412_v45 = vmul.f32 0.5, %v10449_v54  ;;  %v3084_v16 = vadd.f32 1.0, %v7470_v34  ;;  %v3041_v9 = vadd.f32 0.18741608, %v3040_v63  ;;  %3492 = vmatpush.msra.mxu2 %v3396_v61  ;;  %v3394_v63 = vld [vmem:[%s13273_s10 + $0x80] sm:$0xff] }
 0x2dc   : > { %v2989_v52 = vmul.f32 %v2988_v35, %v2964_v44  ;;  %v3003_v31 = vadd.f32 1.1283791, %v3002_v51  ;;  %v3119_v15 = vmul.f32 %v10870_v23, %v3099_v48  ;;  %3317 = vst [vmem:[%s10845_s27 + $0x18] sm:$0xff] %v3191_v53  ;;  %v3027_v54 = vor.u32 1.1754944e-38, %v3026_v19 }
 0x2dd   : > { %7866 = vrcp.f32 %v3054_v7  ;;  %3295 = vmatmul.f32.gmra.mxu0 %v10894_v32  ;;  %v3023_v57 = vsel %vm10912_vm3, %v10840_v41, %v3019_v47  ;;  %vm3025_vm4 = vcmp.eq.f32.partialorder %v3024_v55, 8.507059e+37  ;;  %v3100_v5 = vmul.f32 %v3084_v16, %v2412_v45  ;;  %3493 = vmatpush.msra.mxu2 %v3395_v24 }
 0x2de   : > { %3433 = vmatmul.f32.gmra.mxu1 %v10901_v13  ;;  %v3042_v50 = vmul.f32 %v3041_v9, %v10764_v30  ;;  %v7471_v11 = vclamps-f32 %v2989_v52, 1.0  ;;  %v3004_v58 = vmul.f32 %v3003_v31, %v10623_v28  ;;  %v10928_v48 = vadd.f32 %v10690_v14, %v3119_v15  ;;  %v13340_v9 = vld [vmem:[#allocation59_spill] sm:$0xff] }
 0x2df   : > { %v3028_v44 = vsel %vm3025_vm4, %v3027_v54, %v3023_v57  ;;  %v10931_v27 = vadd.f32 %v3188_v10, %v13336_v2  ;;  %v2413_v30 = vmul.f32 0.5, %v10560_v6  ;;  %v3120_v28 = vmul.f32 %v10870_v23, %v3100_v5  ;;  %v10940_v10 = vld [vmem:[%s13335_s26] ss:$0 sm:$0xff]  ;;  %3494 = vmatpush.msra.mxu2 %v3394_v63  ;;  %s11985_s26 = scalar_lea.vmem [#allocation12], %s10820_s2  ;;  %s13369_s2 = sld [smem:[#allocation40_spill]] }
 0x2e0   : > { %v3193_v41 = vpop.f32.mrf.mxu3  ;;  %v3043_v12 = vadd.f32 1.1283791, %v3042_v50  ;;  %v3085_v34 = vadd.f32 1.0, %v7471_v11  ;;  %v3029_v51 = vmul.f32 %v3028_v44, %v3004_v58  ;;  %v3066_v22 = vand.u32 2147483648, %v3054_v7  ;;  %v13341_v11 = vld [vmem:[#allocation53_spill] sm:$0xff] }
 0x2e1   : > { %v3194_v29 = vadd.f32 %v10823_v56, %v3193_v41  ;;  %vm3060_vm5 = vweird.f32 %v3054_v7  ;;  %v3064_v35 = vand.u32 2147483647, %v3054_v7  ;;  %v3267_v6 = vadd.f32 %v10940_v10, %v3266_v36  ;;  %v13342_v41 = vld [vmem:[#allocation61_spill] sm:$0xff] }
 0x2e2   : > { %v10945_v40 = vadd.f32 %v10690_v14, %v3120_v28  ;;  %v3101_v62 = vmul.f32 %v3085_v34, %v2413_v30  ;;  %v7472_v26 = vclamps-f32 %v3029_v51, 1.0  ;;  %v3067_v55 = vor.u32 1.1754944e-38, %v3066_v22  ;;  %v13343_v22 = vld [vmem:[#allocation62_spill] sm:$0xff] }
 0x2e3   : > { %v7867_v20 = vpop.eup %7866  ;;  %3318 = vst [vmem:[%s10845_s27 + $0x20] sm:$0xff] %v3194_v29  ;;  %v3044_v16 = vmul.f32 %v3043_v12, %v10743_v3  ;;  %vm3065_vm8 = vcmp.eq.f32.partialorder %v3064_v35, 8.507059e+37  ;;  %v10960_v61 = vadd.f32 %v3191_v53, %v13340_v9  ;;  %v2414_v54 = vmul.f32 0.5, %v10594_v39 }
 0x2e4   : > { %v3056_v38 = vmul.f32 %v7867_v20, %v3054_v7  ;;  %vm3061_vm6 = vweird.f32 %v7867_v20  ;;  %3330 = vst [vmem:[%s10952_s18] sm:$0xff] %v3267_v6  ;;  %v13339_v7 = vld [vmem:[#allocation63_spill] sm:$0xff]  ;;  %v3086_v24 = vadd.f32 1.0, %v7472_v26  ;;  %v3121_v3 = vmul.f32 %v10870_v23, %v3101_v62  ;;  %v13345_v62 = vld [vmem:[#allocation65_spill] sm:$0xff] }
 0x2e5   : > { %3298 = vmatmul.f32.gmra.mxu0 %v10928_v48  ;;  %vm10947_vm7 = vmor %vm3060_vm5, %vm3061_vm6  ;;  %v10956_v45 = vadd.f32 %v3267_v6, %v13339_v7  ;;  %v13346_v7 = vld [vmem:[#allocation66_spill] sm:$0xff] }
 0x2e6   : > { %v3057_v8 = vsub.f32 1.0, %v3056_v38  ;;  %3436 = vmatmul.f32.gmra.mxu1 %v10931_v27  ;;  %v3102_v44 = vmul.f32 %v3086_v24, %v2414_v54  ;;  %v10977_v2 = vadd.f32 %v10690_v14, %v3121_v3  ;;  %v2415_v38 = vmul.f32 0.5, %v10721_v37  ;;  %v3909_v3 = vld [vmem:[%s13344_s14 + $0x68] sm:$0xff] }
 0x2e7   : > { %3495 = vmatmul.f32.vlgmr.msra.gmra.mxu2 %v10956_v45 }
 0x2e8   : > { %v3058_v19 = vmul.f32 %v7867_v20, %v3057_v8  ;;  %v3196_v52 = vpop.f32.mrf.mxu3  ;;  %v3122_v34 = vmul.f32 %v10870_v23, %v3102_v44 }
 0x2e9   : > { %v3197_v31 = vadd.f32 %v10823_v56, %v3196_v52 }
 0x2ea   : > { %v3059_v43 = vadd.f32 %v7867_v20, %v3058_v19  ;;  %v3269_v5 = vpop.f32.mrf.mxu0 }
 0x2eb   : > { %3319 = vst [vmem:[%s10845_s27 + $0x28] sm:$0xff] %v3197_v31  ;;  %v3270_v50 = vadd.f32 %v10940_v10, %v3269_v5  ;;  %v10993_v63 = vadd.f32 %v3197_v31, %v13343_v22 }
 0x2ec   : > { %v3063_v15 = vsel %vm10947_vm7, %v7867_v20, %v3059_v43  ;;  %v10980_v20 = vadd.f32 %v3194_v29, %v13342_v41  ;;  %v10990_v29 = vadd.f32 %v10690_v14, %v3122_v34 }
 0x2ed   : > { %v3068_v57 = vsel %vm3065_vm8, %v3067_v55, %v3063_v15  ;;  %3301 = vmatmul.f32.gmra.mxu0 %v10945_v40  ;;  %3331 = vst [vmem:[%s10952_s18 + $0x8] sm:$0xff] %v3270_v50  ;;  %v10974_v58 = vadd.f32 %v3270_v50, %v13341_v11  ;;  %v13347_v11 = vld [vmem:[#allocation60_spill] sm:$0xff] }
 0x2ee   : > { %v3069_v53 = vmul.f32 %v3068_v57, %v3044_v16  ;;  %3439 = vmatmul.f32.gmra.mxu1 %v10960_v61 }
 0x2ef   : > { %3498 = vmatmul.f32.gmra.mxu2 %v10974_v58 }
 0x2f0   : > { %v7473_v39 = vclamps-f32 %v3069_v53, 1.0  ;;  %v3199_v30 = vpop.f32.mrf.mxu3 }
 0x2f1   : > { %v3200_v12 = vadd.f32 %v10823_v56, %v3199_v30 }
 0x2f2   : > { %v3087_v28 = vadd.f32 1.0, %v7473_v39 }
 0x2f3   : > { %3320 = vst [vmem:[%s10845_s27 + $0x30] sm:$0xff] %v3200_v12  ;;  %v11005_v26 = vadd.f32 %v3200_v12, %v13345_v62 }
 0x2f4   : > { %v3103_v51 = vmul.f32 %v3087_v28, %v2415_v38  ;;  %v13349_v28 = vld [vmem:[#allocation58_spill] sm:$0xff] }
 0x2f5   : > { %3304 = vmatmul.f32.gmra.mxu0 %v10977_v2 }
 0x2f6   : > { %3442 = vmatmul.f32.gmra.mxu1 %v10980_v20  ;;  %v3123_v8 = vmul.f32 %v10870_v23, %v3103_v51  ;;  %v3908_v51 = vld [vmem:[%s13344_s14 + $0x60] sm:$0xff] }
 0x2f8   : > { %v3202_v36 = vpop.f32.mrf.mxu3  ;;  %v11001_v6 = vadd.f32 %v10690_v14, %v3123_v8  ;;  %v3911_v14 = vld [vmem:[%s13344_s14 + $0x78] sm:$0xff] }
 0x2f9   : > { %v3203_v37 = vadd.f32 %v10823_v56, %v3202_v36  ;;  %3916 = vmatpush.msra.mxu3 %v3911_v14 }
 0x2fb   : > { %3321 = vst [vmem:[%s10845_s27 + $0x38] sm:$0xff] %v3203_v37  ;;  %v11018_v16 = vadd.f32 %v3203_v37, %v13346_v7  ;;  %v13350_v37 = vld [vmem:[#allocation67_spill] sm:$0xff] }
 0x2fd   : > { %3307 = vmatmul.f32.gmra.mxu0 %v10990_v29 }
 0x2fe   : > { %3445 = vmatmul.f32.gmra.mxu1 %v10993_v63 }
 0x300   : > { %v3272_v35 = vpop.f32.mrf.mxu0  ;;  %v3205_v47 = vpop.f32.mrf.mxu3 }
 0x301   : > { %v3273_v19 = vadd.f32 %v10940_v10, %v3272_v35  ;;  %v3206_v23 = vadd.f32 %v10823_v56, %v3205_v47  ;;  %v3907_v35 = vld [vmem:[%s13344_s14 + $0x58] sm:$0xff] }
 0x303   : > { %3332 = vst [vmem:[%s10952_s18 + $0x10] sm:$0xff] %v3273_v19  ;;  %v11009_v55 = vadd.f32 %v3273_v19, %v10338_v49  ;;  %v3910_v49 = vld [vmem:[%s13344_s14 + $0x70] sm:$0xff]  ;;  %v11024_v52 = vadd.f32 %v3206_v23, %v10295_v42 }
 0x304   : > { %3322 = vst [vmem:[%s10845_s27 + $0x40] sm:$0xff] %v3206_v23  ;;  %3917 = vmatpush.msra.mxu3 %v3910_v49  ;;  %v3906_v23 = vld [vmem:[%s13344_s14 + $0x50] sm:$0xff] }
 0x305   : > { %3310 = vmatmul.f32.gmra.mxu0 %v11001_v6  ;;  %3501 = vmatmul.f32.gmra.mxu2 %v11009_v55 }
 0x306   : > { %3448 = vmatmul.f32.gmra.mxu1 %v11005_v26  ;;  %3918 = vmatpush.msra.mxu3 %v3909_v3 }
 0x308   : > { %3919 = vmatpush.msra.mxu3 %v3908_v51  ;;  %v3899_v51 = vld [vmem:[%s13344_s14 + $0x18] sm:$0xff] }
 0x30a   : > { %3920 = vmatpush.msra.mxu3 %v3907_v35 }
 0x30c   : > { %3921 = vmatpush.msra.mxu3 %v3906_v23 }
 0x30e   : > { %3451 = vmatmul.f32.gmra.mxu1 %v11018_v16 }
 0x30f   : > { %v3275_v43 = vpop.f32.mrf.mxu0 }
 0x310   : > { %v3276_v9 = vadd.f32 %v10940_v10, %v3275_v43  ;;  %v3905_v43 = vld [vmem:[%s13344_s14 + $0x48] sm:$0xff] }
 0x311   : > { %3922 = vmatpush.msra.mxu3 %v3905_v43 }
 0x312   : > { %3333 = vst [vmem:[%s10952_s18 + $0x18] sm:$0xff] %v3276_v9  ;;  %v11028_v31 = vadd.f32 %v3276_v9, %v10422_v18  ;;  %v3208_v15 = vpop.f32.mrf.mxu3 }
 0x313   : > { %v3209_v54 = vadd.f32 %v10823_v56, %v3208_v15 }
 0x314   : > { %3504 = vmatmul.f32.gmra.mxu2 %v11028_v31 }
 0x315   : > { %3323 = vst [vmem:[%s10845_s27 + $0x48] sm:$0xff] %v3209_v54  ;;  %v11036_v42 = vadd.f32 %v3209_v54, %v10406_v21 }
 0x316   : > { %3454 = vmatmul.f32.gmra.mxu1 %v11024_v52 }
 0x317   : > { %v3278_v24 = vpop.f32.mrf.mxu0 }
 0x318   : > { %v3279_v57 = vadd.f32 %v10940_v10, %v3278_v24 }
 0x31a   : > { %3334 = vst [vmem:[%s10952_s18 + $0x20] sm:$0xff] %v3279_v57  ;;  %v11040_v18 = vadd.f32 %v3279_v57, %v10468_v17 }
 0x31c   : > { %3507 = vmatmul.f32.gmra.mxu2 %v11040_v18  ;;  %v3211_v5 = vpop.f32.mrf.mxu3 }
 0x31d   : > { %v3212_v53 = vadd.f32 %v10823_v56, %v3211_v5 }
 0x31e   : > { %3457 = vmatmul.f32.gmra.mxu1 %v11036_v42 }
 0x31f   : > { %3324 = vst [vmem:[%s10845_s27 + $0x50] sm:$0xff] %v3212_v53  ;;  %v11048_v50 = vadd.f32 %v3212_v53, %v10479_v1  ;;  %v13348_v1 = vld [vmem:[#allocation55_spill] sm:$0xff] }
 0x320   : > { %v3903_v53 = vld [vmem:[%s13344_s14 + $0x38] sm:$0xff] }
 0x322   : > { %v3281_v21 = vpop.f32.mrf.mxu0 }
 0x323   : > { %v3282_v17 = vadd.f32 %v10940_v10, %v3281_v21 }
 0x325   : > { %3335 = vst [vmem:[%s10952_s18 + $0x28] sm:$0xff] %v3282_v17  ;;  %v11053_v44 = vadd.f32 %v3282_v17, %v13347_v11  ;;  %v3214_v39 = vpop.f32.mrf.mxu3 }
 0x326   : > { %3460 = vmatmul.f32.gmra.mxu1 %v11048_v50  ;;  %v3215_v41 = vadd.f32 %v10823_v56, %v3214_v39 }
 0x327   : > { %3510 = vmatmul.f32.gmra.mxu2 %v11053_v44 }
 0x328   : > { %3325 = vst [vmem:[%s10845_s27 + $0x58] sm:$0xff] %v3215_v41  ;;  %v11060_v30 = vadd.f32 %v3215_v41, %v13348_v1  ;;  %v3902_v41 = vld [vmem:[%s13344_s14 + $0x30] sm:$0xff] }
 0x32a   : > { %v3284_v12 = vpop.f32.mrf.mxu0 }
 0x32b   : > { %v3285_v38 = vadd.f32 %v10940_v10, %v3284_v12  ;;  %v3900_v12 = vld [vmem:[%s13344_s14 + $0x20] sm:$0xff] }
 0x32d   : > { %3336 = vst [vmem:[%s10952_s18 + $0x30] sm:$0xff] %v3285_v38  ;;  %v11065_v34 = vadd.f32 %v3285_v38, %v13349_v28  ;;  %v11133_v28 = vld [vmem:[%s13351_s7] ss:$0 sm:$0xff]  ;;  %s13370_s7 = sld [smem:[#allocation41_spill]] }
 0x32e   : > { %3463 = vmatmul.f32.gmra.mxu1 %v11060_v30 }
 0x32f   : > { %3513 = vmatmul.f32.gmra.mxu2 %v11065_v34 }
 0x334   : > { %v3217_v22 = vpop.f32.mrf.mxu3 }
 0x335   : > { %v3218_v36 = vadd.f32 %v10823_v56, %v3217_v22 }
 0x337   : > { %3326 = vst [vmem:[%s10845_s27 + $0x60] sm:$0xff] %v3218_v36  ;;  %v11073_v8 = vadd.f32 %v3218_v36, %v13350_v37  ;;  %v3898_v37 = vld [vmem:[%s13344_s14 + $0x10] sm:$0xff] }
 0x338   : > { %v3287_v19 = vpop.f32.mrf.mxu0 }
 0x339   : > { %v3288_v62 = vadd.f32 %v10940_v10, %v3287_v19  ;;  %3466 = vmatmul.f32.gmra.mxu1 %v11073_v8 }
 0x33b   : > { %3337 = vst [vmem:[%s10952_s18 + $0x38] sm:$0xff] %v3288_v62  ;;  %v11080_v47 = vadd.f32 %v3288_v62, %v10693_v60 }
 0x33d   : > { %3516 = vmatmul.f32.gmra.mxu2 %v11080_v47 }
 0x343   : > { %v3220_v14 = vpop.f32.mrf.mxu3 }
 0x344   : > { %v3221_v7 = vadd.f32 %v10823_v56, %v3220_v14 }
 0x346   : > { %3327 = vst [vmem:[%s10845_s27 + $0x68] sm:$0xff] %v3221_v7  ;;  %v11087_v49 = vadd.f32 %v3221_v7, %v10738_v4  ;;  %v3904_v4 = vld [vmem:[%s13344_s14 + $0x40] sm:$0xff] }
 0x347   : > { %3923 = vmatpush.msra.mxu3 %v3904_v4 }
 0x348   : > { %3469 = vmatmul.f32.gmra.mxu1 %v11087_v49 }
 0x349   : > { %3924 = vmatpush.msra.mxu3 %v3903_v53 }
 0x34a   : > { %v3290_v60 = vpop.f32.mrf.mxu0 }
 0x34b   : > { %v3291_v9 = vadd.f32 %v10940_v10, %v3290_v60  ;;  %3925 = vmatpush.msra.mxu3 %v3902_v41 }
 0x34d   : > { %3338 = vst [vmem:[%s10952_s18 + $0x40] sm:$0xff] %v3291_v9  ;;  %v11094_v15 = vadd.f32 %v3291_v9, %v10805_v46 }
 0x34e   : > { %v3223_v54 = vpop.f32.mrf.mxu3 }
 0x34f   : > { %3519 = vmatmul.f32.gmra.mxu2 %v11094_v15  ;;  %v3224_v24 = vadd.f32 %v10823_v56, %v3223_v54 }
 0x351   : > { %3328 = vst [vmem:[%s10845_s27 + $0x70] sm:$0xff] %v3224_v24  ;;  %v11101_v57 = vadd.f32 %v3224_v24, %v10791_v33 }
 0x352   : > { %v3293_v3 = vpop.f32.mrf.mxu0 }
 0x353   : > { %v3294_v5 = vadd.f32 %v10940_v10, %v3293_v3  ;;  %3472 = vmatmul.f32.gmra.mxu1 %v11101_v57  ;;  %v3431_v38 = vpop.f32.mrf.mxu1 }
 0x354   : > { %v3432_v35 = vadd.f32 %v11133_v28, %v3431_v38 }
 0x355   : > { %3339 = vst [vmem:[%s10952_s18 + $0x48] sm:$0xff] %v3294_v5  ;;  %v11107_v46 = vadd.f32 %v3294_v5, %v10833_v25 }
 0x357   : > { %3522 = vmatmul.f32.gmra.mxu2 %v11107_v46 }
 0x35a   : > { %v3226_v21 = vpop.f32.mrf.mxu3  ;;  %v3296_v17 = vpop.f32.mrf.mxu0 }
 0x35b   : > { %v3227_v33 = vadd.f32 %v10823_v56, %v3226_v21  ;;  %v3297_v11 = vadd.f32 %v10940_v10, %v3296_v17  ;;  %v3434_v14 = vpop.f32.mrf.mxu1 }
 0x35c   : > { %v3435_v60 = vadd.f32 %v11133_v28, %v3434_v14 }
 0x35d   : > { %3329 = vst [vmem:[%s10845_s27 + $0x78] sm:$0xff] %v3227_v33  ;;  %v11115_v39 = vadd.f32 %v3227_v33, %v10866_v59  ;;  %v11118_v25 = vadd.f32 %v3297_v11, %v10894_v32  ;;  %v3901_v32 = vld [vmem:[%s13344_s14 + $0x28] sm:$0xff] }
 0x35e   : > { %3340 = vst [vmem:[%s10952_s18 + $0x50] sm:$0xff] %v3297_v11  ;;  %3926 = vmatpush.msra.mxu3 %v3901_v32 }
 0x35f   : > { %3475 = vmatmul.f32.gmra.mxu1 %v11115_v39  ;;  %3525 = vmatmul.f32.gmra.mxu2 %v11118_v25 }
 0x360   : > { %3927 = vmatpush.msra.mxu3 %v3900_v12 }
 0x362   : > { %v3299_v56 = vpop.f32.mrf.mxu0  ;;  %3928 = vmatpush.msra.mxu3 %v3899_v51 }
 0x363   : > { %v3300_v1 = vadd.f32 %v10940_v10, %v3299_v56  ;;  %v3437_v56 = vpop.f32.mrf.mxu1 }
 0x364   : > { %3929 = vmatpush.msra.mxu3 %v3898_v37 }
 0x365   : > { %3341 = vst [vmem:[%s10952_s18 + $0x58] sm:$0xff] %v3300_v1  ;;  %v11127_v59 = vadd.f32 %v3300_v1, %v10928_v48 }
 0x367   : > { %3528 = vmatmul.f32.gmra.mxu2 %v11127_v59 }
 0x36a   : > { %v3302_v22 = vpop.f32.mrf.mxu0  ;;  %v3496_v19 = vpop.f32.mrf.mxu2 }
 0x36b   : > { %v3303_v36 = vadd.f32 %v10940_v10, %v3302_v22  ;;  %v3497_v62 = vadd.f32 %v3496_v19, %v3432_v35 }
 0x36d   : > { %3342 = vst [vmem:[%s10952_s18 + $0x60] sm:$0xff] %v3303_v36  ;;  %v11141_v48 = vadd.f32 %v3303_v36, %v10945_v40  ;;  %v7474_v23 = vmul.f32 -1.442695, %v3497_v62  ;;  %v3440_v62 = vpop.f32.mrf.mxu1 }
 0x36f   : > { %3531 = vmatmul.f32.gmra.mxu2 %v11141_v48  ;;  %7868 = vpow2.f32 %v7474_v23 }
 0x372   : > { %v3305_v7 = vpop.f32.mrf.mxu0  ;;  %v3499_v40 = vpop.f32.mrf.mxu2 }
 0x373   : > { %v3306_v43 = vadd.f32 %v10940_v10, %v3305_v7  ;;  %v3500_v54 = vadd.f32 %v3499_v40, %v3435_v60  ;;  %v3848_v7 = vsub.f32 %v10849_v0, %v10956_v45 }
 0x375   : > { %3343 = vst [vmem:[%s10952_s18 + $0x68] sm:$0xff] %v3306_v43  ;;  %v11148_v9 = vadd.f32 %v3306_v43, %v10977_v2  ;;  %v7869_v24 = vpop.eup %7868  ;;  %v7475_v4 = vmul.f32 -1.442695, %v3500_v54  ;;  %v3897_v2 = vld [vmem:[%s13344_s14 + $0x8] sm:$0xff] }
 0x376   : > { %v3592_v5 = vadd.f32 1.0, %v7869_v24  ;;  %3930 = vmatpush.msra.mxu3 %v3897_v2 }
 0x377   : > { %3534 = vmatmul.f32.gmra.mxu2 %v11148_v9  ;;  %7870 = vpow2.f32 %v7475_v4 }
 0x378   : > { %7872 = vrcp.f32 %v3592_v5  ;;  %v3619_v37 = vand.u32 2147483648, %v3592_v5  ;;  %v3617_v35 = vand.u32 2147483647, %v3592_v5  ;;  %vm3613_vm10 = vweird.f32 %v3592_v5 }
 0x37a   : > { %v3308_v3 = vpop.f32.mrf.mxu0  ;;  %v3620_v14 = vor.u32 1.1754944e-38, %v3619_v37  ;;  %vm3618_vm12 = vcmp.eq.f32.partialorder %v3617_v35, 8.507059e+37 }
 0x37b   : > { %v3309_v53 = vadd.f32 %v10940_v10, %v3308_v3 }
 0x37d   : > { %3344 = vst [vmem:[%s10952_s18 + $0x70] sm:$0xff] %v3309_v53  ;;  %v11154_v21 = vadd.f32 %v3309_v53, %v10990_v29  ;;  %v7871_v17 = vpop.eup %7870  ;;  %v3438_v29 = vadd.f32 %v11133_v28, %v3437_v56 }
 0x37e   : > { %v7873_v33 = vpop.eup %7872  ;;  %v3593_v1 = vadd.f32 1.0, %v7871_v17 }
 0x37f   : > { %3537 = vmatmul.f32.gmra.mxu2 %v11154_v21  ;;  %v3609_v12 = vmul.f32 %v7873_v33, %v3592_v5  ;;  %vm3614_vm9 = vweird.f32 %v7873_v33  ;;  %v3441_v5 = vadd.f32 %v11133_v28, %v3440_v62 }
 0x380   : > { %7874 = vrcp.f32 %v3593_v1  ;;  %vm3615_vm11 = vmor %vm3613_vm10, %vm3614_vm9  ;;  %v3634_v53 = vand.u32 2147483648, %v3593_v1  ;;  %vm3628_vm14 = vweird.f32 %v3593_v1 }
 0x381   : > { %v3610_v51 = vsub.f32 1.0, %v3609_v12 }
 0x382   : > { %v3311_v11 = vpop.f32.mrf.mxu0  ;;  %v3635_v12 = vor.u32 1.1754944e-38, %v3634_v53 }
 0x383   : > { %v3312_v41 = vadd.f32 %v10940_v10, %v3311_v11  ;;  %v3611_v10 = vmul.f32 %v7873_v33, %v3610_v51  ;;  %v3632_v11 = vand.u32 2147483647, %v3593_v1 }
 0x385   : > { %3345 = vst [vmem:[%s10952_s18 + $0x78] sm:$0xff] %v3312_v41  ;;  %v11161_v32 = vadd.f32 %v3312_v41, %v11001_v6  ;;  %v3896_v6 = vld [vmem:[%s13344_s14] sm:$0xff]  ;;  %v3612_v23 = vadd.f32 %v7873_v33, %v3611_v10  ;;  %vm3633_vm1 = vcmp.eq.f32.partialorder %v3632_v11, 8.507059e+37 }
 0x386   : > { %v7875_v19 = vpop.eup %7874  ;;  %3931 = vmatpush.msra.mxu3 %v3896_v6 }
 0x387   : > { %3540 = vmatmul.f32.gmra.mxu2 %v11161_v32  ;;  %v3616_v43 = vsel %vm3615_vm11, %v7873_v33, %v3612_v23  ;;  %v3624_v60 = vmul.f32 %v7875_v19, %v3593_v1  ;;  %vm3629_vm13 = vweird.f32 %v7875_v19  ;;  %v3443_v33 = vpop.f32.mrf.mxu1 }
 0x388   : > { %v3502_v38 = vpop.f32.mrf.mxu2  ;;  %v3621_v40 = vsel %vm3618_vm12, %v3620_v14, %v3616_v43  ;;  %vm3630_vm15 = vmor %vm3628_vm14, %vm3629_vm13  ;;  %v3444_v35 = vadd.f32 %v11133_v28, %v3443_v33 }
 0x389   : > { %v3503_v22 = vadd.f32 %v3502_v38, %v3438_v29  ;;  %v3864_v24 = vmul.f32 %v3848_v7, %v3621_v40  ;;  %v3625_v4 = vsub.f32 1.0, %v3624_v60  ;;  %v3849_v38 = vsub.f32 %v10901_v13, %v10974_v58 }
 0x38b   : > { %v7476_v36 = vmul.f32 -1.442695, %v3503_v22  ;;  %v3880_v2 = vadd.f32 %v3864_v24, %v10956_v45  ;;  %v3626_v17 = vmul.f32 %v7875_v19, %v3625_v4  ;;  %v3850_v24 = vsub.f32 %v10931_v27, %v11009_v55 }
 0x38d   : > { %7876 = vpow2.f32 %v7476_v36  ;;  %3932 = vmatmul.f32.vlgmr.msra.gmra.mxu3 %v3880_v2  ;;  %v3627_v0 = vadd.f32 %v7875_v19, %v3626_v17 }
 0x38f   : > { %v3631_v29 = vsel %vm3630_vm15, %v7875_v19, %v3627_v0  ;;  %v3446_v13 = vpop.f32.mrf.mxu1 }
 0x390   : > { %v3636_v51 = vsel %vm3633_vm1, %v3635_v12, %v3631_v29  ;;  %v3447_v2 = vadd.f32 %v11133_v28, %v3446_v13 }
 0x391   : > { %v3865_v22 = vmul.f32 %v3849_v38, %v3636_v51 }
 0x393   : > { %v7877_v54 = vpop.eup %7876  ;;  %v3881_v10 = vadd.f32 %v3865_v22, %v10974_v58 }
 0x394   : > { %v3594_v3 = vadd.f32 1.0, %v7877_v54 }
 0x395   : > { %3935 = vmatmul.f32.gmra.mxu3 %v3881_v10 }
 0x396   : > { %7878 = vrcp.f32 %v3594_v3  ;;  %v3649_v23 = vand.u32 2147483648, %v3594_v3  ;;  %v3647_v14 = vand.u32 2147483647, %v3594_v3  ;;  %vm3643_vm3 = vweird.f32 %v3594_v3 }
 0x397   : > { %v3505_v41 = vpop.f32.mrf.mxu2  ;;  %v3449_v33 = vpop.f32.mrf.mxu1 }
 0x398   : > { %v3506_v56 = vadd.f32 %v3505_v41, %v3441_v5  ;;  %v3650_v54 = vor.u32 1.1754944e-38, %v3649_v23  ;;  %vm3648_vm5 = vcmp.eq.f32.partialorder %v3647_v14, 8.507059e+37  ;;  %v3450_v51 = vadd.f32 %v11133_v28, %v3449_v33 }
 0x39a   : > { %v7477_v45 = vmul.f32 -1.442695, %v3506_v56 }
 0x39c   : > { %v7879_v36 = vpop.eup %7878  ;;  %7880 = vpow2.f32 %v7477_v45 }
 0x39d   : > { %v3639_v37 = vmul.f32 %v7879_v36, %v3594_v3  ;;  %vm3644_vm2 = vweird.f32 %v7879_v36 }
 0x39e   : > { %vm3645_vm4 = vmor %vm3643_vm3, %vm3644_vm2 }
 0x39f   : > { %v3640_v1 = vsub.f32 1.0, %v3639_v37  ;;  %v3508_v62 = vpop.f32.mrf.mxu2  ;;  %v3452_v14 = vpop.f32.mrf.mxu1 }
 0x3a0   : > { %v3509_v6 = vadd.f32 %v3508_v62, %v3444_v35  ;;  %v3851_v62 = vsub.f32 %v10960_v61, %v11028_v31 }
 0x3a1   : > { %v3641_v19 = vmul.f32 %v7879_v36, %v3640_v1 }
 0x3a2   : > { %v7881_v7 = vpop.eup %7880  ;;  %v7478_v43 = vmul.f32 -1.442695, %v3509_v6 }
 0x3a3   : > { %v3595_v60 = vadd.f32 1.0, %v7881_v7  ;;  %v3642_v40 = vadd.f32 %v7879_v36, %v3641_v19 }
 0x3a4   : > { %7882 = vpow2.f32 %v7478_v43 }
 0x3a5   : > { %7884 = vrcp.f32 %v3595_v60  ;;  %v3646_v58 = vsel %vm3645_vm4, %v7879_v36, %v3642_v40  ;;  %v3664_v38 = vand.u32 2147483648, %v3595_v60  ;;  %v3662_v45 = vand.u32 2147483647, %v3595_v60 }
 0x3a6   : > { %v3651_v4 = vsel %vm3648_vm5, %v3650_v54, %v3646_v58  ;;  %vm3658_vm7 = vweird.f32 %v3595_v60 }
 0x3a7   : > { %v3866_v53 = vmul.f32 %v3850_v24, %v3651_v4  ;;  %v3665_v10 = vor.u32 1.1754944e-38, %v3664_v38  ;;  %vm3663_vm9 = vcmp.eq.f32.partialorder %v3662_v45, 8.507059e+37  ;;  %v3455_v33 = vpop.f32.mrf.mxu1 }
 0x3a9   : > { %v3882_v17 = vadd.f32 %v3866_v53, %v11009_v55  ;;  %v3852_v53 = vsub.f32 %v10980_v20, %v11040_v18 }
 0x3aa   : > { %v7883_v11 = vpop.eup %7882  ;;  %v3511_v5 = vpop.f32.mrf.mxu2 }
 0x3ab   : > { %v7885_v41 = vpop.eup %7884  ;;  %v3596_v0 = vadd.f32 1.0, %v7883_v11  ;;  %v3512_v3 = vadd.f32 %v3511_v5, %v3447_v2  ;;  %3938 = vmatmul.f32.gmra.mxu3 %v3882_v17 }
 0x3ac   : > { %v3654_v56 = vmul.f32 %v7885_v41, %v3595_v60  ;;  %vm3659_vm6 = vweird.f32 %v7885_v41 }
 0x3ad   : > { %7886 = vrcp.f32 %v3596_v0  ;;  %v7479_v12 = vmul.f32 -1.442695, %v3512_v3  ;;  %vm3660_vm8 = vmor %vm3658_vm7, %vm3659_vm6  ;;  %v3677_v40 = vand.u32 2147483647, %v3596_v0  ;;  %v3679_v60 = vand.u32 2147483648, %v3596_v0 }
 0x3ae   : > { %v3655_v29 = vsub.f32 1.0, %v3654_v56  ;;  %vm3673_vm11 = vweird.f32 %v3596_v0  ;;  %v3453_v3 = vadd.f32 %v11133_v28, %v3452_v14 }
 0x3af   : > { %7888 = vpow2.f32 %v7479_v12  ;;  %v3680_v61 = vor.u32 1.1754944e-38, %v3679_v60  ;;  %vm3678_vm13 = vcmp.eq.f32.partialorder %v3677_v40, 8.507059e+37 }
 0x3b0   : > { %v3656_v27 = vmul.f32 %v7885_v41, %v3655_v29 }
 0x3b2   : > { %v3514_v22 = vpop.f32.mrf.mxu2  ;;  %v3657_v55 = vadd.f32 %v7885_v41, %v3656_v27 }
 0x3b3   : > { %v7887_v36 = vpop.eup %7886  ;;  %v3515_v37 = vadd.f32 %v3514_v22, %v3450_v51 }
 0x3b4   : > { %v3669_v35 = vmul.f32 %v7887_v36, %v3596_v0  ;;  %v3661_v1 = vsel %vm3660_vm8, %v7885_v41, %v3657_v55  ;;  %vm3674_vm10 = vweird.f32 %v7887_v36 }
 0x3b5   : > { %v7889_v6 = vpop.eup %7888  ;;  %v7480_v23 = vmul.f32 -1.442695, %v3515_v37  ;;  %v3666_v19 = vsel %vm3663_vm9, %v3665_v10, %v3661_v1  ;;  %vm3675_vm12 = vmor %vm3673_vm11, %vm3674_vm10 }
 0x3b6   : > { %v3670_v7 = vsub.f32 1.0, %v3669_v35  ;;  %v3597_v13 = vadd.f32 1.0, %v7889_v6  ;;  %v3867_v43 = vmul.f32 %v3851_v62, %v3666_v19  ;;  %v3458_v62 = vpop.f32.mrf.mxu1 }
 0x3b7   : > { %7890 = vpow2.f32 %v7480_v23 }
 0x3b8   : > { %7892 = vrcp.f32 %v3597_v13  ;;  %v3883_v54 = vadd.f32 %v3867_v43, %v11028_v31  ;;  %v3671_v58 = vmul.f32 %v7887_v36, %v3670_v7  ;;  %v3694_v38 = vand.u32 2147483648, %v3597_v13 }
 0x3b9   : > { %v3692_v20 = vand.u32 2147483647, %v3597_v13  ;;  %vm3688_vm15 = vweird.f32 %v3597_v13 }
 0x3ba   : > { %3941 = vmatmul.f32.gmra.mxu3 %v3883_v54  ;;  %v3672_v24 = vadd.f32 %v7887_v36, %v3671_v58  ;;  %v3695_v55 = vor.u32 1.1754944e-38, %v3694_v38  ;;  %v3456_v58 = vadd.f32 %v11133_v28, %v3455_v33 }
 0x3bb   : > { %vm3693_vm2 = vcmp.eq.f32.partialorder %v3692_v20, 8.507059e+37 }
 0x3bc   : > { %v3676_v4 = vsel %vm3675_vm12, %v7887_v36, %v3672_v24 }
 0x3bd   : > { %v7891_v2 = vpop.eup %7890  ;;  %v3681_v17 = vsel %vm3678_vm13, %v3680_v61, %v3676_v4 }
 0x3be   : > { %v7893_v11 = vpop.eup %7892  ;;  %v3598_v5 = vadd.f32 1.0, %v7891_v2  ;;  %v3868_v41 = vmul.f32 %v3852_v53, %v3681_v17  ;;  %v3461_v2 = vpop.f32.mrf.mxu1 }
 0x3bf   : > { %v3684_v31 = vmul.f32 %v7893_v11, %v3597_v13  ;;  %vm3689_vm14 = vweird.f32 %v7893_v11 }
 0x3c0   : > { %7894 = vrcp.f32 %v3598_v5  ;;  %v3517_v56 = vpop.f32.mrf.mxu2  ;;  %v3884_v0 = vadd.f32 %v3868_v41, %v11040_v18  ;;  %vm3690_vm1 = vmor %vm3688_vm15, %vm3689_vm14  ;;  %v3853_v18 = vsub.f32 %v10993_v63, %v11053_v44  ;;  %v3709_v6 = vand.u32 2147483648, %v3598_v5 }
 0x3c1   : > { %v3685_v12 = vsub.f32 1.0, %v3684_v31  ;;  %v3518_v29 = vadd.f32 %v3517_v56, %v3453_v3  ;;  %v3707_v7 = vand.u32 2147483647, %v3598_v5  ;;  %vm3703_vm4 = vweird.f32 %v3598_v5 }
 0x3c2   : > { %3944 = vmatmul.f32.gmra.mxu3 %v3884_v0  ;;  %v3710_v40 = vor.u32 1.1754944e-38, %v3709_v6  ;;  %v3854_v63 = vsub.f32 %v11005_v26, %v11065_v34  ;;  %v3459_v3 = vadd.f32 %v11133_v28, %v3458_v62 }
 0x3c3   : > { %v7481_v27 = vmul.f32 -1.442695, %v3518_v29  ;;  %v3686_v45 = vmul.f32 %v7893_v11, %v3685_v12  ;;  %vm3708_vm6 = vcmp.eq.f32.partialorder %v3707_v7, 8.507059e+37 }
 0x3c5   : > { %7896 = vpow2.f32 %v7481_v27  ;;  %v3687_v51 = vadd.f32 %v7893_v11, %v3686_v45  ;;  %v3855_v27 = vsub.f32 %v11018_v16, %v11080_v47 }
 0x3c6   : > { %v7895_v22 = vpop.eup %7894  ;;  %v3464_v45 = vpop.f32.mrf.mxu1 }
 0x3c7   : > { %v3699_v36 = vmul.f32 %v7895_v22, %v3598_v5  ;;  %v3691_v37 = vsel %vm3690_vm1, %v7893_v11, %v3687_v51  ;;  %vm3704_vm3 = vweird.f32 %v7895_v22 }
 0x3c8   : > { %v3696_v10 = vsel %vm3693_vm2, %v3695_v55, %v3691_v37  ;;  %vm3705_vm5 = vmor %vm3703_vm4, %vm3704_vm3  ;;  %v3462_v55 = vadd.f32 %v11133_v28, %v3461_v2 }
 0x3c9   : > { %v3700_v35 = vsub.f32 1.0, %v3699_v36  ;;  %v3869_v1 = vmul.f32 %v3853_v18, %v3696_v10 }
 0x3cb   : > { %v7897_v23 = vpop.eup %7896  ;;  %v3885_v19 = vadd.f32 %v3869_v1, %v11053_v44  ;;  %v3701_v14 = vmul.f32 %v7895_v22, %v3700_v35 }
 0x3cc   : > { %v3599_v13 = vadd.f32 1.0, %v7897_v23  ;;  %v3465_v23 = vadd.f32 %v11133_v28, %v3464_v45 }
 0x3cd   : > { %3947 = vmatmul.f32.gmra.mxu3 %v3885_v19  ;;  %v3702_v43 = vadd.f32 %v7895_v22, %v3701_v14 }
 0x3ce   : > { %7898 = vrcp.f32 %v3599_v13  ;;  %v3724_v41 = vand.u32 2147483648, %v3599_v13  ;;  %v3722_v26 = vand.u32 2147483647, %v3599_v13  ;;  %vm3718_vm8 = vweird.f32 %v3599_v13  ;;  %v3467_v16 = vpop.f32.mrf.mxu1 }
 0x3cf   : > { %v3706_v60 = vsel %vm3705_vm5, %v7895_v22, %v3702_v43  ;;  %v3468_v2 = vadd.f32 %v11133_v28, %v3467_v16 }
 0x3d0   : > { %v3711_v54 = vsel %vm3708_vm6, %v3710_v40, %v3706_v60  ;;  %v3725_v12 = vor.u32 1.1754944e-38, %v3724_v41  ;;  %vm3723_vm10 = vcmp.eq.f32.partialorder %v3722_v26, 8.507059e+37 }
 0x3d1   : > { %v3870_v24 = vmul.f32 %v3854_v63, %v3711_v54 }
 0x3d2   : > { %v3520_v44 = vpop.f32.mrf.mxu2 }
 0x3d3   : > { %v3521_v61 = vadd.f32 %v3520_v44, %v3456_v58  ;;  %v3886_v4 = vadd.f32 %v3870_v24, %v11065_v34  ;;  %v3856_v58 = vsub.f32 %v11024_v52, %v11094_v15 }
 0x3d4   : > { %v7899_v53 = vpop.eup %7898 }
 0x3d5   : > { %v3714_v17 = vmul.f32 %v7899_v53, %v3599_v13  ;;  %v7482_v11 = vmul.f32 -1.442695, %v3521_v61  ;;  %3950 = vmatmul.f32.gmra.mxu3 %v3886_v4  ;;  %vm3719_vm7 = vweird.f32 %v7899_v53 }
 0x3d6   : > { %vm3720_vm9 = vmor %vm3718_vm8, %vm3719_vm7 }
 0x3d7   : > { %v3715_v5 = vsub.f32 1.0, %v3714_v17  ;;  %7900 = vpow2.f32 %v7482_v11 }
 0x3d9   : > { %v3716_v31 = vmul.f32 %v7899_v53, %v3715_v5  ;;  %v3470_v5 = vpop.f32.mrf.mxu1 }
 0x3da   : > { %v3523_v56 = vpop.f32.mrf.mxu2 }
 0x3db   : > { %v3524_v33 = vadd.f32 %v3523_v56, %v3459_v3  ;;  %v3717_v0 = vadd.f32 %v7899_v53, %v3716_v31 }
 0x3dd   : > { %v7901_v34 = vpop.eup %7900  ;;  %v7483_v29 = vmul.f32 -1.442695, %v3524_v33  ;;  %v3721_v38 = vsel %vm3720_vm9, %v7899_v53, %v3717_v0 }
 0x3de   : > { %v3600_v20 = vadd.f32 1.0, %v7901_v34  ;;  %v3726_v51 = vsel %vm3723_vm10, %v3725_v12, %v3721_v38 }
 0x3df   : > { %7902 = vpow2.f32 %v7483_v29  ;;  %v3871_v22 = vmul.f32 %v3855_v27, %v3726_v51  ;;  %v3857_v29 = vsub.f32 %v11036_v42, %v11107_v46  ;;  %v3471_v51 = vadd.f32 %v11133_v28, %v3470_v5 }
 0x3e0   : > { %7904 = vrcp.f32 %v3600_v20  ;;  %v3739_v7 = vand.u32 2147483648, %v3600_v20  ;;  %vm3733_vm12 = vweird.f32 %v3600_v20 }
 0x3e1   : > { %v3887_v36 = vadd.f32 %v3871_v22, %v11080_v47  ;;  %v3737_v47 = vand.u32 2147483647, %v3600_v20 }
 0x3e2   : > { %v3526_v37 = vpop.f32.mrf.mxu2  ;;  %v3740_v44 = vor.u32 1.1754944e-38, %v3739_v7 }
 0x3e3   : > { %v3527_v18 = vadd.f32 %v3526_v37, %v3462_v55  ;;  %3953 = vmatmul.f32.gmra.mxu3 %v3887_v36  ;;  %vm3738_vm14 = vcmp.eq.f32.partialorder %v3737_v47, 8.507059e+37 }
 0x3e5   : > { %v7903_v10 = vpop.eup %7902  ;;  %v7484_v35 = vmul.f32 -1.442695, %v3527_v18 }
 0x3e6   : > { %v7905_v1 = vpop.eup %7904  ;;  %v3601_v62 = vadd.f32 1.0, %v7903_v10 }
 0x3e7   : > { %v3729_v6 = vmul.f32 %v7905_v1, %v3600_v20  ;;  %7906 = vpow2.f32 %v7484_v35  ;;  %vm3734_vm11 = vweird.f32 %v7905_v1 }
 0x3e8   : > { %7908 = vrcp.f32 %v3601_v62  ;;  %vm3735_vm13 = vmor %vm3733_vm12, %vm3734_vm11  ;;  %v3752_v3 = vand.u32 2147483647, %v3601_v62  ;;  %v3754_v31 = vand.u32 2147483648, %v3601_v62  ;;  %vm3748_vm1 = vweird.f32 %v3601_v62 }
 0x3e9   : > { %v3730_v19 = vsub.f32 1.0, %v3729_v6 }
 0x3ea   : > { %v3529_v14 = vpop.f32.mrf.mxu2  ;;  %v3755_v27 = vor.u32 1.1754944e-38, %v3754_v31  ;;  %vm3753_vm3 = vcmp.eq.f32.partialorder %v3752_v3, 8.507059e+37 }
 0x3eb   : > { %v3530_v13 = vadd.f32 %v3529_v14, %v3465_v23  ;;  %v3731_v43 = vmul.f32 %v7905_v1, %v3730_v19  ;;  %v3858_v19 = vsub.f32 %v11048_v50, %v11118_v25 }
 0x3ed   : > { %v7907_v40 = vpop.eup %7906  ;;  %v7485_v60 = vmul.f32 -1.442695, %v3530_v13  ;;  %v3732_v63 = vadd.f32 %v7905_v1, %v3731_v43 }
 0x3ee   : > { %v7909_v54 = vpop.eup %7908  ;;  %v3602_v24 = vadd.f32 1.0, %v7907_v40 }
 0x3ef   : > { %v3744_v61 = vmul.f32 %v7909_v54, %v3601_v62  ;;  %7910 = vpow2.f32 %v7485_v60  ;;  %v3736_v4 = vsel %vm3735_vm13, %v7905_v1, %v3732_v63  ;;  %vm3749_vm15 = vweird.f32 %v7909_v54  ;;  %v3473_v1 = vpop.f32.mrf.mxu1 }
 0x3f0   : > { %7912 = vrcp.f32 %v3602_v24  ;;  %v3741_v53 = vsel %vm3738_vm14, %v3740_v44, %v3736_v4  ;;  %vm3750_vm2 = vmor %vm3748_vm1, %vm3749_vm15  ;;  %v3767_v37 = vand.u32 2147483647, %v3602_v24  ;;  %v3769_v18 = vand.u32 2147483648, %v3602_v24 }
 0x3f1   : > { %v3745_v17 = vsub.f32 1.0, %v3744_v61  ;;  %v3872_v11 = vmul.f32 %v3856_v58, %v3741_v53  ;;  %vm3763_vm5 = vweird.f32 %v3602_v24  ;;  %v3474_v47 = vadd.f32 %v11133_v28, %v3473_v1 }
 0x3f2   : > { %v3532_v41 = vpop.f32.mrf.mxu2  ;;  %v3770_v7 = vor.u32 1.1754944e-38, %v3769_v18  ;;  %vm3768_vm7 = vcmp.eq.f32.partialorder %v3767_v37, 8.507059e+37 }
 0x3f3   : > { %v3533_v26 = vadd.f32 %v3532_v41, %v3468_v2  ;;  %v3888_v52 = vadd.f32 %v3872_v11, %v11094_v15  ;;  %v3746_v56 = vmul.f32 %v7909_v54, %v3745_v17  ;;  %v3859_v17 = vsub.f32 %v11060_v30, %v11127_v59 }
 0x3f5   : > { %v7911_v33 = vpop.eup %7910  ;;  %v7486_v0 = vmul.f32 -1.442695, %v3533_v26  ;;  %3956 = vmatmul.f32.gmra.mxu3 %v3888_v52  ;;  %v3747_v12 = vadd.f32 %v7909_v54, %v3746_v56 }
 0x3f6   : > { %v7913_v34 = vpop.eup %7912  ;;  %v3603_v38 = vadd.f32 1.0, %v7911_v33 }
 0x3f7   : > { %v3759_v45 = vmul.f32 %v7913_v34, %v3602_v24  ;;  %7914 = vpow2.f32 %v7486_v0  ;;  %v3751_v20 = vsel %vm3750_vm2, %v7909_v54, %v3747_v12  ;;  %vm3764_vm4 = vweird.f32 %v7913_v34  ;;  %v3476_v11 = vpop.f32.mrf.mxu1 }
 0x3f8   : > { %7916 = vrcp.f32 %v3603_v38  ;;  %v3756_v15 = vsel %vm3753_vm3, %v3755_v27, %v3751_v20  ;;  %vm3765_vm6 = vmor %vm3763_vm5, %vm3764_vm4  ;;  %v3782_v54 = vand.u32 2147483647, %v3603_v38  ;;  %v3784_v58 = vand.u32 2147483648, %v3603_v38 }
 0x3f9   : > { %v3760_v22 = vsub.f32 1.0, %v3759_v45  ;;  %v3873_v55 = vmul.f32 %v3857_v29, %v3756_v15  ;;  %vm3778_vm9 = vweird.f32 %v3603_v38  ;;  %v3477_v26 = vadd.f32 %v11133_v28, %v3476_v11 }
 0x3fa   : > { %v3535_v36 = vpop.f32.mrf.mxu2  ;;  %v3785_v41 = vor.u32 1.1754944e-38, %v3784_v58  ;;  %vm3783_vm11 = vcmp.eq.f32.partialorder %v3782_v54, 8.507059e+37  ;;  %v3860_v15 = vsub.f32 %v11073_v8, %v11141_v48 }
 0x3fb   : > { %v3536_v10 = vadd.f32 %v3535_v36, %v3471_v51  ;;  %v3889_v35 = vadd.f32 %v3873_v55, %v11107_v46  ;;  %v3761_v42 = vmul.f32 %v7913_v34, %v3760_v22 }
 0x3fd   : > { %v7915_v62 = vpop.eup %7914  ;;  %v7487_v6 = vmul.f32 -1.442695, %v3536_v10  ;;  %3959 = vmatmul.f32.gmra.mxu3 %v3889_v35  ;;  %v3762_v16 = vadd.f32 %v7913_v34, %v3761_v42 }
 0x3fe   : > { %v7917_v23 = vpop.eup %7916  ;;  %v3604_v14 = vadd.f32 1.0, %v7915_v62 }
 0x3ff   : > { %v3774_v13 = vmul.f32 %v7917_v23, %v3603_v38  ;;  %7918 = vpow2.f32 %v7487_v6  ;;  %v3766_v43 = vsel %vm3765_vm6, %v7913_v34, %v3762_v16  ;;  %vm3779_vm8 = vweird.f32 %v7917_v23 }
 0x400   : > { %7920 = vrcp.f32 %v3604_v14  ;;  %v3771_v46 = vsel %vm3768_vm7, %v3770_v7, %v3766_v43  ;;  %vm3780_vm10 = vmor %vm3778_vm9, %vm3779_vm8  ;;  %v3797_v0 = vand.u32 2147483647, %v3604_v14  ;;  %v3799_v12 = vand.u32 2147483648, %v3604_v14  ;;  %v11221_v7 = vld [vmem:[%s13352_s19] ss:$0 sm:$0xff] }
 0x401   : > { %v3775_v40 = vsub.f32 1.0, %v3774_v13  ;;  %v3874_v60 = vmul.f32 %v3858_v19, %v3771_v46  ;;  %vm3793_vm13 = vweird.f32 %v3604_v14 }
 0x402   : > { %v3538_v63 = vpop.f32.mrf.mxu2  ;;  %v3800_v51 = vor.u32 1.1754944e-38, %v3799_v12  ;;  %vm3798_vm15 = vcmp.eq.f32.partialorder %v3797_v0, 8.507059e+37  ;;  %v3863_v12 = vsub.f32 %v11115_v39, %v11161_v32 }
 0x403   : > { %v3539_v24 = vadd.f32 %v3538_v63, %v3474_v47  ;;  %v3890_v44 = vadd.f32 %v3874_v60, %v11118_v25  ;;  %v3776_v50 = vmul.f32 %v7917_v23, %v3775_v40 }
 0x405   : > { %v7919_v61 = vpop.eup %7918  ;;  %v7488_v4 = vmul.f32 -1.442695, %v3539_v24  ;;  %3962 = vmatmul.f32.gmra.mxu3 %v3890_v44  ;;  %v3777_v53 = vadd.f32 %v7917_v23, %v3776_v50  ;;  %v3862_v44 = vsub.f32 %v11101_v57, %v11154_v21 }
 0x406   : > { %v7921_v2 = vpop.eup %7920  ;;  %v3605_v5 = vadd.f32 1.0, %v7919_v61 }
 0x407   : > { %v3789_v3 = vmul.f32 %v7921_v2, %v3604_v14  ;;  %7922 = vpow2.f32 %v7488_v4  ;;  %v3781_v31 = vsel %vm3780_vm10, %v7917_v23, %v3777_v53  ;;  %vm3794_vm12 = vweird.f32 %v7921_v2 }
 0x408   : > { %7924 = vrcp.f32 %v3605_v5  ;;  %v3786_v25 = vsel %vm3783_vm11, %v3785_v41, %v3781_v31  ;;  %vm3795_vm14 = vmor %vm3793_vm13, %vm3794_vm12  ;;  %v3814_v18 = vand.u32 2147483648, %v3605_v5  ;;  %v3812_v42 = vand.u32 2147483647, %v3605_v5 }
 0x409   : > { %v3790_v52 = vsub.f32 1.0, %v3789_v3  ;;  %v3875_v56 = vmul.f32 %v3859_v17, %v3786_v25  ;;  %vm3808_vm2 = vweird.f32 %v3605_v5  ;;  %v3861_v23 = vsub.f32 %v11087_v49, %v11148_v9 }
 0x40a   : > { %v3541_v33 = vpop.f32.mrf.mxu2  ;;  %v3815_v16 = vor.u32 1.1754944e-38, %v3814_v18  ;;  %vm3813_vm4 = vcmp.eq.f32.partialorder %v3812_v42, 8.507059e+37 }
 0x40b   : > { %v3542_v34 = vadd.f32 %v3541_v33, %v3477_v26  ;;  %v3891_v30 = vadd.f32 %v3875_v56, %v11127_v59  ;;  %v3791_v29 = vmul.f32 %v7921_v2, %v3790_v52 }
 0x40d   : > { %v7923_v38 = vpop.eup %7922  ;;  %v7489_v27 = vmul.f32 -1.442695, %v3542_v34  ;;  %3965 = vmatmul.f32.gmra.mxu3 %v3891_v30  ;;  %v3792_v45 = vadd.f32 %v7921_v2, %v3791_v29 }
 0x40e   : > { %v7925_v20 = vpop.eup %7924  ;;  %v3606_v28 = vadd.f32 1.0, %v7923_v38 }
 0x40f   : > { %v3804_v22 = vmul.f32 %v7925_v20, %v3605_v5  ;;  %7926 = vpow2.f32 %v7489_v27  ;;  %v3796_v55 = vsel %vm3795_vm14, %v7921_v2, %v3792_v45  ;;  %vm3809_vm1 = vweird.f32 %v7925_v20 }
 0x410   : > { %7928 = vrcp.f32 %v3606_v28  ;;  %v3801_v59 = vsel %vm3798_vm15, %v3800_v51, %v3796_v55  ;;  %vm3810_vm3 = vmor %vm3808_vm2, %vm3809_vm1  ;;  %v3827_v46 = vand.u32 2147483647, %v3606_v28  ;;  %v3829_v47 = vand.u32 2147483648, %v3606_v28  ;;  %v3933_v40 = vpop.f32.mrf.mxu3 }
 0x411   : > { %v3805_v36 = vsub.f32 1.0, %v3804_v22  ;;  %v3876_v37 = vmul.f32 %v3860_v15, %v3801_v59  ;;  %v11225_v54 = vadd.f32 %v11221_v7, %v3933_v40  ;;  %vm3823_vm6 = vweird.f32 %v3606_v28 }
 0x412   : > { %v3830_v50 = vor.u32 1.1754944e-38, %v3829_v47  ;;  %vm3828_vm8 = vcmp.eq.f32.partialorder %v3827_v46, 8.507059e+37 }
 0x413   : > { %v3892_v10 = vadd.f32 %v3876_v37, %v11141_v48  ;;  %v3806_v35 = vmul.f32 %v7925_v20, %v3805_v36  ;;  %v11228_v58 = vmul.f32 0.70710677, %v11225_v54 }
 0x415   : > { %v7927_v1 = vpop.eup %7926  ;;  %3968 = vmatmul.f32.gmra.mxu3 %v3892_v10  ;;  %v3807_v8 = vadd.f32 %v7925_v20, %v3806_v35 }
 0x416   : > { %v7929_v62 = vpop.eup %7928  ;;  %v3607_v6 = vadd.f32 1.0, %v7927_v1 }
 0x417   : > { %v3819_v19 = vmul.f32 %v7929_v62, %v3606_v28  ;;  %v3811_v14 = vsel %vm3810_vm3, %v7925_v20, %v3807_v8  ;;  %vm3824_vm5 = vweird.f32 %v7929_v62 }
 0x418   : > { %7930 = vrcp.f32 %v3607_v6  ;;  %v3816_v48 = vsel %vm3813_vm4, %v3815_v16, %v3811_v14  ;;  %vm3825_vm7 = vmor %vm3823_vm6, %vm3824_vm5  ;;  %v3842_v5 = vand.u32 2147483647, %v3607_v6  ;;  %v3844_v41 = vand.u32 2147483648, %v3607_v6  ;;  %v3936_v3 = vpop.f32.mrf.mxu3 }
 0x419   : > { %v3820_v13 = vsub.f32 1.0, %v3819_v19  ;;  %v3877_v43 = vmul.f32 %v3861_v23, %v3816_v48  ;;  %v11239_v26 = vadd.f32 %v11221_v7, %v3936_v3  ;;  %vm3838_vm10 = vweird.f32 %v3607_v6 }
 0x41a   : > { %vm3843_vm12 = vcmp.eq.f32.partialorder %v3842_v5, 8.507059e+37 }
 0x41b   : > { %v3893_v60 = vadd.f32 %v3877_v43, %v11148_v9  ;;  %v3821_v63 = vmul.f32 %v7929_v62, %v3820_v13  ;;  %v4013_v9 = vmul.f32 %v11228_v58, %v11228_v58  ;;  %v11243_v0 = vmul.f32 0.70710677, %v11239_v26 }
 0x41d   : > { %3971 = vmatmul.f32.gmra.mxu3 %v3893_v60  ;;  %v3822_v49 = vadd.f32 %v7929_v62, %v3821_v63  ;;  %v11234_v11 = vmin.f32 %v4013_v9, 16.0  ;;  %v4053_v38 = vmul.f32 %v11243_v0, %v11243_v0 }
 0x41e   : > { %v7931_v24 = vpop.eup %7930 }
 0x41f   : > { %v3834_v61 = vmul.f32 %v7931_v24, %v3607_v6  ;;  %v3826_v4 = vsel %vm3825_vm7, %v7929_v62, %v3822_v49  ;;  %vm3839_vm9 = vweird.f32 %v7931_v24  ;;  %v4015_v25 = vmul.f32 2.1237322e-06, %v11234_v11 }
 0x420   : > { %v3831_v53 = vsel %vm3828_vm8, %v3830_v50, %v3826_v4  ;;  %v4026_v52 = vmul.f32 3.8918573e-05, %v11234_v11  ;;  %vm3840_vm11 = vmor %vm3838_vm10, %vm3839_vm9  ;;  %v11252_v28 = vmin.f32 %v4053_v38, 16.0 }
 0x421   : > { %v3835_v2 = vsub.f32 1.0, %v3834_v61  ;;  %v3878_v17 = vmul.f32 %v3862_v44, %v3831_v53  ;;  %v4016_v33 = vadd.f32 0.00028619796, %v4015_v25 }
 0x422   : > { %v4027_v34 = vadd.f32 0.001143296, %v4026_v52  ;;  %v4055_v22 = vmul.f32 2.1237322e-06, %v11252_v28  ;;  %v4066_v55 = vmul.f32 3.8918573e-05, %v11252_v28 }
 0x423   : > { %v3894_v31 = vadd.f32 %v3878_v17, %v11154_v21  ;;  %v3836_v57 = vmul.f32 %v7931_v24, %v3835_v2  ;;  %v3845_v21 = vor.u32 1.1754944e-38, %v3844_v41  ;;  %v4017_v29 = vmul.f32 %v4016_v33, %v11234_v11 }
 0x424   : > { %v4028_v45 = vmul.f32 %v4027_v34, %v11234_v11  ;;  %v4056_v37 = vadd.f32 0.00028619796, %v4055_v22  ;;  %v4067_v18 = vadd.f32 0.001143296, %v4066_v55 }
 0x425   : > { %3974 = vmatmul.f32.gmra.mxu3 %v3894_v31  ;;  %v3837_v56 = vadd.f32 %v7931_v24, %v3836_v57  ;;  %v4018_v15 = vadd.f32 0.0036580483, %v4017_v29 }
 0x426   : > { %v4029_v51 = vadd.f32 0.014752088, %v4028_v45  ;;  %v4057_v42 = vmul.f32 %v4056_v37, %v11252_v28 }
 0x427   : > { %v3841_v30 = vsel %vm3840_vm11, %v7931_v24, %v3837_v56  ;;  %v4019_v59 = vmul.f32 %v4018_v15, %v11234_v11 }
 0x428   : > { %v3846_v27 = vsel %vm3843_vm12, %v3845_v21, %v3841_v30  ;;  %v4030_v36 = vmul.f32 %v4029_v51, %v11234_v11  ;;  %v4058_v16 = vadd.f32 0.0036580483, %v4057_v42 }
 0x429   : > { %v3879_v20 = vmul.f32 %v3863_v12, %v3846_v27  ;;  %v4020_v8 = vadd.f32 0.05243302, %v4019_v59 }
 0x42a   : > { %v4031_v35 = vadd.f32 0.112945676, %v4030_v36  ;;  %v4059_v47 = vmul.f32 %v4058_v16, %v11252_v28 }
 0x42b   : > { %v3895_v39 = vadd.f32 %v3879_v20, %v11161_v32  ;;  %v4068_v32 = vmul.f32 %v4067_v18, %v11252_v28  ;;  %v4021_v48 = vmul.f32 %v4020_v8, %v11234_v11 }
 0x42c   : > { %v4032_v62 = vmul.f32 %v4031_v35, %v11234_v11  ;;  %v4060_v4 = vadd.f32 0.05243302, %v4059_v47 }
 0x42d   : > { %3977 = vmatmul.f32.gmra.mxu3 %v3895_v39  ;;  %v4069_v19 = vadd.f32 0.014752088, %v4068_v32  ;;  %v4022_v24 = vadd.f32 0.18741608, %v4021_v48 }
 0x42e   : > { %v3939_v10 = vpop.f32.mrf.mxu3  ;;  %v4033_v23 = vadd.f32 0.4994258, %v4032_v62  ;;  %v4061_v57 = vmul.f32 %v4060_v4, %v11252_v28 }
 0x42f   : > { %v11261_v1 = vadd.f32 %v11221_v7, %v3939_v10  ;;  %v4070_v43 = vmul.f32 %v4069_v19, %v11252_v28  ;;  %v4023_v17 = vmul.f32 %v4022_v24, %v11234_v11 }
 0x430   : > { %v4034_v13 = vmul.f32 %v4033_v23, %v11234_v11  ;;  %v4062_v29 = vadd.f32 0.18741608, %v4061_v57 }
 0x431   : > { %v11266_v6 = vmul.f32 0.70710677, %v11261_v1  ;;  %v4071_v60 = vadd.f32 0.112945676, %v4070_v43  ;;  %v4024_v33 = vadd.f32 1.1283791, %v4023_v17 }
 0x432   : > { %v4035_v40 = vadd.f32 1.0, %v4034_v13  ;;  %v4063_v37 = vmul.f32 %v4062_v29, %v11252_v28 }
 0x433   : > { %v4093_v14 = vmul.f32 %v11266_v6, %v11266_v6  ;;  %v4072_v50 = vmul.f32 %v4071_v60, %v11252_v28  ;;  %v4025_v51 = vmul.f32 %v4024_v33, %v11228_v58 }
 0x434   : > { %7932 = vrcp.f32 %v4035_v40  ;;  %v4047_v30 = vand.u32 2147483648, %v4035_v40  ;;  %v4045_v27 = vand.u32 2147483647, %v4035_v40  ;;  %vm4041_vm14 = vweird.f32 %v4035_v40 }
 0x435   : > { %v11273_v46 = vmin.f32 %v4093_v14, 16.0  ;;  %v4073_v53 = vadd.f32 0.4994258, %v4072_v50  ;;  %v4064_v13 = vadd.f32 1.1283791, %v4063_v37 }
 0x436   : > { %v4048_v59 = vor.u32 1.1754944e-38, %v4047_v30  ;;  %vm4046_vm1 = vcmp.eq.f32.partialorder %v4045_v27, 8.507059e+37 }
 0x437   : > { %v4095_v63 = vmul.f32 2.1237322e-06, %v11273_v46  ;;  %v4106_v49 = vmul.f32 3.8918573e-05, %v11273_v46  ;;  %v4074_v41 = vmul.f32 %v4073_v53, %v11252_v28  ;;  %v3981_v28 = vmul.f32 0.5, %v11225_v54 }
 0x439   : > { %v4096_v44 = vadd.f32 0.00028619796, %v4095_v63  ;;  %v4107_v61 = vadd.f32 0.001143296, %v4106_v49  ;;  %v4075_v21 = vadd.f32 1.0, %v4074_v41 }
 0x43a   : > { %v7933_v31 = vpop.eup %7932 }
 0x43b   : > { %v4097_v9 = vmul.f32 %v4096_v44, %v11273_v46  ;;  %v4108_v2 = vmul.f32 %v4107_v61, %v11273_v46  ;;  %v4037_v56 = vmul.f32 %v7933_v31, %v4035_v40  ;;  %7934 = vrcp.f32 %v4075_v21 }
 0x43c   : > { %vm4042_vm13 = vweird.f32 %v7933_v31  ;;  %v4085_v24 = vand.u32 2147483647, %v4075_v21  ;;  %v4087_v50 = vand.u32 2147483648, %v4075_v21  ;;  %vm4081_vm3 = vweird.f32 %v4075_v21 }
 0x43d   : > { %v3942_v5 = vpop.f32.mrf.mxu3  ;;  %v4109_v3 = vadd.f32 0.014752088, %v4108_v2  ;;  %v4098_v52 = vadd.f32 0.0036580483, %v4097_v9  ;;  %v4038_v11 = vsub.f32 1.0, %v4037_v56  ;;  %vm4043_vm15 = vmor %vm4041_vm14, %vm4042_vm13  ;;  %v4065_v2 = vmul.f32 %v4064_v13, %v11243_v0 }
 0x43e   : > { %v11285_v25 = vadd.f32 %v11221_v7, %v3942_v5  ;;  %vm4086_vm5 = vcmp.eq.f32.partialorder %v4085_v24, 8.507059e+37  ;;  %v4088_v57 = vor.u32 1.1754944e-38, %v4087_v50 }
 0x43f   : > { %v4110_v34 = vmul.f32 %v4109_v3, %v11273_v46  ;;  %v4099_v45 = vmul.f32 %v4098_v52, %v11273_v46  ;;  %v4039_v20 = vmul.f32 %v7933_v31, %v4038_v11 }
 0x440   : > { %v11288_v12 = vmul.f32 0.70710677, %v11285_v25 }
 0x441   : > { %v4111_v15 = vadd.f32 0.112945676, %v4110_v34  ;;  %v4040_v55 = vadd.f32 %v7933_v31, %v4039_v20  ;;  %v4100_v42 = vadd.f32 0.05243302, %v4099_v45  ;;  %v7935_v8 = vpop.eup %7934 }
 0x442   : > { %v4133_v38 = vmul.f32 %v11288_v12, %v11288_v12  ;;  %v4077_v48 = vmul.f32 %v7935_v8, %v4075_v21  ;;  %vm4082_vm2 = vweird.f32 %v7935_v8 }
 0x443   : > { %v4112_v36 = vmul.f32 %v4111_v15, %v11273_v46  ;;  %v4044_v58 = vsel %vm4043_vm15, %v7933_v31, %v4040_v55  ;;  %v4101_v60 = vmul.f32 %v4100_v42, %v11273_v46  ;;  %vm4083_vm4 = vmor %vm4081_vm3, %vm4082_vm2 }
 0x444   : > { %v11295_v39 = vmin.f32 %v4133_v38, 16.0  ;;  %v4049_v16 = vsel %vm4046_vm1, %v4048_v59, %v4044_v58  ;;  %v4078_v49 = vsub.f32 1.0, %v4077_v48 }
 0x445   : > { %v3945_v22 = vpop.f32.mrf.mxu3  ;;  %v4113_v32 = vadd.f32 0.4994258, %v4112_v36  ;;  %v4050_v14 = vmul.f32 %v4049_v16, %v4025_v51  ;;  %v4102_v5 = vadd.f32 0.18741608, %v4101_v60  ;;  %v3982_v36 = vmul.f32 0.5, %v11239_v26 }
 0x446   : > { %v4135_v18 = vmul.f32 2.1237322e-06, %v11295_v39  ;;  %v11301_v10 = vadd.f32 %v11221_v7, %v3945_v22  ;;  %v4146_v35 = vmul.f32 3.8918573e-05, %v11295_v39  ;;  %v4079_v53 = vmul.f32 %v7935_v8, %v4078_v49 }
 0x447   : > { %v4114_v47 = vmul.f32 %v4113_v32, %v11273_v46  ;;  %v7490_v63 = vclamps-f32 %v4050_v14, 1.0  ;;  %v4103_v21 = vmul.f32 %v4102_v5, %v11273_v46 }
 0x448   : > { %v11305_v62 = vmul.f32 0.70710677, %v11301_v10  ;;  %v4147_v23 = vadd.f32 0.001143296, %v4146_v35  ;;  %v4136_v19 = vadd.f32 0.00028619796, %v4135_v18  ;;  %v4080_v3 = vadd.f32 %v7935_v8, %v4079_v53 }
 0x449   : > { %v11315_v61 = vadd.f32 1.0, %v4114_v47  ;;  %v4653_v9 = vadd.f32 1.0, %v7490_v63  ;;  %v4104_v35 = vadd.f32 1.1283791, %v4103_v21 }
 0x44a   : > { %v4173_v43 = vmul.f32 %v11305_v62, %v11305_v62  ;;  %v4148_v40 = vmul.f32 %v4147_v23, %v11295_v39  ;;  %v4137_v4 = vmul.f32 %v4136_v19, %v11295_v39  ;;  %v4084_v11 = vsel %vm4083_vm4, %v7935_v8, %v4080_v3 }
 0x44b   : > { %7936 = vrcp.f32 %v11315_v61  ;;  %v11321_v41 = vmul.f32 %v4653_v9, %v3981_v28  ;;  %v4089_v29 = vsel %vm4086_vm5, %v4088_v57, %v4084_v11  ;;  %v4125_v16 = vand.u32 2147483647, %v11315_v61 }
 0x44c   : > { %v11313_v44 = vmin.f32 %v4173_v43, 16.0  ;;  %v4149_v54 = vadd.f32 0.014752088, %v4148_v40  ;;  %v4138_v33 = vadd.f32 0.0036580483, %v4137_v4  ;;  %v4090_v27 = vmul.f32 %v4089_v29, %v4065_v2 }
 0x44d   : > { %v4685_v34 = vsel %vm2277_vm0, %v11321_v41, 0.0  ;;  %v4127_v23 = vand.u32 2147483648, %v11315_v61  ;;  %vm4121_vm7 = vweird.f32 %v11315_v61  ;;  %v4105_v2 = vmul.f32 %v4104_v35, %v11266_v6 }
 0x44e   : > { %v4175_v17 = vmul.f32 2.1237322e-06, %v11313_v44  ;;  %v4150_v52 = vmul.f32 %v4149_v54, %v11295_v39  ;;  %v4186_v56 = vmul.f32 3.8918573e-05, %v11313_v44  ;;  %4686 = vadd.xlane.f32.xlu0 %v4685_v34  ;;  %v4139_v51 = vmul.f32 %v4138_v33, %v11295_v39 }
 0x44f   : > { %v7491_v55 = vclamps-f32 %v4090_v27, 1.0  ;;  %v4128_v9 = vor.u32 1.1754944e-38, %v4127_v23  ;;  %vm4126_vm9 = vcmp.eq.f32.partialorder %v4125_v16, 8.507059e+37 }
 0x450   : > { %v3948_v31 = vpop.f32.mrf.mxu3  ;;  %v4176_v30 = vadd.f32 0.00028619796, %v4175_v17  ;;  %v4151_v45 = vadd.f32 0.112945676, %v4150_v52  ;;  %v4187_v15 = vadd.f32 0.001143296, %v4186_v56 }
 0x451   : > { %v11326_v0 = vadd.f32 %v11221_v7, %v3948_v31  ;;  %v7937_v20 = vpop.eup %7936  ;;  %v4654_v58 = vadd.f32 1.0, %v7491_v55  ;;  %v4140_v28 = vadd.f32 0.05243302, %v4139_v51 }
 0x452   : > { %v4117_v59 = vmul.f32 %v7937_v20, %v11315_v61  ;;  %v4177_v37 = vmul.f32 %v4176_v30, %v11313_v44  ;;  %v4152_v46 = vmul.f32 %v4151_v45, %v11295_v39  ;;  %v4188_v18 = vmul.f32 %v4187_v15, %v11313_v44 }
 0x453   : > { %v11332_v38 = vmul.f32 0.70710677, %v11326_v0  ;;  %v11349_v14 = vmul.f32 %v4654_v58, %v3982_v36  ;;  %vm4122_vm6 = vweird.f32 %v7937_v20  ;;  %v4141_v54 = vmul.f32 %v4140_v28, %v11295_v39 }
 0x454   : > { %v4118_v32 = vsub.f32 1.0, %v4117_v59  ;;  %v4153_v19 = vadd.f32 0.4994258, %v4152_v46  ;;  %v4178_v13 = vadd.f32 0.0036580483, %v4177_v37  ;;  %vm4123_vm8 = vmor %vm4121_vm7, %vm4122_vm6 }
 0x455   : > { %v4213_v22 = vmul.f32 %v11332_v38, %v11332_v38  ;;  %v4189_v47 = vadd.f32 0.014752088, %v4188_v18  ;;  %v4688_v63 = vsel %vm2277_vm0, %v11349_v14, 0.0  ;;  %v4142_v56 = vadd.f32 0.18741608, %v4141_v54 }
 0x456   : > { %v4119_v48 = vmul.f32 %v7937_v20, %v4118_v32  ;;  %v4154_v43 = vmul.f32 %v4153_v19, %v11295_v39  ;;  %4689 = vadd.xlane.f32.xlu0 %v4688_v63  ;;  %v4179_v61 = vmul.f32 %v4178_v13, %v11313_v44 }
 0x457   : > { %v11342_v42 = vmin.f32 %v4213_v22, 16.0  ;;  %v4190_v50 = vmul.f32 %v4189_v47, %v11313_v44  ;;  %v4143_v22 = vmul.f32 %v4142_v56, %v11295_v39 }
 0x458   : > { %v3951_v8 = vpop.f32.mrf.mxu3  ;;  %v4120_v49 = vadd.f32 %v7937_v20, %v4119_v48  ;;  %v11359_v24 = vadd.f32 1.0, %v4154_v43  ;;  %v4180_v6 = vadd.f32 0.05243302, %v4179_v61 }
 0x459   : > { %v11347_v26 = vadd.f32 %v11221_v7, %v3951_v8  ;;  %v4215_v40 = vmul.f32 2.1237322e-06, %v11342_v42  ;;  %v4226_v53 = vmul.f32 3.8918573e-05, %v11342_v42  ;;  %v4191_v52 = vadd.f32 0.112945676, %v4190_v50 }
 0x45a   : > { %v4124_v17 = vsel %vm4123_vm8, %v7937_v20, %v4120_v49  ;;  %7938 = vrcp.f32 %v11359_v24  ;;  %v3983_v20 = vmul.f32 0.5, %v11261_v1  ;;  %v4181_v35 = vmul.f32 %v4180_v6, %v11313_v44 }
 0x45b   : > { %v11354_v60 = vmul.f32 0.70710677, %v11347_v26  ;;  %v4216_v5 = vadd.f32 0.00028619796, %v4215_v40  ;;  %v4129_v31 = vsel %vm4126_vm9, %v4128_v9, %v4124_v17  ;;  %v4227_v34 = vadd.f32 0.001143296, %v4226_v53 }
 0x45c   : > { %v4130_v57 = vmul.f32 %v4129_v31, %v4105_v2  ;;  %v4192_v30 = vmul.f32 %v4191_v52, %v11313_v44  ;;  %v4144_v19 = vadd.f32 1.1283791, %v4143_v22  ;;  %v4167_v48 = vand.u32 2147483648, %v11359_v24 }
 0x45d   : > { %v4253_v4 = vmul.f32 %v11354_v60, %v11354_v60  ;;  %v4217_v29 = vmul.f32 %v4216_v5, %v11342_v42  ;;  %v4228_v21 = vmul.f32 %v4227_v34, %v11342_v42  ;;  %v4165_v43 = vand.u32 2147483647, %v11359_v24 }
 0x45e   : > { %v7492_v11 = vclamps-f32 %v4130_v57, 1.0  ;;  %v4193_v51 = vadd.f32 0.4994258, %v4192_v30  ;;  %v4182_v47 = vadd.f32 0.18741608, %v4181_v35  ;;  %vm4161_vm11 = vweird.f32 %v11359_v24 }
 0x45f   : > { %v11369_v3 = vmin.f32 %v4253_v4, 16.0  ;;  %v4229_v46 = vadd.f32 0.014752088, %v4228_v21  ;;  %v4218_v58 = vadd.f32 0.0036580483, %v4217_v29  ;;  %v4145_v4 = vmul.f32 %v4144_v19, %v11288_v12 }
 0x460   : > { %v7939_v45 = vpop.eup %7938  ;;  %v4655_v15 = vadd.f32 1.0, %v7492_v11  ;;  %v4194_v37 = vmul.f32 %v4193_v51, %v11313_v44  ;;  %v4168_v53 = vor.u32 1.1754944e-38, %v4167_v48  ;;  %vm4166_vm13 = vcmp.eq.f32.partialorder %v4165_v43, 8.507059e+37 }
 0x461   : > { %v4255_v33 = vmul.f32 2.1237322e-06, %v11369_v3  ;;  %v4266_v27 = vmul.f32 3.8918573e-05, %v11369_v3  ;;  %v4157_v59 = vmul.f32 %v7939_v45, %v11359_v24  ;;  %v4230_v39 = vmul.f32 %v4229_v46, %v11342_v42 }
 0x462   : > { %v11379_v36 = vmul.f32 %v4655_v15, %v3983_v20  ;;  %v11385_v16 = vadd.f32 1.0, %v4194_v37  ;;  %vm4162_vm10 = vweird.f32 %v7939_v45  ;;  %v4219_v40 = vmul.f32 %v4218_v58, %v11342_v42 }
 0x463   : > { %v4256_v55 = vadd.f32 0.00028619796, %v4255_v33  ;;  %v4267_v18 = vadd.f32 0.001143296, %v4266_v27  ;;  %v4158_v32 = vsub.f32 1.0, %v4157_v59  ;;  %vm4163_vm12 = vmor %vm4161_vm11, %vm4162_vm10  ;;  %v4183_v5 = vmul.f32 %v4182_v47, %v11313_v44 }
 0x464   : > { %v4691_v1 = vsel %vm2277_vm0, %v11379_v36, 0.0  ;;  %7940 = vrcp.f32 %v11385_v16  ;;  %v4231_v50 = vadd.f32 0.112945676, %v4230_v39  ;;  %v4220_v31 = vadd.f32 0.05243302, %v4219_v40 }
 0x465   : > { %v4268_v23 = vmul.f32 %v4267_v18, %v11369_v3  ;;  %v4257_v28 = vmul.f32 %v4256_v55, %v11369_v3  ;;  %4692 = vadd.xlane.f32.xlu1 %v4691_v1  ;;  %v4159_v13 = vmul.f32 %v7939_v45, %v4158_v32  ;;  %v3984_v30 = vmul.f32 0.5, %v11285_v25 }
 0x466   : > { %v3954_v8 = vpop.f32.mrf.mxu3  ;;  %v4232_v17 = vmul.f32 %v4231_v50, %v11342_v42  ;;  %v4184_v21 = vadd.f32 1.1283791, %v4183_v5  ;;  %v4221_v27 = vmul.f32 %v4220_v31, %v11342_v42  ;;  %v4207_v51 = vand.u32 2147483648, %v11385_v16 }
 0x467   : > { %v11395_v63 = vadd.f32 %v11221_v7, %v3954_v8  ;;  %v4160_v49 = vadd.f32 %v7939_v45, %v4159_v13  ;;  %v4269_v54 = vadd.f32 0.014752088, %v4268_v23  ;;  %v4258_v9 = vadd.f32 0.0036580483, %v4257_v28 }
 0x468   : > { %v4233_v33 = vadd.f32 0.4994258, %v4232_v17  ;;  %v4205_v25 = vand.u32 2147483647, %v11385_v16  ;;  %vm4201_vm15 = vweird.f32 %v11385_v16  ;;  %v4185_v32 = vmul.f32 %v4184_v21, %v11305_v62 }
 0x469   : > { %v4164_v2 = vsel %vm4163_vm12, %v7939_v45, %v4160_v49  ;;  %v4270_v61 = vmul.f32 %v4269_v54, %v11369_v3  ;;  %v11403_v57 = vmul.f32 0.70710677, %v11395_v63  ;;  %v4259_v34 = vmul.f32 %v4258_v9, %v11369_v3 }
 0x46a   : > { %v4169_v24 = vsel %vm4166_vm13, %v4168_v53, %v4164_v2  ;;  %v7941_v52 = vpop.eup %7940  ;;  %v4234_v29 = vmul.f32 %v4233_v33, %v11342_v42  ;;  %v4222_v8 = vadd.f32 0.18741608, %v4221_v27  ;;  %v4208_v23 = vor.u32 1.1754944e-38, %v4207_v51 }
 0x46b   : > { %v4170_v56 = vmul.f32 %v4169_v24, %v4145_v4  ;;  %v4271_v12 = vadd.f32 0.112945676, %v4270_v61  ;;  %v4197_v11 = vmul.f32 %v7941_v52, %v11385_v16  ;;  %v4293_v45 = vmul.f32 %v11403_v57, %v11403_v57 }
 0x46c   : > { %v4235_v22 = vadd.f32 1.0, %v4234_v29  ;;  %v4260_v59 = vadd.f32 0.05243302, %v4259_v34  ;;  %vm4202_vm14 = vweird.f32 %v7941_v52  ;;  %vm4206_vm2 = vcmp.eq.f32.partialorder %v4205_v25, 8.507059e+37 }
 0x46d   : > { %v7493_v6 = vclamps-f32 %v4170_v56, 1.0  ;;  %v4272_v44 = vmul.f32 %v4271_v12, %v11369_v3  ;;  %v4198_v20 = vsub.f32 1.0, %v4197_v11  ;;  %v11417_v18 = vmin.f32 %v4293_v45, 16.0  ;;  %vm4203_vm1 = vmor %vm4201_vm15, %vm4202_vm14 }
 0x46e   : > { %7942 = vrcp.f32 %v4235_v22  ;;  %v4261_v19 = vmul.f32 %v4260_v59, %v11369_v3  ;;  %v4223_v49 = vmul.f32 %v4222_v8, %v11342_v42  ;;  %v3985_v53 = vmul.f32 0.5, %v11301_v10 }
 0x46f   : > { %v4656_v15 = vadd.f32 1.0, %v7493_v6  ;;  %v4273_v55 = vadd.f32 0.4994258, %v4272_v44  ;;  %v4199_v37 = vmul.f32 %v7941_v52, %v4198_v20  ;;  %v4306_v47 = vmul.f32 3.8918573e-05, %v11417_v18 }
 0x470   : > { %v4262_v50 = vadd.f32 0.18741608, %v4261_v19  ;;  %v4224_v5 = vadd.f32 1.1283791, %v4223_v49  ;;  %v4247_v56 = vand.u32 2147483648, %v4235_v22  ;;  %vm4241_vm4 = vweird.f32 %v4235_v22 }
 0x471   : > { %v11415_v46 = vmul.f32 %v4656_v15, %v3984_v30  ;;  %v4200_v35 = vadd.f32 %v7941_v52, %v4199_v37  ;;  %v4274_v58 = vmul.f32 %v4273_v55, %v11369_v3  ;;  %v4307_v61 = vadd.f32 0.001143296, %v4306_v47 }
 0x472   : > { %v4263_v31 = vmul.f32 %v4262_v50, %v11369_v3  ;;  %v4245_v34 = vand.u32 2147483647, %v4235_v22  ;;  %v4225_v29 = vmul.f32 %v4224_v5, %v11332_v38  ;;  %v4248_v21 = vor.u32 1.1754944e-38, %v4247_v56 }
 0x473   : > { %v4694_v39 = vsel %vm2277_vm0, %v11415_v46, 0.0  ;;  %v4204_v48 = vsel %vm4203_vm1, %v7941_v52, %v4200_v35  ;;  %v4275_v13 = vadd.f32 1.0, %v4274_v58  ;;  %v4308_v11 = vmul.f32 %v4307_v61, %v11417_v18 }
 0x474   : > { %4695 = vadd.xlane.f32.xlu1 %v4694_v39  ;;  %v4209_v16 = vsel %vm4206_vm2, %v4208_v23, %v4204_v48  ;;  %v7943_v40 = vpop.eup %7942  ;;  %v4264_v44 = vadd.f32 1.1283791, %v4263_v31  ;;  %vm4246_vm6 = vcmp.eq.f32.partialorder %v4245_v34, 8.507059e+37 }
 0x475   : > { %v4210_v62 = vmul.f32 %v4209_v16, %v4185_v32  ;;  %7944 = vrcp.f32 %v4275_v13  ;;  %v4237_v4 = vmul.f32 %v7943_v40, %v4235_v22  ;;  %vm4242_vm3 = vweird.f32 %v7943_v40 }
 0x476   : > { %vm4243_vm5 = vmor %vm4241_vm4, %vm4242_vm3  ;;  %v4285_v51 = vand.u32 2147483647, %v4275_v13  ;;  %v4287_v22 = vand.u32 2147483648, %v4275_v13  ;;  %v4309_v55 = vadd.f32 0.014752088, %v4308_v11  ;;  %vm4281_vm8 = vweird.f32 %v4275_v13 }
 0x477   : > { %v7494_v54 = vclamps-f32 %v4210_v62, 1.0  ;;  %v4238_v17 = vsub.f32 1.0, %v4237_v4  ;;  %v3986_v32 = vmul.f32 0.5, %v11326_v0  ;;  %v4265_v8 = vmul.f32 %v4264_v44, %v11354_v60 }
 0x478   : > { %v3957_v1 = vpop.f32.mrf.mxu3  ;;  %v4310_v39 = vmul.f32 %v4309_v55, %v11417_v18  ;;  %vm4286_vm10 = vcmp.eq.f32.partialorder %v4285_v51, 8.507059e+37 }
 0x479   : > { %v11426_v28 = vadd.f32 %v11221_v7, %v3957_v1  ;;  %v4657_v2 = vadd.f32 1.0, %v7494_v54  ;;  %v4239_v12 = vmul.f32 %v7943_v40, %v4238_v17  ;;  %v4288_v1 = vor.u32 1.1754944e-38, %v4287_v22 }
 0x47a   : > { %v4311_v50 = vadd.f32 0.112945676, %v4310_v39  ;;  %v3987_v54 = vmul.f32 0.5, %v11347_v26 }
 0x47b   : > { %v11429_v43 = vmul.f32 0.70710677, %v11426_v28  ;;  %v11437_v52 = vmul.f32 %v4657_v2, %v3985_v53  ;;  %v7945_v33 = vpop.eup %7944  ;;  %v4240_v3 = vadd.f32 %v7943_v40, %v4239_v12 }
 0x47c   : > { %v4277_v6 = vmul.f32 %v7945_v33, %v4275_v13  ;;  %vm4282_vm7 = vweird.f32 %v7945_v33  ;;  %v4312_v17 = vmul.f32 %v4311_v50, %v11417_v18 }
 0x47d   : > { %v4333_v9 = vmul.f32 %v11429_v43, %v11429_v43  ;;  %v4697_v30 = vsel %vm2277_vm0, %v11437_v52, 0.0  ;;  %v4244_v27 = vsel %vm4243_vm5, %v7943_v40, %v4240_v3  ;;  %vm4283_vm9 = vmor %vm4281_vm8, %vm4282_vm7 }
 0x47e   : > { %4698 = vadd.xlane.f32.xlu2 %v4697_v30  ;;  %v4278_v45 = vsub.f32 1.0, %v4277_v6  ;;  %v4249_v15 = vsel %vm4246_vm6, %v4248_v21, %v4244_v27  ;;  %v4313_v26 = vadd.f32 0.4994258, %v4312_v17 }
 0x47f   : > { %v11439_v42 = vmin.f32 %v4333_v9, 16.0  ;;  %v4250_v37 = vmul.f32 %v4249_v15, %v4225_v29 }
 0x480   : > { %v3960_v24 = vpop.f32.mrf.mxu3  ;;  %v4279_v25 = vmul.f32 %v7945_v33, %v4278_v45  ;;  %v4314_v30 = vmul.f32 %v4313_v26, %v11417_v18 }
 0x481   : > { %v11443_v10 = vadd.f32 %v11221_v7, %v3960_v24  ;;  %v4346_v20 = vmul.f32 3.8918573e-05, %v11439_v42  ;;  %v7495_v38 = vclamps-f32 %v4250_v37, 1.0  ;;  %v4335_v51 = vmul.f32 2.1237322e-06, %v11439_v42 }
 0x482   : > { %v4280_v35 = vadd.f32 %v7945_v33, %v4279_v25  ;;  %v11489_v27 = vadd.f32 1.0, %v4314_v30 }
 0x483   : > { %v11450_v59 = vmul.f32 0.70710677, %v11443_v10  ;;  %v4347_v58 = vadd.f32 0.001143296, %v4346_v20  ;;  %v4658_v19 = vadd.f32 1.0, %v7495_v38 }
 0x484   : > { %v4284_v48 = vsel %vm4283_vm9, %v7945_v33, %v4280_v35  ;;  %v4295_v33 = vmul.f32 2.1237322e-06, %v11417_v18  ;;  %7946 = vrcp.f32 %v11489_v27  ;;  %vm4321_vm12 = vweird.f32 %v11489_v27 }
 0x485   : > { %v4373_v23 = vmul.f32 %v11450_v59, %v11450_v59  ;;  %v4289_v16 = vsel %vm4286_vm10, %v4288_v1, %v4284_v48  ;;  %v11457_v62 = vmul.f32 %v4658_v19, %v3986_v32  ;;  %v4348_v13 = vmul.f32 %v4347_v58, %v11439_v42 }
 0x486   : > { %v4290_v47 = vmul.f32 %v4289_v16, %v4265_v8  ;;  %v4296_v6 = vadd.f32 0.00028619796, %v4295_v33  ;;  %v4336_v58 = vadd.f32 0.00028619796, %v4335_v51 }
 0x487   : > { %v11460_v40 = vmin.f32 %v4373_v23, 16.0  ;;  %v4700_v60 = vsel %vm2277_vm0, %v11457_v62, 0.0  ;;  %v4349_v9 = vadd.f32 0.014752088, %v4348_v13 }
 0x488   : > { %v3963_v0 = vpop.f32.mrf.mxu3  ;;  %v7496_v49 = vclamps-f32 %v4290_v47, 1.0  ;;  %4701 = vadd.xlane.f32.xlu2 %v4700_v60  ;;  %v4297_v20 = vmul.f32 %v4296_v6, %v11417_v18  ;;  %v4337_v48 = vmul.f32 %v4336_v58, %v11439_v42 }
 0x489   : > { %v11466_v53 = vadd.f32 %v11221_v7, %v3963_v0  ;;  %v4386_v61 = vmul.f32 3.8918573e-05, %v11460_v40  ;;  %v4350_v31 = vmul.f32 %v4349_v9, %v11439_v42 }
 0x48a   : > { %v4659_v4 = vadd.f32 1.0, %v7496_v49  ;;  %v4298_v25 = vadd.f32 0.0036580483, %v4297_v20  ;;  %v11503_v23 = vpop.eup %7946  ;;  %v4338_v49 = vadd.f32 0.0036580483, %v4337_v48 }
 0x48b   : > { %v11476_v24 = vmul.f32 0.70710677, %v11466_v53  ;;  %v4387_v56 = vadd.f32 0.001143296, %v4386_v61  ;;  %v4351_v12 = vadd.f32 0.112945676, %v4350_v31  ;;  %v4317_v60 = vmul.f32 %v11503_v23, %v11489_v27 }
 0x48c   : > { %v11468_v2 = vmul.f32 %v4659_v4, %v3987_v54  ;;  %v4299_v39 = vmul.f32 %v4298_v25, %v11417_v18  ;;  %v8401_v4 = vmov 64.0   ;;  %v4375_v31 = vmul.f32 2.1237322e-06, %v11460_v40 }
 0x48d   : > { %v4413_v34 = vmul.f32 %v11476_v24, %v11476_v24  ;;  %v4388_v3 = vmul.f32 %v4387_v56, %v11460_v40  ;;  %v4352_v29 = vmul.f32 %v4351_v12, %v11439_v42  ;;  %v4318_v26 = vsub.f32 1.0, %v4317_v60 }
 0x48e   : > { %v4703_v5 = vsel %vm2277_vm0, %v11468_v2, 0.0  ;;  %v4300_v0 = vadd.f32 0.05243302, %v4299_v39  ;;  %v4339_v33 = vmul.f32 %v4338_v49, %v11439_v42  ;;  %vm4322_vm11 = vweird.f32 %v11503_v23 }
 0x48f   : > { %4704 = vadd.xlane.f32.xlu1 %v4703_v5  ;;  %v11484_v44 = vmin.f32 %v4413_v34, 16.0  ;;  %v4389_v45 = vadd.f32 0.014752088, %v4388_v3  ;;  %v4353_v15 = vadd.f32 0.4994258, %v4352_v29  ;;  %v4319_v20 = vmul.f32 %v11503_v23, %v4318_v26  ;;  %vm11556_vm13 = vmor %vm4321_vm12, %vm4322_vm11 }
 0x490   : > { %v3966_v11 = vpop.f32.mrf.mxu3  ;;  %v4301_v5 = vmul.f32 %v4300_v0, %v11417_v18  ;;  %v4340_v51 = vadd.f32 0.05243302, %v4339_v33  ;;  %v4325_v48 = vand.u32 2147483647, %v11489_v27 }
 0x491   : > { %v11487_v21 = vadd.f32 %v11221_v7, %v3966_v11  ;;  %v4426_v22 = vmul.f32 3.8918573e-05, %v11484_v44  ;;  %v4390_v37 = vmul.f32 %v4389_v45, %v11460_v40  ;;  %v4354_v35 = vmul.f32 %v4353_v15, %v11439_v42 }
 0x492   : > { %v4302_v29 = vadd.f32 0.18741608, %v4301_v5  ;;  %v4376_v45 = vadd.f32 0.00028619796, %v4375_v31  ;;  %vm4326_vm14 = vcmp.eq.f32.partialorder %v4325_v48, 8.507059e+37 }
 0x493   : > { %v11495_v55 = vmul.f32 0.70710677, %v11487_v21  ;;  %v4427_v32 = vadd.f32 0.001143296, %v4426_v22  ;;  %v4391_v1 = vadd.f32 0.112945676, %v4390_v37 }
 0x494   : > { %v11505_v19 = vadd.f32 1.0, %v4354_v35 }
 0x495   : > { %v4453_v8 = vmul.f32 %v11495_v55, %v11495_v55  ;;  %v4428_v16 = vmul.f32 %v4427_v32, %v11484_v44  ;;  %v4392_v13 = vmul.f32 %v4391_v1, %v11460_v40  ;;  %v4303_v32 = vmul.f32 %v4302_v29, %v11417_v18 }
 0x496   : > { %7948 = vrcp.f32 %v11505_v19  ;;  %v4320_v1 = vadd.f32 %v11503_v23, %v4319_v20  ;;  %vm4361_vm2 = vweird.f32 %v11505_v19 }
 0x497   : > { %v11509_v47 = vmin.f32 %v4453_v8, 16.0  ;;  %7950 = vrcp.f32 %v8401_v4  ;;  %v4429_v9 = vadd.f32 0.014752088, %v4428_v16  ;;  %v4393_v17 = vadd.f32 0.4994258, %v4392_v13 }
 0x498   : > { %v3969_v38 = vpop.f32.mrf.mxu3  ;;  %v4377_v8 = vmul.f32 %v4376_v45, %v11460_v40  ;;  %v4327_v16 = vand.u32 2147483648, %v11489_v27  ;;  %v4341_v13 = vmul.f32 %v4340_v51, %v11439_v42  ;;  %v4324_v27 = vsel %vm11556_vm13, %v11503_v23, %v4320_v1 }
 0x499   : > { %v11516_v50 = vadd.f32 %v11221_v7, %v3969_v38  ;;  %v4466_v61 = vmul.f32 3.8918573e-05, %v11509_v47  ;;  %v4430_v34 = vmul.f32 %v4429_v9, %v11484_v44  ;;  %v4394_v30 = vmul.f32 %v4393_v17, %v11460_v40 }
 0x49a   : > { %v4304_v9 = vadd.f32 1.1283791, %v4303_v32  ;;  %v4378_v17 = vadd.f32 0.0036580483, %v4377_v8  ;;  %v4328_v31 = vor.u32 1.1754944e-38, %v4327_v16 }
 0x49b   : > { %v11526_v12 = vmul.f32 0.70710677, %v11516_v50  ;;  %v4467_v3 = vadd.f32 0.001143296, %v4466_v61  ;;  %v4431_v37 = vadd.f32 0.112945676, %v4430_v34 }
 0x49c   : > { %v11529_v11 = vpop.eup %7948  ;;  %v11540_v35 = vadd.f32 1.0, %v4394_v30  ;;  %v4415_v61 = vmul.f32 2.1237322e-06, %v11484_v44  ;;  %v4342_v26 = vadd.f32 0.18741608, %v4341_v13  ;;  %v4305_v20 = vmul.f32 %v4304_v9, %v11403_v57 }
 0x49d   : > { %v7951_v6 = vpop.eup %7950  ;;  %v4493_v22 = vmul.f32 %v11526_v12, %v11526_v12  ;;  %v4357_v38 = vmul.f32 %v11529_v11, %v11505_v19  ;;  %v4468_v58 = vmul.f32 %v4467_v3, %v11509_v47  ;;  %v4432_v60 = vmul.f32 %v4431_v37, %v11484_v44 }
 0x49e   : > { %v4734_v15 = vmul.f32 64.0, %v7951_v6  ;;  %7952 = vrcp.f32 %v11540_v35  ;;  %vm4738_vm15 = vweird.f32 %v7951_v6  ;;  %v4329_v3 = vsel %vm4326_vm14, %v4328_v31, %v4324_v27 }
 0x49f   : > { %v11553_v0 = vmin.f32 %v4493_v22, 16.0  ;;  %v4469_v4 = vadd.f32 0.014752088, %v4468_v58  ;;  %v4433_v34 = vadd.f32 0.4994258, %v4432_v60  ;;  %v4330_v58 = vmul.f32 %v4329_v3, %v4305_v20 }
 0x4a0   : > { %v3972_v54 = vpop.f32.mrf.mxu3  ;;  %v4735_v25 = vsub.f32 1.0, %v4734_v15  ;;  %v4379_v15 = vmul.f32 %v4378_v17, %v11460_v40  ;;  %v4416_v23 = vadd.f32 0.00028619796, %v4415_v61  ;;  %vm4362_vm1 = vweird.f32 %v11529_v11 }
 0x4a1   : > { %v11522_v56 = vadd.f32 %v11221_v7, %v3972_v54  ;;  %v4358_v54 = vsub.f32 1.0, %v4357_v38  ;;  %v4506_v30 = vmul.f32 3.8918573e-05, %v11553_v0  ;;  %v4470_v45 = vmul.f32 %v4469_v4, %v11509_v47  ;;  %vm11589_vm3 = vmor %vm4361_vm2, %vm4362_vm1 }
 0x4a2   : > { %v4736_v18 = vmul.f32 %v7951_v6, %v4735_v25  ;;  %v4343_v25 = vmul.f32 %v4342_v26, %v11439_v42  ;;  %v4434_v32 = vmul.f32 %v4433_v34, %v11484_v44  ;;  %v4417_v48 = vmul.f32 %v4416_v23, %v11484_v44 }
 0x4a3   : > { %v11534_v7 = vmul.f32 0.70710677, %v11522_v56  ;;  %v4359_v29 = vmul.f32 %v11529_v11, %v4358_v54  ;;  %v4507_v51 = vadd.f32 0.001143296, %v4506_v30  ;;  %v4471_v57 = vadd.f32 0.112945676, %v4470_v45 }
 0x4a4   : > { %v4737_v33 = vadd.f32 %v7951_v6, %v4736_v18  ;;  %v11572_v22 = vpop.eup %7952  ;;  %v4367_v13 = vand.u32 2147483648, %v11505_v19  ;;  %v4365_v18 = vand.u32 2147483647, %v11505_v19  ;;  %v4344_v49 = vadd.f32 1.1283791, %v4343_v25 }
 0x4a5   : > { %v4533_v39 = vmul.f32 %v11534_v7, %v11534_v7  ;;  %v4360_v8 = vadd.f32 %v11529_v11, %v4359_v29  ;;  %v4508_v1 = vmul.f32 %v4507_v51, %v11553_v0  ;;  %v4397_v42 = vmul.f32 %v11572_v22, %v11540_v35 }
 0x4a6   : > { %v11576_v38 = vsel %vm4738_vm15, %v7951_v6, %v4737_v33  ;;  %v7497_v54 = vclamps-f32 %v4330_v58, 1.0  ;;  %v11593_v9 = vadd.f32 1.0, %v4434_v32  ;;  %v4472_v27 = vmul.f32 %v4471_v57, %v11509_v47 }
 0x4a7   : > { %v11565_v5 = vmin.f32 %v4533_v39, 16.0  ;;  %v4380_v39 = vadd.f32 0.05243302, %v4379_v15  ;;  %v4364_v61 = vsel %vm11589_vm3, %v11529_v11, %v4360_v8  ;;  %v4509_v31 = vadd.f32 0.014752088, %v4508_v1 }
 0x4a8   : > { %v4418_v26 = vadd.f32 0.0036580483, %v4417_v48  ;;  %v4368_v33 = vor.u32 1.1754944e-38, %v4367_v13  ;;  %v4398_v34 = vsub.f32 1.0, %v4397_v42  ;;  %vm4366_vm4 = vcmp.eq.f32.partialorder %v4365_v18, 8.507059e+37 }
 0x4a9   : > { %v4546_v37 = vmul.f32 3.8918573e-05, %v11565_v5  ;;  %v4381_v19 = vmul.f32 %v4380_v39, %v11460_v40  ;;  %v4660_v29 = vadd.f32 1.0, %v7497_v54  ;;  %7954 = vrcp.f32 %v11593_v9 }
 0x4aa   : > { %v4369_v45 = vsel %vm4366_vm4, %v4368_v33, %v4364_v61  ;;  %v4345_v11 = vmul.f32 %v4344_v49, %v11429_v43  ;;  %v4473_v15 = vadd.f32 0.4994258, %v4472_v27  ;;  %v4510_v23 = vmul.f32 %v4509_v31, %v11553_v0 }
 0x4ab   : > { %v4547_v60 = vadd.f32 0.001143296, %v4546_v37  ;;  %v3988_v51 = vmul.f32 0.5, %v11395_v63  ;;  %v4382_v37 = vadd.f32 0.18741608, %v4381_v19  ;;  %v4419_v25 = vmul.f32 %v4418_v26, %v11484_v44 }
 0x4ac   : > { %v4399_v58 = vmul.f32 %v11572_v22, %v4398_v34  ;;  %v4370_v32 = vmul.f32 %v4369_v45, %v4345_v11  ;;  %v4474_v48 = vmul.f32 %v4473_v15, %v11509_v47  ;;  %vm4402_vm5 = vweird.f32 %v11572_v22 }
 0x4ad   : > { %v4548_v3 = vmul.f32 %v4547_v60, %v11565_v5  ;;  %v11614_v39 = vmul.f32 %v4660_v29, %v3988_v51  ;;  %v4383_v63 = vmul.f32 %v4382_v37, %v11460_v40  ;;  %v4420_v42 = vadd.f32 0.05243302, %v4419_v25 }
 0x4ae   : > { %v7498_v60 = vclamps-f32 %v4370_v32, 1.0  ;;  %v4407_v49 = vand.u32 2147483648, %v11540_v35  ;;  %vm4401_vm6 = vweird.f32 %v11540_v35  ;;  %v4405_v40 = vand.u32 2147483647, %v11540_v35 }
 0x4af   : > { %v4549_v8 = vadd.f32 0.014752088, %v4548_v3  ;;  %v11618_v13 = vpop.eup %7954  ;;  %v4706_v61 = vsel %vm2277_vm0, %v11614_v39, 0.0  ;;  %vm11635_vm7 = vmor %vm4401_vm6, %vm4402_vm5  ;;  %v11641_v19 = vadd.f32 1.0, %v4474_v48  ;;  %v3989_v33 = vmul.f32 0.5, %v11426_v28 }
 0x4b0   : > { %v4437_v31 = vmul.f32 %v11618_v13, %v11593_v9  ;;  %v4384_v34 = vadd.f32 1.1283791, %v4383_v63  ;;  %v4661_v3 = vadd.f32 1.0, %v7498_v60  ;;  %v4421_v45 = vmul.f32 %v4420_v42, %v11484_v44 }
 0x4b1   : > { %v4550_v54 = vmul.f32 %v4549_v8, %v11565_v5  ;;  %vm4406_vm8 = vcmp.eq.f32.partialorder %v4405_v40, 8.507059e+37  ;;  %7956 = vrcp.f32 %v11641_v19  ;;  %vm4442_vm9 = vweird.f32 %v11618_v13 }
 0x4b2   : > { %v4438_v28 = vsub.f32 1.0, %v4437_v31  ;;  %v4385_v51 = vmul.f32 %v4384_v34, %v11450_v59  ;;  %v4422_v25 = vadd.f32 0.18741608, %v4421_v45  ;;  %v4535_v59 = vmul.f32 2.1237322e-06, %v11565_v5 }
 0x4b3   : > { %v4551_v29 = vadd.f32 0.112945676, %v4550_v54  ;;  %vm4441_vm10 = vweird.f32 %v11593_v9  ;;  %v4445_v31 = vand.u32 2147483647, %v11593_v9  ;;  %vm4481_vm14 = vweird.f32 %v11641_v19 }
 0x4b4   : > { %vm4443_vm11 = vmor %vm4441_vm10, %vm4442_vm9 }
 0x4b5   : > { %v4552_v37 = vmul.f32 %v4551_v29, %v11565_v5  ;;  %v3990_v29 = vmul.f32 0.5, %v11443_v10  ;;  %vm4446_vm12 = vcmp.eq.f32.partialorder %v4445_v31, 8.507059e+37 }
 0x4b7   : > { %v4553_v42 = vadd.f32 0.4994258, %v4552_v37 }
 0x4c1   : > { %v4687_v16 = vpop.xlane.xlu0 %4686 }
 0x4c2   : > { %v4740_v6 = vmul.f32 %v11576_v38, %v4687_v16  ;;  %v4511_v16 = vadd.f32 0.112945676, %v4510_v23 }
 0x4c4   : > { %v11596_v17 = vsub.f32 %v11321_v41, %v4740_v6  ;;  %v4455_v41 = vmul.f32 2.1237322e-06, %v11509_v47  ;;  %v4400_v6 = vadd.f32 %v11572_v22, %v4399_v58  ;;  %v4512_v26 = vmul.f32 %v4511_v16, %v11553_v0  ;;  %v11660_v16 = vpop.eup %7956 }
 0x4c5   : > { %vm4482_vm13 = vweird.f32 %v11660_v16 }
 0x4c6   : > { %v4772_v30 = vmul.f32 %v11596_v17, %v11596_v17  ;;  %v4456_v57 = vadd.f32 0.00028619796, %v4455_v41  ;;  %v4404_v35 = vsel %vm11635_vm7, %v11572_v22, %v4400_v6  ;;  %v4408_v41 = vor.u32 1.1754944e-38, %v4407_v49  ;;  %vm11719_vm15 = vmor %vm4481_vm14, %vm4482_vm13 }
 0x4c7   : > { %v4513_v23 = vadd.f32 0.4994258, %v4512_v26  ;;  %v11653_v22 = vmul.f32 %v4661_v3, %v3989_v33  ;;  %v4423_v6 = vmul.f32 %v4422_v25, %v11484_v44  ;;  %v4477_v44 = vmul.f32 %v11660_v16, %v11641_v19 }
 0x4c8   : > { %v4788_v20 = vsel %vm2277_vm0, %v4772_v30, 0.0  ;;  %v4457_v4 = vmul.f32 %v4456_v57, %v11509_v47  ;;  %v4409_v15 = vsel %vm4406_vm8, %v4408_v41, %v4404_v35  ;;  %v4554_v26 = vmul.f32 %v4553_v42, %v11565_v5 }
 0x4c9   : > { %4789 = vadd.xlane.f32.xlu0 %v4788_v20  ;;  %v4690_v1 = vpop.xlane.xlu0 %4689  ;;  %v4495_v20 = vmul.f32 2.1237322e-06, %v11553_v0  ;;  %v4410_v32 = vmul.f32 %v4409_v15, %v4385_v51  ;;  %v4709_v63 = vsel %vm2277_vm0, %v11653_v22, 0.0  ;;  %v4424_v33 = vadd.f32 1.1283791, %v4423_v6 }
 0x4ca   : > { %v4741_v43 = vmul.f32 %v11576_v38, %v4690_v1  ;;  %v4458_v11 = vadd.f32 0.0036580483, %v4457_v4  ;;  %v4439_v1 = vmul.f32 %v11618_v13, %v4438_v28  ;;  %v4487_v6 = vand.u32 2147483648, %v11641_v19 }
 0x4cb   : > { %v4496_v8 = vadd.f32 0.00028619796, %v4495_v20  ;;  %v7499_v54 = vclamps-f32 %v4410_v32, 1.0  ;;  %v11688_v20 = vadd.f32 1.0, %v4554_v26 }
 0x4cc   : > { %v11624_v18 = vsub.f32 %v11349_v14, %v4741_v43  ;;  %v4459_v58 = vmul.f32 %v4458_v11, %v11509_v47  ;;  %v4514_v43 = vmul.f32 %v4513_v23, %v11553_v0  ;;  %v4447_v14 = vand.u32 2147483648, %v11593_v9 }
 0x4cd   : > { %v4497_v4 = vmul.f32 %v4496_v8, %v11553_v0  ;;  %v4662_v35 = vadd.f32 1.0, %v7499_v54  ;;  %v4478_v11 = vsub.f32 1.0, %v4477_v44  ;;  %v4425_v23 = vmul.f32 %v4424_v33, %v11476_v24 }
 0x4ce   : > { %v4773_v27 = vmul.f32 %v11624_v18, %v11624_v18  ;;  %v4460_v60 = vadd.f32 0.05243302, %v4459_v58  ;;  %v11672_v40 = vadd.f32 1.0, %v4514_v43  ;;  %v4448_v45 = vor.u32 1.1754944e-38, %v4447_v14 }
 0x4cf   : > { %v4498_v3 = vadd.f32 0.0036580483, %v4497_v4  ;;  %v11690_v15 = vmul.f32 %v4662_v35, %v3990_v29  ;;  %v4488_v33 = vor.u32 1.1754944e-38, %v4487_v6  ;;  %vm4561_vm7 = vweird.f32 %v11688_v20 }
 0x4d0   : > { %v4791_v30 = vsel %vm2277_vm0, %v4773_v27, 0.0  ;;  %7958 = vrcp.f32 %v11672_v40  ;;  %vm4521_vm3 = vweird.f32 %v11672_v40 }
 0x4d1   : > { %4707 = vadd.xlane.f32.xlu0 %v4706_v61  ;;  %4792 = vadd.xlane.f32.xlu2 %v4791_v30  ;;  %v4440_v61 = vadd.f32 %v11618_v13, %v4439_v1  ;;  %v4461_v30 = vmul.f32 %v4460_v60, %v11509_v47  ;;  %v4499_v37 = vmul.f32 %v4498_v3, %v11553_v0  ;;  %7960 = vrcp.f32 %v11688_v20  ;;  %v3975_v1 = vpop.f32.mrf.mxu3 }
 0x4d2   : > { %v4712_v32 = vsel %vm2277_vm0, %v11690_v15, 0.0  ;;  %v4485_v60 = vand.u32 2147483647, %v11641_v19 }
 0x4d3   : > { %v4444_v41 = vsel %vm4443_vm11, %v11618_v13, %v4440_v61  ;;  %v4462_v51 = vadd.f32 0.18741608, %v4461_v30  ;;  %v4479_v13 = vmul.f32 %v11660_v16, %v4478_v11  ;;  %v8071_v61 = vld [vmem:[%s13352_s19] ss:$0 sm:$0xff]  ;;  %v3991_v30 = vmul.f32 0.5, %v11466_v53 }
 0x4d4   : > { %v4449_v28 = vsel %vm4446_vm12, %v4448_v45, %v4444_v41  ;;  %vm4486_vm1 = vcmp.eq.f32.partialorder %v4485_v60, 8.507059e+37 }
 0x4d5   : > { %v4450_v58 = vmul.f32 %v4449_v28, %v4425_v23  ;;  %v4463_v8 = vmul.f32 %v4462_v51, %v11509_v47 }
 0x4d6   : > { %v11695_v25 = vpop.eup %7958 }
 0x4d7   : > { %v7500_v42 = vclamps-f32 %v4450_v58, 1.0  ;;  %v11713_v54 = vpop.eup %7960  ;;  %v4464_v44 = vadd.f32 1.1283791, %v4463_v8  ;;  %vm4522_vm2 = vweird.f32 %v11695_v25 }
 0x4d8   : > { %v4693_v57 = vpop.xlane.xlu1 %4692  ;;  %v4557_v35 = vmul.f32 %v11713_v54, %v11688_v20  ;;  %vm11757_vm4 = vmor %vm4521_vm3, %vm4522_vm2  ;;  %vm4562_vm6 = vweird.f32 %v11713_v54 }
 0x4d9   : > { %v4742_v48 = vmul.f32 %v11576_v38, %v4693_v57  ;;  %4710 = vadd.xlane.f32.xlu2 %v4709_v63  ;;  %v4500_v57 = vadd.f32 0.05243302, %v4499_v37  ;;  %v4663_v26 = vadd.f32 1.0, %v7500_v42  ;;  %vm4563_vm8 = vmor %vm4561_vm7, %vm4562_vm6 }
 0x4da   : > { %v4558_v51 = vsub.f32 1.0, %v4557_v35 }
 0x4db   : > { %v11667_v49 = vsub.f32 %v11379_v36, %v4742_v48  ;;  %v4536_v36 = vadd.f32 0.00028619796, %v4535_v59  ;;  %v4480_v48 = vadd.f32 %v11660_v16, %v4479_v13  ;;  %v4517_v59 = vmul.f32 %v11695_v25, %v11672_v40 }
 0x4dc   : > { %v4501_v4 = vmul.f32 %v4500_v57, %v11553_v0  ;;  %v11738_v28 = vmul.f32 %v4663_v26, %v3991_v30  ;;  %v4525_v57 = vand.u32 2147483647, %v11672_v40 }
 0x4dd   : > { %v4774_v27 = vmul.f32 %v11667_v49, %v11667_v49  ;;  %v4537_v9 = vmul.f32 %v4536_v36, %v11565_v5  ;;  %v4484_v36 = vsel %vm11719_vm15, %v11660_v16, %v4480_v48  ;;  %v4518_v19 = vsub.f32 1.0, %v4517_v59 }
 0x4de   : > { %v4502_v3 = vadd.f32 0.18741608, %v4501_v4  ;;  %v4489_v29 = vsel %vm4486_vm1, %v4488_v33, %v4484_v36  ;;  %v4465_v16 = vmul.f32 %v4464_v44, %v11495_v55  ;;  %v4715_v8 = vsel %vm2277_vm0, %v11738_v28, 0.0 }
 0x4df   : > { %v4794_v34 = vsel %vm2277_vm0, %v4774_v27, 0.0  ;;  %v4538_v10 = vadd.f32 0.0036580483, %v4537_v9  ;;  %v11717_v27 = vadd.f32 %v8071_v61, %v3975_v1  ;;  %v4519_v45 = vmul.f32 %v11695_v25, %v4518_v19  ;;  %v3978_v9 = vpop.f32.mrf.mxu3 }
 0x4e0   : > { %4795 = vadd.xlane.f32.xlu1 %v4794_v34  ;;  %v4490_v23 = vmul.f32 %v4489_v29, %v4465_v16  ;;  %v4503_v37 = vmul.f32 %v4502_v3, %v11553_v0  ;;  %v4527_v0 = vand.u32 2147483648, %v11672_v40  ;;  %vm4526_vm5 = vcmp.eq.f32.partialorder %v4525_v57, 8.507059e+37 }
 0x4e1   : > { %v4539_v63 = vmul.f32 %v4538_v10, %v11565_v5  ;;  %v11733_v41 = vmul.f32 0.70710677, %v11717_v27  ;;  %v11743_v10 = vadd.f32 %v8071_v61, %v3978_v9  ;;  %v4520_v55 = vadd.f32 %v11695_v25, %v4519_v45 }
 0x4e2   : > { %v4504_v59 = vadd.f32 1.1283791, %v4503_v37  ;;  %v4528_v60 = vor.u32 1.1754944e-38, %v4527_v0  ;;  %v3992_v44 = vmul.f32 0.5, %v11487_v21  ;;  %v4565_v36 = vand.u32 2147483647, %v11688_v20 }
 0x4e3   : > { %v4540_v31 = vadd.f32 0.05243302, %v4539_v63  ;;  %v4573_v53 = vmul.f32 %v11733_v41, %v11733_v41  ;;  %v11770_v40 = vmul.f32 0.70710677, %v11743_v10 }
 0x4e4   : > { %vm4566_vm9 = vcmp.eq.f32.partialorder %v4565_v36, 8.507059e+37 }
 0x4e5   : > { %v4541_v11 = vmul.f32 %v4540_v31, %v11565_v5  ;;  %v11761_v63 = vmin.f32 %v4573_v53, 16.0  ;;  %v4613_v31 = vmul.f32 %v11770_v40, %v11770_v40 }
 0x4e7   : > { %v4696_v24 = vpop.xlane.xlu1 %4695  ;;  %v4586_v19 = vmul.f32 3.8918573e-05, %v11761_v63  ;;  %v11787_v29 = vmin.f32 %v4613_v31, 16.0 }
 0x4e8   : > { %4713 = vadd.xlane.f32.xlu1 %v4712_v32  ;;  %v4743_v43 = vmul.f32 %v11576_v38, %v4696_v24  ;;  %v4542_v32 = vadd.f32 0.18741608, %v4541_v11  ;;  %v7501_v24 = vclamps-f32 %v4490_v23, 1.0 }
 0x4e9   : > { %v4587_v3 = vadd.f32 0.001143296, %v4586_v19  ;;  %v4626_v53 = vmul.f32 3.8918573e-05, %v11787_v29 }
 0x4ea   : > { %v11709_v47 = vsub.f32 %v11415_v46, %v4743_v43  ;;  %v4559_v43 = vmul.f32 %v11713_v54, %v4558_v51  ;;  %v4543_v6 = vmul.f32 %v4542_v32, %v11565_v5  ;;  %v4664_v61 = vadd.f32 1.0, %v7501_v24 }
 0x4eb   : > { %v4505_v5 = vmul.f32 %v4504_v59, %v11526_v12  ;;  %v4588_v51 = vmul.f32 %v4587_v3, %v11761_v63  ;;  %v4627_v57 = vadd.f32 0.001143296, %v4626_v53 }
 0x4ec   : > { %v4775_v46 = vmul.f32 %v11709_v47, %v11709_v47  ;;  %v4560_v14 = vadd.f32 %v11713_v54, %v4559_v43  ;;  %v4544_v26 = vadd.f32 1.1283791, %v4543_v6  ;;  %v11783_v33 = vmul.f32 %v4664_v61, %v3992_v44 }
 0x4ee   : > { %v4797_v34 = vsel %vm2277_vm0, %v4775_v46, 0.0  ;;  %v4545_v16 = vmul.f32 %v4544_v26, %v11534_v7  ;;  %v4718_v11 = vsel %vm2277_vm0, %v11783_v33, 0.0 }
 0x4ef   : > { %4798 = vadd.xlane.f32.xlu0 %v4797_v34  ;;  %v4564_v34 = vsel %vm4563_vm8, %v11713_v54, %v4560_v14 }
 0x4f1   : > { %v4699_v13 = vpop.xlane.xlu2 %4698 }
 0x4f2   : > { %v4744_v58 = vmul.f32 %v11576_v38, %v4699_v13 }
 0x4f4   : > { %v11753_v1 = vsub.f32 %v11437_v52, %v4744_v58  ;;  %v4524_v52 = vsel %vm11757_vm4, %v11695_v25, %v4520_v55  ;;  %v4567_v25 = vand.u32 2147483648, %v11688_v20  ;;  %v3993_v58 = vmul.f32 0.5, %v11516_v50 }
 0x4f5   : > { %v4529_v46 = vsel %vm4526_vm5, %v4528_v60, %v4524_v52  ;;  %v3994_v50 = vmul.f32 0.5, %v11522_v56 }
 0x4f6   : > { %v4776_v42 = vmul.f32 %v11753_v1, %v11753_v1  ;;  %v4530_v21 = vmul.f32 %v4529_v46, %v4505_v5  ;;  %v4568_v30 = vor.u32 1.1754944e-38, %v4567_v25  ;;  %v4575_v46 = vmul.f32 2.1237322e-06, %v11761_v63 }
 0x4f7   : > { %4716 = vadd.xlane.f32.xlu0 %v4715_v8  ;;  %v4589_v8 = vadd.f32 0.014752088, %v4588_v51 }
 0x4f8   : > { %v4800_v4 = vsel %vm2277_vm0, %v4776_v42, 0.0  ;;  %v4569_v20 = vsel %vm4566_vm9, %v4568_v30, %v4564_v34  ;;  %v7502_v9 = vclamps-f32 %v4530_v21, 1.0  ;;  %v4628_v42 = vmul.f32 %v4627_v57, %v11787_v29 }
 0x4f9   : > { %4801 = vadd.xlane.f32.xlu2 %v4800_v4  ;;  %v4570_v23 = vmul.f32 %v4569_v20, %v4545_v16  ;;  %v4590_v59 = vmul.f32 %v4589_v8, %v11761_v63  ;;  %v4576_v5 = vadd.f32 0.00028619796, %v4575_v46  ;;  %v4615_v21 = vmul.f32 2.1237322e-06, %v11787_v29 }
 0x4fa   : > { %v4629_v60 = vadd.f32 0.014752088, %v4628_v42 }
 0x4fb   : > { %v4702_v35 = vpop.xlane.xlu2 %4701  ;;  %v7503_v32 = vclamps-f32 %v4570_v23, 1.0  ;;  %v4591_v6 = vadd.f32 0.112945676, %v4590_v59  ;;  %v4577_v31 = vmul.f32 %v4576_v5, %v11761_v63  ;;  %v4616_v30 = vadd.f32 0.00028619796, %v4615_v21 }
 0x4fc   : > { %v4745_v12 = vmul.f32 %v11576_v38, %v4702_v35  ;;  %v4630_v14 = vmul.f32 %v4629_v60, %v11787_v29 }
 0x4fd   : > { %v4666_v48 = vadd.f32 1.0, %v7503_v32  ;;  %v4592_v61 = vmul.f32 %v4591_v6, %v11761_v63  ;;  %v4578_v34 = vadd.f32 0.0036580483, %v4577_v31  ;;  %v4617_v16 = vmul.f32 %v4616_v30, %v11787_v29 }
 0x4fe   : > { %v11791_v45 = vsub.f32 %v11457_v62, %v4745_v12  ;;  %v4665_v62 = vadd.f32 1.0, %v7502_v9  ;;  %v4631_v56 = vadd.f32 0.112945676, %v4630_v14 }
 0x4ff   : > { %v11815_v52 = vmul.f32 %v4666_v48, %v3994_v50  ;;  %v4593_v44 = vadd.f32 0.4994258, %v4592_v61  ;;  %v4579_v12 = vmul.f32 %v4578_v34, %v11761_v63  ;;  %v5091_v50 = vld [vmem:[#allocation9 + $0x38] sm:$0xff]  ;;  %v5084_v34 = vld [vmem:[#allocation9] sm:$0xff] }
 0x500   : > { %v4777_v54 = vmul.f32 %v11791_v45, %v11791_v45  ;;  %v11805_v0 = vmul.f32 %v4665_v62, %v3993_v58  ;;  %v4632_v36 = vmul.f32 %v4631_v56, %v11787_v29  ;;  %5152 = vmatpush.msrb.mxu0 %v5091_v50 }
 0x501   : > { %4719 = vadd.xlane.f32.xlu2 %v4718_v11  ;;  %v4724_v4 = vsel %vm2277_vm0, %v11815_v52, 0.0  ;;  %v4594_v25 = vmul.f32 %v4593_v44, %v11761_v63  ;;  %v4580_v11 = vadd.f32 0.05243302, %v4579_v12 }
 0x502   : > { %v4705_v37 = vpop.xlane.xlu1 %4704  ;;  %v4803_v13 = vsel %vm2277_vm0, %v4777_v54, 0.0  ;;  %v4633_v26 = vadd.f32 0.4994258, %v4632_v36  ;;  %v4618_v54 = vadd.f32 0.0036580483, %v4617_v16 }
 0x503   : > { %v4746_v7 = vmul.f32 %v11576_v38, %v4705_v37  ;;  %4804 = vadd.xlane.f32.xlu1 %v4803_v13  ;;  %v4595_v19 = vadd.f32 1.0, %v4594_v25  ;;  %v4581_v23 = vmul.f32 %v4580_v11, %v11761_v63 }
 0x504   : > { %v4634_v35 = vmul.f32 %v4633_v26, %v11787_v29  ;;  %v4619_v37 = vmul.f32 %v4618_v54, %v11787_v29 }
 0x505   : > { %v11803_v55 = vsub.f32 %v11468_v2, %v4746_v7  ;;  %v4721_v2 = vsel %vm2277_vm0, %v11805_v0, 0.0  ;;  %7962 = vrcp.f32 %v4595_v19  ;;  %v4582_v13 = vadd.f32 0.18741608, %v4581_v23  ;;  %v5089_v23 = vld [vmem:[#allocation9 + $0x28] sm:$0xff] }
 0x506   : > { %v4635_v3 = vadd.f32 1.0, %v4634_v35  ;;  %v4620_v62 = vadd.f32 0.05243302, %v4619_v37  ;;  %vm4601_vm11 = vweird.f32 %v4595_v19  ;;  %v4605_v59 = vand.u32 2147483647, %v4595_v19 }
 0x507   : > { %v4778_v24 = vmul.f32 %v11803_v55, %v11803_v55  ;;  %v4583_v32 = vmul.f32 %v4582_v13, %v11761_v63 }
 0x508   : > { %7964 = vrcp.f32 %v4635_v3  ;;  %v4621_v57 = vmul.f32 %v4620_v62, %v11787_v29  ;;  %vm4606_vm13 = vcmp.eq.f32.partialorder %v4605_v59, 8.507059e+37  ;;  %vm4641_vm15 = vweird.f32 %v4635_v3 }
 0x509   : > { %v4806_v43 = vsel %vm2277_vm0, %v4778_v24, 0.0  ;;  %v4607_v24 = vand.u32 2147483648, %v4595_v19  ;;  %v4584_v6 = vadd.f32 1.1283791, %v4583_v32  ;;  %v4645_v26 = vand.u32 2147483647, %v4635_v3 }
 0x50a   : > { %4807 = vadd.xlane.f32.xlu0 %v4806_v43  ;;  %v3995_v32 = vmul.f32 0.5, %v11717_v27  ;;  %v11862_v27 = vld [vmem:[%s13365_s1] ss:$0 sm:$0xff]  ;;  %s13375_s1 = sld [smem:[#allocation42_spill]] }
 0x50b   : > { %4722 = vadd.xlane.f32.xlu1 %v4721_v2  ;;  %v7963_v20 = vpop.eup %7962  ;;  %v5090_v2 = vld [vmem:[#allocation9 + $0x30] sm:$0xff]  ;;  %v4608_v63 = vor.u32 1.1754944e-38, %v4607_v24  ;;  %v4585_v46 = vmul.f32 %v4584_v6, %v11733_v41  ;;  %vm4646_vm2 = vcmp.eq.f32.partialorder %v4645_v26, 8.507059e+37 }
 0x50c   : > { %v4597_v9 = vmul.f32 %v7963_v20, %v4595_v19  ;;  %vm4602_vm10 = vweird.f32 %v7963_v20  ;;  %5153 = vmatpush.msrb.mxu0 %v5090_v2  ;;  %v4647_v19 = vand.u32 2147483648, %v4635_v3  ;;  %v5086_v24 = vld [vmem:[#allocation9 + $0x10] sm:$0xff] }
 0x50d   : > { %vm4603_vm12 = vmor %vm4601_vm11, %vm4602_vm10 }
 0x50e   : > { %v4598_v51 = vsub.f32 1.0, %v4597_v9  ;;  %v7965_v53 = vpop.eup %7964  ;;  %v4648_v11 = vor.u32 1.1754944e-38, %v4647_v19  ;;  %5154 = vmatpush.msrb.mxu0 %v5089_v23 }
 0x50f   : > { %v4637_v58 = vmul.f32 %v7965_v53, %v4635_v3  ;;  %vm4642_vm14 = vweird.f32 %v7965_v53 }
 0x510   : > { %v4599_v7 = vmul.f32 %v7963_v20, %v4598_v51  ;;  %vm11837_vm1 = vmor %vm4641_vm15, %vm4642_vm14  ;;  %v5088_v51 = vld [vmem:[#allocation9 + $0x20] sm:$0xff] }
 0x511   : > { %v4638_v43 = vsub.f32 1.0, %v4637_v58  ;;  %5155 = vmatpush.msrb.mxu0 %v5088_v51 }
 0x512   : > { %4725 = vadd.xlane.f32.xlu0 %v4724_v4  ;;  %v4600_v8 = vadd.f32 %v7963_v20, %v4599_v7  ;;  %v4622_v4 = vadd.f32 0.18741608, %v4621_v57  ;;  %v5087_v7 = vld [vmem:[#allocation9 + $0x18] sm:$0xff] }
 0x513   : > { %v4639_v14 = vmul.f32 %v7965_v53, %v4638_v43  ;;  %5156 = vmatpush.msrb.mxu0 %v5087_v7 }
 0x514   : > { %v4604_v60 = vsel %vm4603_vm12, %v7963_v20, %v4600_v8  ;;  %v4623_v56 = vmul.f32 %v4622_v4, %v11787_v29 }
 0x515   : > { %v4609_v44 = vsel %vm4606_vm13, %v4608_v63, %v4604_v60  ;;  %v4640_v25 = vadd.f32 %v7965_v53, %v4639_v14  ;;  %5157 = vmatpush.msrb.mxu0 %v5086_v24 }
 0x516   : > { %v4610_v36 = vmul.f32 %v4609_v44, %v4585_v46  ;;  %v4624_v30 = vadd.f32 1.1283791, %v4623_v56  ;;  %v11873_v56 = vld [vmem:[%s13366_s20] ss:$0 sm:$0xff]  ;;  %s13376_s20 = smov %s13375_s1 }
 0x517   : > { %v4644_v12 = vsel %vm11837_vm1, %v7965_v53, %v4640_v25 }
 0x518   : > { %v7504_v16 = vclamps-f32 %v4610_v36, 1.0  ;;  %v4649_v37 = vsel %vm4646_vm2, %v4648_v11, %v4644_v12  ;;  %v4625_v13 = vmul.f32 %v4624_v30, %v11770_v40  ;;  %v3996_v36 = vmul.f32 0.5, %v11743_v10 }
 0x51a   : > { %v4667_v62 = vadd.f32 1.0, %v7504_v16  ;;  %v4650_v58 = vmul.f32 %v4649_v37, %v4625_v13 }
 0x51c   : > { %v7505_v50 = vclamps-f32 %v4650_v58, 1.0 }
 0x51e   : > { %v4668_v46 = vadd.f32 1.0, %v7505_v50 }
 0x53c   : > { %v4790_v48 = vpop.xlane.xlu0 %4789 }
 0x53d   : > { %v4836_v42 = vmul.f32 %v4790_v48, %v11576_v38  ;;  %v11856_v48 = vmul.f32 %v4667_v62, %v3995_v32 }
 0x53f   : > { %v4852_v61 = vadd.f32 1e-05, %v4836_v42 }
 0x541   : > { %7966 = vrsqrt.f32 %v4852_v61  ;;  %vm4874_vm4 = vweird.f32 %v4852_v61 }
 0x544   : > { %v4708_v5 = vpop.xlane.xlu0 %4707  ;;  %v4793_v21 = vpop.xlane.xlu2 %4792 }
 0x545   : > { %v4747_v31 = vmul.f32 %v11576_v38, %v4708_v5  ;;  %v4837_v41 = vmul.f32 %v4793_v21, %v11576_v38  ;;  %v5085_v21 = vld [vmem:[#allocation9 + $0x8] sm:$0xff] }
 0x546   : > { %5158 = vmatpush.msrb.mxu0 %v5085_v21 }
 0x547   : > { %v7967_v35 = vpop.eup %7966  ;;  %v11843_v29 = vsub.f32 %v11614_v39, %v4747_v31  ;;  %v11847_v9 = vadd.f32 1e-05, %v4837_v41  ;;  %v11877_v31 = vmul.f32 %v4668_v46, %v3996_v36 }
 0x548   : > { %v4869_v20 = vmul.f32 %v7967_v35, %v4852_v61  ;;  %vm4875_vm3 = vweird.f32 %v7967_v35  ;;  %5159 = vmatpush.msrb.mxu0 %v5084_v34 }
 0x549   : > { %v4779_v54 = vmul.f32 %v11843_v29, %v11843_v29  ;;  %7968 = vrsqrt.f32 %v11847_v9  ;;  %vm4876_vm5 = vmor %vm4874_vm4, %vm4875_vm3  ;;  %vm4884_vm7 = vweird.f32 %v11847_v9  ;;  %v4730_v10 = vsel %vm2277_vm0, %v11877_v31, 0.0 }
 0x54a   : > { %v4870_v3 = vmul.f32 %v7967_v35, %v4869_v20 }
 0x54b   : > { %v4809_v53 = vsel %vm2277_vm0, %v4779_v54, 0.0 }
 0x54c   : > { %v4871_v39 = vmul.f32 0.5, %v4870_v3  ;;  %4810 = vadd.xlane.f32.xlu2 %v4809_v53  ;;  %v4711_v57 = vpop.xlane.xlu2 %4710 }
 0x54d   : > { %v4748_v40 = vmul.f32 %v11576_v38, %v4711_v57 }
 0x54e   : > { %v4872_v8 = vsub.f32 1.5, %v4871_v39 }
 0x54f   : > { %v7969_v59 = vpop.eup %7968  ;;  %v11859_v42 = vsub.f32 %v11653_v22, %v4748_v40  ;;  %v4727_v22 = vsel %vm2277_vm0, %v11856_v48, 0.0 }
 0x550   : > { %v4873_v43 = vmul.f32 %v7967_v35, %v4872_v8  ;;  %v4879_v6 = vmul.f32 %v7969_v59, %v11847_v9  ;;  %vm4885_vm6 = vweird.f32 %v7969_v59 }
 0x551   : > { %v4780_v61 = vmul.f32 %v11859_v42, %v11859_v42  ;;  %vm4886_vm8 = vmor %vm4884_vm7, %vm4885_vm6 }
 0x552   : > { %v4877_v2 = vsel %vm4876_vm5, %v7967_v35, %v4873_v43  ;;  %v4880_v63 = vmul.f32 %v7969_v59, %v4879_v6 }
 0x553   : > { %v5028_v60 = vmul.f32 %v4877_v2, %v11596_v17  ;;  %v4796_v4 = vpop.xlane.xlu1 %4795  ;;  %v4812_v44 = vsel %vm2277_vm0, %v4780_v61, 0.0 }
 0x554   : > { %v4838_v14 = vmul.f32 %v4796_v4, %v11576_v38  ;;  %4728 = vadd.xlane.f32.xlu2 %v4727_v22  ;;  %v4881_v5 = vmul.f32 0.5, %v4880_v63  ;;  %4813 = vadd.xlane.f32.xlu1 %v4812_v44 }
 0x555   : > { %v5048_v25 = vmul.f32 %v11862_v27, %v5028_v60 }
 0x556   : > { %v4854_v17 = vadd.f32 1e-05, %v4838_v14  ;;  %v4882_v19 = vsub.f32 1.5, %v4881_v5 }
 0x557   : > { %v5068_v26 = vadd.f32 %v11873_v56, %v5048_v25 }
 0x558   : > { %7970 = vrsqrt.f32 %v4854_v17  ;;  %v4883_v35 = vmul.f32 %v7969_v59, %v4882_v19  ;;  %vm4894_vm10 = vweird.f32 %v4854_v17 }
 0x559   : > { %7506 = vmatmul.msk.f32.vlgmr.msrb.gmra.mxu0 %vm2277_vm0, %v5068_v26 }
 0x55a   : > { %v4887_v16 = vsel %vm4886_vm8, %v7969_v59, %v4883_v35 }
 0x55b   : > { %v4714_v30 = vpop.xlane.xlu1 %4713  ;;  %v5029_v9 = vmul.f32 %v4887_v16, %v11624_v18 }
 0x55c   : > { %v4749_v41 = vmul.f32 %v11576_v38, %v4714_v30  ;;  %4731 = vadd.xlane.f32.xlu1 %v4730_v10  ;;  %v5239_v10 = vld [vmem:[%s13367_s16 + $0x70] sm:$0xff] }
 0x55d   : > { %v5049_v53 = vmul.f32 %v11862_v27, %v5029_v9 }
 0x55e   : > { %v7971_v12 = vpop.eup %7970  ;;  %v11885_v20 = vsub.f32 %v11690_v15, %v4749_v41 }
 0x55f   : > { %v4889_v11 = vmul.f32 %v7971_v12, %v4854_v17  ;;  %vm4895_vm9 = vweird.f32 %v7971_v12  ;;  %v5069_v62 = vadd.f32 %v11873_v56, %v5049_v53 }
 0x560   : > { %v4781_v3 = vmul.f32 %v11885_v20, %v11885_v20  ;;  %vm4896_vm11 = vmor %vm4894_vm10, %vm4895_vm9 }
 0x561   : > { %v4890_v54 = vmul.f32 %v7971_v12, %v4889_v11  ;;  %7507 = vmatmul.msk.f32.gmra.mxu0 %vm2277_vm0, %v5069_v62 }
 0x562   : > { %v4815_v23 = vsel %vm2277_vm0, %v4781_v3, 0.0  ;;  %v4799_v37 = vpop.xlane.xlu0 %4798  ;;  %v5238_v3 = vld [vmem:[%s13367_s16 + $0x68] sm:$0xff] }
 0x563   : > { %v4891_v51 = vmul.f32 0.5, %v4890_v54  ;;  %4816 = vadd.xlane.f32.xlu0 %v4815_v23  ;;  %v4839_v13 = vmul.f32 %v4799_v37, %v11576_v38 }
 0x565   : > { %v4892_v15 = vsub.f32 1.5, %v4891_v51  ;;  %v4855_v39 = vadd.f32 1e-05, %v4839_v13 }
 0x567   : > { %v4893_v7 = vmul.f32 %v7971_v12, %v4892_v15  ;;  %7972 = vrsqrt.f32 %v4855_v39  ;;  %vm4904_vm13 = vweird.f32 %v4855_v39 }
 0x569   : > { %v4897_v18 = vsel %vm4896_vm11, %v7971_v12, %v4893_v7 }
 0x56a   : > { %v4717_v58 = vpop.xlane.xlu0 %4716  ;;  %v5030_v57 = vmul.f32 %v4897_v18, %v11667_v49 }
 0x56b   : > { %v4750_v32 = vmul.f32 %v11576_v38, %v4717_v58 }
 0x56c   : > { %v4802_v43 = vpop.xlane.xlu2 %4801  ;;  %v5050_v60 = vmul.f32 %v11862_v27, %v5030_v57 }
 0x56d   : > { %v7973_v8 = vpop.eup %7972  ;;  %v11899_v24 = vsub.f32 %v11738_v28, %v4750_v32  ;;  %v4840_v59 = vmul.f32 %v4802_v43, %v11576_v38 }
 0x56e   : > { %v4899_v40 = vmul.f32 %v7973_v8, %v4855_v39  ;;  %v5070_v49 = vadd.f32 %v11873_v56, %v5050_v60  ;;  %vm4905_vm12 = vweird.f32 %v7973_v8 }
 0x56f   : > { %v4856_v2 = vadd.f32 1e-05, %v4840_v59  ;;  %v4782_v6 = vmul.f32 %v11899_v24, %v11899_v24  ;;  %vm4906_vm14 = vmor %vm4904_vm13, %vm4905_vm12 }
 0x570   : > { %v4900_v50 = vmul.f32 %v7973_v8, %v4899_v40  ;;  %7508 = vmatmul.msk.f32.gmra.mxu0 %vm2277_vm0, %v5070_v49 }
 0x571   : > { %7974 = vrsqrt.f32 %v4856_v2  ;;  %v4818_v61 = vsel %vm2277_vm0, %v4782_v6, 0.0  ;;  %vm4914_vm1 = vweird.f32 %v4856_v2 }
 0x572   : > { %v4901_v4 = vmul.f32 0.5, %v4900_v50  ;;  %4819 = vadd.xlane.f32.xlu2 %v4818_v61 }
 0x574   : > { %v4902_v63 = vsub.f32 1.5, %v4901_v4  ;;  %v4720_v14 = vpop.xlane.xlu2 %4719 }
 0x575   : > { %v4751_v22 = vmul.f32 %v11576_v38, %v4720_v14 }
 0x576   : > { %v4903_v28 = vmul.f32 %v7973_v8, %v4902_v63  ;;  %v4805_v36 = vpop.xlane.xlu1 %4804 }
 0x577   : > { %v7975_v46 = vpop.eup %7974  ;;  %v11911_v5 = vsub.f32 %v11783_v33, %v4751_v22  ;;  %v4841_v19 = vmul.f32 %v4805_v36, %v11576_v38  ;;  %v5240_v33 = vld [vmem:[%s13367_s16 + $0x78] sm:$0xff]  ;;  %v5235_v36 = vld [vmem:[%s13367_s16 + $0x50] sm:$0xff] }
 0x578   : > { %v4907_v44 = vsel %vm4906_vm14, %v7973_v8, %v4903_v28  ;;  %v4909_v17 = vmul.f32 %v7975_v46, %v4856_v2  ;;  %vm4915_vm15 = vweird.f32 %v7975_v46  ;;  %5245 = vmatpush.msrb.mxu1 %v5240_v33 }
 0x579   : > { %v5031_v25 = vmul.f32 %v4907_v44, %v11709_v47  ;;  %v4783_v26 = vmul.f32 %v11911_v5, %v11911_v5  ;;  %v4857_v35 = vadd.f32 1e-05, %v4841_v19  ;;  %vm4916_vm2 = vmor %vm4914_vm1, %vm4915_vm15  ;;  %v5234_v19 = vld [vmem:[%s13367_s16 + $0x48] sm:$0xff] }
 0x57a   : > { %v4910_v34 = vmul.f32 %v7975_v46, %v4909_v17  ;;  %5246 = vmatpush.msrb.mxu1 %v5239_v10  ;;  %v5236_v17 = vld [vmem:[%s13367_s16 + $0x58] sm:$0xff] }
 0x57b   : > { %v5051_v21 = vmul.f32 %v11862_v27, %v5031_v25  ;;  %v4821_v30 = vsel %vm2277_vm0, %v4783_v26, 0.0  ;;  %7976 = vrsqrt.f32 %v4857_v35  ;;  %vm4924_vm4 = vweird.f32 %v4857_v35  ;;  %v5237_v25 = vld [vmem:[%s13367_s16 + $0x60] sm:$0xff] }
 0x57c   : > { %v4911_v41 = vmul.f32 0.5, %v4910_v34  ;;  %4822 = vadd.xlane.f32.xlu0 %v4821_v30  ;;  %5247 = vmatpush.msrb.mxu1 %v5238_v3 }
 0x57d   : > { %v5071_v47 = vadd.f32 %v11873_v56, %v5051_v21  ;;  %v4808_v16 = vpop.xlane.xlu0 %4807  ;;  %v5232_v21 = vld [vmem:[%s13367_s16 + $0x38] sm:$0xff] }
 0x57e   : > { %v4912_v12 = vsub.f32 1.5, %v4911_v41  ;;  %v4842_v11 = vmul.f32 %v4808_v16, %v11576_v38  ;;  %v4723_v9 = vpop.xlane.xlu1 %4722  ;;  %5248 = vmatpush.msrb.mxu1 %v5237_v25 }
 0x57f   : > { %7509 = vmatmul.msk.f32.gmra.mxu0 %vm2277_vm0, %v5071_v47  ;;  %v4752_v23 = vmul.f32 %v11576_v38, %v4723_v9  ;;  %v5230_v47 = vld [vmem:[%s13367_s16 + $0x28] sm:$0xff] }
 0x580   : > { %v4913_v54 = vmul.f32 %v7975_v46, %v4912_v12  ;;  %v4858_v51 = vadd.f32 1e-05, %v4842_v11  ;;  %5249 = vmatpush.msrb.mxu1 %v5236_v17 }
 0x581   : > { %v7977_v13 = vpop.eup %7976  ;;  %v11927_v39 = vsub.f32 %v11805_v0, %v4752_v23  ;;  %v5229_v23 = vld [vmem:[%s13367_s16 + $0x20] sm:$0xff] }
 0x582   : > { %v4917_v37 = vsel %vm4916_vm2, %v7975_v46, %v4913_v54  ;;  %7978 = vrsqrt.f32 %v4858_v51  ;;  %v4919_v53 = vmul.f32 %v7977_v13, %v4857_v35  ;;  %vm4925_vm3 = vweird.f32 %v7977_v13  ;;  %5250 = vmatpush.msrb.mxu1 %v5235_v36  ;;  %v5231_v35 = vld [vmem:[%s13367_s16 + $0x30] sm:$0xff] }
 0x583   : > { %v5032_v15 = vmul.f32 %v4917_v37, %v11753_v1  ;;  %v4784_v7 = vmul.f32 %v11927_v39, %v11927_v39  ;;  %vm4926_vm5 = vmor %vm4924_vm4, %vm4925_vm3  ;;  %vm4934_vm7 = vweird.f32 %v4858_v51 }
 0x584   : > { %v4920_v18 = vmul.f32 %v7977_v13, %v4919_v53  ;;  %5251 = vmatpush.msrb.mxu1 %v5234_v19 }
 0x585   : > { %v5052_v62 = vmul.f32 %v11862_v27, %v5032_v15  ;;  %v4726_v58 = vpop.xlane.xlu0 %4725  ;;  %v4824_v32 = vsel %vm2277_vm0, %v4784_v7, 0.0  ;;  %v5227_v15 = vld [vmem:[%s13367_s16 + $0x10] sm:$0xff] }
 0x586   : > { %v4753_v8 = vmul.f32 %v11576_v38, %v4726_v58  ;;  %v4921_v40 = vmul.f32 0.5, %v4920_v18  ;;  %4825 = vadd.xlane.f32.xlu1 %v4824_v32 }
 0x587   : > { %v5072_v57 = vadd.f32 %v11873_v56, %v5052_v62  ;;  %v5226_v62 = vld [vmem:[%s13367_s16 + $0x8] sm:$0xff] }
 0x588   : > { %v7979_v1 = vpop.eup %7978  ;;  %v11936_v0 = vsub.f32 %v11815_v52, %v4753_v8  ;;  %v4922_v43 = vsub.f32 1.5, %v4921_v40 }
 0x589   : > { %7510 = vmatmul.msk.f32.gmra.mxu0 %vm2277_vm0, %v5072_v57  ;;  %v4929_v59 = vmul.f32 %v7979_v1, %v4858_v51  ;;  %vm4935_vm6 = vweird.f32 %v7979_v1  ;;  %v5228_v51 = vld [vmem:[%s13367_s16 + $0x18] sm:$0xff] }
 0x58a   : > { %v4785_v50 = vmul.f32 %v11936_v0, %v11936_v0  ;;  %v4923_v2 = vmul.f32 %v7977_v13, %v4922_v43  ;;  %vm4936_vm8 = vmor %vm4934_vm7, %vm4935_vm6 }
 0x58b   : > { %v4930_v6 = vmul.f32 %v7979_v1, %v4929_v59 }
 0x58c   : > { %v4827_v60 = vsel %vm2277_vm0, %v4785_v50, 0.0  ;;  %v4927_v4 = vsel %vm4926_vm5, %v7977_v13, %v4923_v2  ;;  %v11979_v2 = vld [vmem:[%s13368_s28] ss:$0 sm:$0xff] }
 0x58d   : > { %v4931_v61 = vmul.f32 0.5, %v4930_v6  ;;  %4828 = vadd.xlane.f32.xlu2 %v4827_v60  ;;  %v5033_v52 = vmul.f32 %v4927_v4, %v11791_v45 }
 0x58f   : > { %v4932_v49 = vsub.f32 1.5, %v4931_v61  ;;  %v5053_v63 = vmul.f32 %v11862_v27, %v5033_v52 }
 0x591   : > { %v4933_v28 = vmul.f32 %v7979_v1, %v4932_v49  ;;  %v5073_v14 = vadd.f32 %v11873_v56, %v5053_v63 }
 0x593   : > { %v4937_v22 = vsel %vm4936_vm8, %v7979_v1, %v4933_v28  ;;  %7511 = vmatmul.msk.f32.gmra.mxu0 %vm2277_vm0, %v5073_v14  ;;  %v5225_v28 = vld [vmem:[%s13367_s16] sm:$0xff] }
 0x594   : > { %v5034_v44 = vmul.f32 %v4937_v22, %v11803_v55  ;;  %v5233_v55 = vld [vmem:[%s13367_s16 + $0x40] sm:$0xff] }
 0x595   : > { %5252 = vmatpush.msrb.mxu1 %v5233_v55 }
 0x596   : > { %v5054_v45 = vmul.f32 %v11862_v27, %v5034_v44 }
 0x597   : > { %5253 = vmatpush.msrb.mxu1 %v5232_v21 }
 0x598   : > { %v5074_v46 = vadd.f32 %v11873_v56, %v5054_v45 }
 0x599   : > { %5254 = vmatpush.msrb.mxu1 %v5231_v35 }
 0x59b   : > { %7512 = vmatmul.msk.f32.gmra.mxu0 %vm2277_vm0, %v5074_v46  ;;  %5255 = vmatpush.msrb.mxu1 %v5230_v47 }
 0x59d   : > { %5256 = vmatpush.msrb.mxu1 %v5229_v23 }
 0x59f   : > { %5257 = vmatpush.msrb.mxu1 %v5228_v51 }
 0x5a1   : > { %5258 = vmatpush.msrb.mxu1 %v5227_v15 }
 0x5a3   : > { %5259 = vmatpush.msrb.mxu1 %v5226_v62 }
 0x5a5   : > { %5260 = vmatpush.msrb.mxu1 %v5225_v28 }
 0x5bf   : > { %v4811_v26 = vpop.xlane.xlu2 %4810 }
 0x5c0   : > { %v4843_v34 = vmul.f32 %v4811_v26, %v11576_v38 }
 0x5c2   : > { %v4859_v30 = vadd.f32 1e-05, %v4843_v34 }
 0x5c4   : > { %7980 = vrsqrt.f32 %v4859_v30  ;;  %vm4944_vm10 = vweird.f32 %v4859_v30 }
 0x5c7   : > { %v4729_v41 = vpop.xlane.xlu2 %4728  ;;  %v4814_v33 = vpop.xlane.xlu1 %4813 }
 0x5c8   : > { %v4754_v10 = vmul.f32 %v11576_v38, %v4729_v41  ;;  %v4844_v12 = vmul.f32 %v4814_v33, %v11576_v38 }
 0x5ca   : > { %v7981_v16 = vpop.eup %7980  ;;  %v11962_v11 = vsub.f32 %v11856_v48, %v4754_v10  ;;  %v4860_v54 = vadd.f32 1e-05, %v4844_v12 }
 0x5cb   : > { %v4939_v3 = vmul.f32 %v7981_v16, %v4859_v30  ;;  %vm4945_vm9 = vweird.f32 %v7981_v16 }
 0x5cc   : > { %v4786_v9 = vmul.f32 %v11962_v11, %v11962_v11  ;;  %7982 = vrsqrt.f32 %v4860_v54  ;;  %vm4946_vm11 = vmor %vm4944_vm10, %vm4945_vm9  ;;  %vm4954_vm13 = vweird.f32 %v4860_v54 }
 0x5cd   : > { %v4940_v37 = vmul.f32 %v7981_v16, %v4939_v3 }
 0x5ce   : > { %v4830_v13 = vsel %vm2277_vm0, %v4786_v9, 0.0 }
 0x5cf   : > { %v4941_v53 = vmul.f32 0.5, %v4940_v37  ;;  %4831 = vadd.xlane.f32.xlu0 %v4830_v13  ;;  %v4732_v7 = vpop.xlane.xlu1 %4731 }
 0x5d0   : > { %v4755_v18 = vmul.f32 %v11576_v38, %v4732_v7 }
 0x5d1   : > { %v4942_v48 = vsub.f32 1.5, %v4941_v53 }
 0x5d2   : > { %v7983_v58 = vpop.eup %7982  ;;  %v11973_v8 = vsub.f32 %v11877_v31, %v4755_v18 }
 0x5d3   : > { %v4943_v32 = vmul.f32 %v7981_v16, %v4942_v48  ;;  %v4949_v57 = vmul.f32 %v7983_v58, %v4860_v54  ;;  %vm4955_vm12 = vweird.f32 %v7983_v58 }
 0x5d4   : > { %v4787_v1 = vmul.f32 %v11973_v8, %v11973_v8  ;;  %vm4956_vm14 = vmor %vm4954_vm13, %vm4955_vm12 }
 0x5d5   : > { %v4950_v43 = vmul.f32 %v7983_v58, %v4949_v57  ;;  %v4947_v50 = vsel %vm4946_vm11, %v7981_v16, %v4943_v32 }
 0x5d6   : > { %v4817_v40 = vpop.xlane.xlu0 %4816  ;;  %v4833_v6 = vsel %vm2277_vm0, %v4787_v1, 0.0  ;;  %v5035_v4 = vmul.f32 %v4947_v50, %v11843_v29  ;;  %v5161_v52 = vpop.f32.mrf.mxu0 }
 0x5d7   : > { %v4845_v59 = vmul.f32 %v4817_v40, %v11576_v38  ;;  %v4951_v31 = vmul.f32 0.5, %v4950_v43  ;;  %4834 = vadd.xlane.f32.xlu1 %v4833_v6  ;;  %v5162_v49 = vadd.f32 %v11979_v2, %v5161_v52 }
 0x5d8   : > { %v5055_v14 = vmul.f32 %v11862_v27, %v5035_v4 }
 0x5d9   : > { %v4861_v60 = vadd.f32 1e-05, %v4845_v59  ;;  %v4952_v61 = vsub.f32 1.5, %v4951_v31  ;;  %5209 = vst [vmem:[%s11985_s26] sm:$0xff] %v5162_v49  ;;  %5261 = vmatmul.f32.vlgmr.msrb.gmra.mxu1 %v5162_v49 }
 0x5da   : > { %v5075_v29 = vadd.f32 %v11873_v56, %v5055_v14 }
 0x5db   : > { %7984 = vrsqrt.f32 %v4861_v60  ;;  %v4953_v63 = vmul.f32 %v7983_v58, %v4952_v61  ;;  %vm4964_vm1 = vweird.f32 %v4861_v60 }
 0x5dc   : > { %7513 = vmatmul.msk.f32.gmra.mxu0 %vm2277_vm0, %v5075_v29 }
 0x5dd   : > { %v4957_v44 = vsel %vm4956_vm14, %v7983_v58, %v4953_v63 }
 0x5de   : > { %v5036_v25 = vmul.f32 %v4957_v44, %v11859_v42  ;;  %v5164_v36 = vpop.f32.mrf.mxu0 }
 0x5df   : > { %v5165_v55 = vadd.f32 %v11979_v2, %v5164_v36 }
 0x5e0   : > { %v5056_v34 = vmul.f32 %v11862_v27, %v5036_v25 }
 0x5e1   : > { %v7985_v22 = vpop.eup %7984  ;;  %5210 = vst [vmem:[%s11985_s26 + $0x8] sm:$0xff] %v5165_v55  ;;  %5264 = vmatmul.f32.gmra.mxu1 %v5165_v55 }
 0x5e2   : > { %v4959_v45 = vmul.f32 %v7985_v22, %v4861_v60  ;;  %vm4965_vm15 = vweird.f32 %v7985_v22  ;;  %v5076_v47 = vadd.f32 %v11873_v56, %v5056_v34 }
 0x5e3   : > { %vm4966_vm2 = vmor %vm4964_vm1, %vm4965_vm15 }
 0x5e4   : > { %v4960_v46 = vmul.f32 %v7985_v22, %v4959_v45  ;;  %7514 = vmatmul.msk.f32.gmra.mxu0 %vm2277_vm0, %v5076_v47 }
 0x5e5   : > { %v4820_v26 = vpop.xlane.xlu2 %4819 }
 0x5e6   : > { %v4961_v17 = vmul.f32 0.5, %v4960_v46  ;;  %v4846_v21 = vmul.f32 %v4820_v26, %v11576_v38 }
 0x5e8   : > { %v4962_v19 = vsub.f32 1.5, %v4961_v17  ;;  %v4862_v30 = vadd.f32 1e-05, %v4846_v21 }
 0x5ea   : > { %v4963_v35 = vmul.f32 %v7985_v22, %v4962_v19  ;;  %7986 = vrsqrt.f32 %v4862_v30  ;;  %vm4974_vm4 = vweird.f32 %v4862_v30 }
 0x5ec   : > { %v4967_v42 = vsel %vm4966_vm2, %v7985_v22, %v4963_v35 }
 0x5ed   : > { %v5037_v41 = vmul.f32 %v4967_v42, %v11885_v20  ;;  %v5167_v16 = vpop.f32.mrf.mxu0 }
 0x5ee   : > { %v5168_v54 = vadd.f32 %v11979_v2, %v5167_v16 }
 0x5ef   : > { %v4823_v33 = vpop.xlane.xlu0 %4822  ;;  %v5057_v23 = vmul.f32 %v11862_v27, %v5037_v41 }
 0x5f0   : > { %v7987_v10 = vpop.eup %7986  ;;  %v4847_v12 = vmul.f32 %v4823_v33, %v11576_v38  ;;  %5211 = vst [vmem:[%s11985_s26 + $0x10] sm:$0xff] %v5168_v54  ;;  %5267 = vmatmul.f32.gmra.mxu1 %v5168_v54 }
 0x5f1   : > { %v4969_v3 = vmul.f32 %v7987_v10, %v4862_v30  ;;  %v5077_v37 = vadd.f32 %v11873_v56, %v5057_v23  ;;  %vm4975_vm3 = vweird.f32 %v7987_v10 }
 0x5f2   : > { %v4863_v9 = vadd.f32 1e-05, %v4847_v12  ;;  %vm4976_vm5 = vmor %vm4974_vm4, %vm4975_vm3 }
 0x5f3   : > { %v4970_v51 = vmul.f32 %v7987_v10, %v4969_v3  ;;  %7515 = vmatmul.msk.f32.gmra.mxu0 %vm2277_vm0, %v5077_v37 }
 0x5f4   : > { %7988 = vrsqrt.f32 %v4863_v9  ;;  %vm4984_vm7 = vweird.f32 %v4863_v9 }
 0x5f5   : > { %v4971_v13 = vmul.f32 0.5, %v4970_v51 }
 0x5f7   : > { %v4972_v20 = vsub.f32 1.5, %v4971_v13  ;;  %v12035_v13 = vld [vmem:[%s13369_s2] ss:$0 sm:$0xff] }
 0x5f9   : > { %v4973_v15 = vmul.f32 %v7987_v10, %v4972_v20  ;;  %v4826_v18 = vpop.xlane.xlu1 %4825 }
 0x5fa   : > { %v7989_v53 = vpop.eup %7988  ;;  %v4848_v57 = vmul.f32 %v4826_v18, %v11576_v38 }
 0x5fb   : > { %v4977_v62 = vsel %vm4976_vm5, %v7987_v10, %v4973_v15  ;;  %v4979_v48 = vmul.f32 %v7989_v53, %v4863_v9  ;;  %vm4985_vm6 = vweird.f32 %v7989_v53 }
 0x5fc   : > { %v5170_v7 = vpop.f32.mrf.mxu0  ;;  %v5038_v32 = vmul.f32 %v4977_v62, %v11899_v24  ;;  %v4864_v1 = vadd.f32 1e-05, %v4848_v57  ;;  %vm4986_vm8 = vmor %vm4984_vm7, %vm4985_vm6 }
 0x5fd   : > { %v5171_v58 = vadd.f32 %v11979_v2, %v5170_v7  ;;  %v4980_v40 = vmul.f32 %v7989_v53, %v4979_v48 }
 0x5fe   : > { %v5058_v43 = vmul.f32 %v11862_v27, %v5038_v32  ;;  %7990 = vrsqrt.f32 %v4864_v1  ;;  %vm4994_vm10 = vweird.f32 %v4864_v1 }
 0x5ff   : > { %5212 = vst [vmem:[%s11985_s26 + $0x18] sm:$0xff] %v5171_v58  ;;  %5270 = vmatmul.f32.gmra.mxu1 %v5171_v58  ;;  %v4981_v59 = vmul.f32 0.5, %v4980_v40 }
 0x600   : > { %v5078_v50 = vadd.f32 %v11873_v56, %v5058_v43  ;;  %v4829_v31 = vpop.xlane.xlu2 %4828 }
 0x601   : > { %v4982_v6 = vsub.f32 1.5, %v4981_v59  ;;  %v4849_v60 = vmul.f32 %v4829_v31, %v11576_v38 }
 0x602   : > { %7516 = vmatmul.msk.f32.gmra.mxu0 %vm2277_vm0, %v5078_v50 }
 0x603   : > { %v4983_v24 = vmul.f32 %v7989_v53, %v4982_v6  ;;  %v4865_v4 = vadd.f32 1e-05, %v4849_v60 }
 0x604   : > { %v7991_v52 = vpop.eup %7990 }
 0x605   : > { %v4987_v61 = vsel %vm4986_vm8, %v7989_v53, %v4983_v24  ;;  %7992 = vrsqrt.f32 %v4865_v4  ;;  %v4989_v28 = vmul.f32 %v7991_v52, %v4864_v1  ;;  %vm4995_vm9 = vweird.f32 %v7991_v52 }
 0x606   : > { %v5039_v49 = vmul.f32 %v4987_v61, %v11911_v5  ;;  %v5173_v63 = vpop.f32.mrf.mxu0  ;;  %vm4996_vm11 = vmor %vm4994_vm10, %vm4995_vm9  ;;  %vm5004_vm13 = vweird.f32 %v4865_v4 }
 0x607   : > { %v5174_v14 = vadd.f32 %v11979_v2, %v5173_v63  ;;  %v4990_v29 = vmul.f32 %v7991_v52, %v4989_v28 }
 0x608   : > { %v5059_v22 = vmul.f32 %v11862_v27, %v5039_v49 }
 0x609   : > { %5213 = vst [vmem:[%s11985_s26 + $0x20] sm:$0xff] %v5174_v14  ;;  %5273 = vmatmul.f32.gmra.mxu1 %v5174_v14  ;;  %v4991_v45 = vmul.f32 0.5, %v4990_v29 }
 0x60a   : > { %v5079_v44 = vadd.f32 %v11873_v56, %v5059_v22 }
 0x60b   : > { %v7993_v46 = vpop.eup %7992  ;;  %v4992_v25 = vsub.f32 1.5, %v4991_v45 }
 0x60c   : > { %7517 = vmatmul.msk.f32.gmra.mxu0 %vm2277_vm0, %v5079_v44  ;;  %v4999_v5 = vmul.f32 %v7993_v46, %v4865_v4  ;;  %vm5005_vm12 = vweird.f32 %v7993_v46 }
 0x60d   : > { %v4993_v17 = vmul.f32 %v7991_v52, %v4992_v25  ;;  %vm5006_vm14 = vmor %vm5004_vm13, %vm5005_vm12 }
 0x60e   : > { %v5000_v36 = vmul.f32 %v7993_v46, %v4999_v5 }
 0x60f   : > { %v4997_v19 = vsel %vm4996_vm11, %v7991_v52, %v4993_v17 }
 0x610   : > { %v5001_v26 = vmul.f32 0.5, %v5000_v36  ;;  %v5040_v55 = vmul.f32 %v4997_v19, %v11927_v39  ;;  %v5176_v21 = vpop.f32.mrf.mxu0 }
 0x611   : > { %v5177_v35 = vadd.f32 %v11979_v2, %v5176_v21 }
 0x612   : > { %v5002_v34 = vsub.f32 1.5, %v5001_v26  ;;  %v5060_v30 = vmul.f32 %v11862_v27, %v5040_v55 }
 0x613   : > { %5214 = vst [vmem:[%s11985_s26 + $0x28] sm:$0xff] %v5177_v35  ;;  %5276 = vmatmul.f32.gmra.mxu1 %v5177_v35 }
 0x614   : > { %v5003_v47 = vmul.f32 %v7993_v46, %v5002_v34  ;;  %v5080_v42 = vadd.f32 %v11873_v56, %v5060_v30 }
 0x616   : > { %v5007_v41 = vsel %vm5006_vm14, %v7993_v46, %v5003_v47  ;;  %7518 = vmatmul.msk.f32.gmra.mxu0 %vm2277_vm0, %v5080_v42 }
 0x617   : > { %v5041_v33 = vmul.f32 %v5007_v41, %v11936_v0 }
 0x618   : > { %v5179_v39 = vpop.f32.mrf.mxu0 }
 0x619   : > { %v5061_v10 = vmul.f32 %v11862_v27, %v5041_v33  ;;  %v5180_v12 = vadd.f32 %v11979_v2, %v5179_v39 }
 0x61b   : > { %v5081_v16 = vadd.f32 %v11873_v56, %v5061_v10  ;;  %5215 = vst [vmem:[%s11985_s26 + $0x30] sm:$0xff] %v5180_v12  ;;  %5279 = vmatmul.f32.gmra.mxu1 %v5180_v12 }
 0x61e   : > { %7519 = vmatmul.msk.f32.gmra.mxu0 %vm2277_vm0, %v5081_v16 }
 0x642   : > { %v4832_v3 = vpop.xlane.xlu0 %4831 }
 0x643   : > { %v4850_v54 = vmul.f32 %v4832_v3, %v11576_v38 }
 0x645   : > { %v4866_v9 = vadd.f32 1e-05, %v4850_v54 }
 0x647   : > { %7994 = vrsqrt.f32 %v4866_v9  ;;  %vm5014_vm1 = vweird.f32 %v4866_v9 }
 0x64a   : > { %v4835_v23 = vpop.xlane.xlu1 %4834 }
 0x64b   : > { %v4851_v0 = vmul.f32 %v4835_v23, %v11576_v38 }
 0x64d   : > { %v4867_v51 = vadd.f32 1e-05, %v4851_v0  ;;  %v7995_v37 = vpop.eup %7994 }
 0x64e   : > { %v5009_v20 = vmul.f32 %v7995_v37, %v4866_v9  ;;  %vm5015_vm15 = vweird.f32 %v7995_v37 }
 0x64f   : > { %7996 = vrsqrt.f32 %v4867_v51  ;;  %vm5016_vm2 = vmor %vm5014_vm1, %vm5015_vm15  ;;  %vm5024_vm4 = vweird.f32 %v4867_v51 }
 0x650   : > { %v5010_v7 = vmul.f32 %v7995_v37, %v5009_v20 }
 0x652   : > { %v5011_v58 = vmul.f32 0.5, %v5010_v7 }
 0x654   : > { %v5012_v1 = vsub.f32 1.5, %v5011_v58 }
 0x655   : > { %v7997_v48 = vpop.eup %7996 }
 0x656   : > { %v5262_v15 = vpop.f32.mrf.mxu1  ;;  %v5019_v38 = vmul.f32 %v7997_v48, %v4867_v51  ;;  %v5013_v31 = vmul.f32 %v7995_v37, %v5012_v1  ;;  %vm5025_vm3 = vweird.f32 %v7997_v48 }
 0x657   : > { %v12038_v53 = vadd.f32 %v12035_v13, %v5262_v15  ;;  %vm5026_vm5 = vmor %vm5024_vm4, %vm5025_vm3 }
 0x658   : > { %v5020_v43 = vmul.f32 %v7997_v48, %v5019_v38  ;;  %v5017_v52 = vsel %vm5016_vm2, %v7995_v37, %v5013_v31 }
 0x659   : > { %v12041_v62 = vmul.f32 0.70710677, %v12038_v53  ;;  %v5182_v14 = vpop.f32.mrf.mxu0  ;;  %v5042_v46 = vmul.f32 %v5017_v52, %v11962_v11 }
 0x65a   : > { %v5021_v60 = vmul.f32 0.5, %v5020_v43  ;;  %v5183_v44 = vadd.f32 %v11979_v2, %v5182_v14 }
 0x65b   : > { %v5342_v18 = vmul.f32 %v12041_v62, %v12041_v62  ;;  %v5062_v55 = vmul.f32 %v11862_v27, %v5042_v46 }
 0x65c   : > { %v5022_v49 = vsub.f32 1.5, %v5021_v60  ;;  %5216 = vst [vmem:[%s11985_s26 + $0x38] sm:$0xff] %v5183_v44  ;;  %5282 = vmatmul.f32.gmra.mxu1 %v5183_v44 }
 0x65d   : > { %v12045_v32 = vmin.f32 %v5342_v18, 16.0  ;;  %v5082_v30 = vadd.f32 %v11873_v56, %v5062_v55 }
 0x65e   : > { %v5265_v22 = vpop.f32.mrf.mxu1  ;;  %v5023_v25 = vmul.f32 %v7997_v48, %v5022_v49 }
 0x65f   : > { %v5344_v57 = vmul.f32 2.1237322e-06, %v12045_v32  ;;  %v5355_v40 = vmul.f32 3.8918573e-05, %v12045_v32  ;;  %v12055_v45 = vadd.f32 %v12035_v13, %v5265_v22  ;;  %7520 = vmatmul.msk.f32.gmra.mxu0 %vm2277_vm0, %v5082_v30 }
 0x660   : > { %v5027_v11 = vsel %vm5026_vm5, %v7997_v48, %v5023_v25 }
 0x661   : > { %v5356_v59 = vadd.f32 0.001143296, %v5355_v40  ;;  %v5345_v50 = vadd.f32 0.00028619796, %v5344_v57  ;;  %v12061_v36 = vmul.f32 0.70710677, %v12055_v45  ;;  %v5043_v47 = vmul.f32 %v5027_v11, %v11973_v8  ;;  %v5185_v12 = vpop.f32.mrf.mxu0 }
 0x662   : > { %v5186_v16 = vadd.f32 %v11979_v2, %v5185_v12 }
 0x663   : > { %v5357_v6 = vmul.f32 %v5356_v59, %v12045_v32  ;;  %v5346_v4 = vmul.f32 %v5345_v50, %v12045_v32  ;;  %v5382_v26 = vmul.f32 %v12061_v36, %v12061_v36  ;;  %v5063_v9 = vmul.f32 %v11862_v27, %v5043_v47 }
 0x664   : > { %5217 = vst [vmem:[%s11985_s26 + $0x40] sm:$0xff] %v5186_v16  ;;  %5285 = vmatmul.f32.gmra.mxu1 %v5186_v16 }
 0x665   : > { %v5358_v24 = vadd.f32 0.014752088, %v5357_v6  ;;  %v5347_v28 = vadd.f32 0.0036580483, %v5346_v4  ;;  %v12067_v35 = vmin.f32 %v5382_v26, 16.0  ;;  %v5083_v15 = vadd.f32 %v11873_v56, %v5063_v9 }
 0x667   : > { %v5359_v61 = vmul.f32 %v5358_v24, %v12045_v32  ;;  %v5348_v17 = vmul.f32 %v5347_v28, %v12045_v32  ;;  %v5384_v42 = vmul.f32 2.1237322e-06, %v12067_v35  ;;  %v5395_v41 = vmul.f32 3.8918573e-05, %v12067_v35  ;;  %7521 = vmatmul.msk.f32.gmra.mxu0 %vm2277_vm0, %v5083_v15 }
 0x669   : > { %v5360_v63 = vadd.f32 0.112945676, %v5359_v61  ;;  %v5349_v34 = vadd.f32 0.05243302, %v5348_v17  ;;  %v5385_v39 = vadd.f32 0.00028619796, %v5384_v42 }
 0x66a   : > { %v5396_v10 = vadd.f32 0.001143296, %v5395_v41 }
 0x66b   : > { %v5361_v29 = vmul.f32 %v5360_v63, %v12045_v32  ;;  %v5350_v33 = vmul.f32 %v5349_v34, %v12045_v32  ;;  %v5386_v3 = vmul.f32 %v5385_v39, %v12067_v35 }
 0x66c   : > { %v5397_v54 = vmul.f32 %v5396_v10, %v12067_v35 }
 0x66d   : > { %v5362_v5 = vadd.f32 0.4994258, %v5361_v29  ;;  %v5351_v23 = vadd.f32 0.18741608, %v5350_v33  ;;  %v5387_v51 = vadd.f32 0.0036580483, %v5386_v3  ;;  %v5268_v20 = vpop.f32.mrf.mxu1 }
 0x66e   : > { %v5398_v37 = vadd.f32 0.014752088, %v5397_v54  ;;  %v12084_v58 = vadd.f32 %v12035_v13, %v5268_v20 }
 0x66f   : > { %v5363_v19 = vmul.f32 %v5362_v5, %v12045_v32  ;;  %v5388_v48 = vmul.f32 %v5387_v51, %v12067_v35  ;;  %v5352_v27 = vmul.f32 %v5351_v23, %v12045_v32 }
 0x670   : > { %v5399_v18 = vmul.f32 %v5398_v37, %v12067_v35  ;;  %v5188_v1 = vpop.f32.mrf.mxu0  ;;  %v12089_v56 = vmul.f32 0.70710677, %v12084_v58 }
 0x671   : > { %v5364_v21 = vadd.f32 1.0, %v5363_v19  ;;  %v5389_v57 = vadd.f32 0.05243302, %v5388_v48  ;;  %v5189_v43 = vadd.f32 %v11979_v2, %v5188_v1  ;;  %v5353_v32 = vadd.f32 1.1283791, %v5352_v27  ;;  %v6021_v1 = vld [vmem:[#allocation11 + $0x38] sm:$0xff] }
 0x672   : > { %v5400_v40 = vadd.f32 0.112945676, %v5399_v18  ;;  %v5422_v60 = vmul.f32 %v12089_v56, %v12089_v56  ;;  %6082 = vmatpush.msrb.mxu2 %v6021_v1 }
 0x673   : > { %7998 = vrcp.f32 %v5364_v21  ;;  %v5376_v50 = vand.u32 2147483648, %v5364_v21  ;;  %vm5370_vm7 = vweird.f32 %v5364_v21  ;;  %v5374_v31 = vand.u32 2147483647, %v5364_v21  ;;  %5218 = vst [vmem:[%s11985_s26 + $0x48] sm:$0xff] %v5189_v43  ;;  %5288 = vmatmul.f32.gmra.mxu1 %v5189_v43 }
 0x674   : > { %v5401_v6 = vmul.f32 %v5400_v40, %v12067_v35  ;;  %v5390_v24 = vmul.f32 %v5389_v57, %v12067_v35  ;;  %v12097_v52 = vmin.f32 %v5422_v60, 16.0  ;;  %v5354_v44 = vmul.f32 %v5353_v32, %v12041_v62  ;;  %v6020_v32 = vld [vmem:[#allocation11 + $0x30] sm:$0xff] }
 0x675   : > { %v5377_v63 = vor.u32 1.1754944e-38, %v5376_v50  ;;  %vm5375_vm9 = vcmp.eq.f32.partialorder %v5374_v31, 8.507059e+37  ;;  %6083 = vmatpush.msrb.mxu2 %v6020_v32 }
 0x676   : > { %v5402_v4 = vadd.f32 0.4994258, %v5401_v6  ;;  %v5424_v22 = vmul.f32 2.1237322e-06, %v12097_v52  ;;  %v5435_v29 = vmul.f32 3.8918573e-05, %v12097_v52 }
 0x677   : > { %v5391_v25 = vadd.f32 0.18741608, %v5390_v24 }
 0x678   : > { %v5403_v28 = vmul.f32 %v5402_v4, %v12067_v35  ;;  %v5425_v19 = vadd.f32 0.00028619796, %v5424_v22  ;;  %v5436_v26 = vadd.f32 0.001143296, %v5435_v29  ;;  %v6019_v29 = vld [vmem:[#allocation11 + $0x28] sm:$0xff] }
 0x679   : > { %v7999_v8 = vpop.eup %7998  ;;  %v5392_v62 = vmul.f32 %v5391_v25, %v12067_v35  ;;  %6084 = vmatpush.msrb.mxu2 %v6019_v29 }
 0x67a   : > { %v5366_v0 = vmul.f32 %v7999_v8, %v5364_v21  ;;  %vm5371_vm6 = vweird.f32 %v7999_v8  ;;  %v5404_v5 = vadd.f32 1.0, %v5403_v28  ;;  %v5426_v34 = vmul.f32 %v5425_v19, %v12097_v52 }
 0x67b   : > { %vm5372_vm8 = vmor %vm5370_vm7, %vm5371_vm6  ;;  %v5437_v30 = vmul.f32 %v5436_v26, %v12097_v52  ;;  %v5393_v9 = vadd.f32 1.1283791, %v5392_v62 }
 0x67c   : > { %v5367_v7 = vsub.f32 1.0, %v5366_v0  ;;  %v5271_v49 = vpop.f32.mrf.mxu1  ;;  %8000 = vrcp.f32 %v5404_v5  ;;  %v5427_v42 = vadd.f32 0.0036580483, %v5426_v34  ;;  %v5414_v51 = vand.u32 2147483647, %v5404_v5 }
 0x67d   : > { %v12101_v14 = vadd.f32 %v12035_v13, %v5271_v49  ;;  %v5438_v41 = vadd.f32 0.014752088, %v5437_v30  ;;  %v5394_v6 = vmul.f32 %v5393_v9, %v12061_v36  ;;  %vm5410_vm11 = vweird.f32 %v5404_v5 }
 0x67e   : > { %v5368_v38 = vmul.f32 %v7999_v8, %v5367_v7  ;;  %v5428_v16 = vmul.f32 %v5427_v42, %v12097_v52  ;;  %vm5415_vm12 = vcmp.eq.f32.partialorder %v5414_v51, 8.507059e+37 }
 0x67f   : > { %v5191_v17 = vpop.f32.mrf.mxu0  ;;  %v12107_v55 = vmul.f32 0.70710677, %v12101_v14  ;;  %v5439_v3 = vmul.f32 %v5438_v41, %v12097_v52  ;;  %v6017_v41 = vld [vmem:[#allocation11 + $0x18] sm:$0xff] }
 0x680   : > { %v5369_v59 = vadd.f32 %v7999_v8, %v5368_v38  ;;  %v5192_v11 = vadd.f32 %v11979_v2, %v5191_v17  ;;  %v5429_v37 = vadd.f32 0.05243302, %v5428_v16  ;;  %v5416_v38 = vand.u32 2147483648, %v5404_v5 }
 0x681   : > { %v5462_v47 = vmul.f32 %v12107_v55, %v12107_v55  ;;  %v5440_v20 = vadd.f32 0.112945676, %v5439_v3 }
 0x682   : > { %v5373_v61 = vsel %vm5372_vm8, %v7999_v8, %v5369_v59  ;;  %5219 = vst [vmem:[%s11985_s26 + $0x50] sm:$0xff] %v5192_v11  ;;  %5291 = vmatmul.f32.gmra.mxu1 %v5192_v11  ;;  %v8001_v54 = vpop.eup %8000  ;;  %v5430_v57 = vmul.f32 %v5429_v37, %v12097_v52  ;;  %v5417_v28 = vor.u32 1.1754944e-38, %v5416_v38  ;;  %v6018_v11 = vld [vmem:[#allocation11 + $0x20] sm:$0xff] }
 0x683   : > { %v5378_v46 = vsel %vm5375_vm9, %v5377_v63, %v5373_v61  ;;  %v12118_v39 = vmin.f32 %v5462_v47, 16.0  ;;  %v5406_v0 = vmul.f32 %v8001_v54, %v5404_v5  ;;  %v5441_v40 = vmul.f32 %v5440_v20, %v12097_v52  ;;  %6085 = vmatpush.msrb.mxu2 %v6018_v11 }
 0x684   : > { %v12110_v21 = vmul.f32 %v5378_v46, %v5354_v44  ;;  %vm5411_vm10 = vweird.f32 %v8001_v54  ;;  %v5431_v44 = vadd.f32 0.18741608, %v5430_v57 }
 0x685   : > { %v5464_v35 = vmul.f32 2.1237322e-06, %v12118_v39  ;;  %v5475_v8 = vmul.f32 3.8918573e-05, %v12118_v39  ;;  %v5407_v27 = vsub.f32 1.0, %v5406_v0  ;;  %vm5412_vm13 = vmor %vm5410_vm11, %vm5411_vm10  ;;  %6086 = vmatpush.msrb.mxu2 %v6017_v41 }
 0x686   : > { %v5274_v33 = vpop.f32.mrf.mxu1  ;;  %v7522_v12 = vclamps-f32 %v12110_v21, 1.0  ;;  %v5442_v60 = vadd.f32 0.4994258, %v5441_v40 }
 0x687   : > { %v12121_v10 = vadd.f32 %v12035_v13, %v5274_v33  ;;  %v5465_v15 = vadd.f32 0.00028619796, %v5464_v35  ;;  %v5476_v7 = vadd.f32 0.001143296, %v5475_v8  ;;  %v5408_v31 = vmul.f32 %v8001_v54, %v5407_v27 }
 0x688   : > { %v5443_v22 = vmul.f32 %v5442_v60, %v12097_v52  ;;  %v5982_v47 = vadd.f32 1.0, %v7522_v12  ;;  %v5432_v33 = vmul.f32 %v5431_v44, %v12097_v52 }
 0x689   : > { %v5194_v23 = vpop.f32.mrf.mxu0  ;;  %v12129_v48 = vmul.f32 0.70710677, %v12121_v10  ;;  %v5466_v43 = vmul.f32 %v5465_v15, %v12118_v39  ;;  %v5477_v59 = vmul.f32 %v5476_v7, %v12118_v39  ;;  %v5409_v63 = vadd.f32 %v8001_v54, %v5408_v31 }
 0x68a   : > { %v5195_v18 = vadd.f32 %v11979_v2, %v5194_v23  ;;  %v12146_v17 = vadd.f32 1.0, %v5443_v22  ;;  %v6016_v23 = vld [vmem:[#allocation11 + $0x10] sm:$0xff]  ;;  %v5433_v15 = vadd.f32 1.1283791, %v5432_v33 }
 0x68b   : > { %v5502_v50 = vmul.f32 %v12129_v48, %v12129_v48  ;;  %v5467_v24 = vadd.f32 0.0036580483, %v5466_v43  ;;  %v5478_v4 = vadd.f32 0.014752088, %v5477_v59  ;;  %v5413_v5 = vsel %vm5412_vm13, %v8001_v54, %v5409_v63  ;;  %6087 = vmatpush.msrb.mxu2 %v6016_v23  ;;  %v6014_v43 = vld [vmem:[#allocation11] sm:$0xff] }
 0x68c   : > { %5220 = vst [vmem:[%s11985_s26 + $0x58] sm:$0xff] %v5195_v18  ;;  %5294 = vmatmul.f32.gmra.mxu1 %v5195_v18  ;;  %v5418_v21 = vsel %vm5415_vm12, %v5417_v28, %v5413_v5  ;;  %8002 = vrcp.f32 %v12146_v17  ;;  %v5310_v54 = vmul.f32 0.5, %v12038_v53  ;;  %v6015_v53 = vld [vmem:[#allocation11 + $0x8] sm:$0xff]  ;;  %v5311_v59 = vmul.f32 0.5, %v12055_v45 }
 0x68d   : > { %v12140_v61 = vmin.f32 %v5502_v50, 16.0  ;;  %v5468_v36 = vmul.f32 %v5467_v24, %v12118_v39  ;;  %v5479_v46 = vmul.f32 %v5478_v4, %v12118_v39  ;;  %v5419_v42 = vmul.f32 %v5418_v21, %v5394_v6  ;;  %6088 = vmatpush.msrb.mxu2 %v6015_v53 }
 0x68e   : > { %v5998_v51 = vmul.f32 %v5982_v47, %v5310_v54  ;;  %v5454_v28 = vand.u32 2147483647, %v12146_v17  ;;  %v5456_v22 = vand.u32 2147483648, %v12146_v17  ;;  %vm5450_vm15 = vweird.f32 %v12146_v17 }
 0x68f   : > { %v5504_v25 = vmul.f32 2.1237322e-06, %v12140_v61  ;;  %v5515_v19 = vmul.f32 3.8918573e-05, %v12140_v61  ;;  %v5469_v34 = vadd.f32 0.05243302, %v5468_v36  ;;  %6089 = vmatpush.msrb.mxu2 %v6014_v43 }
 0x690   : > { %v5277_v49 = vpop.f32.mrf.mxu1  ;;  %v5480_v30 = vadd.f32 0.112945676, %v5479_v46  ;;  %v7523_v37 = vclamps-f32 %v5419_v42, 1.0  ;;  %7538 = vmatmul.msk.f32.vlgmr.msrb.gmra.mxu2 %vm2277_vm0, %v5998_v51  ;;  %vm5455_vm2 = vcmp.eq.f32.partialorder %v5454_v28, 8.507059e+37  ;;  %v5457_v47 = vor.u32 1.1754944e-38, %v5456_v22 }
 0x691   : > { %v12150_v26 = vadd.f32 %v12035_v13, %v5277_v49  ;;  %v5505_v62 = vadd.f32 0.00028619796, %v5504_v25  ;;  %v5516_v35 = vadd.f32 0.001143296, %v5515_v19  ;;  %v5470_v12 = vmul.f32 %v5469_v34, %v12118_v39 }
 0x692   : > { %v5481_v16 = vmul.f32 %v5480_v30, %v12118_v39  ;;  %v8003_v27 = vpop.eup %8002  ;;  %v5983_v60 = vadd.f32 1.0, %v7523_v37  ;;  %v5434_v49 = vmul.f32 %v5433_v15, %v12089_v56 }
 0x693   : > { %v5197_v3 = vpop.f32.mrf.mxu0  ;;  %v5506_v9 = vmul.f32 %v5505_v62, %v12140_v61  ;;  %v12158_v8 = vmul.f32 0.70710677, %v12150_v26  ;;  %v5517_v52 = vmul.f32 %v5516_v35, %v12140_v61  ;;  %v5446_v50 = vmul.f32 %v8003_v27, %v12146_v17 }
 0x694   : > { %v5482_v0 = vadd.f32 0.4994258, %v5481_v16  ;;  %v5198_v18 = vadd.f32 %v11979_v2, %v5197_v3  ;;  %v5471_v6 = vadd.f32 0.18741608, %v5470_v12  ;;  %vm5451_vm14 = vweird.f32 %v8003_v27 }
 0x695   : > { %v5542_v20 = vmul.f32 %v12158_v8, %v12158_v8  ;;  %v5507_v38 = vadd.f32 0.0036580483, %v5506_v9  ;;  %v5518_v57 = vadd.f32 0.014752088, %v5517_v52  ;;  %v5447_v45 = vsub.f32 1.0, %v5446_v50  ;;  %vm5452_vm1 = vmor %vm5450_vm15, %vm5451_vm14 }
 0x696   : > { %v5483_v7 = vmul.f32 %v5482_v0, %v12118_v39  ;;  %5221 = vst [vmem:[%s11985_s26 + $0x60] sm:$0xff] %v5198_v18  ;;  %5297 = vmatmul.f32.gmra.mxu1 %v5198_v18  ;;  %v5999_v19 = vmul.f32 %v5983_v60, %v5311_v59  ;;  %v5472_v56 = vmul.f32 %v5471_v6, %v12118_v39 }
 0x697   : > { %v12166_v40 = vmin.f32 %v5542_v20, 16.0  ;;  %v5519_v32 = vmul.f32 %v5518_v57, %v12140_v61  ;;  %v5508_v29 = vmul.f32 %v5507_v38, %v12140_v61  ;;  %v5448_v36 = vmul.f32 %v8003_v27, %v5447_v45 }
 0x698   : > { %v5280_v1 = vpop.f32.mrf.mxu1  ;;  %v12170_v31 = vadd.f32 1.0, %v5483_v7  ;;  %v5473_v9 = vadd.f32 1.1283791, %v5472_v56  ;;  %7539 = vmatmul.msk.f32.gmra.mxu2 %vm2277_vm0, %v5999_v19 }
 0x699   : > { %v5544_v24 = vmul.f32 2.1237322e-06, %v12166_v40  ;;  %v5555_v4 = vmul.f32 3.8918573e-05, %v12166_v40  ;;  %v12180_v63 = vadd.f32 %v12035_v13, %v5280_v1  ;;  %v5520_v44 = vadd.f32 0.112945676, %v5519_v32 }
 0x69a   : > { %8004 = vrcp.f32 %v12170_v31  ;;  %v5449_v21 = vadd.f32 %v8003_v27, %v5448_v36  ;;  %v5509_v39 = vadd.f32 0.05243302, %v5508_v29  ;;  %v5494_v37 = vand.u32 2147483647, %v12170_v31 }
 0x69b   : > { %v5545_v46 = vadd.f32 0.00028619796, %v5544_v24  ;;  %v5556_v25 = vadd.f32 0.001143296, %v5555_v4  ;;  %v5200_v5 = vpop.f32.mrf.mxu0  ;;  %v5521_v11 = vmul.f32 %v5520_v44, %v12140_v61  ;;  %v12191_v62 = vmul.f32 0.70710677, %v12180_v63 }
 0x69c   : > { %v5201_v41 = vadd.f32 %v11979_v2, %v5200_v5  ;;  %v5453_v33 = vsel %vm5452_vm1, %v8003_v27, %v5449_v21  ;;  %v5496_v52 = vand.u32 2147483648, %v12170_v31  ;;  %v5510_v15 = vmul.f32 %v5509_v39, %v12140_v61 }
 0x69d   : > { %v5546_v34 = vmul.f32 %v5545_v46, %v12166_v40  ;;  %v5557_v30 = vmul.f32 %v5556_v25, %v12166_v40  ;;  %v5522_v42 = vadd.f32 0.4994258, %v5521_v11  ;;  %v5582_v3 = vmul.f32 %v12191_v62, %v12191_v62 }
 0x69e   : > { %v5458_v54 = vsel %vm5455_vm2, %v5457_v47, %v5453_v33  ;;  %5222 = vst [vmem:[%s11985_s26 + $0x68] sm:$0xff] %v5201_v41  ;;  %5300 = vmatmul.f32.gmra.mxu1 %v5201_v41  ;;  %v5312_v1 = vmul.f32 0.5, %v12084_v58  ;;  %vm5490_vm4 = vweird.f32 %v12170_v31  ;;  %v5497_v6 = vor.u32 1.1754944e-38, %v5496_v52 }
 0x69f   : > { %v5558_v16 = vadd.f32 0.014752088, %v5557_v30  ;;  %v5459_v23 = vmul.f32 %v5458_v54, %v5434_v49  ;;  %v5523_v12 = vmul.f32 %v5522_v42, %v12140_v61  ;;  %v5547_v0 = vadd.f32 0.0036580483, %v5546_v34 }
 0x6a0   : > { %v8005_v17 = vpop.eup %8004  ;;  %v12203_v20 = vmin.f32 %v5582_v3, 16.0  ;;  %v5511_v24 = vadd.f32 0.18741608, %v5510_v15  ;;  %v5474_v45 = vmul.f32 %v5473_v9, %v12107_v55  ;;  %vm5495_vm6 = vcmp.eq.f32.partialorder %v5494_v37, 8.507059e+37 }
 0x6a1   : > { %v5486_v35 = vmul.f32 %v8005_v17, %v12170_v31  ;;  %v5559_v2 = vmul.f32 %v5558_v16, %v12166_v40  ;;  %v7524_v53 = vclamps-f32 %v5459_v23, 1.0  ;;  %v5524_v7 = vadd.f32 1.0, %v5523_v12 }
 0x6a2   : > { %vm5491_vm3 = vweird.f32 %v8005_v17  ;;  %v5584_v38 = vmul.f32 2.1237322e-06, %v12203_v20  ;;  %v5595_v57 = vmul.f32 3.8918573e-05, %v12203_v20  ;;  %v5548_v59 = vmul.f32 %v5547_v0, %v12166_v40 }
 0x6a3   : > { %v5487_v51 = vsub.f32 1.0, %v5486_v35  ;;  %v5560_v18 = vadd.f32 0.112945676, %v5559_v2  ;;  %v5984_v43 = vadd.f32 1.0, %v7524_v53  ;;  %8006 = vrcp.f32 %v5524_v7  ;;  %vm5492_vm5 = vmor %vm5490_vm4, %vm5491_vm3 }
 0x6a4   : > { %v5585_v4 = vadd.f32 0.00028619796, %v5584_v38  ;;  %v5596_v49 = vadd.f32 0.001143296, %v5595_v57  ;;  %v5549_v29 = vadd.f32 0.05243302, %v5548_v59  ;;  %v5512_v5 = vmul.f32 %v5511_v24, %v12140_v61 }
 0x6a5   : > { %v5488_v27 = vmul.f32 %v8005_v17, %v5487_v51  ;;  %v5561_v60 = vmul.f32 %v5560_v18, %v12166_v40  ;;  %v6000_v32 = vmul.f32 %v5984_v43, %v5312_v1  ;;  %v5313_v47 = vmul.f32 0.5, %v12101_v14 }
 0x6a6   : > { %v5586_v44 = vmul.f32 %v5585_v4, %v12203_v20  ;;  %v5597_v36 = vmul.f32 %v5596_v49, %v12203_v20  ;;  %v5550_v11 = vmul.f32 %v5549_v29, %v12166_v40  ;;  %v5534_v33 = vand.u32 2147483647, %v5524_v7 }
 0x6a7   : > { %v5489_v50 = vadd.f32 %v8005_v17, %v5488_v27  ;;  %v5562_v58 = vadd.f32 0.4994258, %v5561_v60  ;;  %7540 = vmatmul.msk.f32.gmra.mxu2 %vm2277_vm0, %v6000_v32  ;;  %v5536_v39 = vand.u32 2147483648, %v5524_v7  ;;  %vm5530_vm8 = vweird.f32 %v5524_v7 }
 0x6a8   : > { %v5598_v19 = vadd.f32 0.014752088, %v5597_v36  ;;  %v5587_v34 = vadd.f32 0.0036580483, %v5586_v44  ;;  %v5551_v54 = vadd.f32 0.18741608, %v5550_v11 }
 0x6a9   : > { %v5493_v28 = vsel %vm5492_vm5, %v8005_v17, %v5489_v50  ;;  %v5563_v46 = vmul.f32 %v5562_v58, %v12166_v40  ;;  %v8007_v25 = vpop.eup %8006  ;;  %v5513_v17 = vadd.f32 1.1283791, %v5512_v5  ;;  %v5537_v14 = vor.u32 1.1754944e-38, %v5536_v39 }
 0x6aa   : > { %v5498_v22 = vsel %vm5495_vm6, %v5497_v6, %v5493_v28  ;;  %v5526_v55 = vmul.f32 %v8007_v25, %v5524_v7  ;;  %v5599_v30 = vmul.f32 %v5598_v19, %v12203_v20  ;;  %vm5531_vm7 = vweird.f32 %v8007_v25 }
 0x6ab   : > { %v5499_v31 = vmul.f32 %v5498_v22, %v5474_v45  ;;  %v5564_v21 = vadd.f32 1.0, %v5563_v46  ;;  %v5588_v9 = vmul.f32 %v5587_v34, %v12203_v20  ;;  %vm5532_vm9 = vmor %vm5530_vm8, %vm5531_vm7  ;;  %v5514_v12 = vmul.f32 %v5513_v17, %v12129_v48 }
 0x6ac   : > { %v5527_v41 = vsub.f32 1.0, %v5526_v55  ;;  %v5600_v61 = vadd.f32 0.112945676, %v5599_v30  ;;  %vm5535_vm10 = vcmp.eq.f32.partialorder %v5534_v33, 8.507059e+37  ;;  %v5552_v52 = vmul.f32 %v5551_v54, %v12166_v40 }
 0x6ad   : > { %v7525_v56 = vclamps-f32 %v5499_v31, 1.0  ;;  %8008 = vrcp.f32 %v5564_v21  ;;  %v5589_v53 = vadd.f32 0.05243302, %v5588_v9  ;;  %v5314_v27 = vmul.f32 0.5, %v12121_v10 }
 0x6ae   : > { %v5528_v3 = vmul.f32 %v8007_v25, %v5527_v41  ;;  %v5601_v23 = vmul.f32 %v5600_v61, %v12203_v20  ;;  %v5553_v1 = vadd.f32 1.1283791, %v5552_v52  ;;  %v5576_v43 = vand.u32 2147483648, %v5564_v21  ;;  %v8072_v61 = vld [vmem:[%s13368_s28] ss:$0 sm:$0xff] }
 0x6af   : > { %v5985_v42 = vadd.f32 1.0, %v7525_v56  ;;  %v5590_v48 = vmul.f32 %v5589_v53, %v12203_v20  ;;  %v5574_v60 = vand.u32 2147483647, %v5564_v21  ;;  %vm5570_vm12 = vweird.f32 %v5564_v21 }
 0x6b0   : > { %v5529_v35 = vadd.f32 %v8007_v25, %v5528_v3  ;;  %v5602_v2 = vadd.f32 0.4994258, %v5601_v23  ;;  %v5577_v24 = vor.u32 1.1754944e-38, %v5576_v43  ;;  %v5554_v10 = vmul.f32 %v5553_v1, %v12158_v8 }
 0x6b1   : > { %v6001_v16 = vmul.f32 %v5985_v42, %v5313_v47  ;;  %v5591_v4 = vadd.f32 0.18741608, %v5590_v48  ;;  %vm5575_vm14 = vcmp.eq.f32.partialorder %v5574_v60, 8.507059e+37  ;;  %v5315_v36 = vmul.f32 0.5, %v12150_v26 }
 0x6b2   : > { %v5533_v0 = vsel %vm5532_vm9, %v8007_v25, %v5529_v35  ;;  %v5603_v7 = vmul.f32 %v5602_v2, %v12203_v20  ;;  %v5316_v47 = vmul.f32 0.5, %v12180_v63 }
 0x6b3   : > { %7541 = vmatmul.msk.f32.gmra.mxu2 %vm2277_vm0, %v6001_v16  ;;  %v8009_v51 = vpop.eup %8008  ;;  %v5538_v37 = vsel %vm5535_vm10, %v5537_v14, %v5533_v0  ;;  %v5592_v22 = vmul.f32 %v5591_v4, %v12203_v20 }
 0x6b4   : > { %v5539_v15 = vmul.f32 %v5538_v37, %v5514_v12  ;;  %v5566_v18 = vmul.f32 %v8009_v51, %v5564_v21  ;;  %v5604_v59 = vadd.f32 1.0, %v5603_v7  ;;  %vm5571_vm11 = vweird.f32 %v8009_v51 }
 0x6b5   : > { %vm5572_vm13 = vmor %vm5570_vm12, %vm5571_vm11  ;;  %v5593_v25 = vadd.f32 1.1283791, %v5592_v22 }
 0x6b6   : > { %v7526_v38 = vclamps-f32 %v5539_v15, 1.0  ;;  %v5567_v57 = vsub.f32 1.0, %v5566_v18  ;;  %8010 = vrcp.f32 %v5604_v59  ;;  %v5616_v5 = vand.u32 2147483648, %v5604_v59 }
 0x6b7   : > { %v5614_v8 = vand.u32 2147483647, %v5604_v59  ;;  %vm5610_vm1 = vweird.f32 %v5604_v59  ;;  %v5594_v20 = vmul.f32 %v5593_v25, %v12191_v62 }
 0x6b8   : > { %v5986_v50 = vadd.f32 1.0, %v7526_v38  ;;  %v5568_v6 = vmul.f32 %v8009_v51, %v5567_v57  ;;  %v5617_v11 = vor.u32 1.1754944e-38, %v5616_v5 }
 0x6b9   : > { %vm5615_vm3 = vcmp.eq.f32.partialorder %v5614_v8, 8.507059e+37 }
 0x6ba   : > { %v6002_v40 = vmul.f32 %v5986_v50, %v5314_v27  ;;  %v5569_v32 = vadd.f32 %v8009_v51, %v5568_v6 }
 0x6bc   : > { %v5573_v49 = vsel %vm5572_vm13, %v8009_v51, %v5569_v32  ;;  %7542 = vmatmul.msk.f32.gmra.mxu2 %vm2277_vm0, %v6002_v40  ;;  %v8011_v58 = vpop.eup %8010 }
 0x6bd   : > { %v5578_v45 = vsel %vm5575_vm14, %v5577_v24, %v5573_v49  ;;  %v5606_v44 = vmul.f32 %v8011_v58, %v5604_v59  ;;  %vm5611_vm15 = vweird.f32 %v8011_v58 }
 0x6be   : > { %v5579_v28 = vmul.f32 %v5578_v45, %v5554_v10  ;;  %vm5612_vm2 = vmor %vm5610_vm1, %vm5611_vm15 }
 0x6bf   : > { %v5607_v46 = vsub.f32 1.0, %v5606_v44 }
 0x6c0   : > { %v7527_v29 = vclamps-f32 %v5579_v28, 1.0 }
 0x6c1   : > { %v5608_v56 = vmul.f32 %v8011_v58, %v5607_v46 }
 0x6c2   : > { %v5987_v31 = vadd.f32 1.0, %v7527_v29 }
 0x6c3   : > { %v5609_v55 = vadd.f32 %v8011_v58, %v5608_v56 }
 0x6c4   : > { %v6003_v19 = vmul.f32 %v5987_v31, %v5315_v36 }
 0x6c5   : > { %v5613_v21 = vsel %vm5612_vm2, %v8011_v58, %v5609_v55 }
 0x6c6   : > { %7543 = vmatmul.msk.f32.gmra.mxu2 %vm2277_vm0, %v6003_v19  ;;  %v5618_v26 = vsel %vm5615_vm3, %v5617_v11, %v5613_v21 }
 0x6c7   : > { %v5619_v34 = vmul.f32 %v5618_v26, %v5594_v20 }
 0x6c9   : > { %v7528_v30 = vclamps-f32 %v5619_v34, 1.0 }
 0x6cb   : > { %v5988_v42 = vadd.f32 1.0, %v7528_v30 }
 0x6cd   : > { %v6004_v41 = vmul.f32 %v5988_v42, %v5316_v47 }
 0x6cf   : > { %7544 = vmatmul.msk.f32.gmra.mxu2 %vm2277_vm0, %v6004_v41 }
 0x6d9   : > { %v5283_v17 = vpop.f32.mrf.mxu1 }
 0x6da   : > { %v12238_v33 = vadd.f32 %v12035_v13, %v5283_v17 }
 0x6dc   : > { %v12241_v39 = vmul.f32 0.70710677, %v12238_v33  ;;  %v5203_v3 = vpop.f32.mrf.mxu0 }
 0x6dd   : > { %v5204_v54 = vadd.f32 %v8072_v61, %v5203_v3 }
 0x6de   : > { %v5622_v62 = vmul.f32 %v12241_v39, %v12241_v39 }
 0x6df   : > { %5223 = vst [vmem:[%s11985_s26 + $0x70] sm:$0xff] %v5204_v54  ;;  %5303 = vmatmul.f32.gmra.mxu1 %v5204_v54 }
 0x6e0   : > { %v5623_v16 = vmin.f32 %v5622_v62, 16.0 }
 0x6e1   : > { %v5286_v14 = vpop.f32.mrf.mxu1 }
 0x6e2   : > { %v5624_v9 = vmul.f32 2.1237322e-06, %v5623_v16  ;;  %v5635_v63 = vmul.f32 3.8918573e-05, %v5623_v16  ;;  %v12248_v2 = vadd.f32 %v12035_v13, %v5286_v14 }
 0x6e4   : > { %v5625_v35 = vadd.f32 0.00028619796, %v5624_v9  ;;  %v5636_v23 = vadd.f32 0.001143296, %v5635_v63  ;;  %v12251_v52 = vmul.f32 0.70710677, %v12248_v2  ;;  %v5206_v53 = vpop.f32.mrf.mxu0 }
 0x6e5   : > { %v5207_v7 = vadd.f32 %v8072_v61, %v5206_v53 }
 0x6e6   : > { %v5626_v12 = vmul.f32 %v5625_v35, %v5623_v16  ;;  %v5637_v0 = vmul.f32 %v5636_v23, %v5623_v16  ;;  %v5662_v27 = vmul.f32 %v12251_v52, %v12251_v52 }
 0x6e7   : > { %5224 = vst [vmem:[%s11985_s26 + $0x78] sm:$0xff] %v5207_v7  ;;  %5306 = vmatmul.f32.gmra.mxu1 %v5207_v7 }
 0x6e8   : > { %v5627_v51 = vadd.f32 0.0036580483, %v5626_v12  ;;  %v5638_v37 = vadd.f32 0.014752088, %v5637_v0  ;;  %v12256_v57 = vmin.f32 %v5662_v27, 16.0 }
 0x6ea   : > { %v5628_v15 = vmul.f32 %v5627_v51, %v5623_v16  ;;  %v5639_v18 = vmul.f32 %v5638_v37, %v5623_v16  ;;  %v5664_v50 = vmul.f32 2.1237322e-06, %v12256_v57  ;;  %v5675_v6 = vmul.f32 3.8918573e-05, %v12256_v57 }
 0x6ec   : > { %v5640_v38 = vadd.f32 0.112945676, %v5639_v18  ;;  %v5629_v43 = vadd.f32 0.05243302, %v5628_v15  ;;  %v5665_v40 = vadd.f32 0.00028619796, %v5664_v50 }
 0x6ed   : > { %v5676_v32 = vadd.f32 0.001143296, %v5675_v6 }
 0x6ee   : > { %v5641_v48 = vmul.f32 %v5640_v38, %v5623_v16  ;;  %v5630_v4 = vmul.f32 %v5629_v43, %v5623_v16  ;;  %v5666_v49 = vmul.f32 %v5665_v40, %v12256_v57 }
 0x6ef   : > { %v5677_v45 = vmul.f32 %v5676_v32, %v12256_v57 }
 0x6f0   : > { %v5289_v1 = vpop.f32.mrf.mxu1  ;;  %v5642_v60 = vadd.f32 0.4994258, %v5641_v48  ;;  %v5667_v22 = vadd.f32 0.0036580483, %v5666_v49  ;;  %v5631_v31 = vadd.f32 0.18741608, %v5630_v4 }
 0x6f1   : > { %v12259_v59 = vadd.f32 %v12035_v13, %v5289_v1  ;;  %v5678_v29 = vadd.f32 0.014752088, %v5677_v45 }
 0x6f2   : > { %v5643_v10 = vmul.f32 %v5642_v60, %v5623_v16  ;;  %v5668_v46 = vmul.f32 %v5667_v22, %v12256_v57  ;;  %v5632_v11 = vmul.f32 %v5631_v31, %v5623_v16 }
 0x6f3   : > { %v12264_v24 = vmul.f32 0.70710677, %v12259_v59  ;;  %v5679_v25 = vmul.f32 %v5678_v29, %v12256_v57 }
 0x6f4   : > { %v5644_v58 = vadd.f32 1.0, %v5643_v10  ;;  %v5669_v8 = vadd.f32 0.05243302, %v5668_v46  ;;  %v5633_v3 = vadd.f32 1.1283791, %v5632_v11 }
 0x6f5   : > { %v5702_v28 = vmul.f32 %v12264_v24, %v12264_v24  ;;  %v5680_v55 = vadd.f32 0.112945676, %v5679_v25 }
 0x6f6   : > { %8012 = vrcp.f32 %v5644_v58  ;;  %v5670_v17 = vmul.f32 %v5669_v8, %v12256_v57  ;;  %v5654_v35 = vand.u32 2147483647, %v5644_v58  ;;  %v5656_v23 = vand.u32 2147483648, %v5644_v58 }
 0x6f7   : > { %v12270_v44 = vmin.f32 %v5702_v28, 16.0  ;;  %v5681_v26 = vmul.f32 %v5680_v55, %v12256_v57  ;;  %v5634_v1 = vmul.f32 %v5633_v3, %v12241_v39  ;;  %vm5650_vm5 = vweird.f32 %v5644_v58 }
 0x6f8   : > { %v5671_v53 = vadd.f32 0.18741608, %v5670_v17  ;;  %vm5655_vm7 = vcmp.eq.f32.partialorder %v5654_v35, 8.507059e+37  ;;  %v5657_v48 = vor.u32 1.1754944e-38, %v5656_v23 }
 0x6f9   : > { %v5704_v5 = vmul.f32 2.1237322e-06, %v12270_v44  ;;  %v5715_v19 = vmul.f32 3.8918573e-05, %v12270_v44  ;;  %v5682_v62 = vadd.f32 0.4994258, %v5681_v26 }
 0x6fa   : > { %v5672_v4 = vmul.f32 %v5671_v53, %v12256_v57 }
 0x6fb   : > { %v5705_v20 = vadd.f32 0.00028619796, %v5704_v5  ;;  %v5716_v21 = vadd.f32 0.001143296, %v5715_v19  ;;  %v5683_v14 = vmul.f32 %v5682_v62, %v12256_v57 }
 0x6fc   : > { %v8013_v30 = vpop.eup %8012  ;;  %v5673_v5 = vadd.f32 1.1283791, %v5672_v4 }
 0x6fd   : > { %v5706_v47 = vmul.f32 %v5705_v20, %v12270_v44  ;;  %v5717_v42 = vmul.f32 %v5716_v21, %v12270_v44  ;;  %v5646_v41 = vmul.f32 %v8013_v30, %v5644_v58  ;;  %vm5651_vm4 = vweird.f32 %v8013_v30 }
 0x6fe   : > { %v12293_v15 = vadd.f32 1.0, %v5683_v14  ;;  %vm5652_vm6 = vmor %vm5650_vm5, %vm5651_vm4  ;;  %v5317_v58 = vmul.f32 0.5, %v12238_v33  ;;  %v12322_v21 = vmul.f32 0.5, %v12248_v2 }
 0x6ff   : > { %v5292_v36 = vpop.f32.mrf.mxu1  ;;  %v5707_v61 = vadd.f32 0.0036580483, %v5706_v47  ;;  %v5718_v54 = vadd.f32 0.014752088, %v5717_v42  ;;  %v5647_v63 = vsub.f32 1.0, %v5646_v41 }
 0x700   : > { %v12277_v56 = vadd.f32 %v12035_v13, %v5292_v36  ;;  %8014 = vrcp.f32 %v12293_v15  ;;  %v5694_v11 = vand.u32 2147483647, %v12293_v15  ;;  %v5696_v17 = vand.u32 2147483648, %v12293_v15 }
 0x701   : > { %v5708_v12 = vmul.f32 %v5707_v61, %v12270_v44  ;;  %v5719_v0 = vmul.f32 %v5718_v54, %v12270_v44  ;;  %v5648_v37 = vmul.f32 %v8013_v30, %v5647_v63  ;;  %v5674_v54 = vmul.f32 %v5673_v5, %v12251_v52  ;;  %v12333_v63 = vld [vmem:[%s13369_s2] ss:$0 sm:$0xff]  ;;  %s7033_s2 = scalar_lea.hbm %s13171_s6, %s13007_s4 }
 0x702   : > { %v12281_v34 = vmul.f32 0.70710677, %v12277_v56  ;;  %vm5690_vm9 = vweird.f32 %v12293_v15  ;;  %vm5695_vm10 = vcmp.eq.f32.partialorder %v5694_v11, 8.507059e+37  ;;  %v5697_v14 = vor.u32 1.1754944e-38, %v5696_v17  ;;  %s7036_s5 = sshll.u32 %s7033_s2, 4  ;;  %s7037_s5 = int_to_ptr.hbm [resolvable:$true] %s7036_s5 }
 0x703   : > { %v5709_v7 = vadd.f32 0.05243302, %v5708_v12  ;;  %v5720_v27 = vadd.f32 0.112945676, %v5719_v0  ;;  %v5649_v43 = vadd.f32 %v8013_v30, %v5648_v37  ;;  %s8239_s8 = sshra.s32 %s7037_s5, 4  ;;  %s8240_s8 = int_to_ptr.hbm [resolvable:$true] %s8239_s8 }
 0x704   : > { %v5742_v16 = vmul.f32 %v12281_v34, %v12281_v34  ;;  %s8241_s9 = scalar_lea.hbm %s8240_s8, 128  ;;  %p8246_p3 = scmp.lt.s32.totalorder %s8240_s8, %s13171_s6 }
 0x705   : > { %v5710_v50 = vmul.f32 %v5709_v7, %v12270_v44  ;;  %v5721_v6 = vmul.f32 %v5720_v27, %v12270_v44  ;;  %p8242_p10 = scmp.ne.s32.totalorder %s8240_s8, %s8241_s9 }
 0x706   : > { %v12291_v51 = vmin.f32 %v5742_v16, 16.0  ;;  %v8015_v29 = vpop.eup %8014 }
 0x707   : > { %v5722_v49 = vadd.f32 0.4994258, %v5721_v6  ;;  %v5711_v31 = vadd.f32 0.18741608, %v5710_v50  ;;  %v5686_v57 = vmul.f32 %v8015_v29, %v12293_v15  ;;  %vm5691_vm8 = vweird.f32 %v8015_v29  ;;  %p8243_p12 = pnand %p8242_p10, %p8607_p5 }
 0x708   : > { %v5744_v38 = vmul.f32 2.1237322e-06, %v12291_v51  ;;  %v5755_v40 = vmul.f32 3.8918573e-05, %v12291_v51  ;;  %vm5692_vm11 = vmor %vm5690_vm9, %vm5691_vm8 }
 0x709   : > { %v5295_v9 = vpop.f32.mrf.mxu1  ;;  %v5723_v46 = vmul.f32 %v5722_v49, %v12270_v44  ;;  %v5687_v26 = vsub.f32 1.0, %v5686_v57  ;;  %v5712_v62 = vmul.f32 %v5711_v31, %v12270_v44  ;;  %p8244_p0 = pneg %p8243_p12 }
 0x70a   : > { %v12296_v18 = vadd.f32 %v12035_v13, %v5295_v9  ;;  %v5653_v13 = vsel %vm5652_vm6, %v8013_v30, %v5649_v43  ;;  %v5745_v60 = vadd.f32 0.00028619796, %v5744_v38  ;;  %v5756_v28 = vadd.f32 0.001143296, %v5755_v40 }
 0x70b   : > { %v5658_v39 = vsel %vm5655_vm7, %v5657_v48, %v5653_v13  ;;  %v12319_v33 = vadd.f32 1.0, %v5723_v46  ;;  %v5688_v3 = vmul.f32 %v8015_v29, %v5687_v26  ;;  %v5713_v53 = vadd.f32 1.1283791, %v5712_v62 }
 0x70c   : > { %v12306_v32 = vmul.f32 0.70710677, %v12296_v18  ;;  %v5659_v10 = vmul.f32 %v5658_v39, %v5634_v1  ;;  %v5746_v45 = vmul.f32 %v5745_v60, %v12291_v51  ;;  %v5757_v25 = vmul.f32 %v5756_v28, %v12291_v51 }
 0x70d   : > { %8016 = vrcp.f32 %v12319_v33  ;;  %v5689_v44 = vadd.f32 %v8015_v29, %v5688_v3  ;;  %vm5730_vm12 = vweird.f32 %v12319_v33  ;;  %v5734_v13 = vand.u32 2147483647, %v12319_v33  ;;  %v12373_v3 = vld [vmem:[%s13370_s7] ss:$0 sm:$0xff] }
 0x70e   : > { %v5782_v22 = vmul.f32 %v12306_v32, %v12306_v32  ;;  %v7529_v36 = vclamps-f32 %v5659_v10, 1.0  ;;  %v5747_v19 = vadd.f32 0.0036580483, %v5746_v45  ;;  %v5758_v20 = vadd.f32 0.014752088, %v5757_v25 }
 0x70f   : > { %v5693_v37 = vsel %vm5692_vm11, %v8015_v29, %v5689_v44  ;;  %v5736_v45 = vand.u32 2147483648, %v12319_v33  ;;  %vm5735_vm15 = vcmp.eq.f32.partialorder %v5734_v13, 8.507059e+37  ;;  %v12403_v13 = vmul.f32 0.5, %v12296_v18 }
 0x710   : > { %v12316_v8 = vmin.f32 %v5782_v22, 16.0  ;;  %v5989_v55 = vadd.f32 1.0, %v7529_v36  ;;  %v5748_v61 = vmul.f32 %v5747_v19, %v12291_v51  ;;  %v5759_v2 = vmul.f32 %v5758_v20, %v12291_v51 }
 0x711   : > { %v5698_v1 = vsel %vm5695_vm10, %v5697_v14, %v5693_v37  ;;  %v5737_v17 = vor.u32 1.1754944e-38, %v5736_v45 }
 0x712   : > { %v5784_v30 = vmul.f32 2.1237322e-06, %v12316_v8  ;;  %v5795_v47 = vmul.f32 3.8918573e-05, %v12316_v8  ;;  %v6005_v41 = vmul.f32 %v5989_v55, %v5317_v58  ;;  %v5760_v23 = vadd.f32 0.112945676, %v5759_v2 }
 0x713   : > { %v5298_v42 = vpop.f32.mrf.mxu1  ;;  %v5749_v7 = vadd.f32 0.05243302, %v5748_v61  ;;  %v8017_v38 = vpop.eup %8016  ;;  %v5699_v50 = vmul.f32 %v5698_v1, %v5674_v54 }
 0x714   : > { %v5785_v16 = vadd.f32 0.00028619796, %v5784_v30  ;;  %v5796_v9 = vadd.f32 0.001143296, %v5795_v47  ;;  %v12336_v35 = vadd.f32 %v12333_v63, %v5298_v42  ;;  %7545 = vmatmul.msk.f32.gmra.mxu2 %vm2277_vm0, %v6005_v41  ;;  %v5761_v27 = vmul.f32 %v5760_v23, %v12291_v51  ;;  %v6091_v57 = vpop.f32.mrf.mxu2 }
 0x715   : > { %v5726_v6 = vmul.f32 %v8017_v38, %v12319_v33  ;;  %v7530_v10 = vclamps-f32 %v5699_v50, 1.0  ;;  %v5750_v28 = vmul.f32 %v5749_v7, %v12291_v51  ;;  %vm5731_vm13 = vweird.f32 %v8017_v38 }
 0x716   : > { %v5786_v12 = vmul.f32 %v5785_v16, %v12316_v8  ;;  %v5797_v52 = vmul.f32 %v5796_v9, %v12316_v8  ;;  %v12343_v0 = vmul.f32 0.70710677, %v12336_v35  ;;  %v5762_v60 = vadd.f32 0.4994258, %v5761_v27  ;;  %vm5732_vm14 = vmor %vm5730_vm12, %vm5731_vm13 }
 0x717   : > { %v5727_v49 = vsub.f32 1.0, %v5726_v6  ;;  %v5990_v31 = vadd.f32 1.0, %v7530_v10  ;;  %v5751_v47 = vadd.f32 0.18741608, %v5750_v28  ;;  %v5714_v41 = vmul.f32 %v5713_v53, %v12264_v24 }
 0x718   : > { %v5787_v43 = vadd.f32 0.0036580483, %v5786_v12  ;;  %v5798_v15 = vadd.f32 0.014752088, %v5797_v52  ;;  %v5822_v48 = vmul.f32 %v12343_v0, %v12343_v0  ;;  %v5763_v58 = vmul.f32 %v5762_v60, %v12291_v51 }
 0x719   : > { %v5728_v46 = vmul.f32 %v8017_v38, %v5727_v49  ;;  %v6006_v26 = vmul.f32 %v5990_v31, %v12322_v21  ;;  %v5319_v24 = vmul.f32 0.5, %v12259_v59  ;;  %v5752_v44 = vmul.f32 %v5751_v47, %v12291_v51 }
 0x71a   : > { %v5788_v40 = vmul.f32 %v5787_v43, %v12316_v8  ;;  %v5799_v39 = vmul.f32 %v5798_v15, %v12316_v8  ;;  %v12353_v4 = vmin.f32 %v5822_v48, 16.0  ;;  %v12360_v19 = vadd.f32 1.0, %v5763_v58 }
 0x71b   : > { %v5301_v5 = vpop.f32.mrf.mxu1  ;;  %v5729_v30 = vadd.f32 %v8017_v38, %v5728_v46  ;;  %v12386_v53 = vadd.f32 %v12373_v3, %v6091_v57  ;;  %v12389_v7 = vmul.f32 0.5, %v12277_v56  ;;  %v5753_v6 = vadd.f32 1.1283791, %v5752_v44 }
 0x71c   : > { %v5789_v22 = vadd.f32 0.05243302, %v5788_v40  ;;  %v5800_v29 = vadd.f32 0.112945676, %v5799_v39  ;;  %v5824_v36 = vmul.f32 2.1237322e-06, %v12353_v4  ;;  %8018 = vrcp.f32 %v12360_v19  ;;  %7546 = vmatmul.msk.f32.gmra.mxu2 %vm2277_vm0, %v6006_v26  ;;  %v6094_v60 = vpop.f32.mrf.mxu2 }
 0x71d   : > { %v5835_v25 = vmul.f32 3.8918573e-05, %v12353_v4  ;;  %v12370_v62 = vadd.f32 %v12333_v63, %v5301_v5  ;;  %v5733_v61 = vsel %vm5732_vm14, %v8017_v38, %v5729_v30  ;;  %v5774_v12 = vand.u32 2147483647, %v12360_v19 }
 0x71e   : > { %v5790_v55 = vmul.f32 %v5789_v22, %v12316_v8  ;;  %v5801_v11 = vmul.f32 %v5800_v29, %v12316_v8  ;;  %v5825_v20 = vadd.f32 0.00028619796, %v5824_v36  ;;  %v5738_v54 = vsel %vm5735_vm15, %v5737_v17, %v5733_v61 }
 0x71f   : > { %v5836_v42 = vadd.f32 0.001143296, %v5835_v25  ;;  %v5739_v9 = vmul.f32 %v5738_v54, %v5714_v41  ;;  %v12383_v37 = vmul.f32 0.70710677, %v12370_v62  ;;  %v12399_v48 = vmul.f32 0.70710677, %v12386_v53 }
 0x720   : > { %v5802_v2 = vadd.f32 0.4994258, %v5801_v11  ;;  %v5826_v21 = vmul.f32 %v5825_v20, %v12353_v4  ;;  %v5791_v33 = vadd.f32 0.18741608, %v5790_v55  ;;  %vm5770_vm1 = vweird.f32 %v12360_v19 }
 0x721   : > { %v5837_v16 = vmul.f32 %v5836_v42, %v12353_v4  ;;  %v7531_v59 = vclamps-f32 %v5739_v9, 1.0  ;;  %v5862_v15 = vmul.f32 %v12383_v37, %v12383_v37  ;;  %vm12406_vm2 = vcmp.eq.f32.partialorder %v5774_v12, 8.507059e+37 }
 0x722   : > { %v5803_v23 = vmul.f32 %v5802_v2, %v12316_v8  ;;  %v5827_v14 = vadd.f32 0.0036580483, %v5826_v21  ;;  %v8019_v38 = vpop.eup %8018  ;;  %v5792_v1 = vmul.f32 %v5791_v33, %v12316_v8  ;;  %v5776_v40 = vand.u32 2147483648, %v12360_v19 }
 0x723   : > { %v5838_v52 = vadd.f32 0.014752088, %v5837_v16  ;;  %v5991_v50 = vadd.f32 1.0, %v7531_v59  ;;  %v5766_v56 = vmul.f32 %v8019_v38, %v12360_v19  ;;  %v12412_v58 = vmin.f32 %v5862_v15, 16.0 }
 0x724   : > { %v12391_v27 = vadd.f32 1.0, %v5803_v23  ;;  %v5828_v51 = vmul.f32 %v5827_v14, %v12353_v4  ;;  %v5793_v28 = vadd.f32 1.1283791, %v5792_v1  ;;  %v6171_v18 = vmul.f32 %v12399_v48, %v12399_v48 }
 0x725   : > { %v5839_v43 = vmul.f32 %v5838_v52, %v12353_v4  ;;  %v6007_v39 = vmul.f32 %v5991_v50, %v5319_v24  ;;  %v5767_v10 = vsub.f32 1.0, %v5766_v56  ;;  %v12417_v22 = vadd.f32 %v12373_v3, %v6094_v60 }
 0x726   : > { %8020 = vrcp.f32 %v12391_v27  ;;  %v5829_v49 = vadd.f32 0.05243302, %v5828_v51  ;;  %vm5771_vm3 = vweird.f32 %v8019_v38  ;;  %v5777_v46 = vor.u32 1.1754944e-38, %v5776_v40 }
 0x727   : > { %v5840_v45 = vadd.f32 0.112945676, %v5839_v43  ;;  %v5768_v29 = vmul.f32 %v8019_v38, %v5767_v10  ;;  %7547 = vmatmul.msk.f32.gmra.mxu2 %vm2277_vm0, %v6007_v39  ;;  %v5864_v25 = vmul.f32 2.1237322e-06, %v12412_v58  ;;  %v5875_v5 = vmul.f32 3.8918573e-05, %v12412_v58  ;;  %vm5772_vm4 = vmor %vm5770_vm1, %vm5771_vm3 }
 0x728   : > { %v5830_v36 = vmul.f32 %v5829_v49, %v12353_v4  ;;  %v12424_v57 = vmin.f32 %v6171_v18, 16.0  ;;  %v5814_v11 = vand.u32 2147483647, %v12391_v27  ;;  %v5754_v47 = vmul.f32 %v5753_v6, %v12281_v34 }
 0x729   : > { %v5841_v31 = vmul.f32 %v5840_v45, %v12353_v4  ;;  %v5769_v55 = vadd.f32 %v8019_v38, %v5768_v29  ;;  %v5865_v42 = vadd.f32 0.00028619796, %v5864_v25  ;;  %v5876_v41 = vadd.f32 0.001143296, %v5875_v5 }
 0x72a   : > { %v5831_v20 = vadd.f32 0.18741608, %v5830_v36  ;;  %v6173_v17 = vmul.f32 2.1237322e-06, %v12424_v57  ;;  %v5816_v21 = vand.u32 2147483648, %v12391_v27  ;;  %vm5810_vm5 = vweird.f32 %v12391_v27  ;;  %v6097_v5 = vpop.f32.mrf.mxu2 }
 0x72b   : > { %v5842_v26 = vadd.f32 0.4994258, %v5841_v31  ;;  %v5773_v61 = vsel %vm5772_vm4, %v8019_v38, %v5769_v55  ;;  %v12434_v24 = vmul.f32 0.70710677, %v12417_v22  ;;  %v5866_v19 = vmul.f32 %v5865_v42, %v12412_v58 }
 0x72c   : > { %v8021_v30 = vpop.eup %8020  ;;  %v5778_v54 = vsel %vm12406_vm2, %v5777_v46, %v5773_v61  ;;  %v5877_v33 = vmul.f32 %v5876_v41, %v12412_v58  ;;  %v6174_v44 = vadd.f32 0.00028619796, %v6173_v17  ;;  %v5832_v23 = vmul.f32 %v5831_v20, %v12353_v4 }
 0x72d   : > { %v5806_v2 = vmul.f32 %v8021_v30, %v12391_v27  ;;  %v5843_v34 = vmul.f32 %v5842_v26, %v12353_v4  ;;  %v5779_v16 = vmul.f32 %v5778_v54, %v5754_v47  ;;  %v5867_v12 = vadd.f32 0.0036580483, %v5866_v19 }
 0x72e   : > { %v5878_v52 = vadd.f32 0.014752088, %v5877_v33  ;;  %vm5811_vm6 = vweird.f32 %v8021_v30  ;;  %v6175_v38 = vmul.f32 %v6174_v44, %v12424_v57  ;;  %vm12446_vm7 = vcmp.eq.f32.partialorder %v5814_v11, 8.507059e+37 }
 0x72f   : > { %v5807_v9 = vsub.f32 1.0, %v5806_v2  ;;  %v12443_v14 = vadd.f32 1.0, %v5843_v34  ;;  %v7532_v59 = vclamps-f32 %v5779_v16, 1.0  ;;  %v5817_v43 = vor.u32 1.1754944e-38, %v5816_v21  ;;  %vm5812_vm8 = vmor %vm5810_vm5, %vm5811_vm6 }
 0x730   : > { %v6211_v15 = vmul.f32 %v12434_v24, %v12434_v24  ;;  %v5868_v6 = vmul.f32 %v5867_v12, %v12412_v58  ;;  %v5879_v56 = vmul.f32 %v5878_v52, %v12412_v58  ;;  %v5794_v60 = vmul.f32 %v5793_v28, %v12306_v32 }
 0x731   : > { %v5808_v51 = vmul.f32 %v8021_v30, %v5807_v9  ;;  %8022 = vrcp.f32 %v12443_v14  ;;  %v5992_v4 = vadd.f32 1.0, %v7532_v59  ;;  %v5833_v8 = vadd.f32 1.1283791, %v5832_v23  ;;  %v6850_v23 = vld [vmem:[%s13375_s1 + $0x38] sm:$0xff]  ;;  %s7321_s1 = sshll.u32 %s13401_s23, 3 }
 0x732   : > { %v6176_v40 = vadd.f32 0.0036580483, %v6175_v38  ;;  %v6184_v39 = vmul.f32 3.8918573e-05, %v12424_v57  ;;  %v5869_v45 = vadd.f32 0.05243302, %v5868_v6  ;;  %v12475_v21 = vadd.f32 %v12373_v3, %v6097_v5  ;;  %6911 = vmatpush.msrb.mxu3 %v6850_v23  ;;  %s12921_s23 = scalar_lea.vmem %s13387_s12, %s7321_s1 }
 0x733   : > { %v5809_v50 = vadd.f32 %v8021_v30, %v5808_v51  ;;  %v6008_v10 = vmul.f32 %v5992_v4, %v12389_v7  ;;  %v5880_v18 = vadd.f32 0.112945676, %v5879_v56  ;;  %v12463_v46 = vmin.f32 %v6211_v15, 16.0  ;;  %s6995_s1 = sand.u32 1, %s8588_s0   ;;  %s8245_s0 = scalar_lea.hbm %s13171_s6, 256 }
 0x734   : > { %v6177_v36 = vmul.f32 %v6176_v40, %v12424_v57  ;;  %v6185_v31 = vadd.f32 0.001143296, %v6184_v39  ;;  %v5854_v27 = vand.u32 2147483647, %v12443_v14  ;;  %v5870_v28 = vmul.f32 %v5869_v45, %v12412_v58  ;;  %p8247_p4 = scmp.lt.s32.totalorder %s8245_s0, %s8241_s9 }
 0x735   : > { %v5813_v49 = vsel %vm5812_vm8, %v8021_v30, %v5809_v50  ;;  %v5881_v25 = vmul.f32 %v5880_v18, %v12412_v58  ;;  %7548 = vmatmul.msk.f32.gmra.mxu2 %vm2277_vm0, %v6008_v10  ;;  %v6213_v20 = vmul.f32 2.1237322e-06, %v12463_v46  ;;  %v6224_v26 = vmul.f32 3.8918573e-05, %v12463_v46 }
 0x736   : > { %v5818_v29 = vsel %vm12446_vm7, %v5817_v43, %v5813_v49  ;;  %v6178_v55 = vadd.f32 0.05243302, %v6177_v36  ;;  %v6186_v11 = vmul.f32 %v6185_v31, %v12424_v57  ;;  %v5856_v42 = vand.u32 2147483648, %v12443_v14  ;;  %p8248_p7 = por %p8247_p4, %p8246_p3 }
 0x737   : > { %v5819_v32 = vmul.f32 %v5818_v29, %v5794_v60  ;;  %v8023_v7 = vpop.eup %8022  ;;  %v5871_v41 = vadd.f32 0.18741608, %v5870_v28  ;;  %v5882_v17 = vadd.f32 0.4994258, %v5881_v25  ;;  %v6214_v2 = vadd.f32 0.00028619796, %v6213_v20 }
 0x738   : > { %v5846_v47 = vmul.f32 %v8023_v7, %v12443_v14  ;;  %v6187_v61 = vadd.f32 0.014752088, %v6186_v11  ;;  %vm5851_vm9 = vweird.f32 %v8023_v7  ;;  %v6225_v19 = vadd.f32 0.001143296, %v6224_v26  ;;  %p8249_p8 = pnand %p8248_p7, %p8244_p0 }
 0x739   : > { %v7533_v30 = vclamps-f32 %v5819_v32, 1.0  ;;  %v5883_v33 = vmul.f32 %v5882_v17, %v12412_v58  ;;  %v6179_v16 = vmul.f32 %v6178_v55, %v12424_v57  ;;  %v6215_v44 = vmul.f32 %v6214_v2, %v12463_v46 }
 0x73a   : > { %v5847_v34 = vsub.f32 1.0, %v5846_v47  ;;  %v6188_v9 = vmul.f32 %v6187_v61, %v12424_v57  ;;  %v5872_v59 = vmul.f32 %v5871_v41, %v12412_v58  ;;  %v6226_v51 = vmul.f32 %v6225_v19, %v12463_v46  ;;  %v6847_v19 = vld [vmem:[%s13376_s20 + $0x20] sm:$0xff] }
 0x73b   : > { %v5993_v54 = vadd.f32 1.0, %v7533_v30  ;;  %v5834_v38 = vmul.f32 %v5833_v8, %v12343_v0  ;;  %v12486_v1 = vadd.f32 1.0, %v5883_v33  ;;  %v6216_v15 = vadd.f32 0.0036580483, %v6215_v44  ;;  %v6100_v8 = vpop.f32.mrf.mxu2  ;;  %v6848_v30 = vld [vmem:[%s13376_s20 + $0x28] sm:$0xff]  ;;  %v6846_v44 = vld [vmem:[%s13376_s20 + $0x18] sm:$0xff] }
 0x73c   : > { %v5848_v52 = vmul.f32 %v8023_v7, %v5847_v34  ;;  %v6189_v43 = vadd.f32 0.112945676, %v6188_v9  ;;  %vm5850_vm10 = vweird.f32 %v12443_v14  ;;  %vm5855_vm11 = vcmp.eq.f32.partialorder %v5854_v27, 8.507059e+37 }
 0x73d   : > { %v6009_v12 = vmul.f32 %v5993_v54, %v12403_v13  ;;  %v6227_v50 = vadd.f32 0.014752088, %v6226_v51  ;;  %vm5852_vm12 = vmor %vm5850_vm10, %vm5851_vm9  ;;  %v5857_v13 = vor.u32 1.1754944e-38, %v5856_v42  ;;  %8024 = vrcp.f32 %v12486_v1 }
 0x73e   : > { %v5849_v4 = vadd.f32 %v8023_v7, %v5848_v52  ;;  %v6180_v58 = vadd.f32 0.18741608, %v6179_v16  ;;  %v12493_v6 = vmul.f32 0.70710677, %v12475_v21  ;;  %v5873_v56 = vadd.f32 1.1283791, %v5872_v59 }
 0x73f   : > { %7549 = vmatmul.msk.f32.gmra.mxu2 %vm2277_vm0, %v6009_v12  ;;  %v6190_v60 = vmul.f32 %v6189_v43, %v12424_v57  ;;  %v6217_v14 = vmul.f32 %v6216_v15, %v12463_v46  ;;  %v5322_v40 = vmul.f32 0.5, %v12336_v35  ;;  %v6228_v10 = vmul.f32 %v6227_v50, %v12463_v46  ;;  %v6849_v35 = vld [vmem:[%s13376_s20 + $0x30] sm:$0xff] }
 0x740   : > { %v5853_v0 = vsel %vm5852_vm12, %v8023_v7, %v5849_v4  ;;  %v12500_v45 = vmul.f32 0.5, %v12370_v62  ;;  %v6181_v36 = vmul.f32 %v6180_v58, %v12424_v57  ;;  %v6251_v32 = vmul.f32 %v12493_v6, %v12493_v6  ;;  %6912 = vmatpush.msrb.mxu3 %v6849_v35 }
 0x741   : > { %v5858_v39 = vsel %vm5855_vm11, %v5857_v13, %v5853_v0  ;;  %v6191_v18 = vadd.f32 0.4994258, %v6190_v60  ;;  %v6218_v29 = vadd.f32 0.05243302, %v6217_v14  ;;  %v6229_v31 = vadd.f32 0.112945676, %v6228_v10 }
 0x742   : > { %v5859_v49 = vmul.f32 %v5858_v39, %v5834_v38  ;;  %v12506_v27 = vadd.f32 %v12373_v3, %v6100_v8  ;;  %v12510_v25 = vmul.f32 %v5873_v56, %v12383_v37  ;;  %v5894_v55 = vand.u32 2147483647, %v12486_v1  ;;  %6913 = vmatpush.msrb.mxu3 %v6848_v30  ;;  %v6845_v0 = vld [vmem:[%s13376_s20 + $0x10] sm:$0xff] }
 0x743   : > { %v6192_v62 = vmul.f32 %v6191_v18, %v12424_v57  ;;  %v6219_v5 = vmul.f32 %v6218_v29, %v12463_v46  ;;  %v8025_v7 = vpop.eup %8024  ;;  %v6230_v11 = vmul.f32 %v6229_v31, %v12463_v46  ;;  %v12516_v20 = vmin.f32 %v6251_v32, 16.0  ;;  %v6844_v18 = vld [vmem:[%s13376_s20 + $0x8] sm:$0xff] }
 0x744   : > { %v7534_v28 = vclamps-f32 %v5859_v49, 1.0  ;;  %v12519_v26 = vmul.f32 0.70710677, %v12506_v27  ;;  %v5886_v37 = vmul.f32 %v8025_v7, %v12486_v1  ;;  %v5896_v57 = vand.u32 2147483648, %v12486_v1  ;;  %6914 = vmatpush.msrb.mxu3 %v6847_v19 }
 0x745   : > { %v12524_v42 = vadd.f32 1.0, %v6192_v62  ;;  %v6220_v41 = vadd.f32 0.18741608, %v6219_v5  ;;  %v6231_v17 = vadd.f32 0.4994258, %v6230_v11  ;;  %vm5890_vm13 = vweird.f32 %v12486_v1 }
 0x746   : > { %v5994_v47 = vadd.f32 1.0, %v7534_v28  ;;  %v6253_v61 = vmul.f32 2.1237322e-06, %v12516_v20  ;;  %v6291_v2 = vmul.f32 %v12519_v26, %v12519_v26  ;;  %v5887_v34 = vsub.f32 1.0, %v5886_v37  ;;  %6915 = vmatpush.msrb.mxu3 %v6846_v44  ;;  %v6843_v28 = vld [vmem:[%s13376_s20] sm:$0xff] }
 0x747   : > { %8026 = vrcp.f32 %v12524_v42  ;;  %vm5891_vm14 = vweird.f32 %v8025_v7  ;;  %v6182_v33 = vadd.f32 1.1283791, %v6181_v36  ;;  %v6221_v16 = vmul.f32 %v6220_v41, %v12463_v46 }
 0x748   : > { %v6010_v54 = vmul.f32 %v5994_v47, %v5322_v40  ;;  %v6232_v9 = vmul.f32 %v6231_v17, %v12463_v46  ;;  %v5888_v23 = vmul.f32 %v8025_v7, %v5887_v34  ;;  %v6254_v12 = vadd.f32 0.00028619796, %v6253_v61  ;;  %v6103_v46 = vpop.f32.mrf.mxu2  ;;  %vm5892_vm1 = vmor %vm5890_vm13, %vm5891_vm14  ;;  %6916 = vmatpush.msrb.mxu3 %v6845_v0 }
 0x749   : > { %v6264_v52 = vmul.f32 3.8918573e-05, %v12516_v20  ;;  %v12536_v59 = vmin.f32 %v6291_v2, 16.0  ;;  %vm12539_vm15 = vcmp.eq.f32.partialorder %v5894_v55, 8.507059e+37  ;;  %v5897_v38 = vor.u32 1.1754944e-38, %v5896_v57 }
 0x74a   : > { %7550 = vmatmul.msk.f32.gmra.mxu2 %vm2277_vm0, %v6010_v54  ;;  %v6203_v43 = vand.u32 2147483647, %v12524_v42  ;;  %v12544_v15 = vadd.f32 1.0, %v6232_v9  ;;  %v5889_v4 = vadd.f32 %v8025_v7, %v5888_v23  ;;  %v6205_v50 = vand.u32 2147483648, %v12524_v42  ;;  %6917 = vmatpush.msrb.mxu3 %v6844_v18 }
 0x74b   : > { %v6255_v13 = vmul.f32 %v6254_v12, %v12516_v20  ;;  %v6265_v58 = vadd.f32 0.001143296, %v6264_v52  ;;  %v6183_v56 = vmul.f32 %v6182_v33, %v12399_v48  ;;  %v6222_v60 = vadd.f32 1.1283791, %v6221_v16 }
 0x74c   : > { %8028 = vrcp.f32 %v12544_v15  ;;  %v6293_v14 = vmul.f32 2.1237322e-06, %v12536_v59  ;;  %v5893_v40 = vsel %vm5892_vm1, %v8025_v7, %v5889_v4  ;;  %v12557_v49 = vadd.f32 %v12373_v3, %v6103_v46  ;;  %6918 = vmatpush.msrb.mxu3 %v6843_v28 }
 0x74d   : > { %v8027_v8 = vpop.eup %8026  ;;  %v6256_v39 = vadd.f32 0.0036580483, %v6255_v13  ;;  %v6266_v10 = vmul.f32 %v6265_v58, %v12516_v20  ;;  %v5898_v1 = vsel %vm12539_vm15, %v5897_v38, %v5893_v40  ;;  %vm6199_vm2 = vweird.f32 %v12524_v42 }
 0x74e   : > { %v6195_v48 = vmul.f32 %v8027_v8, %v12524_v42  ;;  %vm12564_vm3 = vcmp.eq.f32.partialorder %v6203_v43, 8.507059e+37  ;;  %v5899_v36 = vmul.f32 %v5898_v1, %v12510_v25  ;;  %v6206_v31 = vor.u32 1.1754944e-38, %v6205_v50 }
 0x74f   : > { %v6257_v32 = vmul.f32 %v6256_v39, %v12516_v20  ;;  %v6267_v35 = vadd.f32 0.014752088, %v6266_v10  ;;  %v6223_v5 = vmul.f32 %v6222_v60, %v12434_v24  ;;  %v6294_v7 = vadd.f32 0.00028619796, %v6293_v14 }
 0x750   : > { %v6196_v62 = vsub.f32 1.0, %v6195_v48  ;;  %v6304_v55 = vmul.f32 3.8918573e-05, %v12536_v59  ;;  %v7535_v11 = vclamps-f32 %v5899_v36, 1.0  ;;  %vm6239_vm4 = vweird.f32 %v12544_v15  ;;  %v6106_v38 = vpop.f32.mrf.mxu2 }
 0x751   : > { %v6268_v30 = vmul.f32 %v6267_v35, %v12516_v20  ;;  %v12576_v47 = vmul.f32 0.70710677, %v12557_v49  ;;  %vm6200_vm5 = vweird.f32 %v8027_v8  ;;  %v6295_v57 = vmul.f32 %v6294_v7, %v12536_v59 }
 0x752   : > { %v8029_v25 = vpop.eup %8028  ;;  %v6197_v37 = vmul.f32 %v8027_v8, %v6196_v62  ;;  %v6305_v41 = vadd.f32 0.001143296, %v6304_v55  ;;  %v5995_v17 = vadd.f32 1.0, %v7535_v11  ;;  %v6243_v61 = vand.u32 2147483647, %v12544_v15  ;;  %vm6201_vm6 = vmor %vm6199_vm2, %vm6200_vm5 }
 0x753   : > { %v6235_v24 = vmul.f32 %v8029_v25, %v12544_v15  ;;  %v6258_v2 = vadd.f32 0.05243302, %v6257_v32  ;;  %v6245_v34 = vand.u32 2147483648, %v12544_v15  ;;  %v6269_v19 = vadd.f32 0.112945676, %v6268_v30 }
 0x754   : > { %v6198_v54 = vadd.f32 %v8027_v8, %v6197_v37  ;;  %v6306_v33 = vmul.f32 %v6305_v41, %v12536_v59  ;;  %v6011_v16 = vmul.f32 %v5995_v17, %v12500_v45  ;;  %vm6240_vm7 = vweird.f32 %v8029_v25 }
 0x755   : > { %v6236_v9 = vsub.f32 1.0, %v6235_v24  ;;  %v6331_v44 = vmul.f32 %v12576_v47, %v12576_v47  ;;  %v6270_v12 = vmul.f32 %v6269_v19, %v12516_v20  ;;  %v6296_v52 = vadd.f32 0.0036580483, %v6295_v57  ;;  %vm6241_vm9 = vmor %vm6239_vm4, %vm6240_vm7 }
 0x756   : > { %v6202_v23 = vsel %vm6201_vm6, %v8027_v8, %v6198_v54  ;;  %v6307_v51 = vadd.f32 0.014752088, %v6306_v33  ;;  %v6259_v45 = vmul.f32 %v6258_v2, %v12516_v20  ;;  %7551 = vmatmul.msk.f32.gmra.mxu2 %vm2277_vm0, %v6011_v16  ;;  %vm12595_vm8 = vcmp.eq.f32.partialorder %v6243_v61, 8.507059e+37 }
 0x757   : > { %v6207_v43 = vsel %vm12564_vm3, %v6206_v31, %v6202_v23  ;;  %v6237_v46 = vmul.f32 %v8029_v25, %v6236_v9  ;;  %v12592_v4 = vmin.f32 %v6331_v44, 16.0  ;;  %v6271_v13 = vadd.f32 0.4994258, %v6270_v12 }
 0x758   : > { %v6208_v42 = vmul.f32 %v6207_v43, %v6183_v56  ;;  %v6308_v58 = vmul.f32 %v6307_v51, %v12536_v59  ;;  %v6246_v60 = vor.u32 1.1754944e-38, %v6245_v34  ;;  %v6297_v39 = vmul.f32 %v6296_v52, %v12536_v59  ;;  %v6109_v17 = vpop.f32.mrf.mxu2 }
 0x759   : > { %v6238_v0 = vadd.f32 %v8029_v25, %v6237_v46  ;;  %v6333_v14 = vmul.f32 2.1237322e-06, %v12592_v4  ;;  %v6344_v8 = vmul.f32 3.8918573e-05, %v12592_v4  ;;  %v6272_v56 = vmul.f32 %v6271_v13, %v12516_v20 }
 0x75a   : > { %v7554_v40 = vclamps-f32 %v6208_v42, 1.0  ;;  %v6309_v10 = vadd.f32 0.112945676, %v6308_v58  ;;  %v6260_v1 = vadd.f32 0.18741608, %v6259_v45  ;;  %v6139_v36 = vmul.f32 0.5, %v12386_v53 }
 0x75b   : > { %v6242_v18 = vsel %vm6241_vm9, %v8029_v25, %v6238_v0  ;;  %v6334_v48 = vadd.f32 0.00028619796, %v6333_v14  ;;  %v6345_v29 = vadd.f32 0.001143296, %v6344_v8  ;;  %v6273_v35 = vadd.f32 1.0, %v6272_v56 }
 0x75c   : > { %v6811_v31 = vadd.f32 1.0, %v7554_v40  ;;  %v6247_v32 = vsel %vm12595_vm8, %v6246_v60, %v6242_v18  ;;  %v6310_v15 = vmul.f32 %v6309_v10, %v12536_v59  ;;  %v6298_v11 = vadd.f32 0.05243302, %v6297_v39 }
 0x75d   : > { %v6248_v28 = vmul.f32 %v6247_v32, %v6223_v5  ;;  %v6335_v62 = vmul.f32 %v6334_v48, %v12592_v4  ;;  %v6346_v7 = vmul.f32 %v6345_v29, %v12592_v4  ;;  %8030 = vrcp.f32 %v6273_v35 }
 0x75e   : > { %v6827_v55 = vmul.f32 %v6811_v31, %v6139_v36  ;;  %v12614_v30 = vadd.f32 %v12373_v3, %v6106_v38  ;;  %v6261_v53 = vmul.f32 %v6260_v1, %v12516_v20  ;;  %v6311_v37 = vadd.f32 0.4994258, %v6310_v15 }
 0x75f   : > { %v7555_v25 = vclamps-f32 %v6248_v28, 1.0  ;;  %v6336_v57 = vadd.f32 0.0036580483, %v6335_v62  ;;  %v6347_v41 = vadd.f32 0.014752088, %v6346_v7  ;;  %v6140_v5 = vmul.f32 0.5, %v12417_v22  ;;  %v5304_v28 = vpop.f32.mrf.mxu1 }
 0x760   : > { %7570 = vmatmul.msk.f32.vlgmr.msrb.gmra.mxu3 %vm2277_vm0, %v6827_v55  ;;  %v6312_v61 = vmul.f32 %v6311_v37, %v12536_v59  ;;  %v6299_v2 = vmul.f32 %v6298_v11, %v12536_v59  ;;  %v12624_v19 = vmul.f32 0.70710677, %v12614_v30  ;;  %v6262_v20 = vadd.f32 1.1283791, %v6261_v53 }
 0x761   : > { %v6812_v24 = vadd.f32 1.0, %v7555_v25  ;;  %v6337_v54 = vmul.f32 %v6336_v57, %v12592_v4  ;;  %v6348_v34 = vmul.f32 %v6347_v41, %v12592_v4  ;;  %v12629_v16 = vadd.f32 %v12373_v3, %v6109_v17 }
 0x762   : > { %v12626_v33 = vadd.f32 1.0, %v6312_v61  ;;  %v6371_v12 = vmul.f32 %v12624_v19, %v12624_v19  ;;  %v12634_v52 = vmul.f32 0.5, %v12475_v21  ;;  %v12637_v38 = vmul.f32 0.5, %v12506_v27 }
 0x763   : > { %v8031_v9 = vpop.eup %8030  ;;  %v6828_v22 = vmul.f32 %v6812_v24, %v6140_v5  ;;  %v6338_v44 = vadd.f32 0.05243302, %v6337_v54  ;;  %v6349_v23 = vadd.f32 0.112945676, %v6348_v34  ;;  %v6283_v43 = vand.u32 2147483647, %v6273_v35 }
 0x764   : > { %v6275_v51 = vmul.f32 %v8031_v9, %v6273_v35  ;;  %8032 = vrcp.f32 %v12626_v33  ;;  %v6300_v46 = vadd.f32 0.18741608, %v6299_v2  ;;  %v6263_v42 = vmul.f32 %v6262_v20, %v12493_v6 }
 0x765   : > { %v6339_v3 = vmul.f32 %v6338_v44, %v12592_v4  ;;  %v6350_v45 = vmul.f32 %v6349_v23, %v12592_v4  ;;  %v12643_v13 = vmin.f32 %v6371_v12, 16.0  ;;  %v12646_v21 = vmul.f32 0.70710677, %v12629_v16 }
 0x766   : > { %v6276_v50 = vsub.f32 1.0, %v6275_v51  ;;  %vm6280_vm10 = vweird.f32 %v8031_v9  ;;  %v6285_v58 = vand.u32 2147483648, %v6273_v35  ;;  %vm6279_vm11 = vweird.f32 %v6273_v35 }
 0x767   : > { %v6340_v27 = vadd.f32 0.18741608, %v6339_v3  ;;  %v6351_v0 = vadd.f32 0.4994258, %v6350_v45  ;;  %v6373_v14 = vmul.f32 2.1237322e-06, %v12643_v13  ;;  %v6411_v6 = vmul.f32 %v12646_v21, %v12646_v21  ;;  %vm6281_vm13 = vmor %vm6279_vm11, %vm6280_vm10 }
 0x768   : > { %7571 = vmatmul.msk.f32.gmra.mxu3 %vm2277_vm0, %v6828_v22  ;;  %v6277_v60 = vmul.f32 %v8031_v9, %v6276_v50  ;;  %v6384_v8 = vmul.f32 3.8918573e-05, %v12643_v13  ;;  %vm12653_vm12 = vcmp.eq.f32.partialorder %v6283_v43, 8.507059e+37  ;;  %v6301_v56 = vmul.f32 %v6300_v46, %v12536_v59 }
 0x769   : > { %v6352_v39 = vmul.f32 %v6351_v0, %v12592_v4  ;;  %v6374_v1 = vadd.f32 0.00028619796, %v6373_v14  ;;  %v12659_v29 = vmin.f32 %v6411_v6, 16.0  ;;  %v6286_v36 = vor.u32 1.1754944e-38, %v6285_v58 }
 0x76a   : > { %v8033_v10 = vpop.eup %8032  ;;  %v6278_v18 = vadd.f32 %v8031_v9, %v6277_v60  ;;  %v6385_v48 = vadd.f32 0.001143296, %v6384_v8  ;;  %v6325_v32 = vand.u32 2147483648, %v12626_v33  ;;  %v6341_v59 = vmul.f32 %v6340_v27, %v12592_v4 }
 0x76b   : > { %v6315_v31 = vmul.f32 %v8033_v10, %v12626_v33  ;;  %v12664_v35 = vadd.f32 1.0, %v6352_v39  ;;  %v6375_v62 = vmul.f32 %v6374_v1, %v12643_v13  ;;  %v6413_v25 = vmul.f32 2.1237322e-06, %v12659_v29 }
 0x76c   : > { %v6282_v15 = vsel %vm6281_vm13, %v8031_v9, %v6278_v18  ;;  %v6386_v7 = vmul.f32 %v6385_v48, %v12643_v13  ;;  %v6302_v37 = vadd.f32 1.1283791, %v6301_v56  ;;  %v6323_v57 = vand.u32 2147483647, %v12626_v33  ;;  %v5307_v18 = vpop.f32.mrf.mxu1 }
 0x76d   : > { %v6287_v55 = vsel %vm12653_vm12, %v6286_v36, %v6282_v15  ;;  %v6316_v11 = vsub.f32 1.0, %v6315_v31  ;;  %8034 = vrcp.f32 %v12664_v35  ;;  %v12675_v41 = vadd.f32 %v12333_v63, %v5304_v28 }
 0x76e   : > { %v6288_v53 = vmul.f32 %v6287_v55, %v6263_v42  ;;  %vm6320_vm14 = vweird.f32 %v8033_v10  ;;  %v6376_v17 = vadd.f32 0.0036580483, %v6375_v62  ;;  %v6387_v5 = vadd.f32 0.014752088, %v6386_v7 }
 0x76f   : > { %v6317_v4 = vmul.f32 %v8033_v10, %v6316_v11  ;;  %vm6319_vm15 = vweird.f32 %v12626_v33  ;;  %v6342_v61 = vadd.f32 1.1283791, %v6341_v59  ;;  %v6424_v2 = vmul.f32 3.8918573e-05, %v12659_v29 }
 0x770   : > { %v7556_v24 = vclamps-f32 %v6288_v53, 1.0  ;;  %v6326_v34 = vor.u32 1.1754944e-38, %v6325_v32  ;;  %v6388_v20 = vmul.f32 %v6387_v5, %v12643_v13  ;;  %v6414_v9 = vadd.f32 0.00028619796, %v6413_v25  ;;  %vm6321_vm1 = vmor %vm6319_vm15, %vm6320_vm14 }
 0x771   : > { %v6318_v54 = vadd.f32 %v8033_v10, %v6317_v4  ;;  %v6377_v44 = vmul.f32 %v6376_v17, %v12643_v13  ;;  %v6425_v23 = vadd.f32 0.001143296, %v6424_v2  ;;  %v12682_v12 = vmul.f32 0.70710677, %v12675_v41 }
 0x772   : > { %v6813_v22 = vadd.f32 1.0, %v7556_v24  ;;  %v6303_v43 = vmul.f32 %v6302_v37, %v12519_v26  ;;  %vm6324_vm2 = vcmp.eq.f32.partialorder %v6323_v57, 8.507059e+37  ;;  %v6389_v46 = vadd.f32 0.112945676, %v6388_v20 }
 0x773   : > { %v8035_v51 = vpop.eup %8034  ;;  %v6322_v33 = vsel %vm6321_vm1, %v8033_v10, %v6318_v54  ;;  %v6343_v42 = vmul.f32 %v6342_v61, %v12576_v47  ;;  %v6365_v27 = vand.u32 2147483648, %v12664_v35  ;;  %v6415_v60 = vmul.f32 %v6414_v9, %v12659_v29 }
 0x774   : > { %v6829_v3 = vmul.f32 %v6813_v22, %v12634_v52  ;;  %v6327_v45 = vsel %vm6324_vm2, %v6326_v34, %v6322_v33  ;;  %v6355_v50 = vmul.f32 %v8035_v51, %v12664_v35  ;;  %v6390_v0 = vmul.f32 %v6389_v46, %v12643_v13 }
 0x775   : > { %v6328_v58 = vmul.f32 %v6327_v45, %v6303_v43  ;;  %v6378_v8 = vadd.f32 0.05243302, %v6377_v44  ;;  %v6426_v26 = vmul.f32 %v6425_v23, %v12659_v29  ;;  %v5902_v52 = vmul.f32 %v12682_v12, %v12682_v12 }
 0x776   : > { %v6356_v14 = vsub.f32 1.0, %v6355_v50  ;;  %7572 = vmatmul.msk.f32.gmra.mxu3 %vm2277_vm0, %v6829_v3  ;;  %vm6359_vm3 = vweird.f32 %v12664_v35  ;;  %v6363_v47 = vand.u32 2147483647, %v12664_v35  ;;  %v6391_v40 = vadd.f32 0.4994258, %v6390_v0 }
 0x777   : > { %v7557_v6 = vclamps-f32 %v6328_v58, 1.0  ;;  %vm6360_vm4 = vweird.f32 %v8035_v51  ;;  %v6427_v39 = vadd.f32 0.014752088, %v6426_v26  ;;  %v12697_v10 = vmin.f32 %v5902_v52, 16.0 }
 0x778   : > { %v6357_v56 = vmul.f32 %v8035_v51, %v6356_v14  ;;  %v6366_v48 = vor.u32 1.1754944e-38, %v6365_v27  ;;  %v6392_v36 = vmul.f32 %v6391_v40, %v12643_v13  ;;  %v6416_v31 = vadd.f32 0.0036580483, %v6415_v60  ;;  %vm6361_vm5 = vmor %vm6359_vm3, %vm6360_vm4 }
 0x779   : > { %v6814_v1 = vadd.f32 1.0, %v7557_v6  ;;  %v6379_v28 = vmul.f32 %v6378_v8, %v12643_v13  ;;  %v6428_v15 = vmul.f32 %v6427_v39, %v12659_v29  ;;  %v5904_v59 = vmul.f32 2.1237322e-06, %v12697_v10 }
 0x77a   : > { %v6358_v32 = vadd.f32 %v8035_v51, %v6357_v56  ;;  %v6393_v7 = vadd.f32 1.0, %v6392_v36  ;;  %v5915_v55 = vmul.f32 3.8918573e-05, %v12697_v10  ;;  %v12708_v11 = vadd.f32 %v12333_v63, %v5307_v18 }
 0x77b   : > { %v6830_v62 = vmul.f32 %v6814_v1, %v12637_v38  ;;  %vm6364_vm6 = vcmp.eq.f32.partialorder %v6363_v47, 8.507059e+37  ;;  %v6429_v53 = vadd.f32 0.112945676, %v6428_v15  ;;  %v5905_v37 = vadd.f32 0.00028619796, %v5904_v59 }
 0x77c   : > { %v6362_v25 = vsel %vm6361_vm5, %v8035_v51, %v6358_v32  ;;  %8036 = vrcp.f32 %v6393_v7  ;;  %v6417_v4 = vmul.f32 %v6416_v31, %v12659_v29  ;;  %v6380_v5 = vadd.f32 0.18741608, %v6379_v28 }
 0x77d   : > { %v6367_v57 = vsel %vm6364_vm6, %v6366_v48, %v6362_v25  ;;  %v6430_v38 = vmul.f32 %v6429_v53, %v12659_v29  ;;  %v5906_v35 = vmul.f32 %v5905_v37, %v12697_v10  ;;  %v5916_v24 = vadd.f32 0.001143296, %v5915_v55 }
 0x77e   : > { %v6368_v17 = vmul.f32 %v6367_v57, %v6343_v42  ;;  %7573 = vmatmul.msk.f32.gmra.mxu3 %vm2277_vm0, %v6830_v62  ;;  %v12715_v63 = vmul.f32 0.70710677, %v12708_v11  ;;  %v6418_v2 = vadd.f32 0.05243302, %v6417_v4  ;;  %v6143_v9 = vmul.f32 0.5, %v12557_v49 }
 0x77f   : > { %v6431_v54 = vadd.f32 0.4994258, %v6430_v38  ;;  %v5917_v34 = vmul.f32 %v5916_v24, %v12697_v10  ;;  %v6381_v44 = vmul.f32 %v6380_v5, %v12643_v13  ;;  %v5907_v43 = vadd.f32 0.0036580483, %v5906_v35 }
 0x780   : > { %v7558_v61 = vclamps-f32 %v6368_v17, 1.0  ;;  %v5942_v20 = vmul.f32 %v12715_v63, %v12715_v63  ;;  %v6419_v42 = vmul.f32 %v6418_v2, %v12659_v29  ;;  %v6403_v60 = vand.u32 2147483647, %v6393_v7 }
 0x781   : > { %v6432_v51 = vmul.f32 %v6431_v54, %v12659_v29  ;;  %v5918_v33 = vadd.f32 0.014752088, %v5917_v34  ;;  %v6382_v27 = vadd.f32 1.1283791, %v6381_v44  ;;  %v6405_v14 = vand.u32 2147483648, %v6393_v7 }
 0x782   : > { %v6815_v22 = vadd.f32 1.0, %v7558_v61  ;;  %v8037_v23 = vpop.eup %8036  ;;  %v12723_v46 = vmin.f32 %v5942_v20, 16.0  ;;  %v5908_v8 = vmul.f32 %v5907_v43, %v12697_v10  ;;  %v6420_v47 = vadd.f32 0.18741608, %v6419_v42 }
 0x783   : > { %v6395_v45 = vmul.f32 %v8037_v23, %v6393_v7  ;;  %v12726_v50 = vadd.f32 1.0, %v6432_v51  ;;  %v5919_v58 = vmul.f32 %v5918_v33, %v12697_v10  ;;  %vm6400_vm7 = vweird.f32 %v8037_v23  ;;  %v12750_v51 = vld [vmem:[%s13370_s7] ss:$0 sm:$0xff]  ;;  %s13015_s7 = scalar_lea.sflag [#allocation14], %s6995_s1 }
 0x784   : > { %v6831_v3 = vmul.f32 %v6815_v22, %v6143_v9  ;;  %v5944_v49 = vmul.f32 2.1237322e-06, %v12723_v46  ;;  %v5955_v13 = vmul.f32 3.8918573e-05, %v12723_v46  ;;  %vm6399_vm8 = vweird.f32 %v6393_v7 }
 0x785   : > { %v6396_v0 = vsub.f32 1.0, %v6395_v45  ;;  %8038 = vrcp.f32 %v12726_v50  ;;  %v5920_v52 = vadd.f32 0.112945676, %v5919_v58  ;;  %v6383_v18 = vmul.f32 %v6382_v27, %v12624_v19  ;;  %vm6401_vm9 = vmor %vm6399_vm8, %vm6400_vm7 }
 0x786   : > { %7574 = vmatmul.msk.f32.gmra.mxu3 %vm2277_vm0, %v6831_v3  ;;  %v5945_v6 = vadd.f32 0.00028619796, %v5944_v49  ;;  %v5956_v40 = vadd.f32 0.001143296, %v5955_v13  ;;  %v6406_v1 = vor.u32 1.1754944e-38, %v6405_v14  ;;  %vm6404_vm10 = vcmp.eq.f32.partialorder %v6403_v60, 8.507059e+37 }
 0x787   : > { %v6397_v26 = vmul.f32 %v8037_v23, %v6396_v0  ;;  %v5921_v39 = vmul.f32 %v5920_v52, %v12697_v10  ;;  %v5909_v32 = vadd.f32 0.05243302, %v5908_v8  ;;  %v6421_v62 = vmul.f32 %v6420_v47, %v12659_v29 }
 0x788   : > { %v5946_v48 = vmul.f32 %v5945_v6, %v12723_v46  ;;  %v5957_v36 = vmul.f32 %v5956_v40, %v12723_v46  ;;  %v6144_v57 = vmul.f32 0.5, %v12614_v30  ;;  %v6445_v35 = vand.u32 2147483648, %v12726_v50 }
 0x789   : > { %v6398_v56 = vadd.f32 %v8037_v23, %v6397_v26  ;;  %v5922_v28 = vadd.f32 0.4994258, %v5921_v39  ;;  %v5910_v5 = vmul.f32 %v5909_v32, %v12697_v10  ;;  %v6422_v38 = vadd.f32 1.1283791, %v6421_v62 }
 0x78a   : > { %v5958_v55 = vadd.f32 0.014752088, %v5957_v36  ;;  %v5947_v53 = vadd.f32 0.0036580483, %v5946_v48  ;;  %v6443_v54 = vand.u32 2147483647, %v12726_v50  ;;  %vm6439_vm12 = vweird.f32 %v12726_v50 }
 0x78b   : > { %v6402_v31 = vsel %vm6401_vm9, %v8037_v23, %v6398_v56  ;;  %v8039_v15 = vpop.eup %8038  ;;  %v5923_v19 = vmul.f32 %v5922_v28, %v12697_v10  ;;  %v5911_v9 = vadd.f32 0.18741608, %v5910_v5  ;;  %v6446_v23 = vor.u32 1.1754944e-38, %v6445_v35 }
 0x78c   : > { %v6407_v59 = vsel %vm6404_vm10, %v6406_v1, %v6402_v31  ;;  %v6435_v25 = vmul.f32 %v8039_v15, %v12726_v50  ;;  %v5959_v37 = vmul.f32 %v5958_v55, %v12723_v46  ;;  %vm6440_vm11 = vweird.f32 %v8039_v15 }
 0x78d   : > { %v6408_v7 = vmul.f32 %v6407_v59, %v6383_v18  ;;  %v5924_v24 = vadd.f32 1.0, %v5923_v19  ;;  %v5948_v30 = vmul.f32 %v5947_v53, %v12723_v46  ;;  %vm6441_vm13 = vmor %vm6439_vm12, %vm6440_vm11  ;;  %v6423_v33 = vmul.f32 %v6422_v38, %v12646_v21 }
 0x78e   : > { %v6436_v17 = vsub.f32 1.0, %v6435_v25  ;;  %v5960_v29 = vadd.f32 0.112945676, %v5959_v37  ;;  %vm6444_vm14 = vcmp.eq.f32.partialorder %v6443_v54, 8.507059e+37  ;;  %v5912_v27 = vmul.f32 %v5911_v9, %v12697_v10 }
 0x78f   : > { %v7559_v4 = vclamps-f32 %v6408_v7, 1.0  ;;  %8040 = vrcp.f32 %v5924_v24  ;;  %v5949_v50 = vadd.f32 0.05243302, %v5948_v30  ;;  %v6145_v6 = vmul.f32 0.5, %v12629_v16 }
 0x790   : > { %v6437_v2 = vmul.f32 %v8039_v15, %v6436_v17  ;;  %v5961_v22 = vmul.f32 %v5960_v29, %v12723_v46  ;;  %v5913_v40 = vadd.f32 1.1283791, %v5912_v27  ;;  %v5934_v10 = vand.u32 2147483647, %v5924_v24 }
 0x791   : > { %v6816_v61 = vadd.f32 1.0, %v7559_v4  ;;  %v5950_v8 = vmul.f32 %v5949_v50, %v12723_v46  ;;  %v5936_v39 = vand.u32 2147483648, %v5924_v24  ;;  %vm5930_vm1 = vweird.f32 %v5924_v24 }
 0x792   : > { %v6438_v20 = vadd.f32 %v8039_v15, %v6437_v2  ;;  %v5962_v45 = vadd.f32 0.4994258, %v5961_v22  ;;  %vm5935_vm3 = vcmp.eq.f32.partialorder %v5934_v10, 8.507059e+37  ;;  %v5325_v10 = vmul.f32 0.5, %v12708_v11 }
 0x793   : > { %v6832_v34 = vmul.f32 %v6816_v61, %v6144_v57  ;;  %v5951_v31 = vadd.f32 0.18741608, %v5950_v8  ;;  %v5937_v59 = vor.u32 1.1754944e-38, %v5936_v39 }
 0x794   : > { %v6442_v3 = vsel %vm6441_vm13, %v8039_v15, %v6438_v20  ;;  %v5963_v0 = vmul.f32 %v5962_v45, %v12723_v46  ;;  %v5914_v15 = vmul.f32 %v5913_v40, %v12682_v12 }
 0x795   : > { %7575 = vmatmul.msk.f32.gmra.mxu3 %vm2277_vm0, %v6832_v34  ;;  %v6447_v42 = vsel %vm6444_vm14, %v6446_v23, %v6442_v3  ;;  %v8041_v13 = vpop.eup %8040  ;;  %v5952_v53 = vmul.f32 %v5951_v31, %v12723_v46 }
 0x796   : > { %v6448_v49 = vmul.f32 %v6447_v42, %v6423_v33  ;;  %v5926_v14 = vmul.f32 %v8041_v13, %v5924_v24  ;;  %v5964_v26 = vadd.f32 1.0, %v5963_v0  ;;  %vm5931_vm15 = vweird.f32 %v8041_v13 }
 0x797   : > { %v6112_v44 = vpop.f32.mrf.mxu2  ;;  %vm5932_vm2 = vmor %vm5930_vm1, %vm5931_vm15  ;;  %v5324_v24 = vmul.f32 0.5, %v12675_v41  ;;  %v5953_v29 = vadd.f32 1.1283791, %v5952_v53 }
 0x798   : > { %v12753_v43 = vadd.f32 %v12750_v51, %v6112_v44  ;;  %v7560_v21 = vclamps-f32 %v6448_v49, 1.0  ;;  %v5927_v56 = vsub.f32 1.0, %v5926_v14  ;;  %8042 = vrcp.f32 %v5964_v26 }
 0x799   : > { %v5976_v61 = vand.u32 2147483648, %v5964_v26  ;;  %v5974_v46 = vand.u32 2147483647, %v5964_v26  ;;  %vm5970_vm5 = vweird.f32 %v5964_v26  ;;  %v5954_v3 = vmul.f32 %v5953_v29, %v12715_v63 }
 0x79a   : > { %v12758_v58 = vmul.f32 0.70710677, %v12753_v43  ;;  %v6817_v47 = vadd.f32 1.0, %v7560_v21  ;;  %v5928_v1 = vmul.f32 %v8041_v13, %v5927_v56 }
 0x79b   : > { %v5977_v23 = vor.u32 1.1754944e-38, %v5976_v61  ;;  %vm5975_vm7 = vcmp.eq.f32.partialorder %v5974_v46, 8.507059e+37 }
 0x79c   : > { %v6451_v60 = vmul.f32 %v12758_v58, %v12758_v58  ;;  %v6833_v18 = vmul.f32 %v6817_v47, %v6145_v6  ;;  %v5929_v32 = vadd.f32 %v8041_v13, %v5928_v1 }
 0x79e   : > { %v12765_v52 = vmin.f32 %v6451_v60, 16.0  ;;  %7576 = vmatmul.msk.f32.gmra.mxu3 %vm2277_vm0, %v6833_v18  ;;  %v5933_v62 = vsel %vm5932_vm2, %v8041_v13, %v5929_v32  ;;  %v8043_v25 = vpop.eup %8042 }
 0x79f   : > { %v5938_v19 = vsel %vm5935_vm3, %v5937_v59, %v5933_v62  ;;  %v5966_v57 = vmul.f32 %v8043_v25, %v5964_v26  ;;  %v6115_v5 = vpop.f32.mrf.mxu2  ;;  %vm5971_vm4 = vweird.f32 %v8043_v25 }
 0x7a0   : > { %v6453_v48 = vmul.f32 2.1237322e-06, %v12765_v52  ;;  %v6464_v36 = vmul.f32 3.8918573e-05, %v12765_v52  ;;  %v5939_v37 = vmul.f32 %v5938_v19, %v5914_v15  ;;  %v12777_v35 = vadd.f32 %v12750_v51, %v6115_v5  ;;  %vm5972_vm6 = vmor %vm5970_vm5, %vm5971_vm4 }
 0x7a1   : > { %v5967_v12 = vsub.f32 1.0, %v5966_v57  ;;  %vm6968_vm5 = vcmask 7168  }
 0x7a2   : > { %v6454_v28 = vadd.f32 0.00028619796, %v6453_v48  ;;  %v6465_v16 = vadd.f32 0.001143296, %v6464_v36  ;;  %v7536_v38 = vclamps-f32 %v5939_v37, 1.0 }
 0x7a3   : > { %v5968_v30 = vmul.f32 %v8043_v25, %v5967_v12  ;;  %v12783_v9 = vmul.f32 0.70710677, %v12777_v35 }
 0x7a4   : > { %v6455_v55 = vmul.f32 %v6454_v28, %v12765_v52  ;;  %v6466_v7 = vmul.f32 %v6465_v16, %v12765_v52  ;;  %v5996_v54 = vadd.f32 1.0, %v7536_v38 }
 0x7a5   : > { %v5969_v44 = vadd.f32 %v8043_v25, %v5968_v30  ;;  %v6491_v33 = vmul.f32 %v12783_v9, %v12783_v9 }
 0x7a6   : > { %v6456_v4 = vadd.f32 0.0036580483, %v6455_v55  ;;  %v6467_v17 = vadd.f32 0.014752088, %v6466_v7  ;;  %v6012_v22 = vmul.f32 %v5996_v54, %v5324_v24 }
 0x7a7   : > { %v5973_v45 = vsel %vm5972_vm6, %v8043_v25, %v5969_v44  ;;  %v12790_v27 = vmin.f32 %v6491_v33, 16.0 }
 0x7a8   : > { %v6468_v2 = vmul.f32 %v6467_v17, %v12765_v52  ;;  %v6457_v34 = vmul.f32 %v6456_v4, %v12765_v52  ;;  %7552 = vmatmul.msk.f32.gmra.mxu2 %vm2277_vm0, %v6012_v22  ;;  %v5978_v42 = vsel %vm5975_vm7, %v5977_v23, %v5973_v45 }
 0x7a9   : > { %v5979_v13 = vmul.f32 %v5978_v42, %v5954_v3  ;;  %v6493_v14 = vmul.f32 2.1237322e-06, %v12790_v27  ;;  %v6504_v63 = vmul.f32 3.8918573e-05, %v12790_v27 }
 0x7aa   : > { %v6469_v20 = vadd.f32 0.112945676, %v6468_v2  ;;  %v6458_v50 = vadd.f32 0.05243302, %v6457_v34  ;;  %v6118_v0 = vpop.f32.mrf.mxu2 }
 0x7ab   : > { %v12793_v60 = vadd.f32 %v12750_v51, %v6118_v0  ;;  %v7537_v8 = vclamps-f32 %v5979_v13, 1.0  ;;  %v6494_v40 = vadd.f32 0.00028619796, %v6493_v14  ;;  %v6505_v56 = vadd.f32 0.001143296, %v6504_v63 }
 0x7ac   : > { %v6470_v41 = vmul.f32 %v6469_v20, %v12765_v52  ;;  %v6459_v6 = vmul.f32 %v6458_v50, %v12765_v52 }
 0x7ad   : > { %v12799_v26 = vmul.f32 0.70710677, %v12793_v60  ;;  %v5997_v39 = vadd.f32 1.0, %v7537_v8  ;;  %v6495_v48 = vmul.f32 %v6494_v40, %v12790_v27  ;;  %v6506_v36 = vmul.f32 %v6505_v56, %v12790_v27 }
 0x7ae   : > { %v6471_v49 = vadd.f32 0.4994258, %v6470_v41  ;;  %v6460_v32 = vadd.f32 0.18741608, %v6459_v6 }
 0x7af   : > { %v6531_v18 = vmul.f32 %v12799_v26, %v12799_v26  ;;  %v6013_v1 = vmul.f32 %v5997_v39, %v5325_v10  ;;  %v6496_v28 = vadd.f32 0.0036580483, %v6495_v48  ;;  %v6507_v16 = vadd.f32 0.014752088, %v6506_v36 }
 0x7b0   : > { %v6472_v21 = vmul.f32 %v6471_v49, %v12765_v52  ;;  %v6461_v53 = vmul.f32 %v6460_v32, %v12765_v52  ;;  %v6146_v32 = vmul.f32 0.5, %v12753_v43 }
 0x7b1   : > { %v12807_v31 = vmin.f32 %v6531_v18, 16.0  ;;  %7553 = vmatmul.msk.f32.gmra.mxu2 %vm2277_vm0, %v6013_v1  ;;  %v6497_v62 = vmul.f32 %v6496_v28, %v12790_v27  ;;  %v6508_v55 = vmul.f32 %v6507_v16, %v12790_v27 }
 0x7b2   : > { %v6473_v47 = vadd.f32 1.0, %v6472_v21  ;;  %v6462_v54 = vadd.f32 1.1283791, %v6461_v53 }
 0x7b3   : > { %v6533_v15 = vmul.f32 2.1237322e-06, %v12807_v31  ;;  %v6544_v11 = vmul.f32 3.8918573e-05, %v12807_v31  ;;  %v6498_v4 = vadd.f32 0.05243302, %v6497_v62 }
 0x7b4   : > { %8044 = vrcp.f32 %v6473_v47  ;;  %v6509_v17 = vadd.f32 0.112945676, %v6508_v55  ;;  %v6485_v29 = vand.u32 2147483648, %v6473_v47  ;;  %v6483_v20 = vand.u32 2147483647, %v6473_v47 }
 0x7b5   : > { %v6534_v7 = vadd.f32 0.00028619796, %v6533_v15  ;;  %v6545_v37 = vadd.f32 0.001143296, %v6544_v11  ;;  %v6499_v61 = vmul.f32 %v6498_v4, %v12790_v27  ;;  %vm6479_vm9 = vweird.f32 %v6473_v47 }
 0x7b6   : > { %v6510_v2 = vmul.f32 %v6509_v17, %v12790_v27  ;;  %v6486_v3 = vor.u32 1.1754944e-38, %v6485_v29  ;;  %v6463_v50 = vmul.f32 %v6462_v54, %v12758_v58  ;;  %vm6484_vm11 = vcmp.eq.f32.partialorder %v6483_v20, 8.507059e+37 }
 0x7b7   : > { %v6535_v5 = vmul.f32 %v6534_v7, %v12807_v31  ;;  %v6546_v38 = vmul.f32 %v6545_v37, %v12807_v31  ;;  %v6500_v45 = vadd.f32 0.18741608, %v6499_v61  ;;  %v12853_v4 = vmul.f32 0.5, %v12777_v35 }
 0x7b8   : > { %v6121_v59 = vpop.f32.mrf.mxu2  ;;  %v6511_v22 = vadd.f32 0.4994258, %v6510_v2 }
 0x7b9   : > { %v12815_v25 = vadd.f32 %v12750_v51, %v6121_v59  ;;  %v6536_v30 = vadd.f32 0.0036580483, %v6535_v5  ;;  %v6547_v52 = vadd.f32 0.014752088, %v6546_v38  ;;  %v6501_v58 = vmul.f32 %v6500_v45, %v12790_v27 }
 0x7ba   : > { %v8045_v19 = vpop.eup %8044  ;;  %v6512_v42 = vmul.f32 %v6511_v22, %v12790_v27 }
 0x7bb   : > { %v6475_v57 = vmul.f32 %v8045_v19, %v6473_v47  ;;  %v12821_v12 = vmul.f32 0.70710677, %v12815_v25  ;;  %vm6480_vm8 = vweird.f32 %v8045_v19  ;;  %v6537_v44 = vmul.f32 %v6536_v30, %v12807_v31 }
 0x7bc   : > { %v6548_v23 = vmul.f32 %v6547_v52, %v12807_v31  ;;  %vm6481_vm10 = vmor %vm6479_vm9, %vm6480_vm8  ;;  %v6513_v63 = vadd.f32 1.0, %v6512_v42  ;;  %v6502_v59 = vadd.f32 1.1283791, %v6501_v58 }
 0x7bd   : > { %v6476_v24 = vsub.f32 1.0, %v6475_v57  ;;  %v6571_v46 = vmul.f32 %v12821_v12, %v12821_v12  ;;  %v6538_v49 = vadd.f32 0.05243302, %v6537_v44 }
 0x7be   : > { %v6549_v0 = vadd.f32 0.112945676, %v6548_v23  ;;  %8046 = vrcp.f32 %v6513_v63  ;;  %v6523_v17 = vand.u32 2147483647, %v6513_v63  ;;  %v6503_v61 = vmul.f32 %v6502_v59, %v12783_v9 }
 0x7bf   : > { %v6477_v34 = vmul.f32 %v8045_v19, %v6476_v24  ;;  %v12829_v41 = vmin.f32 %v6571_v46, 16.0  ;;  %v6539_v39 = vmul.f32 %v6538_v49, %v12807_v31  ;;  %v6525_v2 = vand.u32 2147483648, %v6513_v63 }
 0x7c0   : > { %v6550_v47 = vmul.f32 %v6549_v0, %v12807_v31  ;;  %vm6519_vm13 = vweird.f32 %v6513_v63  ;;  %vm12867_vm14 = vcmp.eq.f32.partialorder %v6523_v17, 8.507059e+37 }
 0x7c1   : > { %v6478_v33 = vadd.f32 %v8045_v19, %v6477_v34  ;;  %v6573_v13 = vmul.f32 2.1237322e-06, %v12829_v41  ;;  %v6584_v8 = vmul.f32 3.8918573e-05, %v12829_v41  ;;  %v6540_v62 = vadd.f32 0.18741608, %v6539_v39 }
 0x7c2   : > { %v6124_v21 = vpop.f32.mrf.mxu2  ;;  %v6551_v48 = vadd.f32 0.4994258, %v6550_v47 }
 0x7c3   : > { %v6482_v14 = vsel %vm6481_vm10, %v8045_v19, %v6478_v33  ;;  %v6574_v40 = vadd.f32 0.00028619796, %v6573_v13  ;;  %v12837_v10 = vadd.f32 %v12750_v51, %v6124_v21  ;;  %v6585_v36 = vadd.f32 0.001143296, %v6584_v8 }
 0x7c4   : > { %v6487_v6 = vsel %vm6484_vm11, %v6486_v3, %v6482_v14  ;;  %v6552_v16 = vmul.f32 %v6551_v48, %v12807_v31  ;;  %v8047_v55 = vpop.eup %8046  ;;  %v6541_v54 = vmul.f32 %v6540_v62, %v12807_v31  ;;  %v6526_v3 = vor.u32 1.1754944e-38, %v6525_v2 }
 0x7c5   : > { %v6488_v56 = vmul.f32 %v6487_v6, %v6463_v50  ;;  %v6575_v18 = vmul.f32 %v6574_v40, %v12829_v41  ;;  %v6586_v15 = vmul.f32 %v6585_v36, %v12829_v41  ;;  %v12846_v11 = vmul.f32 0.70710677, %v12837_v10 }
 0x7c6   : > { %v12848_v19 = vadd.f32 1.0, %v6552_v16  ;;  %v6515_v43 = vmul.f32 %v8047_v55, %v6513_v63  ;;  %vm6520_vm12 = vweird.f32 %v8047_v55  ;;  %v6542_v45 = vadd.f32 1.1283791, %v6541_v54 }
 0x7c7   : > { %v7561_v1 = vclamps-f32 %v6488_v56, 1.0  ;;  %v6576_v27 = vadd.f32 0.0036580483, %v6575_v18  ;;  %v6587_v53 = vadd.f32 0.014752088, %v6586_v15  ;;  %v6611_v37 = vmul.f32 %v12846_v11, %v12846_v11  ;;  %vm6521_vm15 = vmor %vm6519_vm13, %vm6520_vm12 }
 0x7c8   : > { %8048 = vrcp.f32 %v12848_v19  ;;  %v6516_v5 = vsub.f32 1.0, %v6515_v43  ;;  %v6563_v13 = vand.u32 2147483647, %v12848_v19  ;;  %v6565_v21 = vand.u32 2147483648, %v12848_v19 }
 0x7c9   : > { %v6818_v28 = vadd.f32 1.0, %v7561_v1  ;;  %v6577_v38 = vmul.f32 %v6576_v27, %v12829_v41  ;;  %v6588_v24 = vmul.f32 %v6587_v53, %v12829_v41  ;;  %v12859_v29 = vmin.f32 %v6611_v37, 16.0 }
 0x7ca   : > { %v6517_v30 = vmul.f32 %v8047_v55, %v6516_v5  ;;  %v6543_v16 = vmul.f32 %v6542_v45, %v12799_v26  ;;  %vm6559_vm2 = vweird.f32 %v12848_v19  ;;  %vm6564_vm4 = vcmp.eq.f32.partialorder %v6563_v13, 8.507059e+37 }
 0x7cb   : > { %v6834_v7 = vmul.f32 %v6818_v28, %v6146_v32  ;;  %v6589_v52 = vadd.f32 0.112945676, %v6588_v24  ;;  %v6613_v46 = vmul.f32 2.1237322e-06, %v12859_v29  ;;  %v6624_v20 = vmul.f32 3.8918573e-05, %v12859_v29 }
 0x7cc   : > { %v6518_v22 = vadd.f32 %v8047_v55, %v6517_v30  ;;  %v6578_v31 = vadd.f32 0.05243302, %v6577_v38  ;;  %v6566_v53 = vor.u32 1.1754944e-38, %v6565_v21  ;;  %v12908_v30 = vld [vmem:[#allocation2] ss:$0 sm:$0xff] }
 0x7cd   : > { %v6127_v57 = vpop.f32.mrf.mxu2  ;;  %7577 = vmatmul.msk.f32.gmra.mxu3 %vm2277_vm0, %v6834_v7  ;;  %v6590_v44 = vmul.f32 %v6589_v52, %v12829_v41  ;;  %v6614_v23 = vadd.f32 0.00028619796, %v6613_v46  ;;  %v6625_v42 = vadd.f32 0.001143296, %v6624_v20 }
 0x7ce   : > { %v12864_v35 = vadd.f32 %v12750_v51, %v6127_v57  ;;  %v8049_v33 = vpop.eup %8048  ;;  %v6522_v49 = vsel %vm6521_vm15, %v8047_v55, %v6518_v22  ;;  %v6579_v56 = vmul.f32 %v6578_v31, %v12829_v41 }
 0x7cf   : > { %v6555_v0 = vmul.f32 %v8049_v33, %v12848_v19  ;;  %v6527_v14 = vsel %vm12867_vm14, %v6526_v3, %v6522_v49  ;;  %v6591_v63 = vadd.f32 0.4994258, %v6590_v44  ;;  %v6615_v8 = vmul.f32 %v6614_v23, %v12859_v29 }
 0x7d0   : > { %v12873_v9 = vmul.f32 0.70710677, %v12864_v35  ;;  %v6626_v6 = vmul.f32 %v6625_v42, %v12859_v29  ;;  %v6528_v47 = vmul.f32 %v6527_v14, %v6503_v61  ;;  %vm6560_vm1 = vweird.f32 %v8049_v33 }
 0x7d1   : > { %v6556_v40 = vsub.f32 1.0, %v6555_v0  ;;  %v6592_v39 = vmul.f32 %v6591_v63, %v12829_v41  ;;  %v6616_v18 = vadd.f32 0.0036580483, %v6615_v8  ;;  %v6580_v55 = vadd.f32 0.18741608, %v6579_v56  ;;  %vm6561_vm3 = vmor %vm6559_vm2, %vm6560_vm1 }
 0x7d2   : > { %v6651_v50 = vmul.f32 %v12873_v9, %v12873_v9  ;;  %v6627_v1 = vadd.f32 0.014752088, %v6626_v6  ;;  %v7562_v48 = vclamps-f32 %v6528_v47, 1.0 }
 0x7d3   : > { %v6557_v36 = vmul.f32 %v8049_v33, %v6556_v40  ;;  %v12893_v15 = vadd.f32 1.0, %v6592_v39  ;;  %v6617_v19 = vmul.f32 %v6616_v18, %v12859_v29  ;;  %v6581_v24 = vmul.f32 %v6580_v55, %v12829_v41 }
 0x7d4   : > { %v12886_v58 = vmin.f32 %v6651_v50, 16.0  ;;  %v6628_v59 = vmul.f32 %v6627_v1, %v12859_v29  ;;  %v6819_v62 = vadd.f32 1.0, %v7562_v48  ;;  %v6148_v41 = vmul.f32 0.5, %v12793_v60 }
 0x7d5   : > { %v6558_v27 = vadd.f32 %v8049_v33, %v6557_v36  ;;  %8050 = vrcp.f32 %v12893_v15  ;;  %v6618_v46 = vadd.f32 0.05243302, %v6617_v19  ;;  %v6582_v23 = vadd.f32 1.1283791, %v6581_v24 }
 0x7d6   : > { %v6653_v32 = vmul.f32 2.1237322e-06, %v12886_v58  ;;  %v6664_v28 = vmul.f32 3.8918573e-05, %v12886_v58  ;;  %v6835_v43 = vmul.f32 %v6819_v62, %v12853_v4  ;;  %v6629_v57 = vadd.f32 0.112945676, %v6628_v59 }
 0x7d7   : > { %v6562_v26 = vsel %vm6561_vm3, %v8049_v33, %v6558_v27  ;;  %v6619_v13 = vmul.f32 %v6618_v46, %v12859_v29  ;;  %v6605_v14 = vand.u32 2147483648, %v12893_v15  ;;  %v6603_v40 = vand.u32 2147483647, %v12893_v15 }
 0x7d8   : > { %v6665_v7 = vadd.f32 0.001143296, %v6664_v28  ;;  %v6654_v37 = vadd.f32 0.00028619796, %v6653_v32  ;;  %v6567_v5 = vsel %vm6564_vm4, %v6566_v53, %v6562_v26  ;;  %v6630_v61 = vmul.f32 %v6629_v57, %v12859_v29  ;;  %7578 = vmatmul.msk.f32.gmra.mxu3 %vm2277_vm0, %v6835_v43 }
 0x7d9   : > { %v6130_v17 = vpop.f32.mrf.mxu2  ;;  %v6568_v38 = vmul.f32 %v6567_v5, %v6543_v16  ;;  %vm6599_vm7 = vweird.f32 %v12893_v15  ;;  %v6620_v18 = vadd.f32 0.18741608, %v6619_v13  ;;  %v6583_v36 = vmul.f32 %v6582_v23, %v12821_v12 }
 0x7da   : > { %v6666_v2 = vmul.f32 %v6665_v7, %v12886_v58  ;;  %v6655_v54 = vmul.f32 %v6654_v37, %v12886_v58  ;;  %v12906_v4 = vadd.f32 %v12750_v51, %v6130_v17  ;;  %v6631_v34 = vadd.f32 0.4994258, %v6630_v61 }
 0x7db   : > { %v7563_v52 = vclamps-f32 %v6568_v38, 1.0  ;;  %v8051_v20 = vpop.eup %8050  ;;  %v6606_v32 = vor.u32 1.1754944e-38, %v6605_v14  ;;  %vm6604_vm9 = vcmp.eq.f32.partialorder %v6603_v40, 8.507059e+37  ;;  %v6621_v37 = vmul.f32 %v6620_v18, %v12859_v29 }
 0x7dc   : > { %v6667_v22 = vadd.f32 0.014752088, %v6666_v2  ;;  %v12913_v31 = vmul.f32 0.70710677, %v12906_v4  ;;  %v6595_v33 = vmul.f32 %v8051_v20, %v12893_v15  ;;  %v6632_v3 = vmul.f32 %v6631_v34, %v12859_v29 }
 0x7dd   : > { %v6820_v44 = vadd.f32 1.0, %v7563_v52  ;;  %v6656_v45 = vadd.f32 0.0036580483, %v6655_v54  ;;  %vm6600_vm6 = vweird.f32 %v8051_v20  ;;  %v6149_v2 = vmul.f32 0.5, %v12815_v25 }
 0x7de   : > { %v6668_v42 = vmul.f32 %v6667_v22, %v12886_v58  ;;  %v6691_v50 = vmul.f32 %v12913_v31, %v12913_v31  ;;  %v6596_v0 = vsub.f32 1.0, %v6595_v33  ;;  %v6633_v63 = vadd.f32 1.0, %v6632_v3  ;;  %vm6601_vm8 = vmor %vm6599_vm7, %vm6600_vm6 }
 0x7df   : > { %v6836_v49 = vmul.f32 %v6820_v44, %v6148_v41  ;;  %v6657_v56 = vmul.f32 %v6656_v45, %v12886_v58  ;;  %v6622_v54 = vadd.f32 1.1283791, %v6621_v37 }
 0x7e0   : > { %v6669_v8 = vadd.f32 0.112945676, %v6668_v42  ;;  %v12926_v6 = vmin.f32 %v6691_v50, 16.0  ;;  %v6597_v47 = vmul.f32 %v8051_v20, %v6596_v0  ;;  %8052 = vrcp.f32 %v6633_v63 }
 0x7e1   : > { %7579 = vmatmul.msk.f32.gmra.mxu3 %vm2277_vm0, %v6836_v49  ;;  %v6658_v27 = vadd.f32 0.05243302, %v6657_v56  ;;  %v6643_v46 = vand.u32 2147483647, %v6633_v63  ;;  %v6645_v34 = vand.u32 2147483648, %v6633_v63  ;;  %vm6639_vm11 = vweird.f32 %v6633_v63 }
 0x7e2   : > { %v6598_v39 = vadd.f32 %v8051_v20, %v6597_v47  ;;  %v6670_v1 = vmul.f32 %v6669_v8, %v12886_v58  ;;  %v6693_v48 = vmul.f32 2.1237322e-06, %v12926_v6  ;;  %v6704_v28 = vmul.f32 3.8918573e-05, %v12926_v6 }
 0x7e3   : > { %v6920_v60 = vpop.f32.mrf.mxu3  ;;  %v6659_v38 = vmul.f32 %v6658_v27, %v12886_v58  ;;  %v6623_v25 = vmul.f32 %v6622_v54, %v12846_v11  ;;  %v6646_v45 = vor.u32 1.1754944e-38, %v6645_v34  ;;  %vm6644_vm13 = vcmp.eq.f32.partialorder %v6643_v46, 8.507059e+37 }
 0x7e4   : > { %v6921_v21 = vadd.f32 %v12908_v30, %v6920_v60  ;;  %v6602_v16 = vsel %vm6601_vm8, %v8051_v20, %v6598_v39  ;;  %v6671_v59 = vadd.f32 0.4994258, %v6670_v1  ;;  %v6694_v62 = vadd.f32 0.00028619796, %v6693_v48 }
 0x7e5   : > { %v6607_v15 = vsel %vm6604_vm9, %v6606_v32, %v6602_v16  ;;  %v6705_v55 = vadd.f32 0.001143296, %v6704_v28  ;;  %v6660_v23 = vadd.f32 0.18741608, %v6659_v38  ;;  %v6150_v8 = vmul.f32 0.5, %v12837_v10 }
 0x7e6   : > { %6969 = vst.msk [vmem:[%s12921_s23] sm:$0xff] %vm6968_vm5, %v6921_v21  ;;  %v6608_v53 = vmul.f32 %v6607_v15, %v6583_v36  ;;  %v6672_v43 = vmul.f32 %v6671_v59, %v12886_v58  ;;  %v8053_v26 = vpop.eup %8052  ;;  %v6695_v5 = vmul.f32 %v6694_v62, %v12926_v6 }
 0x7e7   : > { %v6706_v12 = vmul.f32 %v6705_v55, %v12926_v6  ;;  %v6635_v17 = vmul.f32 %v8053_v26, %v6633_v63  ;;  %vm6640_vm10 = vweird.f32 %v8053_v26  ;;  %v6661_v13 = vmul.f32 %v6660_v23, %v12886_v58 }
 0x7e8   : > { %v7564_v57 = vclamps-f32 %v6608_v53, 1.0  ;;  %v6673_v24 = vadd.f32 1.0, %v6672_v43  ;;  %v6696_v22 = vadd.f32 0.0036580483, %v6695_v5  ;;  %vm6641_vm12 = vmor %vm6639_vm11, %vm6640_vm10 }
 0x7e9   : > { %v6707_v61 = vadd.f32 0.014752088, %v6706_v12  ;;  %v6636_v52 = vsub.f32 1.0, %v6635_v17  ;;  %v6662_v39 = vadd.f32 1.1283791, %v6661_v13 }
 0x7ea   : > { %v6821_v29 = vadd.f32 1.0, %v7564_v57  ;;  %8054 = vrcp.f32 %v6673_v24  ;;  %v6697_v50 = vmul.f32 %v6696_v22, %v12926_v6  ;;  %v6685_v18 = vand.u32 2147483648, %v6673_v24 }
 0x7eb   : > { %v6923_v7 = vpop.f32.mrf.mxu3  ;;  %v6637_v41 = vmul.f32 %v8053_v26, %v6636_v52  ;;  %v6708_v44 = vmul.f32 %v6707_v61, %v12926_v6  ;;  %v6683_v58 = vand.u32 2147483647, %v6673_v24  ;;  %vm6679_vm15 = vweird.f32 %v6673_v24 }
 0x7ec   : > { %v6924_v19 = vadd.f32 %v12908_v30, %v6923_v7  ;;  %v6837_v20 = vmul.f32 %v6821_v29, %v6149_v2  ;;  %v6698_v40 = vadd.f32 0.05243302, %v6697_v50  ;;  %v6686_v62 = vor.u32 1.1754944e-38, %v6685_v18 }
 0x7ed   : > { %v6638_v33 = vadd.f32 %v8053_v26, %v6637_v41  ;;  %v6709_v3 = vadd.f32 0.112945676, %v6708_v44  ;;  %v6663_v15 = vmul.f32 %v6662_v39, %v12873_v9  ;;  %vm6684_vm2 = vcmp.eq.f32.partialorder %v6683_v58, 8.507059e+37 }
 0x7ee   : > { %6970 = vst.msk [vmem:[%s12921_s23 + $0x8] sm:$0xff] %vm6968_vm5, %v6924_v19  ;;  %7580 = vmatmul.msk.f32.gmra.mxu3 %vm2277_vm0, %v6837_v20  ;;  %v6699_v10 = vmul.f32 %v6698_v40, %v12926_v6  ;;  %v6151_v19 = vmul.f32 0.5, %v12864_v35  ;;  %v6152_v44 = vmul.f32 0.5, %v12906_v4 }
 0x7ef   : > { %v6642_v42 = vsel %vm6641_vm12, %v8053_v26, %v6638_v33  ;;  %v6710_v60 = vmul.f32 %v6709_v3, %v12926_v6 }
 0x7f0   : > { %v8055_v49 = vpop.eup %8054  ;;  %v6647_v0 = vsel %vm6644_vm13, %v6646_v45, %v6642_v42  ;;  %v6700_v53 = vadd.f32 0.18741608, %v6699_v10 }
 0x7f1   : > { %v6648_v21 = vmul.f32 %v6647_v0, %v6623_v25  ;;  %v6675_v14 = vmul.f32 %v8055_v49, %v6673_v24  ;;  %v6711_v63 = vadd.f32 0.4994258, %v6710_v60  ;;  %vm6680_vm14 = vweird.f32 %v8055_v49 }
 0x7f2   : > { %vm6681_vm1 = vmor %vm6679_vm15, %vm6680_vm14  ;;  %v6701_v17 = vmul.f32 %v6700_v53, %v12926_v6 }
 0x7f3   : > { %v7565_v47 = vclamps-f32 %v6648_v21, 1.0  ;;  %v6676_v11 = vsub.f32 1.0, %v6675_v14  ;;  %v6712_v1 = vmul.f32 %v6711_v63, %v12926_v6 }
 0x7f4   : > { %v6702_v61 = vadd.f32 1.1283791, %v6701_v17 }
 0x7f5   : > { %v6822_v36 = vadd.f32 1.0, %v7565_v47  ;;  %v6677_v32 = vmul.f32 %v8055_v49, %v6676_v11  ;;  %v6713_v28 = vadd.f32 1.0, %v6712_v1 }
 0x7f6   : > { %v6703_v6 = vmul.f32 %v6702_v61, %v12913_v31 }
 0x7f7   : > { %v6838_v16 = vmul.f32 %v6822_v36, %v6150_v8  ;;  %v6678_v59 = vadd.f32 %v8055_v49, %v6677_v32  ;;  %8056 = vrcp.f32 %v6713_v28  ;;  %v6725_v24 = vand.u32 2147483648, %v6713_v28 }
 0x7f8   : > { %v6723_v29 = vand.u32 2147483647, %v6713_v28  ;;  %vm6719_vm4 = vweird.f32 %v6713_v28 }
 0x7f9   : > { %v6926_v56 = vpop.f32.mrf.mxu3  ;;  %v6682_v27 = vsel %vm6681_vm1, %v8055_v49, %v6678_v59  ;;  %7581 = vmatmul.msk.f32.gmra.mxu3 %vm2277_vm0, %v6838_v16  ;;  %v6726_v35 = vor.u32 1.1754944e-38, %v6725_v24 }
 0x7fa   : > { %v6927_v48 = vadd.f32 %v12908_v30, %v6926_v56  ;;  %v6687_v55 = vsel %vm6684_vm2, %v6686_v62, %v6682_v27  ;;  %vm6724_vm7 = vcmp.eq.f32.partialorder %v6723_v29, 8.507059e+37 }
 0x7fb   : > { %v6688_v7 = vmul.f32 %v6687_v55, %v6663_v15 }
 0x7fc   : > { %6971 = vst.msk [vmem:[%s12921_s23 + $0x10] sm:$0xff] %vm6968_vm5, %v6927_v48 }
 0x7fd   : > { %v7566_v26 = vclamps-f32 %v6688_v7, 1.0  ;;  %v8057_v12 = vpop.eup %8056 }
 0x7fe   : > { %v6715_v9 = vmul.f32 %v8057_v12, %v6713_v28  ;;  %vm6720_vm3 = vweird.f32 %v8057_v12 }
 0x7ff   : > { %v6823_v57 = vadd.f32 1.0, %v7566_v26  ;;  %vm6721_vm6 = vmor %vm6719_vm4, %vm6720_vm3 }
 0x800   : > { %v6716_v38 = vsub.f32 1.0, %v6715_v9 }
 0x801   : > { %v6929_v37 = vpop.f32.mrf.mxu3  ;;  %v6839_v5 = vmul.f32 %v6823_v57, %v6151_v19 }
 0x802   : > { %v6930_v43 = vadd.f32 %v12908_v30, %v6929_v37  ;;  %v6717_v2 = vmul.f32 %v8057_v12, %v6716_v38 }
 0x803   : > { %7582 = vmatmul.msk.f32.gmra.mxu3 %vm2277_vm0, %v6839_v5 }
 0x804   : > { %6972 = vst.msk [vmem:[%s12921_s23 + $0x18] sm:$0xff] %vm6968_vm5, %v6930_v43  ;;  %v6718_v46 = vadd.f32 %v8057_v12, %v6717_v2 }
 0x806   : > { %v6722_v34 = vsel %vm6721_vm6, %v8057_v12, %v6718_v46 }
 0x807   : > { %v6727_v20 = vsel %vm6724_vm7, %v6726_v35, %v6722_v34 }
 0x808   : > { %v6728_v41 = vmul.f32 %v6727_v20, %v6703_v6 }
 0x809   : > { %v6932_v54 = vpop.f32.mrf.mxu3 }
 0x80a   : > { %v6933_v52 = vadd.f32 %v12908_v30, %v6932_v54  ;;  %v7567_v22 = vclamps-f32 %v6728_v41, 1.0 }
 0x80c   : > { %6973 = vst.msk [vmem:[%s12921_s23 + $0x20] sm:$0xff] %vm6968_vm5, %v6933_v52  ;;  %v6824_v23 = vadd.f32 1.0, %v7567_v22 }
 0x80e   : > { %v6840_v33 = vmul.f32 %v6824_v23, %v6152_v44 }
 0x810   : > { %7583 = vmatmul.msk.f32.gmra.mxu3 %vm2277_vm0, %v6840_v33 }
 0x818   : > { %v6935_v3 = vpop.f32.mrf.mxu3 }
 0x819   : > { %v6936_v25 = vadd.f32 %v12908_v30, %v6935_v3 }
 0x81b   : > { %6974 = vst.msk [vmem:[%s12921_s23 + $0x28] sm:$0xff] %vm6968_vm5, %v6936_v25 }
 0x821   : > { %v6938_v45 = vpop.f32.mrf.mxu3 }
 0x822   : > { %v6939_v42 = vadd.f32 %v12908_v30, %v6938_v45 }
 0x824   : > { %6975 = vst.msk [vmem:[%s12921_s23 + $0x30] sm:$0xff] %vm6968_vm5, %v6939_v42 }
 0x82b   : > { %v6133_v31 = vpop.f32.mrf.mxu2 }
 0x82c   : > { %v12980_v50 = vadd.f32 %v12750_v51, %v6133_v31 }
 0x82e   : > { %v6169_v4 = vmul.f32 0.70710677, %v12980_v50 }
 0x830   : > { %v6731_v60 = vmul.f32 %v6169_v4, %v6169_v4 }
 0x832   : > { %v6732_v49 = vmin.f32 %v6731_v60, 16.0 }
 0x834   : > { %v6733_v0 = vmul.f32 2.1237322e-06, %v6732_v49  ;;  %v6744_v13 = vmul.f32 3.8918573e-05, %v6732_v49  ;;  %v6136_v21 = vpop.f32.mrf.mxu2 }
 0x835   : > { %v12984_v8 = vadd.f32 %v12750_v51, %v6136_v21  ;;  %v6153_v21 = vmul.f32 0.5, %v12980_v50 }
 0x836   : > { %v6734_v14 = vadd.f32 0.00028619796, %v6733_v0  ;;  %v6745_v63 = vadd.f32 0.001143296, %v6744_v13 }
 0x837   : > { %v12987_v40 = vmul.f32 0.70710677, %v12984_v8 }
 0x838   : > { %v6735_v47 = vmul.f32 %v6734_v14, %v6732_v49  ;;  %v6746_v11 = vmul.f32 %v6745_v63, %v6732_v49 }
 0x839   : > { %v6771_v18 = vmul.f32 %v12987_v40, %v12987_v40 }
 0x83a   : > { %v6736_v56 = vadd.f32 0.0036580483, %v6735_v47  ;;  %v6747_v39 = vadd.f32 0.014752088, %v6746_v11 }
 0x83b   : > { %v6772_v48 = vmin.f32 %v6771_v18, 16.0 }
 0x83c   : > { %v6748_v1 = vmul.f32 %v6747_v39, %v6732_v49  ;;  %v6737_v36 = vmul.f32 %v6736_v56, %v6732_v49 }
 0x83d   : > { %v6773_v58 = vmul.f32 2.1237322e-06, %v6772_v48  ;;  %v6784_v28 = vmul.f32 3.8918573e-05, %v6772_v48 }
 0x83e   : > { %v6749_v32 = vadd.f32 0.112945676, %v6748_v1  ;;  %v6738_v10 = vadd.f32 0.05243302, %v6737_v36 }
 0x83f   : > { %v6774_v59 = vadd.f32 0.00028619796, %v6773_v58  ;;  %v6785_v51 = vadd.f32 0.001143296, %v6784_v28 }
 0x840   : > { %v6750_v16 = vmul.f32 %v6749_v32, %v6732_v49  ;;  %v6739_v53 = vmul.f32 %v6738_v10, %v6732_v49 }
 0x841   : > { %v6775_v15 = vmul.f32 %v6774_v59, %v6772_v48  ;;  %v6786_v27 = vmul.f32 %v6785_v51, %v6772_v48  ;;  %v6154_v59 = vmul.f32 0.5, %v12984_v8 }
 0x842   : > { %v6751_v62 = vadd.f32 0.4994258, %v6750_v16  ;;  %v6740_v19 = vadd.f32 0.18741608, %v6739_v53 }
 0x843   : > { %v6787_v7 = vadd.f32 0.014752088, %v6786_v27  ;;  %v6776_v43 = vadd.f32 0.0036580483, %v6775_v15 }
 0x844   : > { %v6752_v55 = vmul.f32 %v6751_v62, %v6732_v49  ;;  %v6741_v61 = vmul.f32 %v6740_v19, %v6732_v49 }
 0x845   : > { %v6788_v26 = vmul.f32 %v6787_v7, %v6772_v48  ;;  %v6777_v57 = vmul.f32 %v6776_v43, %v6772_v48 }
 0x846   : > { %v6753_v37 = vadd.f32 1.0, %v6752_v55  ;;  %v6742_v35 = vadd.f32 1.1283791, %v6741_v61 }
 0x847   : > { %v6789_v12 = vadd.f32 0.112945676, %v6788_v26  ;;  %v6778_v2 = vadd.f32 0.05243302, %v6777_v57 }
 0x848   : > { %8058 = vrcp.f32 %v6753_v37  ;;  %v6765_v6 = vand.u32 2147483648, %v6753_v37  ;;  %v6763_v41 = vand.u32 2147483647, %v6753_v37  ;;  %vm6759_vm9 = vweird.f32 %v6753_v37 }
 0x849   : > { %v6790_v17 = vmul.f32 %v6789_v12, %v6772_v48  ;;  %v6779_v34 = vmul.f32 %v6778_v2, %v6772_v48  ;;  %v6743_v33 = vmul.f32 %v6742_v35, %v6169_v4 }
 0x84a   : > { %v6766_v44 = vor.u32 1.1754944e-38, %v6765_v6  ;;  %vm6764_vm11 = vcmp.eq.f32.partialorder %v6763_v41, 8.507059e+37 }
 0x84b   : > { %v6791_v38 = vadd.f32 0.4994258, %v6790_v17  ;;  %v6780_v23 = vadd.f32 0.18741608, %v6779_v34 }
 0x84d   : > { %v6792_v54 = vmul.f32 %v6791_v38, %v6772_v48  ;;  %v6781_v31 = vmul.f32 %v6780_v23, %v6772_v48 }
 0x84e   : > { %v8059_v24 = vpop.eup %8058 }
 0x84f   : > { %v6755_v29 = vmul.f32 %v8059_v24, %v6753_v37  ;;  %v6793_v46 = vadd.f32 1.0, %v6792_v54  ;;  %vm6760_vm8 = vweird.f32 %v8059_v24  ;;  %v6782_v11 = vadd.f32 1.1283791, %v6781_v31 }
 0x850   : > { %v6941_v9 = vpop.f32.mrf.mxu3  ;;  %vm6761_vm10 = vmor %vm6759_vm9, %vm6760_vm8 }
 0x851   : > { %v6942_v5 = vadd.f32 %v12908_v30, %v6941_v9  ;;  %v6756_v52 = vsub.f32 1.0, %v6755_v29  ;;  %8060 = vrcp.f32 %v6793_v46  ;;  %v6805_v63 = vand.u32 2147483648, %v6793_v46 }
 0x852   : > { %v6803_v4 = vand.u32 2147483647, %v6793_v46  ;;  %vm6799_vm13 = vweird.f32 %v6793_v46  ;;  %v6783_v50 = vmul.f32 %v6782_v11, %v12987_v40 }
 0x853   : > { %6976 = vst.msk [vmem:[%s12921_s23 + $0x38] sm:$0xff] %vm6968_vm5, %v6942_v5  ;;  %v6757_v20 = vmul.f32 %v8059_v24, %v6756_v52  ;;  %v6806_v1 = vor.u32 1.1754944e-38, %v6805_v63 }
 0x854   : > { %vm6804_vm15 = vcmp.eq.f32.partialorder %v6803_v4, 8.507059e+37 }
 0x855   : > { %v6758_v22 = vadd.f32 %v8059_v24, %v6757_v20 }
 0x857   : > { %v6762_v3 = vsel %vm6761_vm10, %v8059_v24, %v6758_v22  ;;  %v8061_v45 = vpop.eup %8060 }
 0x858   : > { %v6767_v25 = vsel %vm6764_vm11, %v6766_v44, %v6762_v3  ;;  %v6795_v60 = vmul.f32 %v8061_v45, %v6793_v46  ;;  %vm6800_vm12 = vweird.f32 %v8061_v45 }
 0x859   : > { %v6768_v42 = vmul.f32 %v6767_v25, %v6743_v33  ;;  %vm6801_vm14 = vmor %vm6799_vm13, %vm6800_vm12 }
 0x85a   : > { %v6796_v0 = vsub.f32 1.0, %v6795_v60 }
 0x85b   : > { %v7568_v49 = vclamps-f32 %v6768_v42, 1.0  ;;  %v6944_v13 = vpop.f32.mrf.mxu3 }
 0x85c   : > { %v6945_v47 = vadd.f32 %v12908_v30, %v6944_v13  ;;  %v6797_v56 = vmul.f32 %v8061_v45, %v6796_v0 }
 0x85d   : > { %v6825_v14 = vadd.f32 1.0, %v7568_v49 }
 0x85e   : > { %6977 = vst.msk [vmem:[%s12921_s23 + $0x40] sm:$0xff] %vm6968_vm5, %v6945_v47  ;;  %v6798_v18 = vadd.f32 %v8061_v45, %v6797_v56 }
 0x85f   : > { %v6841_v39 = vmul.f32 %v6825_v14, %v6153_v21 }
 0x860   : > { %v6802_v48 = vsel %vm6801_vm14, %v8061_v45, %v6798_v18 }
 0x861   : > { %7584 = vmatmul.msk.f32.gmra.mxu3 %vm2277_vm0, %v6841_v39  ;;  %v6807_v36 = vsel %vm6804_vm15, %v6806_v1, %v6802_v48 }
 0x862   : > { %v6808_v32 = vmul.f32 %v6807_v36, %v6783_v50 }
 0x864   : > { %v6947_v58 = vpop.f32.mrf.mxu3  ;;  %v7569_v16 = vclamps-f32 %v6808_v32, 1.0 }
 0x865   : > { %v6948_v28 = vadd.f32 %v12908_v30, %v6947_v58 }
 0x866   : > { %v6826_v51 = vadd.f32 1.0, %v7569_v16 }
 0x867   : > { %6978 = vst.msk [vmem:[%s12921_s23 + $0x48] sm:$0xff] %vm6968_vm5, %v6948_v28 }
 0x868   : > { %v6842_v10 = vmul.f32 %v6826_v51, %v6154_v59 }
 0x86a   : > { %7585 = vmatmul.msk.f32.gmra.mxu3 %vm2277_vm0, %v6842_v10 }
 0x871   : > { %v6950_v40 = vpop.f32.mrf.mxu3 }
 0x872   : > { %v6951_v62 = vadd.f32 %v12908_v30, %v6950_v40 }
 0x874   : > { %6979 = vst.msk [vmem:[%s12921_s23 + $0x50] sm:$0xff] %vm6968_vm5, %v6951_v62 }
 0x875   : > { %8252 = shalt.err (!%p8249_p8)
}
 0x876   : > { %s8402_s10 = smov 128   ;;  %s13388_s27 = sld [smem:[#allocation46_spill]] }
 0x877   : > { %s13389_s2 = sld [smem:[#allocation44_spill]]  ;;  %s8403_s1 = smov 8  }
 0x878   : > { %7671 = dma.vmem_to_hbm [thread:$0]  (%p8607_p5), %s7035_s3, 2048, %s7037_s5, %s13015_s7, %s8402_s10, %s8402_s10, %s8403_s1  }
 0x879   : > { %s7017_s6 = sshll.u32 %s11985_s26, 4  ;;  %s7051_s13 = sshll.u32 %s10952_s18, 4  ;;  %s7018_s6 = int_to_ptr.vmem [resolvable:$true] %s7017_s6  ;;  %s7052_s13 = int_to_ptr.vmem [resolvable:$true] %s7051_s13 }
 0x87a   : > { %s13390_s14 = sand.u32 1, %s8351_s22  }
 0x87b   : > { %s6991_s15 = scalar_lea.sflag [#allocation5], %s13390_s14 }
 0x87c   : > { %s7050_s9 = scalar_lea.hbm %s13388_s27, %s13007_s4 }
 0x87d   : > { %s13029_s8 = sshll.u32 %s7050_s9, 4  ;;  %s7016_s0 = scalar_lea.hbm %s13389_s2, %s13007_s4  ;;  %s7054_s8 = int_to_ptr.hbm [resolvable:$true] %s13029_s8 }
 0x87e   : > { %s7019_s12 = sshll.u32 %s7016_s0, 4  ;;  %s8273_s5 = scalar_lea.hbm %s13389_s2, 256  ;;  %s7020_s12 = int_to_ptr.hbm [resolvable:$true] %s7019_s12 }
 0x87f   : > { %s8267_s16 = sshra.s32 %s7020_s12, 4  ;;  %s8268_s16 = int_to_ptr.hbm [resolvable:$true] %s8267_s16 }
 0x880   : > { %s8269_s17 = scalar_lea.hbm %s8268_s16, 128  ;;  %p8274_p2 = scmp.lt.s32.totalorder %s8268_s16, %s13389_s2 }
 0x881   : > { %p8270_p11 = scmp.ne.s32.totalorder %s8268_s16, %s8269_s17  ;;  %p8275_p9 = scmp.lt.s32.totalorder %s8273_s5, %s8269_s17 }
 0x883   : > { %p8271_p13 = pnand %p8270_p11, %p8607_p5  ;;  %p8276_p10 = por %p8275_p9, %p8274_p2 }
 0x885   : > { %p8272_p1 = pneg %p8271_p13 }
 0x887   : > { %p8277_p12 = pnand %p8276_p10, %p8272_p1 }
 0x889   : > { %8280 = shalt.err (!%p8277_p12)
}
 0x88a   : > { %7670 = dma.vmem_to_hbm [thread:$0]  (%p8607_p5), %s7018_s6, 2048, %s7020_s12, %s6991_s15, %s8402_s10, %s8402_s10, %s8403_s1   ;;  %v6953_v8 = vpop.f32.mrf.mxu3 }
 0x88b   : > { %v6954_v15 = vadd.f32 %v12908_v30, %v6953_v8  ;;  %s8295_s3 = sshra.s32 %s7054_s8, 4  ;;  %s8301_s4 = scalar_lea.hbm %s13388_s27, 256  ;;  %s8296_s3 = int_to_ptr.hbm [resolvable:$true] %s8295_s3 }
 0x88c   : > { %s8297_s17 = scalar_lea.hbm %s8296_s3, 128  ;;  %p8302_p7 = scmp.lt.s32.totalorder %s8296_s3, %s13388_s27 }
 0x88d   : > { %p8298_p0 = scmp.ne.s32.totalorder %s8296_s3, %s8297_s17  ;;  %p8303_p8 = scmp.lt.s32.totalorder %s8301_s4, %s8297_s17 }
 0x88f   : > { %p8299_p3 = pnand %p8298_p0, %p8607_p5  ;;  %p8304_p11 = por %p8303_p8, %p8302_p7 }
 0x891   : > { %p8300_p4 = pneg %p8299_p3 }
 0x893   : > { %p8305_p13 = pnand %p8304_p11, %p8300_p4 }
 0x895   : > { %8308 = shalt.err (!%p8305_p13)
}
 0x896   : > { %7672 = dma.vmem_to_hbm [thread:$0]  (%p8607_p5), %s7052_s13, 2048, %s7054_s8, %s13015_s7, %s8402_s10, %s8402_s10, %s8403_s1   ;;  %v6956_v27 = vpop.f32.mrf.mxu3 }
 0x897   : > { %6980 = vst.msk [vmem:[%s12921_s23 + $0x58] sm:$0xff] %vm6968_vm5, %v6954_v15  ;;  %v6957_v55 = vadd.f32 %v12908_v30, %v6956_v27 }
 0x899   : > { %6981 = vst.msk [vmem:[%s12921_s23 + $0x60] sm:$0xff] %vm6968_vm5, %v6957_v55 }
 0x89e   : > { %v6959_v7 = vpop.f32.mrf.mxu3 }
 0x89f   : > { %v6960_v53 = vadd.f32 %v12908_v30, %v6959_v7 }
 0x8a1   : > { %6982 = vst.msk [vmem:[%s12921_s23 + $0x68] sm:$0xff] %vm6968_vm5, %v6960_v53 }
 0x8e4   : > { %v6962_v37 = vpop.f32.mrf.mxu3 }
 0x8e5   : > { %v6963_v43 = vadd.f32 %v12908_v30, %v6962_v37 }
 0x8e7   : > { %6983 = vst.msk [vmem:[%s12921_s23 + $0x70] sm:$0xff] %vm6968_vm5, %v6963_v43 }
 0x8ed   : > { %v6965_v26 = vpop.f32.mrf.mxu3 }
 0x8ee   : > { %v6966_v12 = vadd.f32 %v12908_v30, %v6965_v26 }
 0x8f0   : > { %6984 = vst.msk [vmem:[%s12921_s23 + $0x78] sm:$0xff] %vm6968_vm5, %v6966_v12 }
 0x8f1 PF: > { %s13391_s13 = sld [smem:[#allocation49_spill]] }
 0x8f2   : > { %s13392_s6 = sld [smem:[#allocation47_spill]] }
 0x8f7   : > { %p7712_p5 = scmp.ge.s32.totalorder %s13391_s13, 2 }
 0x8f8   : > { %s7076_s11 = sand.u32 1, %s13392_s6  }
 0x8f9   : > { %p7693_p1 = pnand %p7712_p5, %p8611_p6  ;;  %s7077_s15 = scalar_lea.sflag [#allocation5], %s7076_s11 }
 0x8fb   : > { %p7694_p2 = pneg %p7693_p1 }
 0x8fd   : > { %8338 = dma.done.wait (%p7694_p2), %s7077_s15, 2048  }
 0x8fe   : > { %8340 = vsyncadd (%p7694_p2), %s7077_s15, 4294965248  ;;  %s13394_s10 = sadd.s32 4294967294, %s13391_s13  }
 0x8ff   : > { %s7086_s18 = sand.u32 1, %s13394_s10  }
 0x900   : > { %s7087_s14 = scalar_lea.sflag [#allocation14], %s7086_s18 }
 0x901   : > { %8342 = dma.done.wait (%p7694_p2), %s7087_s14, 4096  }
 0x902   : > { %8344 = vsyncadd (%p7694_p2), %s7087_s14, 4294963200  ;;  %s13395_s1 = sld [smem:[#allocation50_spill]]  ;;  %s13398_s23 = smov %s8351_s22 }
 0x903   : > { %s13396_s16 = sld [smem:[#allocation48_spill]] }
 0x904   : > { %s13397_s26 = sld [smem:[#allocation51_spill]] }
 0x908   : > { %p82_p9 = scmp.ge.s32.totalorder %s13395_s1, 4  }
 0x909   : > { %s13399_s22 = smov %s13396_s16 }
 0x90a   :  { %84 = sbr.rel (!%p82_p9) target bundleno = 75 (0x4b), region = 266 }
 0x90f   :  { %7103 = vsyncpa [#allocation4], 1 }
 0x910   :  { %7105 = vsyncpa [#allocation4 + $0x1], 1 }
 0x911   :  { %7106 = vsyncpa [#allocation7], 1 }
 0x912   :  { %7107 = vsyncpa [#allocation10], 1 }
 0x913   :  { %7108 = vsyncpa [#allocation5], 1 }
 0x914   :  { %7110 = vsyncpa [#allocation5 + $0x1], 1 }
 0x915   :  { %7111 = vsyncpa [#allocation14], 1 }
 0x916   :  { %7113 = vsyncpa [#allocation14 + $0x1], 1 }

</bundles_post_ra>
